<compile_context>
chip_gen: v7x
topology: tpu7x:2x2x1
jax: 0.10.0
libtpu: 0.0.40
codegen_flags: <defaults>
</compile_context>

<pallas_src>
import functools

import jax
import jax.numpy as jnp
from jax.experimental import pallas as pl
from jax.experimental.pallas import tpu as pltpu

EPS = 1e-5
NEG_INF = -1e9


def _round_up(x, m):
    return ((x + m - 1) // m) * m


def _layernorm(x, gamma, beta):
    mu = jnp.mean(x, axis=-1, keepdims=True)
    var = jnp.mean((x - mu) ** 2, axis=-1, keepdims=True)
    return (x - mu) * jax.lax.rsqrt(var + EPS) * gamma + beta


def _quick_gelu(x):
    # CLIP uses quick_gelu: x * sigmoid(1.702 * x)
    return x * jax.nn.sigmoid(1.702 * x)


# ---------------------------------------------------------------------------
# One fused kernel: the whole CLIP text transformer stack + final LN + token-0
# pooling + projection.  grid = (batch_blocks, layers); batch is 'parallel',
# layer is 'arbitrary'; the residual stream lives in a VMEM f32 scratch.
# ---------------------------------------------------------------------------
def clip_text_kernel(x_ref, pad_ref, lnvec_ref, wqkv_ref, bqkv_ref, wo_ref,
                     w1_ref, b1_ref, w2_ref, lnf_ref, wp_ref, bp_ref,
                     o_ref, xres_ref, ctx_ref, *, num_heads):
    layer = pl.program_id(1)
    n_layers = pl.num_programs(1)

    # Load the batch block's residual stream at layer 0 (f32 in scratch).
    @pl.when(layer == 0)
    def _():
        xres_ref[...] = x_ref[...].astype(jnp.float32)

    x = xres_ref[...]                                   # [Bt, S, D] f32
    Bt, S, D = x.shape
    H = num_heads
    hd = D // H

    lnv = lnvec_ref[0]                                  # [6, D] f32
    ln1_g, ln1_b = lnv[0:1, :], lnv[1:2, :]
    ln2_g, ln2_b = lnv[2:3, :], lnv[3:4, :]
    bo, b2 = lnv[4:5, :], lnv[5:6, :]

    # ---------------- self-attention block (pre-LN, causal) ----------------
    h = _layernorm(x, ln1_g, ln1_b)                     # [Bt, S, D] f32
    h2 = h.reshape(Bt * S, D).astype(jnp.bfloat16)

    # Fused, lane-dense QKV projection (1/sqrt(hd) folded into q weight & bias).
    qkv = jnp.dot(h2, wqkv_ref[0], preferred_element_type=jnp.float32)
    qkv = (qkv + bqkv_ref[0]).astype(jnp.bfloat16)      # [Bt*S, 3D] bf16
    qkv = qkv.reshape(Bt, S, 3 * D)

    # Additive mask (causal + key padding), shared across heads, built in-kernel.
    rows = jax.lax.broadcasted_iota(jnp.int32, (S, S), 0)
    cols = jax.lax.broadcasted_iota(jnp.int32, (S, S), 1)
    causal = jnp.where(cols <= rows, 0.0, NEG_INF).astype(jnp.float32)
    addmask = causal[None, :, :] + pad_ref[...]         # [Bt, S, S]

    # Per-head attention; contexts are written into a bf16 VMEM scratch so the
    # output projection can contract over the full H*hd = D depth at once.
    for hh in range(H):
        qh = qkv[:, :, hh * hd:(hh + 1) * hd]                       # [Bt, S, hd]
        kh = qkv[:, :, D + hh * hd:D + (hh + 1) * hd]
        vh = qkv[:, :, 2 * D + hh * hd:2 * D + (hh + 1) * hd]
        logits = jnp.einsum('bqd,bkd->bqk', qh, kh,
                            preferred_element_type=jnp.float32)     # [Bt, S, S]
        logits = logits + addmask
        logits = logits - jnp.max(logits, axis=-1, keepdims=True)
        p = jnp.exp(logits)
        p = p * pl.reciprocal(jnp.sum(p, axis=-1, keepdims=True), approx=True)
        ctxh = jnp.einsum('bqk,bkd->bqd', p.astype(jnp.bfloat16), vh,
                          preferred_element_type=jnp.float32)       # [Bt, S, hd]
        ctx_ref[:, :, hh * hd:(hh + 1) * hd] = ctxh.astype(jnp.bfloat16)

    ctx2 = ctx_ref[...].reshape(Bt * S, D)                          # bf16
    attn = jnp.dot(ctx2, wo_ref[0], preferred_element_type=jnp.float32) + bo
    x = x + attn.reshape(Bt, S, D)

    # ---------------- MLP block (pre-LN, quick_gelu) ----------------
    h = _layernorm(x, ln2_g, ln2_b)
    h2 = h.reshape(Bt * S, D).astype(jnp.bfloat16)
    m = jnp.dot(h2, w1_ref[0], preferred_element_type=jnp.float32) + b1_ref[0]
    m = _quick_gelu(m).astype(jnp.bfloat16)
    m = jnp.dot(m, w2_ref[0], preferred_element_type=jnp.float32) + b2
    x = x + m.reshape(Bt, S, D)

    xres_ref[...] = x

    # --------- fused epilogue: final LN + token-0 pooling + projection ---------
    # (spec: text_embeddings = last_hidden_state[:, 0], then optional Linear)
    @pl.when(layer == n_layers - 1)
    def _():
        lnf = lnf_ref[...]                                          # [2, D]
        x0 = x[:, 0, :]                                             # [Bt, D]
        p0 = _layernorm(x0, lnf[0:1, :], lnf[1:2, :])
        y = jnp.dot(p0.astype(jnp.bfloat16), wp_ref[...],
                    preferred_element_type=jnp.float32) + bp_ref[...]
        o_ref[...] = y.reshape(Bt, 1, y.shape[-1]).astype(o_ref.dtype)


# ---------------------------------------------------------------------------
# Heuristics: batch-block size and scoped-VMEM budget from the actual shapes.
# ---------------------------------------------------------------------------
def _pick_batch_block(B, S, D, F):
    f32, bf16 = 4, 2
    per_elem = (S * D * (f32 + bf16)            # residual f32 scratch + ctx bf16 scratch
                + S * 3 * D * (f32 + bf16)      # fused qkv (f32 acc + bf16 copy)
                + 2 * S * S * f32               # logits + probs (one head live)
                + S * F * (f32 + bf16)          # mlp hidden
                + 6 * S * D * f32)              # ln / residual temporaries
    budget = 24 << 20
    bt_max = max(1, budget // max(per_elem, 1))
    bt = 1
    for cand in range(1, B + 1):
        if B % cand == 0 and cand <= bt_max:
            bt = cand
    return bt


def _vmem_limit_bytes(Bt, S, D, F, E):
    bf16, f32 = 2, 4
    w_layer = (3 * D * D + D * D + 2 * D * F) * bf16 + (9 * D + F) * f32
    w_const = 2 * D * f32 + D * E * bf16 + E * f32
    io_blk = (Bt * S * D + Bt * S) * f32 + Bt * E * f32
    scratch = Bt * S * D * (f32 + bf16)
    interm = (Bt * S * 3 * D * (f32 + bf16)
              + 2 * Bt * S * S * f32
              + Bt * S * F * (f32 + bf16)
              + 6 * Bt * S * D * f32)
    need = 2 * (w_layer + io_blk) + w_const + scratch + interm + (4 << 20)
    try:
        phys = getattr(pltpu.get_tpu_info(), "vmem_capacity_bytes", 64 << 20)
    except Exception:
        phys = 64 << 20
    cap = (phys * 3) // 4          # ~96 MiB on 128 MiB parts, ~48 MiB on v7x
    return int(min(max(need, 16 << 20), cap))


def run_text_transformer(x, pad_add, params, num_heads):
    """x: [B, S_pad, D] f32; pad_add: [B, 1, S_pad] additive key mask."""
    B, S, D = x.shape
    L = params['wqkv'].shape[0]
    F = params['w1'].shape[2]
    E = params['wp'].shape[1]
    Bt = _pick_batch_block(B, S, D, F)
    NB = B // Bt

    def b_spec(*shape):      # batch-indexed block
        return pl.BlockSpec((Bt,) + shape, lambda bi, l: (bi,) + (0,) * len(shape))

    def l_spec(*shape):      # layer-indexed block
        return pl.BlockSpec((1,) + shape, lambda bi, l: (l,) + (0,) * len(shape))

    def c_spec(*shape):      # constant block (fetched once)
        return pl.BlockSpec(shape, lambda bi, l: (0,) * len(shape))

    grid_spec = pltpu.PrefetchScalarGridSpec(
        num_scalar_prefetch=0,
        grid=(NB, L),
        in_specs=[
            b_spec(S, D),                       # x (residual stream init)
            b_spec(1, S),                       # additive key-padding mask
            l_spec(6, D),                       # ln1_g/b, ln2_g/b, attn bias, mlp bias
            l_spec(D, 3 * D),                   # fused qkv weight (bf16)
            l_spec(1, 3 * D),                   # fused qkv bias (q-scale folded)
            l_spec(D, D),                       # attention output projection (bf16)
            l_spec(D, F), l_spec(1, F),         # mlp w1, b1
            l_spec(F, D),                       # mlp w2
            c_spec(2, D),                       # final LN gamma/beta
            c_spec(D, E), c_spec(1, E),         # projection weight / bias
        ],
        out_specs=pl.BlockSpec((Bt, 1, E), lambda bi, l: (bi, 0, 0)),
        scratch_shapes=[pltpu.VMEM((Bt, S, D), jnp.float32),     # residual stream
                        pltpu.VMEM((Bt, S, D), jnp.bfloat16)],   # per-head ctx slab
    )
    out = pl.pallas_call(
        functools.partial(clip_text_kernel, num_heads=num_heads),
        out_shape=jax.ShapeDtypeStruct((B, 1, E), jnp.float32),
        grid_spec=grid_spec,
        compiler_params=pltpu.CompilerParams(
            dimension_semantics=("parallel", "arbitrary"),
            vmem_limit_bytes=_vmem_limit_bytes(Bt, S, D, F, E)),
    )(x, pad_add,
      params['lnvec'], params['wqkv'], params['bqkv'], params['wo'],
      params['w1'], params['b1'], params['w2'],
      params['lnf'], params['wp'], params['bp'])
    return out[:, 0, :]


# ---------------------------------------------------------------------------
# Parameter construction (deterministic, synthetic — no checkpoint loading).
# Linear weights are [in, out]; Q/K/V are fused into [L, D, 3D] with the
# 1/sqrt(head_dim) scale folded into BOTH the q weight and the q bias.
# ---------------------------------------------------------------------------
def make_params(key, vocab, max_pos, D, mlp_dim, num_layers, num_heads, embed_dim):
    L, F = num_layers, mlp_dim
    hd = D // num_heads
    scale = 1.0 / float(hd) ** 0.5
    ks = jax.random.split(key, 10)
    w = lambda k, shape: 0.02 * jax.random.normal(k, shape, jnp.float32)

    wq, wk, wv = w(ks[3], (L, D, D)), w(ks[4], (L, D, D)), w(ks[5], (L, D, D))
    bq = 0.01 * jax.random.normal(ks[9], (L, 1, D), jnp.float32)
    bk = jnp.zeros((L, 1, D), jnp.float32)
    bv = jnp.zeros((L, 1, D), jnp.float32)
    wqkv = jnp.concatenate([wq * scale, wk, wv], axis=-1)      # [L, D, 3D]
    bqkv = jnp.concatenate([bq * scale, bk, bv], axis=-1)      # [L, 1, 3D]

    # rows: ln1_g, ln1_b, ln2_g, ln2_b, attn-out bias, mlp-out bias
    lnvec = jnp.stack([
        jnp.ones((L, D)), jnp.zeros((L, D)),
        jnp.ones((L, D)), jnp.zeros((L, D)),
        jnp.zeros((L, D)), jnp.zeros((L, D)),
    ], axis=1).astype(jnp.float32)                             # [L, 6, D]

    if embed_dim == D:
        wp = jnp.eye(D, dtype=jnp.float32)     # no projection layer -> identity
        bp = jnp.zeros((1, D), jnp.float32)
    else:
        wp = w(ks[2], (D, embed_dim))
        bp = jnp.zeros((1, embed_dim), jnp.float32)

    return {
        'tok_emb': w(ks[0], (vocab, D)),
        'pos_emb': w(ks[1], (max_pos, D)),
        'lnvec': lnvec,
        'wqkv': wqkv.astype(jnp.bfloat16),
        'bqkv': bqkv,
        'wo': w(ks[6], (L, D, D)).astype(jnp.bfloat16),
        'w1': w(ks[7], (L, D, F)).astype(jnp.bfloat16),
        'b1': jnp.zeros((L, 1, F), jnp.float32),
        'w2': w(ks[8], (L, F, D)).astype(jnp.bfloat16),
        'lnf': jnp.stack([jnp.ones((D,)), jnp.zeros((D,))]).astype(jnp.float32),
        'wp': wp.astype(jnp.bfloat16),
        'bp': bp,
    }


def text_encoder_forward(token_ids, attn_mask, params, num_heads, embed_dim):
    """Mirrors TextEncoder.forward after host-side tokenization."""
    if token_ids is None or token_ids.shape[0] == 0:
        # forward() returns zeros(1, out_features) for empty input
        return jnp.zeros((1, embed_dim), jnp.float32)

    B, S = token_ids.shape
    S_pad = _round_up(S, 128)      # lane-dense softmax / activations (77 -> 128)

    # glue (plain JAX, outside kernels): embedding gather + position embeddings
    x = (params['tok_emb'][token_ids] + params['pos_emb'][:S][None]).astype(jnp.float32)
    if S_pad != S:
        x = jnp.pad(x, ((0, 0), (0, S_pad - S), (0, 0)))

    # additive key-padding mask; padded columns fully masked
    pad_add = jnp.where(attn_mask > 0, 0.0, NEG_INF).astype(jnp.float32)     # [B, S]
    if S_pad != S:
        pad_add = jnp.pad(pad_add, ((0, 0), (0, S_pad - S)), constant_values=NEG_INF)
    pad_add = pad_add.reshape(B, 1, S_pad)

    return run_text_transformer(x, pad_add, params, num_heads)


if __name__ == "__main__":
    # small synthetic config (stands in for CLIP-ViT-B/32 text config)
    B, S = 2, 8            # batch, tokenized seq len (padded to 128 internally)
    D = 32                 # hidden_size (original_dim)
    NUM_HEADS = 4
    MLP = 4 * D
    NUM_LAYERS = 2
    VOCAB = 64
    MAX_POS = 16
    EMBED_DIM = 16         # != D  -> projection branch is exercised

    key = jax.random.PRNGKey(0)
    k_param, k_tok = jax.random.split(key)
    params = make_params(k_param, VOCAB, MAX_POS, D, MLP, NUM_LAYERS,
                         NUM_HEADS, EMBED_DIM)

    token_ids = jax.random.randint(k_tok, (B, S), 0, VOCAB, dtype=jnp.int32)
    attn_mask = jnp.ones((B, S), jnp.float32)   # tokenizer attention_mask (all valid)

    out = text_encoder_forward(token_ids, attn_mask, params, NUM_HEADS, EMBED_DIM)
    out = jax.block_until_ready(out)
    assert out.shape == (B, EMBED_DIM), out.shape
    assert bool(jnp.all(jnp.isfinite(out)))
    print("KERNEL_OK")
</pallas_src>

<mosaic_0001>
module attributes {stable_mosaic.version = 11 : i64} {
  func.func @clip_text_kernel(%arg0: i32, %arg1: i32, %arg2: memref<2x128x32xf32, #tpu.memory_space<vmem>>, %arg3: memref<2x1x128xf32, #tpu.memory_space<vmem>>, %arg4: memref<1x6x32xf32, #tpu.memory_space<vmem>>, %arg5: memref<1x32x96xbf16, #tpu.memory_space<vmem>>, %arg6: memref<1x1x96xf32, #tpu.memory_space<vmem>>, %arg7: memref<1x32x32xbf16, #tpu.memory_space<vmem>>, %arg8: memref<1x32x128xbf16, #tpu.memory_space<vmem>>, %arg9: memref<1x1x128xf32, #tpu.memory_space<vmem>>, %arg10: memref<1x128x32xbf16, #tpu.memory_space<vmem>>, %arg11: memref<2x32xf32, #tpu.memory_space<vmem>>, %arg12: memref<32x16xbf16, #tpu.memory_space<vmem>>, %arg13: memref<1x16xf32, #tpu.memory_space<vmem>>, %arg14: memref<2x1x16xf32, #tpu.memory_space<vmem>>, %arg15: memref<2x128x32xf32, #tpu.memory_space<vmem>>, %arg16: memref<2x128x32xbf16, #tpu.memory_space<vmem>>) attributes {dimension_semantics = [#tpu.dimension_semantics<parallel>, #tpu.dimension_semantics<arbitrary>], iteration_bounds = array<i64: 1, 2>, scalar_prefetch = 0 : i64, scratch_operands = 2 : i64, tpu.core_type = #tpu.core_type<tc>, window_params = [{transform_indices = @transform_0, window_bounds = array<i64: 2, 128, 32>}, {transform_indices = @transform_1, window_bounds = array<i64: 2, 1, 128>}, {transform_indices = @transform_2, window_bounds = array<i64: 1, 6, 32>}, {transform_indices = @transform_3, window_bounds = array<i64: 1, 32, 96>}, {transform_indices = @transform_4, window_bounds = array<i64: 1, 1, 96>}, {transform_indices = @transform_5, window_bounds = array<i64: 1, 32, 32>}, {transform_indices = @transform_6, window_bounds = array<i64: 1, 32, 128>}, {transform_indices = @transform_7, window_bounds = array<i64: 1, 1, 128>}, {transform_indices = @transform_8, window_bounds = array<i64: 1, 128, 32>}, {pipeline_mode = #tpu.pipeline_mode<synchronous>, transform_indices = @transform_9, window_bounds = array<i64: 2, 32>}, {pipeline_mode = #tpu.pipeline_mode<synchronous>, transform_indices = @transform_10, window_bounds = array<i64: 32, 16>}, {pipeline_mode = #tpu.pipeline_mode<synchronous>, transform_indices = @transform_11, window_bounds = array<i64: 1, 16>}, {transform_indices = @transform_12, window_bounds = array<i64: 2, 1, 16>}]} {
    %c0_i32 = arith.constant 0 : i32
    %0 = arith.cmpi eq, %arg1, %c0_i32 : i32
    %1 = arith.extui %0 : i1 to i32
    %c0_i32_0 = arith.constant 0 : i32
    %2 = arith.cmpi ne, %1, %c0_i32_0 : i32
    scf.if %2 {
      %c0_76 = arith.constant 0 : index
      %c0_77 = arith.constant 0 : index
      %c0_78 = arith.constant 0 : index
      %196 = vector.load %arg2[%c0_76, %c0_77, %c0_78] : memref<2x128x32xf32, #tpu.memory_space<vmem>>, vector<2x128x32xf32>
      %c0_79 = arith.constant 0 : index
      %c0_80 = arith.constant 0 : index
      %c0_81 = arith.constant 0 : index
      %197 = vector.load %arg15[%c0_79, %c0_80, %c0_81] : memref<2x128x32xf32, #tpu.memory_space<vmem>>, vector<2x128x32xf32>
      tpu.vector_store %arg15[%c0_79, %c0_80, %c0_81], %196 {strides = array<i32>} : memref<2x128x32xf32, #tpu.memory_space<vmem>>, vector<2x128x32xf32>,
    } else {
    }
    %c0 = arith.constant 0 : index
    %c0_1 = arith.constant 0 : index
    %c0_2 = arith.constant 0 : index
    %3 = vector.load %arg15[%c0, %c0_1, %c0_2] : memref<2x128x32xf32, #tpu.memory_space<vmem>>, vector<2x128x32xf32>
    %c0_3 = arith.constant 0 : index
    %c0_4 = arith.constant 0 : index
    %c0_5 = arith.constant 0 : index
    %4 = vector.load %arg4[%c0_3, %c0_4, %c0_5] : memref<1x6x32xf32, #tpu.memory_space<vmem>>, vector<1x6x32xf32>
    %5 = vector.shape_cast %4 : vector<1x6x32xf32> to vector<6x32xf32>
    %6 = vector.extract_strided_slice %5 {offsets = [0, 0], sizes = [1, 32], strides = [1, 1]} : vector<6x32xf32> to vector<1x32xf32>
    %7 = vector.extract_strided_slice %5 {offsets = [1, 0], sizes = [1, 32], strides = [1, 1]} : vector<6x32xf32> to vector<1x32xf32>
    %8 = vector.extract_strided_slice %5 {offsets = [2, 0], sizes = [1, 32], strides = [1, 1]} : vector<6x32xf32> to vector<1x32xf32>
    %9 = vector.extract_strided_slice %5 {offsets = [3, 0], sizes = [1, 32], strides = [1, 1]} : vector<6x32xf32> to vector<1x32xf32>
    %10 = vector.extract_strided_slice %5 {offsets = [4, 0], sizes = [1, 32], strides = [1, 1]} : vector<6x32xf32> to vector<1x32xf32>
    %11 = vector.extract_strided_slice %5 {offsets = [5, 0], sizes = [1, 32], strides = [1, 1]} : vector<6x32xf32> to vector<1x32xf32>
    %cst = arith.constant dense<0.000000e+00> : vector<2x128xf32>
    %12 = vector.multi_reduction <add>, %3, %cst [2] : vector<2x128x32xf32> to vector<2x128xf32>
    %13 = vector.shape_cast %12 : vector<2x128xf32> to vector<2x128x1xf32>
    %cst_6 = arith.constant 3.200000e+01 : f32
    %14 = vector.broadcast %cst_6 : f32 to vector<2x128x1xf32>
    %15 = arith.divf %13, %14 : vector<2x128x1xf32>
    %16 = vector.broadcast %15 : vector<2x128x1xf32> to vector<2x128x32xf32>
    %17 = arith.subf %3, %16 : vector<2x128x32xf32>
    %18 = arith.mulf %17, %17 : vector<2x128x32xf32>
    %cst_7 = arith.constant dense<0.000000e+00> : vector<2x128xf32>
    %19 = vector.multi_reduction <add>, %18, %cst_7 [2] : vector<2x128x32xf32> to vector<2x128xf32>
    %20 = vector.shape_cast %19 : vector<2x128xf32> to vector<2x128x1xf32>
    %cst_8 = arith.constant 3.200000e+01 : f32
    %21 = vector.broadcast %cst_8 : f32 to vector<2x128x1xf32>
    %22 = arith.divf %20, %21 : vector<2x128x1xf32>
    %23 = vector.broadcast %15 : vector<2x128x1xf32> to vector<2x128x32xf32>
    %24 = arith.subf %3, %23 : vector<2x128x32xf32>
    %cst_9 = arith.constant 9.99999974E-6 : f32
    %25 = vector.broadcast %cst_9 : f32 to vector<2x128x1xf32>
    %26 = arith.addf %22, %25 : vector<2x128x1xf32>
    %27 = math.rsqrt %26 : vector<2x128x1xf32>
    %28 = vector.broadcast %27 : vector<2x128x1xf32> to vector<2x128x32xf32>
    %29 = arith.mulf %24, %28 : vector<2x128x32xf32>
    %30 = vector.shape_cast %6 : vector<1x32xf32> to vector<1x1x32xf32>
    %31 = vector.broadcast %30 : vector<1x1x32xf32> to vector<2x128x32xf32>
    %32 = arith.mulf %29, %31 : vector<2x128x32xf32>
    %33 = vector.shape_cast %7 : vector<1x32xf32> to vector<1x1x32xf32>
    %34 = vector.broadcast %33 : vector<1x1x32xf32> to vector<2x128x32xf32>
    %35 = arith.addf %32, %34 : vector<2x128x32xf32>
    %36 = vector.shape_cast %35 : vector<2x128x32xf32> to vector<256x32xf32>
    %37 = arith.truncf %36 : vector<256x32xf32> to vector<256x32xbf16>
    %c0_10 = arith.constant 0 : index
    %c0_11 = arith.constant 0 : index
    %c0_12 = arith.constant 0 : index
    %38 = vector.load %arg5[%c0_10, %c0_11, %c0_12] : memref<1x32x96xbf16, #tpu.memory_space<vmem>>, vector<1x32x96xbf16>
    %39 = vector.shape_cast %38 : vector<1x32x96xbf16> to vector<32x96xbf16>
    %cst_13 = arith.constant dense<0.000000e+00> : vector<256x96xf32>
    %40 = tpu.matmul %37, %39, %cst_13 {dimension_numbers = #tpu.dot_dimension_numbers<[1], [0], [0], [1], [0, 0, 1, 1], [], []>} : vector<256x32xbf16>, vector<32x96xbf16>, vector<256x96xf32> -> vector<256x96xf32>
    %c0_14 = arith.constant 0 : index
    %c0_15 = arith.constant 0 : index
    %c0_16 = arith.constant 0 : index
    %41 = vector.load %arg6[%c0_14, %c0_15, %c0_16] : memref<1x1x96xf32, #tpu.memory_space<vmem>>, vector<1x1x96xf32>
    %42 = vector.shape_cast %41 : vector<1x1x96xf32> to vector<1x96xf32>
    %43 = vector.broadcast %42 : vector<1x96xf32> to vector<256x96xf32>
    %44 = arith.addf %40, %43 : vector<256x96xf32>
    %45 = arith.truncf %44 : vector<256x96xf32> to vector<256x96xbf16>
    %46 = vector.shape_cast %45 : vector<256x96xbf16> to vector<2x128x96xbf16>
    %47 = tpu.iota {dimensions = array<i32: 0>} : vector<128x128xi32>
    %48 = tpu.iota {dimensions = array<i32: 1>} : vector<128x128xi32>
    %49 = arith.cmpi sle, %48, %47 : vector<128x128xi32>
    %cst_17 = arith.constant 0.000000e+00 : f32
    %cst_18 = arith.constant -1.000000e+09 : f32
    %50 = vector.broadcast %cst_17 : f32 to vector<128x128xf32>
    %51 = vector.broadcast %cst_18 : f32 to vector<128x128xf32>
    %52 = arith.select %49, %50, %51 : vector<128x128xi1>, vector<128x128xf32>
    %53 = vector.shape_cast %52 : vector<128x128xf32> to vector<1x128x128xf32>
    %c0_19 = arith.constant 0 : index
    %c0_20 = arith.constant 0 : index
    %c0_21 = arith.constant 0 : index
    %54 = vector.load %arg3[%c0_19, %c0_20, %c0_21] : memref<2x1x128xf32, #tpu.memory_space<vmem>>, vector<2x1x128xf32>
    %55 = vector.broadcast %53 : vector<1x128x128xf32> to vector<2x128x128xf32>
    %56 = vector.broadcast %54 : vector<2x1x128xf32> to vector<2x128x128xf32>
    %57 = arith.addf %55, %56 : vector<2x128x128xf32>
    %58 = vector.extract_strided_slice %46 {offsets = [0, 0, 0], sizes = [2, 128, 8], strides = [1, 1, 1]} : vector<2x128x96xbf16> to vector<2x128x8xbf16>
    %59 = vector.extract_strided_slice %46 {offsets = [0, 0, 32], sizes = [2, 128, 8], strides = [1, 1, 1]} : vector<2x128x96xbf16> to vector<2x128x8xbf16>
    %60 = vector.extract_strided_slice %46 {offsets = [0, 0, 64], sizes = [2, 128, 8], strides = [1, 1, 1]} : vector<2x128x96xbf16> to vector<2x128x8xbf16>
    "tpu.trace_start"() <{level = 10 : i32, message = "bqd,bkd->bqk"}> : () -> ()
    %cst_22 = arith.constant dense<0.000000e+00> : vector<2x128x128xf32>
    %61 = tpu.matmul %58, %59, %cst_22 {dimension_numbers = #tpu.dot_dimension_numbers<[2], [2], [1], [1], [0, 0, 0, 1, 1, 1], [0], [0]>} : vector<2x128x8xbf16>, vector<2x128x8xbf16>, vector<2x128x128xf32> -> vector<2x128x128xf32>
    "tpu.trace_stop"() : () -> ()
    %62 = arith.addf %61, %57 : vector<2x128x128xf32>
    %cst_23 = arith.constant dense<0xFF800000> : vector<2x128xf32>
    %63 = vector.multi_reduction <maximumf>, %62, %cst_23 [2] : vector<2x128x128xf32> to vector<2x128xf32>
    %64 = vector.shape_cast %63 : vector<2x128xf32> to vector<2x128x1xf32>
    %65 = vector.broadcast %64 : vector<2x128x1xf32> to vector<2x128x128xf32>
    %66 = arith.subf %62, %65 : vector<2x128x128xf32>
    %67 = math.exp %66 : vector<2x128x128xf32>
    %cst_24 = arith.constant dense<0.000000e+00> : vector<2x128xf32>
    %68 = vector.multi_reduction <add>, %67, %cst_24 [2] : vector<2x128x128xf32> to vector<2x128xf32>
    %69 = vector.shape_cast %68 : vector<2x128xf32> to vector<2x128x1xf32>
    %70 = tpu.reciprocal %69 {approx = true} : vector<2x128x1xf32> -> vector<2x128x1xf32>
    %71 = vector.broadcast %70 : vector<2x128x1xf32> to vector<2x128x128xf32>
    %72 = arith.mulf %67, %71 : vector<2x128x128xf32>
    %73 = arith.truncf %72 : vector<2x128x128xf32> to vector<2x128x128xbf16>
    "tpu.trace_start"() <{level = 10 : i32, message = "bqk,bkd->bqd"}> : () -> ()
    %cst_25 = arith.constant dense<0.000000e+00> : vector<2x128x8xf32>
    %74 = tpu.matmul %73, %60, %cst_25 {dimension_numbers = #tpu.dot_dimension_numbers<[2], [1], [1], [2], [0, 0, 0, 1, 1, 2], [0], [0]>} : vector<2x128x128xbf16>, vector<2x128x8xbf16>, vector<2x128x8xf32> -> vector<2x128x8xf32>
    "tpu.trace_stop"() : () -> ()
    %75 = arith.truncf %74 : vector<2x128x8xf32> to vector<2x128x8xbf16>
    %c0_26 = arith.constant 0 : index
    %c0_27 = arith.constant 0 : index
    %c0_28 = arith.constant 0 : index
    %76 = vector.load %arg16[%c0_26, %c0_27, %c0_28] : memref<2x128x32xbf16, #tpu.memory_space<vmem>>, vector<2x128x8xbf16>
    tpu.vector_store %arg16[%c0_26, %c0_27, %c0_28], %75 {strides = array<i32>} : memref<2x128x32xbf16, #tpu.memory_space<vmem>>, vector<2x128x8xbf16>,
    %77 = vector.extract_strided_slice %46 {offsets = [0, 0, 8], sizes = [2, 128, 8], strides = [1, 1, 1]} : vector<2x128x96xbf16> to vector<2x128x8xbf16>
    %78 = vector.extract_strided_slice %46 {offsets = [0, 0, 40], sizes = [2, 128, 8], strides = [1, 1, 1]} : vector<2x128x96xbf16> to vector<2x128x8xbf16>
    %79 = vector.extract_strided_slice %46 {offsets = [0, 0, 72], sizes = [2, 128, 8], strides = [1, 1, 1]} : vector<2x128x96xbf16> to vector<2x128x8xbf16>
    "tpu.trace_start"() <{level = 10 : i32, message = "bqd,bkd->bqk"}> : () -> ()
    %cst_29 = arith.constant dense<0.000000e+00> : vector<2x128x128xf32>
    %80 = tpu.matmul %77, %78, %cst_29 {dimension_numbers = #tpu.dot_dimension_numbers<[2], [2], [1], [1], [0, 0, 0, 1, 1, 1], [0], [0]>} : vector<2x128x8xbf16>, vector<2x128x8xbf16>, vector<2x128x128xf32> -> vector<2x128x128xf32>
    "tpu.trace_stop"() : () -> ()
    %81 = arith.addf %80, %57 : vector<2x128x128xf32>
    %cst_30 = arith.constant dense<0xFF800000> : vector<2x128xf32>
    %82 = vector.multi_reduction <maximumf>, %81, %cst_30 [2] : vector<2x128x128xf32> to vector<2x128xf32>
    %83 = vector.shape_cast %82 : vector<2x128xf32> to vector<2x128x1xf32>
    %84 = vector.broadcast %83 : vector<2x128x1xf32> to vector<2x128x128xf32>
    %85 = arith.subf %81, %84 : vector<2x128x128xf32>
    %86 = math.exp %85 : vector<2x128x128xf32>
    %cst_31 = arith.constant dense<0.000000e+00> : vector<2x128xf32>
    %87 = vector.multi_reduction <add>, %86, %cst_31 [2] : vector<2x128x128xf32> to vector<2x128xf32>
    %88 = vector.shape_cast %87 : vector<2x128xf32> to vector<2x128x1xf32>
    %89 = tpu.reciprocal %88 {approx = true} : vector<2x128x1xf32> -> vector<2x128x1xf32>
    %90 = vector.broadcast %89 : vector<2x128x1xf32> to vector<2x128x128xf32>
    %91 = arith.mulf %86, %90 : vector<2x128x128xf32>
    %92 = arith.truncf %91 : vector<2x128x128xf32> to vector<2x128x128xbf16>
    "tpu.trace_start"() <{level = 10 : i32, message = "bqk,bkd->bqd"}> : () -> ()
    %cst_32 = arith.constant dense<0.000000e+00> : vector<2x128x8xf32>
    %93 = tpu.matmul %92, %79, %cst_32 {dimension_numbers = #tpu.dot_dimension_numbers<[2], [1], [1], [2], [0, 0, 0, 1, 1, 2], [0], [0]>} : vector<2x128x128xbf16>, vector<2x128x8xbf16>, vector<2x128x8xf32> -> vector<2x128x8xf32>
    "tpu.trace_stop"() : () -> ()
    %94 = arith.truncf %93 : vector<2x128x8xf32> to vector<2x128x8xbf16>
    %c0_33 = arith.constant 0 : index
    %c0_34 = arith.constant 0 : index
    %c8 = arith.constant 8 : index
    %95 = vector.load %arg16[%c0_33, %c0_34, %c8] : memref<2x128x32xbf16, #tpu.memory_space<vmem>>, vector<2x128x8xbf16>
    tpu.vector_store %arg16[%c0_33, %c0_34, %c8], %94 {strides = array<i32>} : memref<2x128x32xbf16, #tpu.memory_space<vmem>>, vector<2x128x8xbf16>,
    %96 = vector.extract_strided_slice %46 {offsets = [0, 0, 16], sizes = [2, 128, 8], strides = [1, 1, 1]} : vector<2x128x96xbf16> to vector<2x128x8xbf16>
    %97 = vector.extract_strided_slice %46 {offsets = [0, 0, 48], sizes = [2, 128, 8], strides = [1, 1, 1]} : vector<2x128x96xbf16> to vector<2x128x8xbf16>
    %98 = vector.extract_strided_slice %46 {offsets = [0, 0, 80], sizes = [2, 128, 8], strides = [1, 1, 1]} : vector<2x128x96xbf16> to vector<2x128x8xbf16>
    "tpu.trace_start"() <{level = 10 : i32, message = "bqd,bkd->bqk"}> : () -> ()
    %cst_35 = arith.constant dense<0.000000e+00> : vector<2x128x128xf32>
    %99 = tpu.matmul %96, %97, %cst_35 {dimension_numbers = #tpu.dot_dimension_numbers<[2], [2], [1], [1], [0, 0, 0, 1, 1, 1], [0], [0]>} : vector<2x128x8xbf16>, vector<2x128x8xbf16>, vector<2x128x128xf32> -> vector<2x128x128xf32>
    "tpu.trace_stop"() : () -> ()
    %100 = arith.addf %99, %57 : vector<2x128x128xf32>
    %cst_36 = arith.constant dense<0xFF800000> : vector<2x128xf32>
    %101 = vector.multi_reduction <maximumf>, %100, %cst_36 [2] : vector<2x128x128xf32> to vector<2x128xf32>
    %102 = vector.shape_cast %101 : vector<2x128xf32> to vector<2x128x1xf32>
    %103 = vector.broadcast %102 : vector<2x128x1xf32> to vector<2x128x128xf32>
    %104 = arith.subf %100, %103 : vector<2x128x128xf32>
    %105 = math.exp %104 : vector<2x128x128xf32>
    %cst_37 = arith.constant dense<0.000000e+00> : vector<2x128xf32>
    %106 = vector.multi_reduction <add>, %105, %cst_37 [2] : vector<2x128x128xf32> to vector<2x128xf32>
    %107 = vector.shape_cast %106 : vector<2x128xf32> to vector<2x128x1xf32>
    %108 = tpu.reciprocal %107 {approx = true} : vector<2x128x1xf32> -> vector<2x128x1xf32>
    %109 = vector.broadcast %108 : vector<2x128x1xf32> to vector<2x128x128xf32>
    %110 = arith.mulf %105, %109 : vector<2x128x128xf32>
    %111 = arith.truncf %110 : vector<2x128x128xf32> to vector<2x128x128xbf16>
    "tpu.trace_start"() <{level = 10 : i32, message = "bqk,bkd->bqd"}> : () -> ()
    %cst_38 = arith.constant dense<0.000000e+00> : vector<2x128x8xf32>
    %112 = tpu.matmul %111, %98, %cst_38 {dimension_numbers = #tpu.dot_dimension_numbers<[2], [1], [1], [2], [0, 0, 0, 1, 1, 2], [0], [0]>} : vector<2x128x128xbf16>, vector<2x128x8xbf16>, vector<2x128x8xf32> -> vector<2x128x8xf32>
    "tpu.trace_stop"() : () -> ()
    %113 = arith.truncf %112 : vector<2x128x8xf32> to vector<2x128x8xbf16>
    %c0_39 = arith.constant 0 : index
    %c0_40 = arith.constant 0 : index
    %c16 = arith.constant 16 : index
    %114 = vector.load %arg16[%c0_39, %c0_40, %c16] : memref<2x128x32xbf16, #tpu.memory_space<vmem>>, vector<2x128x8xbf16>
    tpu.vector_store %arg16[%c0_39, %c0_40, %c16], %113 {strides = array<i32>} : memref<2x128x32xbf16, #tpu.memory_space<vmem>>, vector<2x128x8xbf16>,
    %115 = vector.extract_strided_slice %46 {offsets = [0, 0, 24], sizes = [2, 128, 8], strides = [1, 1, 1]} : vector<2x128x96xbf16> to vector<2x128x8xbf16>
    %116 = vector.extract_strided_slice %46 {offsets = [0, 0, 56], sizes = [2, 128, 8], strides = [1, 1, 1]} : vector<2x128x96xbf16> to vector<2x128x8xbf16>
    %117 = vector.extract_strided_slice %46 {offsets = [0, 0, 88], sizes = [2, 128, 8], strides = [1, 1, 1]} : vector<2x128x96xbf16> to vector<2x128x8xbf16>
    "tpu.trace_start"() <{level = 10 : i32, message = "bqd,bkd->bqk"}> : () -> ()
    %cst_41 = arith.constant dense<0.000000e+00> : vector<2x128x128xf32>
    %118 = tpu.matmul %115, %116, %cst_41 {dimension_numbers = #tpu.dot_dimension_numbers<[2], [2], [1], [1], [0, 0, 0, 1, 1, 1], [0], [0]>} : vector<2x128x8xbf16>, vector<2x128x8xbf16>, vector<2x128x128xf32> -> vector<2x128x128xf32>
    "tpu.trace_stop"() : () -> ()
    %119 = arith.addf %118, %57 : vector<2x128x128xf32>
    %cst_42 = arith.constant dense<0xFF800000> : vector<2x128xf32>
    %120 = vector.multi_reduction <maximumf>, %119, %cst_42 [2] : vector<2x128x128xf32> to vector<2x128xf32>
    %121 = vector.shape_cast %120 : vector<2x128xf32> to vector<2x128x1xf32>
    %122 = vector.broadcast %121 : vector<2x128x1xf32> to vector<2x128x128xf32>
    %123 = arith.subf %119, %122 : vector<2x128x128xf32>
    %124 = math.exp %123 : vector<2x128x128xf32>
    %cst_43 = arith.constant dense<0.000000e+00> : vector<2x128xf32>
    %125 = vector.multi_reduction <add>, %124, %cst_43 [2] : vector<2x128x128xf32> to vector<2x128xf32>
    %126 = vector.shape_cast %125 : vector<2x128xf32> to vector<2x128x1xf32>
    %127 = tpu.reciprocal %126 {approx = true} : vector<2x128x1xf32> -> vector<2x128x1xf32>
    %128 = vector.broadcast %127 : vector<2x128x1xf32> to vector<2x128x128xf32>
    %129 = arith.mulf %124, %128 : vector<2x128x128xf32>
    %130 = arith.truncf %129 : vector<2x128x128xf32> to vector<2x128x128xbf16>
    "tpu.trace_start"() <{level = 10 : i32, message = "bqk,bkd->bqd"}> : () -> ()
    %cst_44 = arith.constant dense<0.000000e+00> : vector<2x128x8xf32>
    %131 = tpu.matmul %130, %117, %cst_44 {dimension_numbers = #tpu.dot_dimension_numbers<[2], [1], [1], [2], [0, 0, 0, 1, 1, 2], [0], [0]>} : vector<2x128x128xbf16>, vector<2x128x8xbf16>, vector<2x128x8xf32> -> vector<2x128x8xf32>
    "tpu.trace_stop"() : () -> ()
    %132 = arith.truncf %131 : vector<2x128x8xf32> to vector<2x128x8xbf16>
    %c0_45 = arith.constant 0 : index
    %c0_46 = arith.constant 0 : index
    %c24 = arith.constant 24 : index
    %133 = vector.load %arg16[%c0_45, %c0_46, %c24] : memref<2x128x32xbf16, #tpu.memory_space<vmem>>, vector<2x128x8xbf16>
    tpu.vector_store %arg16[%c0_45, %c0_46, %c24], %132 {strides = array<i32>} : memref<2x128x32xbf16, #tpu.memory_space<vmem>>, vector<2x128x8xbf16>,
    %c0_47 = arith.constant 0 : index
    %c0_48 = arith.constant 0 : index
    %c0_49 = arith.constant 0 : index
    %134 = vector.load %arg16[%c0_47, %c0_48, %c0_49] : memref<2x128x32xbf16, #tpu.memory_space<vmem>>, vector<2x128x32xbf16>
    %135 = vector.shape_cast %134 : vector<2x128x32xbf16> to vector<256x32xbf16>
    %c0_50 = arith.constant 0 : index
    %c0_51 = arith.constant 0 : index
    %c0_52 = arith.constant 0 : index
    %136 = vector.load %arg7[%c0_50, %c0_51, %c0_52] : memref<1x32x32xbf16, #tpu.memory_space<vmem>>, vector<1x32x32xbf16>
    %137 = vector.shape_cast %136 : vector<1x32x32xbf16> to vector<32x32xbf16>
    %cst_53 = arith.constant dense<0.000000e+00> : vector<256x32xf32>
    %138 = tpu.matmul %135, %137, %cst_53 {dimension_numbers = #tpu.dot_dimension_numbers<[1], [0], [0], [1], [0, 0, 1, 1], [], []>} : vector<256x32xbf16>, vector<32x32xbf16>, vector<256x32xf32> -> vector<256x32xf32>
    %139 = vector.broadcast %10 : vector<1x32xf32> to vector<256x32xf32>
    %140 = arith.addf %138, %139 : vector<256x32xf32>
    %141 = vector.shape_cast %140 : vector<256x32xf32> to vector<2x128x32xf32>
    %142 = arith.addf %3, %141 : vector<2x128x32xf32>
    %cst_54 = arith.constant dense<0.000000e+00> : vector<2x128xf32>
    %143 = vector.multi_reduction <add>, %142, %cst_54 [2] : vector<2x128x32xf32> to vector<2x128xf32>
    %144 = vector.shape_cast %143 : vector<2x128xf32> to vector<2x128x1xf32>
    %cst_55 = arith.constant 3.200000e+01 : f32
    %145 = vector.broadcast %cst_55 : f32 to vector<2x128x1xf32>
    %146 = arith.divf %144, %145 : vector<2x128x1xf32>
    %147 = vector.broadcast %146 : vector<2x128x1xf32> to vector<2x128x32xf32>
    %148 = arith.subf %142, %147 : vector<2x128x32xf32>
    %149 = arith.mulf %148, %148 : vector<2x128x32xf32>
    %cst_56 = arith.constant dense<0.000000e+00> : vector<2x128xf32>
    %150 = vector.multi_reduction <add>, %149, %cst_56 [2] : vector<2x128x32xf32> to vector<2x128xf32>
    %151 = vector.shape_cast %150 : vector<2x128xf32> to vector<2x128x1xf32>
    %cst_57 = arith.constant 3.200000e+01 : f32
    %152 = vector.broadcast %cst_57 : f32 to vector<2x128x1xf32>
    %153 = arith.divf %151, %152 : vector<2x128x1xf32>
    %154 = vector.broadcast %146 : vector<2x128x1xf32> to vector<2x128x32xf32>
    %155 = arith.subf %142, %154 : vector<2x128x32xf32>
    %cst_58 = arith.constant 9.99999974E-6 : f32
    %156 = vector.broadcast %cst_58 : f32 to vector<2x128x1xf32>
    %157 = arith.addf %153, %156 : vector<2x128x1xf32>
    %158 = math.rsqrt %157 : vector<2x128x1xf32>
    %159 = vector.broadcast %158 : vector<2x128x1xf32> to vector<2x128x32xf32>
    %160 = arith.mulf %155, %159 : vector<2x128x32xf32>
    %161 = vector.shape_cast %8 : vector<1x32xf32> to vector<1x1x32xf32>
    %162 = vector.broadcast %161 : vector<1x1x32xf32> to vector<2x128x32xf32>
    %163 = arith.mulf %160, %162 : vector<2x128x32xf32>
    %164 = vector.shape_cast %9 : vector<1x32xf32> to vector<1x1x32xf32>
    %165 = vector.broadcast %164 : vector<1x1x32xf32> to vector<2x128x32xf32>
    %166 = arith.addf %163, %165 : vector<2x128x32xf32>
    %167 = vector.shape_cast %166 : vector<2x128x32xf32> to vector<256x32xf32>
    %168 = arith.truncf %167 : vector<256x32xf32> to vector<256x32xbf16>
    %c0_59 = arith.constant 0 : index
    %c0_60 = arith.constant 0 : index
    %c0_61 = arith.constant 0 : index
    %169 = vector.load %arg8[%c0_59, %c0_60, %c0_61] : memref<1x32x128xbf16, #tpu.memory_space<vmem>>, vector<1x32x128xbf16>
    %170 = vector.shape_cast %169 : vector<1x32x128xbf16> to vector<32x128xbf16>
    %cst_62 = arith.constant dense<0.000000e+00> : vector<256x128xf32>
    %171 = tpu.matmul %168, %170, %cst_62 {dimension_numbers = #tpu.dot_dimension_numbers<[1], [0], [0], [1], [0, 0, 1, 1], [], []>} : vector<256x32xbf16>, vector<32x128xbf16>, vector<256x128xf32> -> vector<256x128xf32>
    %c0_63 = arith.constant 0 : index
    %c0_64 = arith.constant 0 : index
    %c0_65 = arith.constant 0 : index
    %172 = vector.load %arg9[%c0_63, %c0_64, %c0_65] : memref<1x1x128xf32, #tpu.memory_space<vmem>>, vector<1x1x128xf32>
    %173 = vector.shape_cast %172 : vector<1x1x128xf32> to vector<1x128xf32>
    %174 = vector.broadcast %173 : vector<1x128xf32> to vector<256x128xf32>
    %175 = arith.addf %171, %174 : vector<256x128xf32>
    %cst_66 = arith.constant 1.702000e+00 : f32
    %176 = vector.broadcast %cst_66 : f32 to vector<256x128xf32>
    %177 = arith.mulf %176, %175 : vector<256x128xf32>
    %178 = arith.negf %177 : vector<256x128xf32>
    %179 = math.exp %178 : vector<256x128xf32>
    %cst_67 = arith.constant 1.000000e+00 : f32
    %180 = vector.broadcast %cst_67 : f32 to vector<256x128xf32>
    %181 = arith.addf %180, %179 : vector<256x128xf32>
    %182 = arith.divf %180, %181 : vector<256x128xf32>
    %183 = arith.mulf %175, %182 : vector<256x128xf32>
    %184 = arith.truncf %183 : vector<256x128xf32> to vector<256x128xbf16>
    %c0_68 = arith.constant 0 : index
    %c0_69 = arith.constant 0 : index
    %c0_70 = arith.constant 0 : index
    %185 = vector.load %arg10[%c0_68, %c0_69, %c0_70] : memref<1x128x32xbf16, #tpu.memory_space<vmem>>, vector<1x128x32xbf16>
    %186 = vector.shape_cast %185 : vector<1x128x32xbf16> to vector<128x32xbf16>
    %cst_71 = arith.constant dense<0.000000e+00> : vector<256x32xf32>
    %187 = tpu.matmul %184, %186, %cst_71 {dimension_numbers = #tpu.dot_dimension_numbers<[1], [0], [0], [1], [0, 0, 1, 1], [], []>} : vector<256x128xbf16>, vector<128x32xbf16>, vector<256x32xf32> -> vector<256x32xf32>
    %188 = vector.broadcast %11 : vector<1x32xf32> to vector<256x32xf32>
    %189 = arith.addf %187, %188 : vector<256x32xf32>
    %190 = vector.shape_cast %189 : vector<256x32xf32> to vector<2x128x32xf32>
    %191 = arith.addf %142, %190 : vector<2x128x32xf32>
    %c0_72 = arith.constant 0 : index
    %c0_73 = arith.constant 0 : index
    %c0_74 = arith.constant 0 : index
    %192 = vector.load %arg15[%c0_72, %c0_73, %c0_74] : memref<2x128x32xf32, #tpu.memory_space<vmem>>, vector<2x128x32xf32>
    tpu.vector_store %arg15[%c0_72, %c0_73, %c0_74], %191 {strides = array<i32>} : memref<2x128x32xf32, #tpu.memory_space<vmem>>, vector<2x128x32xf32>,
    %c1_i32 = arith.constant 1 : i32
    %193 = arith.cmpi eq, %arg1, %c1_i32 : i32
    %194 = arith.extui %193 : i1 to i32
    %c0_i32_75 = arith.constant 0 : i32
    %195 = arith.cmpi ne, %194, %c0_i32_75 : i32
    scf.if %195 {
      %c0_76 = arith.constant 0 : index
      %c0_77 = arith.constant 0 : index
      %196 = vector.load %arg11[%c0_76, %c0_77] : memref<2x32xf32, #tpu.memory_space<vmem>>, vector<2x32xf32>
      %197 = vector.extract_strided_slice %191 {offsets = [0, 0, 0], sizes = [2, 1, 32], strides = [1, 1, 1]} : vector<2x128x32xf32> to vector<2x1x32xf32>
      %198 = vector.shape_cast %197 : vector<2x1x32xf32> to vector<2x32xf32>
      %199 = vector.extract_strided_slice %196 {offsets = [0, 0], sizes = [1, 32], strides = [1, 1]} : vector<2x32xf32> to vector<1x32xf32>
      %200 = vector.extract_strided_slice %196 {offsets = [1, 0], sizes = [1, 32], strides = [1, 1]} : vector<2x32xf32> to vector<1x32xf32>
      %cst_78 = arith.constant dense<0.000000e+00> : vector<2xf32>
      %201 = vector.multi_reduction <add>, %198, %cst_78 [1] : vector<2x32xf32> to vector<2xf32>
      %202 = vector.shape_cast %201 : vector<2xf32> to vector<2x1xf32>
      %cst_79 = arith.constant 3.200000e+01 : f32
      %203 = vector.broadcast %cst_79 : f32 to vector<2x1xf32>
      %204 = arith.divf %202, %203 : vector<2x1xf32>
      %205 = vector.broadcast %204 : vector<2x1xf32> to vector<2x32xf32>
      %206 = arith.subf %198, %205 : vector<2x32xf32>
      %207 = arith.mulf %206, %206 : vector<2x32xf32>
      %cst_80 = arith.constant dense<0.000000e+00> : vector<2xf32>
      %208 = vector.multi_reduction <add>, %207, %cst_80 [1] : vector<2x32xf32> to vector<2xf32>
      %209 = vector.shape_cast %208 : vector<2xf32> to vector<2x1xf32>
      %cst_81 = arith.constant 3.200000e+01 : f32
      %210 = vector.broadcast %cst_81 : f32 to vector<2x1xf32>
      %211 = arith.divf %209, %210 : vector<2x1xf32>
      %212 = vector.broadcast %204 : vector<2x1xf32> to vector<2x32xf32>
      %213 = arith.subf %198, %212 : vector<2x32xf32>
      %cst_82 = arith.constant 9.99999974E-6 : f32
      %214 = vector.broadcast %cst_82 : f32 to vector<2x1xf32>
      %215 = arith.addf %211, %214 : vector<2x1xf32>
      %216 = math.rsqrt %215 : vector<2x1xf32>
      %217 = vector.broadcast %216 : vector<2x1xf32> to vector<2x32xf32>
      %218 = arith.mulf %213, %217 : vector<2x32xf32>
      %219 = vector.broadcast %199 : vector<1x32xf32> to vector<2x32xf32>
      %220 = arith.mulf %218, %219 : vector<2x32xf32>
      %221 = vector.broadcast %200 : vector<1x32xf32> to vector<2x32xf32>
      %222 = arith.addf %220, %221 : vector<2x32xf32>
      %223 = arith.truncf %222 : vector<2x32xf32> to vector<2x32xbf16>
      %c0_83 = arith.constant 0 : index
      %c0_84 = arith.constant 0 : index
      %224 = vector.load %arg12[%c0_83, %c0_84] : memref<32x16xbf16, #tpu.memory_space<vmem>>, vector<32x16xbf16>
      %cst_85 = arith.constant dense<0.000000e+00> : vector<2x16xf32>
      %225 = tpu.matmul %223, %224, %cst_85 {dimension_numbers = #tpu.dot_dimension_numbers<[1], [0], [0], [1], [0, 0, 1, 1], [], []>} : vector<2x32xbf16>, vector<32x16xbf16>, vector<2x16xf32> -> vector<2x16xf32>
      %c0_86 = arith.constant 0 : index
      %c0_87 = arith.constant 0 : index
      %226 = vector.load %arg13[%c0_86, %c0_87] : memref<1x16xf32, #tpu.memory_space<vmem>>, vector<1x16xf32>
      %227 = vector.broadcast %226 : vector<1x16xf32> to vector<2x16xf32>
      %228 = arith.addf %225, %227 : vector<2x16xf32>
      %229 = vector.shape_cast %228 : vector<2x16xf32> to vector<2x1x16xf32>
      %c0_88 = arith.constant 0 : index
      %c0_89 = arith.constant 0 : index
      %c0_90 = arith.constant 0 : index
      %230 = vector.load %arg14[%c0_88, %c0_89, %c0_90] : memref<2x1x16xf32, #tpu.memory_space<vmem>>, vector<2x1x16xf32>
      tpu.vector_store %arg14[%c0_88, %c0_89, %c0_90], %229 {strides = array<i32>} : memref<2x1x16xf32, #tpu.memory_space<vmem>>, vector<2x1x16xf32>,
    } else {
    }
    return
  }
  func.func @transform_0(%arg0: i32, %arg1: i32) -> (i32, i32, i32) {
    %c0_i32 = arith.constant 0 : i32
    %c0_i32_0 = arith.constant 0 : i32
    %c0_i32_1 = arith.constant 0 : i32
    return %arg0, %c0_i32, %c0_i32_0 : i32, i32, i32
  }
  func.func @transform_1(%arg0: i32, %arg1: i32) -> (i32, i32, i32) {
    %c0_i32 = arith.constant 0 : i32
    %c0_i32_0 = arith.constant 0 : i32
    %c0_i32_1 = arith.constant 0 : i32
    return %arg0, %c0_i32, %c0_i32_0 : i32, i32, i32
  }
  func.func @transform_2(%arg0: i32, %arg1: i32) -> (i32, i32, i32) {
    %c0_i32 = arith.constant 0 : i32
    %c0_i32_0 = arith.constant 0 : i32
    %c0_i32_1 = arith.constant 0 : i32
    return %arg1, %c0_i32, %c0_i32_0 : i32, i32, i32
  }
  func.func @transform_3(%arg0: i32, %arg1: i32) -> (i32, i32, i32) {
    %c0_i32 = arith.constant 0 : i32
    %c0_i32_0 = arith.constant 0 : i32
    %c0_i32_1 = arith.constant 0 : i32
    return %arg1, %c0_i32, %c0_i32_0 : i32, i32, i32
  }
  func.func @transform_4(%arg0: i32, %arg1: i32) -> (i32, i32, i32) {
    %c0_i32 = arith.constant 0 : i32
    %c0_i32_0 = arith.constant 0 : i32
    %c0_i32_1 = arith.constant 0 : i32
    return %arg1, %c0_i32, %c0_i32_0 : i32, i32, i32
  }
  func.func @transform_5(%arg0: i32, %arg1: i32) -> (i32, i32, i32) {
    %c0_i32 = arith.constant 0 : i32
    %c0_i32_0 = arith.constant 0 : i32
    %c0_i32_1 = arith.constant 0 : i32
    return %arg1, %c0_i32, %c0_i32_0 : i32, i32, i32
  }
  func.func @transform_6(%arg0: i32, %arg1: i32) -> (i32, i32, i32) {
    %c0_i32 = arith.constant 0 : i32
    %c0_i32_0 = arith.constant 0 : i32
    %c0_i32_1 = arith.constant 0 : i32
    return %arg1, %c0_i32, %c0_i32_0 : i32, i32, i32
  }
  func.func @transform_7(%arg0: i32, %arg1: i32) -> (i32, i32, i32) {
    %c0_i32 = arith.constant 0 : i32
    %c0_i32_0 = arith.constant 0 : i32
    %c0_i32_1 = arith.constant 0 : i32
    return %arg1, %c0_i32, %c0_i32_0 : i32, i32, i32
  }
  func.func @transform_8(%arg0: i32, %arg1: i32) -> (i32, i32, i32) {
    %c0_i32 = arith.constant 0 : i32
    %c0_i32_0 = arith.constant 0 : i32
    %c0_i32_1 = arith.constant 0 : i32
    return %arg1, %c0_i32, %c0_i32_0 : i32, i32, i32
  }
  func.func @transform_9(%arg0: i32, %arg1: i32) -> (i32, i32) {
    %c0_i32 = arith.constant 0 : i32
    %c0_i32_0 = arith.constant 0 : i32
    %c0_i32_1 = arith.constant 0 : i32
    return %c0_i32, %c0_i32_0 : i32, i32
  }
  func.func @transform_10(%arg0: i32, %arg1: i32) -> (i32, i32) {
    %c0_i32 = arith.constant 0 : i32
    %c0_i32_0 = arith.constant 0 : i32
    %c0_i32_1 = arith.constant 0 : i32
    return %c0_i32, %c0_i32_0 : i32, i32
  }
  func.func @transform_11(%arg0: i32, %arg1: i32) -> (i32, i32) {
    %c0_i32 = arith.constant 0 : i32
    %c0_i32_0 = arith.constant 0 : i32
    %c0_i32_1 = arith.constant 0 : i32
    return %c0_i32, %c0_i32_0 : i32, i32
  }
  func.func @transform_12(%arg0: i32, %arg1: i32) -> (i32, i32, i32) {
    %c0_i32 = arith.constant 0 : i32
    %c0_i32_0 = arith.constant 0 : i32
    %c0_i32_1 = arith.constant 0 : i32
    return %arg0, %c0_i32, %c0_i32_0 : i32, i32, i32
  }
}

</mosaic_0001>

<bundles_post_ra>
// kernel: tpu_custom_call.1
= control target key start
LH: loop header
LB: loop body
LE: loop exit
PB: predicated region body
PF: predicated region fallthrough
CT: control target
= control target key end

     0   :  { %s13743_s0 = inlined_call_operand.vmem [shape: f32[2,128,32], index: 0, kind: input, shape index: {}]   ;;  %s13744_s1 = inlined_call_operand.vmem [shape: f32[2,1,128], index: 1, kind: input, shape index: {}]   ;;  %s13745_s2 = inlined_call_operand.vmem [shape: f32[2,6,32], index: 2, kind: input, shape index: {}]   ;;  %s13746_s3 = inlined_call_operand.vmem [shape: bf16[2,32,96], index: 3, kind: input, shape index: {}]   ;;  %s13747_s4 = inlined_call_operand.vmem [shape: f32[2,1,96], index: 4, kind: input, shape index: {}]   ;;  %s13748_s5 = inlined_call_operand.vmem [shape: bf16[2,32,32], index: 5, kind: input, shape index: {}]   ;;  %s13749_s6 = inlined_call_operand.vmem [shape: bf16[2,32,128], index: 6, kind: input, shape index: {}]   ;;  %s13750_s7 = inlined_call_operand.vmem [shape: f32[2,1,128], index: 7, kind: input, shape index: {}]   ;;  %s13751_s8 = inlined_call_operand.vmem [shape: bf16[2,128,32], index: 8, kind: input, shape index: {}]   ;;  %s13752_s9 = inlined_call_operand.vmem [shape: f32[2,32], index: 9, kind: input, shape index: {}]   ;;  %s13753_s10 = inlined_call_operand.vmem [shape: bf16[32,16], index: 10, kind: input, shape index: {}]   ;;  %s13754_s11 = inlined_call_operand.vmem [shape: f32[1,16], index: 11, kind: input, shape index: {}]   ;;  %s13755_s12 = inlined_call_operand.hbm [shape: f32[2,1,16], index: 12, kind: output, shape index: {}]  }
   0x1   :  { %13945 = sst [smem:[#allocation84_spill]] %s13745_s2 }
   0x2   :  { %13946 = sst [smem:[#allocation85_spill]] %s13746_s3 }
   0x3   :  { %13947 = sst [smem:[#allocation86_spill]] %s13755_s12 }
   0x4   :  { %17 = vsyncpa [#allocation5], 0  ;;  %s9595_s21 = smov 0   ;;  %s9597_s22 = smov 0  }
   0x5   :  { %s9599_s23 = smov 0  }
   0x6 LB: > { %13948 = sst [smem:[#allocation7_spill]] %s9504_s22  ;;  %s32_s25 = sadd.s32 1, %s9504_s22  ;;  %s9508_s23 = sphi %s9599_s23, %s23_s23   ;;  %s9504_s22 = sphi %s9597_s22, %s14320_s22   ;;  %s9500_s21 = sphi %s9595_s21, %s14319_s21  }
   0x7   : > { %p33_p0 = scmp.ge.s32.totalorder %s32_s25, 2  ;;  %p7323_p1 = scmp.ge.s32.totalorder %s9508_s23, 1 }
   0x8   : > { %p452_p2 = scmp.lt.s32.totalorder %s9508_s23, 3 }
   0x9   : > { %s14322_s25 = smov (%p33_p0, %s32_s25), 0 }
   0xa   : > { %13949 = sst [smem:[#allocation8_spill]] %s14322_s25  ;;  %p453_p3 = pnand %p7323_p1, %p452_p2 }
   0xc   : > { %456 = sbr.rel (%p453_p3) target bundleno = 5870 (0x16ee), region = 68 }
  0x13   : > { %p536_p4 = scmp.lt.s32.totalorder %s9500_s21, 1  ;;  %s13950_s2 = sld [smem:[#allocation84_spill]] }
  0x14   : > { %s13951_s3 = sld [smem:[#allocation85_spill]]  ;;  %p7333_p5 = scmp.ne.s32.totalorder %s9500_s21, 0 }
  0x15   : > { %s9618_s26 = scalar_select %p536_p4, %s9500_s21, 1 }
  0x16   : > { %571 = sbr.rel (%p7333_p5) target bundleno = 39 (0x27), region = 72  ;;  %v572_v0 = vld [vmem:[%s13743_s0] sm:$0xff] (!%p7333_p5)  ;;  %vm604_vm0 = vcmask (!%p7333_p5), 261120   ;;  %v573_v1 = vld [vmem:[%s13743_s0 + $0x8] sm:$0xff] (!%p7333_p5)  ;;  %v574_v2 = vld [vmem:[%s13743_s0 + $0x10] sm:$0xff] (!%p7333_p5) }
  0x17   : > { %s7324_s27 = sshll.u32 %s9618_s26, 3  ;;  %s7505_s28 = sshll.u32 %s9618_s26, 4  ;;  %605 = vst.msk [vmem:[#allocation2] sm:$0xff] (!%p7333_p5), %vm604_vm0, %v572_v0  ;;  %606 = vst.msk [vmem:[#allocation2 + $0x8] sm:$0xff] (!%p7333_p5), %vm604_vm0, %v573_v1  ;;  %v575_v3 = vld [vmem:[%s13743_s0 + $0x18] sm:$0xff] (!%p7333_p5)  ;;  %v576_v4 = vld [vmem:[%s13743_s0 + $0x20] sm:$0xff] (!%p7333_p5) }
  0x18   : > { %s547_s19 = scalar_lea.vmem %s13747_s4, %s9618_s26  ;;  %s9639_s25 = scalar_lea.vmem %s13748_s5, %s7505_s28  ;;  %607 = vst.msk [vmem:[#allocation2 + $0x10] sm:$0xff] (!%p7333_p5), %vm604_vm0, %v574_v2  ;;  %v577_v5 = vld [vmem:[%s13743_s0 + $0x28] sm:$0xff] (!%p7333_p5)  ;;  %608 = vst.msk [vmem:[#allocation2 + $0x18] sm:$0xff] (!%p7333_p5), %vm604_vm0, %v575_v3  ;;  %v578_v6 = vld [vmem:[%s13743_s0 + $0x30] sm:$0xff] (!%p7333_p5) }
  0x19   : > { %s9625_s13 = scalar_lea.vmem %s13950_s2, %s7324_s27  ;;  %s9644_s29 = scalar_lea.vmem %s13749_s6, %s7505_s28  ;;  %609 = vst.msk [vmem:[#allocation2 + $0x20] sm:$0xff] (!%p7333_p5), %vm604_vm0, %v576_v4  ;;  %610 = vst.msk [vmem:[#allocation2 + $0x28] sm:$0xff] (!%p7333_p5), %vm604_vm0, %v577_v5  ;;  %v579_v7 = vld [vmem:[%s13743_s0 + $0x38] sm:$0xff] (!%p7333_p5)  ;;  %v580_v8 = vld [vmem:[%s13743_s0 + $0x40] sm:$0xff] (!%p7333_p5) }
  0x1a   : > { %s9630_s16 = scalar_lea.vmem %s13951_s3, %s7505_s28  ;;  %s560_s14 = scalar_lea.vmem %s13750_s7, %s9618_s26  ;;  %611 = vst.msk [vmem:[#allocation2 + $0x30] sm:$0xff] (!%p7333_p5), %vm604_vm0, %v578_v6  ;;  %612 = vst.msk [vmem:[#allocation2 + $0x38] sm:$0xff] (!%p7333_p5), %vm604_vm0, %v579_v7  ;;  %v581_v9 = vld [vmem:[%s13743_s0 + $0x48] sm:$0xff] (!%p7333_p5)  ;;  %v582_v10 = vld [vmem:[%s13743_s0 + $0x50] sm:$0xff] (!%p7333_p5) }
  0x1b   : > { %s7508_s15 = sshll.u32 %s9618_s26, 6  ;;  %613 = vst.msk [vmem:[#allocation2 + $0x40] sm:$0xff] (!%p7333_p5), %vm604_vm0, %v580_v8  ;;  %v583_v11 = vld [vmem:[%s13743_s0 + $0x58] sm:$0xff] (!%p7333_p5)  ;;  %614 = vst.msk [vmem:[#allocation2 + $0x48] sm:$0xff] (!%p7333_p5), %vm604_vm0, %v581_v9  ;;  %v584_v12 = vld [vmem:[%s13743_s0 + $0x60] sm:$0xff] (!%p7333_p5) }
  0x1c   : > { %s9654_s17 = scalar_lea.vmem %s13751_s8, %s7508_s15  ;;  %615 = vst.msk [vmem:[#allocation2 + $0x50] sm:$0xff] (!%p7333_p5), %vm604_vm0, %v582_v10  ;;  %616 = vst.msk [vmem:[#allocation2 + $0x58] sm:$0xff] (!%p7333_p5), %vm604_vm0, %v583_v11  ;;  %v585_v13 = vld [vmem:[%s13743_s0 + $0x68] sm:$0xff] (!%p7333_p5)  ;;  %v586_v14 = vld [vmem:[%s13743_s0 + $0x70] sm:$0xff] (!%p7333_p5) }
  0x1d   : > { %617 = vst.msk [vmem:[#allocation2 + $0x60] sm:$0xff] %vm604_vm0, %v584_v12  ;;  %618 = vst.msk [vmem:[#allocation2 + $0x68] sm:$0xff] %vm604_vm0, %v585_v13  ;;  %v587_v15 = vld [vmem:[%s13743_s0 + $0x78] sm:$0xff]  ;;  %v588_v16 = vld [vmem:[%s13743_s0 + $0x80] sm:$0xff] }
  0x1e   : > { %619 = vst.msk [vmem:[#allocation2 + $0x70] sm:$0xff] %vm604_vm0, %v586_v14  ;;  %v589_v17 = vld [vmem:[%s13743_s0 + $0x88] sm:$0xff]  ;;  %620 = vst.msk [vmem:[#allocation2 + $0x78] sm:$0xff] %vm604_vm0, %v587_v15  ;;  %v590_v18 = vld [vmem:[%s13743_s0 + $0x90] sm:$0xff] }
  0x1f   : > { %621 = vst.msk [vmem:[#allocation2 + $0x80] sm:$0xff] %vm604_vm0, %v588_v16  ;;  %622 = vst.msk [vmem:[#allocation2 + $0x88] sm:$0xff] %vm604_vm0, %v589_v17  ;;  %v591_v19 = vld [vmem:[%s13743_s0 + $0x98] sm:$0xff]  ;;  %v592_v20 = vld [vmem:[%s13743_s0 + $0xa0] sm:$0xff] }
  0x20   : > { %623 = vst.msk [vmem:[#allocation2 + $0x90] sm:$0xff] %vm604_vm0, %v590_v18  ;;  %624 = vst.msk [vmem:[#allocation2 + $0x98] sm:$0xff] %vm604_vm0, %v591_v19  ;;  %v593_v21 = vld [vmem:[%s13743_s0 + $0xa8] sm:$0xff]  ;;  %v594_v22 = vld [vmem:[%s13743_s0 + $0xb0] sm:$0xff] }
  0x21   : > { %625 = vst.msk [vmem:[#allocation2 + $0xa0] sm:$0xff] %vm604_vm0, %v592_v20  ;;  %v595_v23 = vld [vmem:[%s13743_s0 + $0xb8] sm:$0xff]  ;;  %626 = vst.msk [vmem:[#allocation2 + $0xa8] sm:$0xff] %vm604_vm0, %v593_v21  ;;  %v596_v24 = vld [vmem:[%s13743_s0 + $0xc0] sm:$0xff] }
  0x22   : > { %627 = vst.msk [vmem:[#allocation2 + $0xb0] sm:$0xff] %vm604_vm0, %v594_v22  ;;  %628 = vst.msk [vmem:[#allocation2 + $0xb8] sm:$0xff] %vm604_vm0, %v595_v23  ;;  %v597_v25 = vld [vmem:[%s13743_s0 + $0xc8] sm:$0xff]  ;;  %v598_v26 = vld [vmem:[%s13743_s0 + $0xd0] sm:$0xff] }
  0x23   : > { %629 = vst.msk [vmem:[#allocation2 + $0xc0] sm:$0xff] %vm604_vm0, %v596_v24  ;;  %630 = vst.msk [vmem:[#allocation2 + $0xc8] sm:$0xff] %vm604_vm0, %v597_v25  ;;  %v599_v27 = vld [vmem:[%s13743_s0 + $0xd8] sm:$0xff]  ;;  %v600_v28 = vld [vmem:[%s13743_s0 + $0xe0] sm:$0xff] }
  0x24   : > { %631 = vst.msk [vmem:[#allocation2 + $0xd0] sm:$0xff] %vm604_vm0, %v598_v26  ;;  %v601_v29 = vld [vmem:[%s13743_s0 + $0xe8] sm:$0xff]  ;;  %632 = vst.msk [vmem:[#allocation2 + $0xd8] sm:$0xff] %vm604_vm0, %v599_v27  ;;  %v602_v30 = vld [vmem:[%s13743_s0 + $0xf0] sm:$0xff] }
  0x25   : > { %633 = vst.msk [vmem:[#allocation2 + $0xe0] sm:$0xff] %vm604_vm0, %v600_v28  ;;  %634 = vst.msk [vmem:[#allocation2 + $0xe8] sm:$0xff] %vm604_vm0, %v601_v29  ;;  %v603_v31 = vld [vmem:[%s13743_s0 + $0xf8] sm:$0xff] }
  0x26   : > { %635 = vst.msk [vmem:[#allocation2 + $0xf0] sm:$0xff] %vm604_vm0, %v602_v30  ;;  %636 = vst.msk [vmem:[#allocation2 + $0xf8] sm:$0xff] %vm604_vm0, %v603_v31 }
  0x27 PF: > { %vm670_vm1 = vcmask 261120   ;;  %v9841_v60 = vld [vmem:[#allocation2 + $0x70] sm:$0xff]  ;;  %v9843_v61 = vld [vmem:[#allocation2 + $0x78] sm:$0xff]  ;;  %v9849_v0 = vld [vmem:[#allocation2 + $0x80] sm:$0xff]  ;;  %vm1545_vm2 = vcmask 64512   ;;  %s9510_s15 = smov 96  }
  0x28   : > { %v9785_v32 = vld [vmem:[#allocation2] sm:$0xff]  ;;  %v9789_v34 = vld [vmem:[#allocation2 + $0x8] sm:$0xff]  ;;  %v713_v62 = vsel %vm670_vm1, %v9841_v60, 0.0  ;;  %v716_v63 = vsel %vm670_vm1, %v9843_v61, 0.0  ;;  %v719_v2 = vsel %vm670_vm1, %v9849_v0, 0.0  ;;  %v9857_v4 = vld [vmem:[#allocation2 + $0x90] sm:$0xff] }
  0x29   : > { %v9787_v33 = vld [vmem:[#allocation2 + $0x10] sm:$0xff]  ;;  %v671_v35 = vsel %vm670_vm1, %v9785_v32, 0.0  ;;  %v9795_v37 = vld [vmem:[#allocation2 + $0x18] sm:$0xff]  ;;  %v674_v38 = vsel %vm670_vm1, %v9789_v34, 0.0  ;;  %v9851_v1 = vld [vmem:[#allocation2 + $0x88] sm:$0xff]  ;;  %v725_v6 = vsel %vm670_vm1, %v9857_v4, 0.0 }
  0x2a   : > { %v677_v36 = vsel %vm670_vm1, %v9787_v33, 0.0  ;;  %672 = vadd.xlane.f32.xlu0 %v671_v35  ;;  %v680_v39 = vsel %vm670_vm1, %v9795_v37, 0.0  ;;  %v9801_v40 = vld [vmem:[#allocation2 + $0x20] sm:$0xff]  ;;  %v9803_v41 = vld [vmem:[#allocation2 + $0x28] sm:$0xff]  ;;  %v722_v3 = vsel %vm670_vm1, %v9851_v1, 0.0  ;;  %v9859_v5 = vld [vmem:[#allocation2 + $0x98] sm:$0xff] }
  0x2b   : > { %678 = vadd.xlane.f32.xlu1 %v677_v36  ;;  %v9805_v42 = vld [vmem:[#allocation2 + $0x30] sm:$0xff]  ;;  %v9807_v43 = vld [vmem:[#allocation2 + $0x38] sm:$0xff]  ;;  %v683_v44 = vsel %vm670_vm1, %v9801_v40, 0.0  ;;  %v686_v45 = vsel %vm670_vm1, %v9803_v41, 0.0  ;;  %v728_v7 = vsel %vm670_vm1, %v9859_v5, 0.0  ;;  %v9865_v8 = vld [vmem:[#allocation2 + $0xa0] sm:$0xff] }
  0x2c   : > { %v9813_v46 = vld [vmem:[#allocation2 + $0x40] sm:$0xff]  ;;  %v9815_v47 = vld [vmem:[#allocation2 + $0x48] sm:$0xff]  ;;  %v689_v48 = vsel %vm670_vm1, %v9805_v42, 0.0  ;;  %v692_v49 = vsel %vm670_vm1, %v9807_v43, 0.0  ;;  %v731_v10 = vsel %vm670_vm1, %v9865_v8, 0.0  ;;  %v9873_v12 = vld [vmem:[#allocation2 + $0xb0] sm:$0xff] }
  0x2d   : > { %v695_v50 = vsel %vm670_vm1, %v9813_v46, 0.0  ;;  %v698_v51 = vsel %vm670_vm1, %v9815_v47, 0.0  ;;  %v9825_v52 = vld [vmem:[#allocation2 + $0x50] sm:$0xff]  ;;  %v9827_v53 = vld [vmem:[#allocation2 + $0x58] sm:$0xff]  ;;  %v9867_v9 = vld [vmem:[#allocation2 + $0xa8] sm:$0xff]  ;;  %v737_v14 = vsel %vm670_vm1, %v9873_v12, 0.0 }
  0x2e   : > { %675 = vadd.xlane.f32.xlu0 %v674_v38  ;;  %v701_v54 = vsel %vm670_vm1, %v9825_v52, 0.0  ;;  %v704_v55 = vsel %vm670_vm1, %v9827_v53, 0.0  ;;  %v9833_v56 = vld [vmem:[#allocation2 + $0x60] sm:$0xff]  ;;  %v9835_v57 = vld [vmem:[#allocation2 + $0x68] sm:$0xff]  ;;  %v734_v11 = vsel %vm670_vm1, %v9867_v9, 0.0  ;;  %v9875_v13 = vld [vmem:[#allocation2 + $0xb8] sm:$0xff] }
  0x2f   : > { %681 = vadd.xlane.f32.xlu1 %v680_v39  ;;  %v707_v58 = vsel %vm670_vm1, %v9833_v56, 0.0  ;;  %v710_v59 = vsel %vm670_vm1, %v9835_v57, 0.0  ;;  %v740_v15 = vsel %vm670_vm1, %v9875_v13, 0.0  ;;  %v9881_v16 = vld [vmem:[#allocation2 + $0xc0] sm:$0xff]  ;;  %v9883_v17 = vld [vmem:[#allocation2 + $0xc8] sm:$0xff]  ;;  %v9889_v20 = vld [vmem:[#allocation2 + $0xd0] sm:$0xff] }
  0x30   : > { %v743_v18 = vsel %vm670_vm1, %v9881_v16, 0.0  ;;  %v746_v19 = vsel %vm670_vm1, %v9883_v17, 0.0  ;;  %v9891_v21 = vld [vmem:[#allocation2 + $0xd8] sm:$0xff]  ;;  %v749_v22 = vsel %vm670_vm1, %v9889_v20, 0.0  ;;  %s9512_s24 = smov 88   ;;  %s9514_s22 = smov 120  }
  0x31   : > { %v752_v23 = vsel %vm670_vm1, %v9891_v21, 0.0  ;;  %s9515_s2 = smov 56   ;;  %s9516_s3 = smov 80  }
  0x32   : > { %684 = vadd.xlane.f32.xlu0 %v683_v44  ;;  %s9517_s27 = smov 112   ;;  %s9519_s30 = smov 72  }
  0x33   : > { %687 = vadd.xlane.f32.xlu1 %v686_v45  ;;  %s9523_s18 = smov 16   ;;  %s9524_s12 = smov 24  }
  0x34   : > { %p7496_p6 = scmp.ne.s32.totalorder %s9500_s21, 1 }
  0x36   : > { %690 = vadd.xlane.f32.xlu0 %v689_v48 }
  0x37   : > { %693 = vadd.xlane.f32.xlu1 %v692_v49 }
  0x3a   : > { %696 = vadd.xlane.f32.xlu0 %v695_v50 }
  0x3b   : > { %699 = vadd.xlane.f32.xlu1 %v698_v51 }
  0x3e   : > { %702 = vadd.xlane.f32.xlu0 %v701_v54 }
  0x3f   : > { %705 = vadd.xlane.f32.xlu1 %v704_v55  ;;  %v9919_v55 = vld [vmem:[#allocation2 + $0xe0] sm:$0xff] }
  0x42   : > { %708 = vadd.xlane.f32.xlu0 %v707_v58 }
  0x43   : > { %711 = vadd.xlane.f32.xlu1 %v710_v59 }
  0x46   : > { %714 = vadd.xlane.f32.xlu0 %v713_v62  ;;  %v755_v62 = vsel %vm670_vm1, %v9919_v55, 0.0 }
  0x47   : > { %717 = vadd.xlane.f32.xlu1 %v716_v63 }
  0x4a   : > { %720 = vadd.xlane.f32.xlu0 %v719_v2 }
  0x4b   : > { %723 = vadd.xlane.f32.xlu1 %v722_v3  ;;  %v9928_v3 = vld [vmem:[#allocation2 + $0xf0] sm:$0xff] }
  0x4e   : > { %726 = vadd.xlane.f32.xlu0 %v725_v6 }
  0x4f   : > { %729 = vadd.xlane.f32.xlu1 %v728_v7  ;;  %v9930_v7 = vld [vmem:[#allocation2 + $0xe8] sm:$0xff] }
  0x52   : > { %732 = vadd.xlane.f32.xlu0 %v731_v10 }
  0x53   : > { %735 = vadd.xlane.f32.xlu1 %v734_v11  ;;  %v761_v11 = vsel %vm670_vm1, %v9928_v3, 0.0 }
  0x56   : > { %738 = vadd.xlane.f32.xlu0 %v737_v14 }
  0x57   : > { %741 = vadd.xlane.f32.xlu1 %v740_v15 }
  0x5a   : > { %744 = vadd.xlane.f32.xlu0 %v743_v18 }
  0x5b   : > { %747 = vadd.xlane.f32.xlu1 %v746_v19 }
  0x5e   : > { %750 = vadd.xlane.f32.xlu0 %v749_v22  ;;  %v9942_v22 = vld [vmem:[#allocation2 + $0xf8] sm:$0xff] }
  0x5f   : > { %753 = vadd.xlane.f32.xlu1 %v752_v23 }
  0xb7   : > { %v673_v24 = vpop.xlane.xlu0 %672 }
  0xb8   : > { %v679_v25 = vpop.xlane.xlu1 %678  ;;  %v768_v26 = vmul.f32 0.03125, %v673_v24 }
  0xb9   : > { %v770_v27 = vmul.f32 0.03125, %v679_v25  ;;  %v764_v25 = vsel %vm670_vm1, %v9942_v22, 0.0 }
  0xba   : > { %v9898_v28 = vsub.f32 %v9785_v32, %v768_v26 }
  0xbb   : > { %v9901_v29 = vsub.f32 %v9787_v33, %v770_v27  ;;  %v676_v30 = vpop.xlane.xlu0 %675 }
  0xbc   : > { %v682_v31 = vpop.xlane.xlu1 %681  ;;  %v769_v35 = vmul.f32 0.03125, %v676_v30  ;;  %v832_v38 = vmul.f32 %v9898_v28, %v9898_v28 }
  0xbd   : > { %v771_v36 = vmul.f32 0.03125, %v682_v31  ;;  %v834_v39 = vmul.f32 %v9901_v29, %v9901_v29 }
  0xbe   : > { %v9908_v44 = vsub.f32 %v9789_v34, %v769_v35  ;;  %v864_v32 = vsel %vm670_vm1, %v832_v38, 0.0 }
  0xbf   : > { %v9911_v45 = vsub.f32 %v9795_v37, %v771_v36  ;;  %865 = vadd.xlane.f32.xlu0 %v864_v32  ;;  %v685_v33 = vpop.xlane.xlu0 %684  ;;  %v870_v49 = vsel %vm670_vm1, %v834_v39, 0.0 }
  0xc0   : > { %v688_v48 = vpop.xlane.xlu1 %687  ;;  %v833_v50 = vmul.f32 %v9908_v44, %v9908_v44  ;;  %v772_v54 = vmul.f32 0.03125, %v685_v33 }
  0xc1   : > { %v835_v51 = vmul.f32 %v9911_v45, %v9911_v45  ;;  %v773_v37 = vmul.f32 0.03125, %v688_v48 }
  0xc2   : > { %v867_v34 = vsel %vm670_vm1, %v833_v50, 0.0  ;;  %v9926_v2 = vsub.f32 %v9801_v40, %v772_v54  ;;  %v758_v40 = vsel %vm670_vm1, %v9930_v7, 0.0 }
  0xc3   : > { %871 = vadd.xlane.f32.xlu0 %v870_v49  ;;  %868 = vadd.xlane.f32.xlu1 %v867_v34  ;;  %v691_v58 = vpop.xlane.xlu0 %690  ;;  %v873_v63 = vsel %vm670_vm1, %v835_v51, 0.0  ;;  %v9933_v10 = vsub.f32 %v9803_v41, %v773_v37 }
  0xc4   : > { %v694_v59 = vpop.xlane.xlu1 %693  ;;  %v774_v6 = vmul.f32 0.03125, %v691_v58  ;;  %v836_v23 = vmul.f32 %v9926_v2, %v9926_v2 }
  0xc5   : > { %v775_v14 = vmul.f32 0.03125, %v694_v59  ;;  %v837_v27 = vmul.f32 %v9933_v10, %v9933_v10 }
  0xc6   : > { %v9940_v19 = vsub.f32 %v9805_v42, %v774_v6  ;;  %v876_v31 = vsel %vm670_vm1, %v836_v23, 0.0 }
  0xc7   : > { %756 = vadd.xlane.f32.xlu0 %v755_v62  ;;  %874 = vadd.xlane.f32.xlu1 %v873_v63  ;;  %v697_v15 = vpop.xlane.xlu0 %696  ;;  %v9947_v41 = vsub.f32 %v9807_v43, %v775_v14  ;;  %v879_v39 = vsel %vm670_vm1, %v837_v27, 0.0 }
  0xc8   : > { %v700_v18 = vpop.xlane.xlu1 %699  ;;  %v776_v24 = vmul.f32 0.03125, %v697_v15  ;;  %v838_v36 = vmul.f32 %v9940_v19, %v9940_v19 }
  0xc9   : > { %v777_v26 = vmul.f32 0.03125, %v700_v18  ;;  %v839_v33 = vmul.f32 %v9947_v41, %v9947_v41 }
  0xca   : > { %v9955_v35 = vsub.f32 %v9813_v46, %v776_v24  ;;  %v882_v46 = vsel %vm670_vm1, %v838_v36, 0.0 }
  0xcb   : > { %762 = vadd.xlane.f32.xlu0 %v761_v11  ;;  %759 = vadd.xlane.f32.xlu1 %v758_v40  ;;  %v703_v42 = vpop.xlane.xlu0 %702  ;;  %v9960_v43 = vsub.f32 %v9815_v47, %v777_v26  ;;  %v885_v34 = vsel %vm670_vm1, %v839_v33, 0.0 }
  0xcc   : > { %v706_v30 = vpop.xlane.xlu1 %705  ;;  %v778_v38 = vmul.f32 0.03125, %v703_v42  ;;  %v840_v51 = vmul.f32 %v9955_v35, %v9955_v35 }
  0xcd   : > { %v779_v32 = vmul.f32 0.03125, %v706_v30  ;;  %v841_v58 = vmul.f32 %v9960_v43, %v9960_v43 }
  0xce   : > { %v9967_v50 = vsub.f32 %v9825_v52, %v778_v38  ;;  %v888_v52 = vsel %vm670_vm1, %v840_v51, 0.0 }
  0xcf   : > { %765 = vadd.xlane.f32.xlu1 %v764_v25  ;;  %877 = vadd.xlane.f32.xlu0 %v876_v31  ;;  %v709_v48 = vpop.xlane.xlu0 %708  ;;  %v9972_v47 = vsub.f32 %v9827_v53, %v779_v32  ;;  %v891_v14 = vsel %vm670_vm1, %v841_v58, 0.0 }
  0xd0   : > { %v712_v49 = vpop.xlane.xlu1 %711  ;;  %v780_v54 = vmul.f32 0.03125, %v709_v48  ;;  %v842_v6 = vmul.f32 %v9967_v50, %v9967_v50 }
  0xd1   : > { %v781_v37 = vmul.f32 0.03125, %v712_v49  ;;  %v843_v18 = vmul.f32 %v9972_v47, %v9972_v47 }
  0xd2   : > { %v9979_v63 = vsub.f32 %v9833_v56, %v780_v54  ;;  %v894_v56 = vsel %vm670_vm1, %v842_v6, 0.0 }
  0xd3   : > { %880 = vadd.xlane.f32.xlu1 %v879_v39  ;;  %883 = vadd.xlane.f32.xlu0 %v882_v46  ;;  %v715_v59 = vpop.xlane.xlu0 %714  ;;  %v9984_v53 = vsub.f32 %v9835_v57, %v781_v37  ;;  %v897_v27 = vsel %vm670_vm1, %v843_v18, 0.0 }
  0xd4   : > { %v718_v62 = vpop.xlane.xlu1 %717  ;;  %v782_v11 = vmul.f32 0.03125, %v715_v59  ;;  %v844_v25 = vmul.f32 %v9979_v63, %v9979_v63 }
  0xd5   : > { %v783_v15 = vmul.f32 0.03125, %v718_v62  ;;  %v845_v30 = vmul.f32 %v9984_v53, %v9984_v53 }
  0xd6   : > { %v9991_v24 = vsub.f32 %v9841_v60, %v782_v11  ;;  %v900_v60 = vsel %vm670_vm1, %v844_v25, 0.0 }
  0xd7   : > { %886 = vadd.xlane.f32.xlu1 %v885_v34  ;;  %889 = vadd.xlane.f32.xlu0 %v888_v52  ;;  %v721_v40 = vpop.xlane.xlu0 %720  ;;  %v9996_v57 = vsub.f32 %v9843_v61, %v783_v15  ;;  %v903_v33 = vsel %vm670_vm1, %v845_v30, 0.0 }
  0xd8   : > { %v724_v23 = vpop.xlane.xlu1 %723  ;;  %v784_v26 = vmul.f32 0.03125, %v721_v40  ;;  %v846_v39 = vmul.f32 %v9991_v24, %v9991_v24 }
  0xd9   : > { %v785_v42 = vmul.f32 0.03125, %v724_v23  ;;  %v847_v49 = vmul.f32 %v9996_v57, %v9996_v57 }
  0xda   : > { %v10003_v38 = vsub.f32 %v9849_v0, %v784_v26  ;;  %v906_v0 = vsel %vm670_vm1, %v846_v39, 0.0  ;;  %v8637_v26 = vld [vmem:[%s9630_s16 + $0x8] sm:$0xff]  }
  0xdb   : > { %892 = vadd.xlane.f32.xlu1 %v891_v14  ;;  %895 = vadd.xlane.f32.xlu0 %v894_v56  ;;  %v727_v31 = vpop.xlane.xlu0 %726  ;;  %v10008_v61 = vsub.f32 %v9851_v1, %v785_v42  ;;  %v909_v58 = vsel %vm670_vm1, %v847_v49, 0.0 }
  0xdc   : > { %v730_v36 = vpop.xlane.xlu1 %729  ;;  %v786_v32 = vmul.f32 0.03125, %v727_v31  ;;  %v848_v34 = vmul.f32 %v10003_v38, %v10003_v38 }
  0xdd   : > { %v787_v48 = vmul.f32 0.03125, %v730_v36  ;;  %v849_v62 = vmul.f32 %v10008_v61, %v10008_v61 }
  0xde   : > { %v10015_v54 = vsub.f32 %v9857_v4, %v786_v32  ;;  %v8636_v4 = vld [vmem:[%s9630_s16] sm:$0xff]   ;;  %v912_v11 = vsel %vm670_vm1, %v848_v34, 0.0  ;;  %s9518_s16 = smov 48  }
  0xdf   : > { %898 = vadd.xlane.f32.xlu1 %v897_v27  ;;  %901 = vadd.xlane.f32.xlu0 %v900_v60  ;;  %v733_v46 = vpop.xlane.xlu0 %732  ;;  %v10020_v1 = vsub.f32 %v9859_v5, %v787_v48  ;;  %v915_v40 = vsel %vm670_vm1, %v849_v62, 0.0 }
  0xe0   : > { %v736_v51 = vpop.xlane.xlu1 %735  ;;  %v788_v37 = vmul.f32 0.03125, %v733_v46  ;;  %v850_v15 = vmul.f32 %v10015_v54, %v10015_v54  ;;  %7846 = vmatprep.subr.bf16.mxu0 %v8636_v4 }
  0xe1   : > { %v789_v59 = vmul.f32 0.03125, %v736_v51  ;;  %7847 = vmatpush3.bf16.msra.mxu0 %v8636_v4  ;;  %v851_v56 = vmul.f32 %v10020_v1, %v10020_v1 }
  0xe2   : > { %v10028_v14 = vsub.f32 %v9865_v8, %v788_v37  ;;  %v918_v27 = vsel %vm670_vm1, %v850_v15, 0.0  ;;  %7848 = vmatprep.subr.bf16.mxu0 %v8637_v26 }
  0xe3   : > { %904 = vadd.xlane.f32.xlu1 %v903_v33  ;;  %907 = vadd.xlane.f32.xlu0 %v906_v0  ;;  %v739_v52 = vpop.xlane.xlu0 %738  ;;  %v10033_v18 = vsub.f32 %v9867_v9, %v789_v59  ;;  %v921_v36 = vsel %vm670_vm1, %v851_v56, 0.0 }
  0xe4   : > { %v742_v6 = vpop.xlane.xlu1 %741  ;;  %v790_v5 = vmul.f32 0.03125, %v739_v52  ;;  %v852_v30 = vmul.f32 %v10028_v14, %v10028_v14 }
  0xe5   : > { %v791_v23 = vmul.f32 0.03125, %v742_v6  ;;  %7849 = vmatpush3.bf16.msra.mxu0 %v8637_v26  ;;  %v853_v39 = vmul.f32 %v10033_v18, %v10033_v18 }
  0xe6   : > { %v10041_v42 = vsub.f32 %v9873_v12, %v790_v5  ;;  %v924_v12 = vsel %vm670_vm1, %v852_v30, 0.0 }
  0xe7   : > { %910 = vadd.xlane.f32.xlu1 %v909_v58  ;;  %913 = vadd.xlane.f32.xlu0 %v912_v11  ;;  %v745_v25 = vpop.xlane.xlu0 %744  ;;  %v10046_v9 = vsub.f32 %v9875_v13, %v791_v23  ;;  %v927_v51 = vsel %vm670_vm1, %v853_v39, 0.0 }
  0xe8   : > { %v748_v8 = vpop.xlane.xlu1 %747  ;;  %v792_v31 = vmul.f32 0.03125, %v745_v25  ;;  %v854_v48 = vmul.f32 %v10041_v42, %v10041_v42  ;;  %v1088_v25 = vlaneseq }
  0xe9   : > { %v793_v60 = vmul.f32 0.03125, %v748_v8  ;;  %v855_v0 = vmul.f32 %v10046_v9, %v10046_v9 }
  0xea   : > { %v10053_v33 = vsub.f32 %v9881_v16, %v792_v31  ;;  %v930_v34 = vsel %vm670_vm1, %v854_v48, 0.0 }
  0xeb   : > { %916 = vadd.xlane.f32.xlu1 %v915_v40  ;;  %919 = vadd.xlane.f32.xlu0 %v918_v27  ;;  %v751_v32 = vpop.xlane.xlu0 %750  ;;  %v10058_v13 = vsub.f32 %v9883_v17, %v793_v60  ;;  %v933_v59 = vsel %vm670_vm1, %v855_v0, 0.0  ;;  %v10084_v60 = vshrl.u32 %v1088_v25, 7 }
  0xec   : > { %v794_v49 = vmul.f32 0.03125, %v751_v32  ;;  %v754_v46 = vpop.xlane.xlu1 %753  ;;  %v856_v58 = vmul.f32 %v10053_v33, %v10053_v33 }
  0xed   : > { %v795_v37 = vmul.f32 0.03125, %v754_v46  ;;  %v857_v52 = vmul.f32 %v10058_v13, %v10058_v13  ;;  %13952 = vst [vmem:[#allocation9_spill] sm:$0xff] %v10084_v60 }
  0xee   : > { %v10065_v16 = vsub.f32 %v9889_v20, %v794_v49  ;;  %v936_v62 = vsel %vm670_vm1, %v856_v58, 0.0  ;;  %v669_v58 = vld [vmem:[%s9625_s13] sm:$0x3f] }
  0xef   : > { %922 = vadd.xlane.f32.xlu1 %v921_v36  ;;  %925 = vadd.xlane.f32.xlu0 %v924_v12  ;;  %v10071_v17 = vsub.f32 %v9891_v21, %v795_v37  ;;  %v939_v6 = vsel %vm670_vm1, %v857_v52, 0.0 }
  0xf0   : > { %v858_v20 = vmul.f32 %v10065_v16, %v10065_v16 }
  0xf1   : > { %v859_v11 = vmul.f32 %v10071_v17, %v10071_v17 }
  0xf2   : > { %v942_v4 = vsel %vm670_vm1, %v858_v20, 0.0 }
  0xf3   : > { %928 = vadd.xlane.f32.xlu1 %v927_v51  ;;  %931 = vadd.xlane.f32.xlu0 %v930_v34  ;;  %v945_v21 = vsel %vm670_vm1, %v859_v11, 0.0  ;;  %v13759_v51 = vsub.s32 0, %v10084_v60 }
  0xf5   : > { %v10103_v11 = vrot.slane %v669_v58, %v13759_v51 }
  0xf7   : > { %934 = vadd.xlane.f32.xlu1 %v933_v59  ;;  %937 = vadd.xlane.f32.xlu0 %v936_v62 }
  0xfb   : > { %940 = vadd.xlane.f32.xlu1 %v939_v6  ;;  %943 = vadd.xlane.f32.xlu0 %v942_v4 }
  0xff   : > { %946 = vadd.xlane.f32.xlu1 %v945_v21  ;;  %v13758_v21 = vsub.s32 1, %v10084_v60 }
 0x14c   : > { %v866_v15 = vpop.xlane.xlu0 %865 }
 0x14d   : > { %v960_v5 = vmul.f32 0.03125, %v866_v15 }
 0x14f   : > { %v992_v40 = vadd.f32 1e-05, %v960_v5 }
 0x150   : > { %v869_v23 = vpop.xlane.xlu1 %868  ;;  %v872_v56 = vpop.xlane.xlu0 %871 }
 0x151   : > { %8650 = vrsqrt.f32 %v992_v40  ;;  %v961_v8 = vmul.f32 0.03125, %v869_v23  ;;  %v962_v26 = vmul.f32 0.03125, %v872_v56 }
 0x153   : > { %v993_v27 = vadd.f32 1e-05, %v961_v8  ;;  %v994_v30 = vadd.f32 1e-05, %v962_v26 }
 0x154   : > { %v875_v31 = vpop.xlane.xlu1 %874  ;;  %v757_v36 = vpop.xlane.xlu0 %756 }
 0x155   : > { %8652 = vrsqrt.f32 %v993_v27  ;;  %v963_v39 = vmul.f32 0.03125, %v875_v31  ;;  %v796_v32 = vmul.f32 0.03125, %v757_v36 }
 0x156   : > { %8654 = vrsqrt.f32 %v994_v30 }
 0x157   : > { %v995_v12 = vadd.f32 1e-05, %v963_v39  ;;  %v10087_v48 = vsub.f32 %v9919_v55, %v796_v32  ;;  %v10119_v39 = vrot.slane %v669_v58, %v13758_v21 }
 0x158   : > { %v760_v49 = vpop.xlane.xlu1 %759  ;;  %v763_v46 = vpop.xlane.xlu0 %762 }
 0x159   : > { %8656 = vrsqrt.f32 %v995_v12  ;;  %v797_v0 = vmul.f32 0.03125, %v760_v49  ;;  %v798_v34 = vmul.f32 0.03125, %v763_v46  ;;  %v860_v37 = vmul.f32 %v10087_v48, %v10087_v48 }
 0x15b   : > { %v8651_v59 = vpop.eup %8650  ;;  %v10094_v62 = vsub.f32 %v9930_v7, %v797_v0  ;;  %v10097_v52 = vsub.f32 %v9928_v3, %v798_v34  ;;  %v948_v55 = vsel %vm670_vm1, %v860_v37, 0.0 }
 0x15c   : > { %v766_v20 = vpop.xlane.xlu1 %765  ;;  %949 = vadd.xlane.f32.xlu0 %v948_v55  ;;  %v878_v6 = vpop.xlane.xlu0 %877  ;;  %v1056_v4 = vmul.f32 %v8651_v59, %v9898_v28 }
 0x15d   : > { %v799_v15 = vmul.f32 0.03125, %v766_v20  ;;  %v964_v5 = vmul.f32 0.03125, %v878_v6  ;;  %v861_v7 = vmul.f32 %v10094_v62, %v10094_v62  ;;  %v862_v3 = vmul.f32 %v10097_v52, %v10097_v52 }
 0x15e   : > { %v1092_v36 = vmul.f32 %v10103_v11, %v1056_v4 }
 0x15f   : > { %v8653_v40 = vpop.eup %8652  ;;  %v10111_v23 = vsub.f32 %v9942_v22, %v799_v15  ;;  %v996_v56 = vadd.f32 1e-05, %v964_v5  ;;  %v951_v28 = vsel %vm670_vm1, %v861_v7, 0.0  ;;  %v954_v8 = vsel %vm670_vm1, %v862_v3, 0.0 }
 0x160   : > { %v8655_v26 = vpop.eup %8654  ;;  %952 = vadd.xlane.f32.xlu1 %v951_v28  ;;  %v881_v27 = vpop.xlane.xlu1 %880  ;;  %955 = vadd.xlane.f32.xlu0 %v954_v8  ;;  %v1057_v31 = vmul.f32 %v8653_v40, %v9908_v44  ;;  %v1128_v58 = vadd.f32 %v10119_v39, %v1092_v36 }
 0x161   : > { %v884_v30 = vpop.xlane.xlu0 %883  ;;  %8658 = vrsqrt.f32 %v996_v56  ;;  %v965_v22 = vmul.f32 0.03125, %v881_v27  ;;  %v863_v12 = vmul.f32 %v10111_v23, %v10111_v23  ;;  %v1058_v46 = vmul.f32 %v8655_v26, %v9901_v29 }
 0x162   : > { %v966_v32 = vmul.f32 0.03125, %v884_v30  ;;  %v1093_v49 = vmul.f32 %v10103_v11, %v1057_v31 }
 0x163   : > { %v8657_v0 = vpop.eup %8656  ;;  %v997_v34 = vadd.f32 1e-05, %v965_v22  ;;  %v957_v44 = vsel %vm670_vm1, %v863_v12, 0.0  ;;  %v1094_v4 = vmul.f32 %v10103_v11, %v1058_v46 }
 0x164   : > { %v998_v37 = vadd.f32 1e-05, %v966_v32  ;;  %958 = vadd.xlane.f32.xlu1 %v957_v44  ;;  %v887_v59 = vpop.xlane.xlu1 %886  ;;  %v1129_v20 = vadd.f32 %v10119_v39, %v1093_v49  ;;  %v1059_v6 = vmul.f32 %v8657_v0, %v9911_v45 }
 0x165   : > { %v890_v55 = vpop.xlane.xlu0 %889  ;;  %8660 = vrsqrt.f32 %v997_v34  ;;  %v967_v15 = vmul.f32 0.03125, %v887_v59  ;;  %v1130_v8 = vadd.f32 %v10119_v39, %v1094_v4 }
 0x166   : > { %v968_v5 = vmul.f32 0.03125, %v890_v55  ;;  %8662 = vrsqrt.f32 %v998_v37  ;;  %v1160_v29 = vpack.c.bf16 %v1129_v20, %v1128_v58  ;;  %v1095_v7 = vmul.f32 %v10103_v11, %v1059_v6 }
 0x167   : > { %v999_v3 = vadd.f32 1e-05, %v967_v15 }
 0x168   : > { %v1000_v40 = vadd.f32 1e-05, %v968_v5  ;;  %v893_v56 = vpop.xlane.xlu1 %892  ;;  %7850 = vmatprep.mubr.msk.bf16.mxu0 %vm670_vm1, %v1160_v29  ;;  %v1131_v26 = vadd.f32 %v10119_v39, %v1095_v7 }
 0x169   : > { %v896_v28 = vpop.xlane.xlu0 %895  ;;  %8664 = vrsqrt.f32 %v999_v3  ;;  %v969_v45 = vmul.f32 0.03125, %v893_v56 }
 0x16a   : > { %v970_v27 = vmul.f32 0.03125, %v896_v28  ;;  %8666 = vrsqrt.f32 %v1000_v40  ;;  %v1161_v30 = vpack.c.bf16 %v1131_v26, %v1130_v8 }
 0x16b   : > { %v8659_v31 = vpop.eup %8658  ;;  %v1001_v36 = vadd.f32 1e-05, %v969_v45 }
 0x16c   : > { %v1002_v22 = vadd.f32 1e-05, %v970_v27  ;;  %v899_v32 = vpop.xlane.xlu1 %898  ;;  %7851 = vmatmul.mubr.msk.bf16.vlgmr.msra.gmra.mrb[0].mxu0 %vm670_vm1, %v1161_v30  ;;  %v1060_v49 = vmul.f32 %v8659_v31, %v9926_v2 }
 0x16d   : > { %v902_v12 = vpop.xlane.xlu0 %901  ;;  %8668 = vrsqrt.f32 %v1001_v36  ;;  %v971_v46 = vmul.f32 0.03125, %v899_v32 }
 0x16e   : > { %v972_v0 = vmul.f32 0.03125, %v902_v12  ;;  %8670 = vrsqrt.f32 %v1002_v22  ;;  %v1096_v6 = vmul.f32 %v10103_v11, %v1060_v49 }
 0x16f   : > { %v8661_v34 = vpop.eup %8660  ;;  %v1003_v37 = vadd.f32 1e-05, %v971_v46 }
 0x170   : > { %v1004_v44 = vadd.f32 1e-05, %v972_v0  ;;  %v8663_v59 = vpop.eup %8662  ;;  %v905_v55 = vpop.xlane.xlu1 %904  ;;  %v1061_v20 = vmul.f32 %v8661_v34, %v9933_v10  ;;  %v1132_v8 = vadd.f32 %v10119_v39, %v1096_v6 }
 0x171   : > { %v908_v58 = vpop.xlane.xlu0 %907  ;;  %8672 = vrsqrt.f32 %v1003_v37  ;;  %v973_v4 = vmul.f32 0.03125, %v905_v55  ;;  %v1062_v5 = vmul.f32 %v8663_v59, %v9940_v19 }
 0x172   : > { %v974_v15 = vmul.f32 0.03125, %v908_v58  ;;  %8674 = vrsqrt.f32 %v1004_v44  ;;  %v1097_v2 = vmul.f32 %v10103_v11, %v1061_v20 }
 0x173   : > { %v8665_v29 = vpop.eup %8664  ;;  %v1005_v7 = vadd.f32 1e-05, %v973_v4  ;;  %v1098_v45 = vmul.f32 %v10103_v11, %v1062_v5 }
 0x174   : > { %v1006_v3 = vadd.f32 1e-05, %v974_v15  ;;  %v8667_v40 = vpop.eup %8666  ;;  %v911_v56 = vpop.xlane.xlu1 %910  ;;  %v1133_v10 = vadd.f32 %v10119_v39, %v1097_v2  ;;  %v1063_v26 = vmul.f32 %v8665_v29, %v9947_v41 }
 0x175   : > { %v914_v28 = vpop.xlane.xlu0 %913  ;;  %8676 = vrsqrt.f32 %v1005_v7  ;;  %v975_v27 = vmul.f32 0.03125, %v911_v56  ;;  %v1064_v36 = vmul.f32 %v8667_v40, %v9955_v35  ;;  %v1134_v41 = vadd.f32 %v10119_v39, %v1098_v45 }
 0x176   : > { %v976_v19 = vmul.f32 0.03125, %v914_v28  ;;  %8678 = vrsqrt.f32 %v1006_v3  ;;  %v1162_v30 = vpack.c.bf16 %v1133_v10, %v1132_v8  ;;  %v1099_v31 = vmul.f32 %v10103_v11, %v1063_v26 }
 0x177   : > { %v8669_v22 = vpop.eup %8668  ;;  %v1007_v32 = vadd.f32 1e-05, %v975_v27  ;;  %v1100_v44 = vmul.f32 %v10103_v11, %v1064_v36 }
 0x178   : > { %v1008_v12 = vadd.f32 1e-05, %v976_v19  ;;  %v8671_v49 = vpop.eup %8670  ;;  %v917_v46 = vpop.xlane.xlu1 %916  ;;  %7854 = vmatprep.mubr.msk.bf16.mxu0 %vm670_vm1, %v1162_v30  ;;  %v1135_v34 = vadd.f32 %v10119_v39, %v1099_v31  ;;  %v1065_v37 = vmul.f32 %v8669_v22, %v9960_v43 }
 0x179   : > { %v920_v0 = vpop.xlane.xlu0 %919  ;;  %8680 = vrsqrt.f32 %v1007_v32  ;;  %v977_v59 = vmul.f32 0.03125, %v917_v46  ;;  %v1066_v35 = vmul.f32 %v8671_v49, %v9967_v50  ;;  %v1136_v43 = vadd.f32 %v10119_v39, %v1100_v44 }
 0x17a   : > { %v978_v55 = vmul.f32 0.03125, %v920_v0  ;;  %8682 = vrsqrt.f32 %v1008_v12  ;;  %v1163_v58 = vpack.c.bf16 %v1135_v34, %v1134_v41  ;;  %v1101_v20 = vmul.f32 %v10103_v11, %v1065_v37 }
 0x17b   : > { %v8673_v6 = vpop.eup %8672  ;;  %v1009_v4 = vadd.f32 1e-05, %v977_v59  ;;  %v1102_v50 = vmul.f32 %v10103_v11, %v1066_v35 }
 0x17c   : > { %v1010_v15 = vadd.f32 1e-05, %v978_v55  ;;  %v8675_v5 = vpop.eup %8674  ;;  %v923_v2 = vpop.xlane.xlu1 %922  ;;  %7855 = vmatmul.mubr.msk.bf16.gmra.mrb[4].mxu0 %vm670_vm1, %v1163_v58  ;;  %v1137_v7 = vadd.f32 %v10119_v39, %v1101_v20  ;;  %v1067_v3 = vmul.f32 %v8673_v6, %v9972_v47 }
 0x17d   : > { %v926_v29 = vpop.xlane.xlu0 %925  ;;  %8684 = vrsqrt.f32 %v1009_v4  ;;  %v979_v40 = vmul.f32 0.03125, %v923_v2  ;;  %v1068_v10 = vmul.f32 %v8675_v5, %v9979_v63  ;;  %v1138_v47 = vadd.f32 %v10119_v39, %v1102_v50 }
 0x17e   : > { %v980_v56 = vmul.f32 0.03125, %v926_v29  ;;  %8686 = vrsqrt.f32 %v1010_v15  ;;  %v1164_v28 = vpack.c.bf16 %v1137_v7, %v1136_v43  ;;  %v1103_v8 = vmul.f32 %v10103_v11, %v1067_v3 }
 0x17f   : > { %v8677_v26 = vpop.eup %8676  ;;  %v1011_v45 = vadd.f32 1e-05, %v979_v40  ;;  %v1104_v32 = vmul.f32 %v10103_v11, %v1068_v10 }
 0x180   : > { %v1012_v27 = vadd.f32 1e-05, %v980_v56  ;;  %v8679_v19 = vpop.eup %8678  ;;  %v929_v30 = vpop.xlane.xlu1 %928  ;;  %7858 = vmatprep.mubr.msk.bf16.mxu0 %vm670_vm1, %v1164_v28  ;;  %v1139_v36 = vadd.f32 %v10119_v39, %v1103_v8  ;;  %v1069_v22 = vmul.f32 %v8677_v26, %v9984_v53 }
 0x181   : > { %v932_v31 = vpop.xlane.xlu0 %931  ;;  %8688 = vrsqrt.f32 %v1011_v45  ;;  %v981_v12 = vmul.f32 0.03125, %v929_v30  ;;  %v1070_v63 = vmul.f32 %v8679_v19, %v9991_v24  ;;  %v1140_v53 = vadd.f32 %v10119_v39, %v1104_v32 }
 0x182   : > { %v982_v49 = vmul.f32 0.03125, %v932_v31  ;;  %8690 = vrsqrt.f32 %v1012_v27  ;;  %v1165_v46 = vpack.c.bf16 %v1139_v36, %v1138_v47  ;;  %v1105_v0 = vmul.f32 %v10103_v11, %v1069_v22 }
 0x183   : > { %v8681_v41 = vpop.eup %8680  ;;  %v1013_v34 = vadd.f32 1e-05, %v981_v12  ;;  %v1106_v24 = vmul.f32 %v10103_v11, %v1070_v63 }
 0x184   : > { %v1014_v37 = vadd.f32 1e-05, %v982_v49  ;;  %v8683_v44 = vpop.eup %8682  ;;  %v935_v59 = vpop.xlane.xlu1 %934  ;;  %7859 = vmatmul.mubr.msk.bf16.gmra.mrb[8].mxu0 %vm670_vm1, %v1165_v46  ;;  %v1141_v35 = vadd.f32 %v10119_v39, %v1105_v0  ;;  %v1071_v58 = vmul.f32 %v8681_v41, %v9996_v57 }
 0x185   : > { %v938_v55 = vpop.xlane.xlu0 %937  ;;  %8692 = vrsqrt.f32 %v1013_v34  ;;  %v983_v20 = vmul.f32 0.03125, %v935_v59  ;;  %v1072_v5 = vmul.f32 %v8683_v44, %v10003_v38  ;;  %v1142_v57 = vadd.f32 %v10119_v39, %v1106_v24 }
 0x186   : > { %v984_v6 = vmul.f32 0.03125, %v938_v55  ;;  %8694 = vrsqrt.f32 %v1014_v37  ;;  %v1166_v4 = vpack.c.bf16 %v1141_v35, %v1140_v53  ;;  %v1107_v15 = vmul.f32 %v10103_v11, %v1071_v58 }
 0x187   : > { %v8685_v2 = vpop.eup %8684  ;;  %v1015_v29 = vadd.f32 1e-05, %v983_v20  ;;  %v1108_v28 = vmul.f32 %v10103_v11, %v1072_v5 }
 0x188   : > { %v1016_v43 = vadd.f32 1e-05, %v984_v6  ;;  %v8687_v7 = vpop.eup %8686  ;;  %v941_v3 = vpop.xlane.xlu1 %940  ;;  %7862 = vmatprep.mubr.msk.bf16.mxu0 %vm670_vm1, %v1166_v4  ;;  %v1143_v40 = vadd.f32 %v10119_v39, %v1107_v15  ;;  %v1073_v56 = vmul.f32 %v8685_v2, %v10008_v61 }
 0x189   : > { %v944_v50 = vpop.xlane.xlu0 %943  ;;  %8696 = vrsqrt.f32 %v1015_v29  ;;  %v985_v8 = vmul.f32 0.03125, %v941_v3  ;;  %v1074_v38 = vmul.f32 %v8687_v7, %v10015_v54  ;;  %v1144_v61 = vadd.f32 %v10119_v39, %v1108_v28 }
 0x18a   : > { %v986_v10 = vmul.f32 0.03125, %v944_v50  ;;  %8698 = vrsqrt.f32 %v1016_v43  ;;  %v1167_v26 = vpack.c.bf16 %v1143_v40, %v1142_v57  ;;  %v1109_v45 = vmul.f32 %v10103_v11, %v1073_v56 }
 0x18b   : > { %v8689_v27 = vpop.eup %8688  ;;  %v1017_v19 = vadd.f32 1e-05, %v985_v8  ;;  %v1110_v32 = vmul.f32 %v10103_v11, %v1074_v38 }
 0x18c   : > { %v1018_v30 = vadd.f32 1e-05, %v986_v10  ;;  %v8691_v31 = vpop.eup %8690  ;;  %v947_v47 = vpop.xlane.xlu1 %946  ;;  %7863 = vmatmul.mubr.msk.bf16.gmra.mrb[12].mxu0 %vm670_vm1, %v1167_v26  ;;  %v1145_v36 = vadd.f32 %v10119_v39, %v1109_v45  ;;  %v1075_v22 = vmul.f32 %v8689_v27, %v10020_v1 }
 0x18d   : > { %8700 = vrsqrt.f32 %v1017_v19  ;;  %v987_v54 = vmul.f32 0.03125, %v947_v47  ;;  %v1076_v12 = vmul.f32 %v8691_v31, %v10028_v14  ;;  %v1146_v34 = vadd.f32 %v10119_v39, %v1110_v32 }
 0x18e   : > { %8702 = vrsqrt.f32 %v1018_v30  ;;  %v1168_v49 = vpack.c.bf16 %v1145_v36, %v1144_v61  ;;  %v1111_v63 = vmul.f32 %v10103_v11, %v1075_v22 }
 0x18f   : > { %v8693_v46 = vpop.eup %8692  ;;  %v1019_v0 = vadd.f32 1e-05, %v987_v54  ;;  %v1112_v44 = vmul.f32 %v10103_v11, %v1076_v12 }
 0x190   : > { %v8695_v41 = vpop.eup %8694  ;;  %7866 = vmatprep.mubr.msk.bf16.mxu0 %vm670_vm1, %v1168_v49  ;;  %v1147_v37 = vadd.f32 %v10119_v39, %v1111_v63  ;;  %v1077_v1 = vmul.f32 %v8693_v46, %v10033_v18 }
 0x191   : > { %8704 = vrsqrt.f32 %v1019_v0  ;;  %v1078_v14 = vmul.f32 %v8695_v41, %v10041_v42  ;;  %v1148_v58 = vadd.f32 %v10119_v39, %v1112_v44 }
 0x192   : > { %v1169_v59 = vpack.c.bf16 %v1147_v37, %v1146_v34  ;;  %v1113_v55 = vmul.f32 %v10103_v11, %v1077_v1 }
 0x193   : > { %v8697_v53 = vpop.eup %8696  ;;  %v1114_v18 = vmul.f32 %v10103_v11, %v1078_v14 }
 0x194   : > { %v8699_v35 = vpop.eup %8698  ;;  %7867 = vmatmul.mubr.msk.bf16.gmra.mrb[16].mxu0 %vm670_vm1, %v1169_v59  ;;  %v1149_v24 = vadd.f32 %v10119_v39, %v1113_v55  ;;  %v1079_v20 = vmul.f32 %v8697_v53, %v10046_v9 }
 0x195   : > { %v1080_v6 = vmul.f32 %v8699_v35, %v10053_v33  ;;  %v1150_v2 = vadd.f32 %v10119_v39, %v1114_v18 }
 0x196   : > { %v1170_v4 = vpack.c.bf16 %v1149_v24, %v1148_v58  ;;  %v1115_v42 = vmul.f32 %v10103_v11, %v1079_v20 }
 0x197   : > { %v8701_v15 = vpop.eup %8700  ;;  %v1116_v7 = vmul.f32 %v10103_v11, %v1080_v6 }
 0x198   : > { %v8703_v5 = vpop.eup %8702  ;;  %7870 = vmatprep.mubr.msk.bf16.mxu0 %vm670_vm1, %v1170_v4  ;;  %v1151_v29 = vadd.f32 %v10119_v39, %v1115_v42  ;;  %v1081_v43 = vmul.f32 %v8701_v15, %v10058_v13 }
 0x199   : > { %v1082_v9 = vmul.f32 %v8703_v5, %v10065_v16  ;;  %v1152_v57 = vadd.f32 %v10119_v39, %v1116_v7 }
 0x19a   : > { %v1171_v3 = vpack.c.bf16 %v1151_v29, %v1150_v2  ;;  %v1117_v33 = vmul.f32 %v10103_v11, %v1081_v43 }
 0x19b   : > { %v8705_v50 = vpop.eup %8704  ;;  %v1118_v28 = vmul.f32 %v10103_v11, %v1082_v9 }
 0x19c   : > { %7871 = vmatmul.mubr.msk.bf16.gmra.mrb[20].mxu0 %vm670_vm1, %v1171_v3  ;;  %v1153_v40 = vadd.f32 %v10119_v39, %v1117_v33  ;;  %v1083_v56 = vmul.f32 %v8705_v50, %v10071_v17 }
 0x19d   : > { %v1154_v16 = vadd.f32 %v10119_v39, %v1118_v28 }
 0x19e   : > { %v1172_v8 = vpack.c.bf16 %v1153_v40, %v1152_v57  ;;  %v1119_v13 = vmul.f32 %v10103_v11, %v1083_v56 }
 0x1a0   : > { %7874 = vmatprep.mubr.msk.bf16.mxu0 %vm670_vm1, %v1172_v8  ;;  %v1155_v10 = vadd.f32 %v10119_v39, %v1119_v13 }
 0x1a2   : > { %v1173_v38 = vpack.c.bf16 %v1155_v10, %v1154_v16 }
 0x1a4   : > { %7875 = vmatmul.mubr.msk.bf16.gmra.mrb[24].mxu0 %vm670_vm1, %v1173_v38 }
 0x1e9   : > { %v950_v26 = vpop.xlane.xlu0 %949 }
 0x1ea   : > { %v988_v45 = vmul.f32 0.03125, %v950_v26 }
 0x1ec   : > { %v1020_v27 = vadd.f32 1e-05, %v988_v45 }
 0x1ed   : > { %v953_v19 = vpop.xlane.xlu1 %952  ;;  %v956_v30 = vpop.xlane.xlu0 %955 }
 0x1ee   : > { %8706 = vrsqrt.f32 %v1020_v27  ;;  %v989_v17 = vmul.f32 0.03125, %v953_v19  ;;  %v990_v31 = vmul.f32 0.03125, %v956_v30 }
 0x1f0   : > { %v1021_v47 = vadd.f32 1e-05, %v989_v17  ;;  %v1022_v61 = vadd.f32 1e-05, %v990_v31 }
 0x1f1   : > { %v959_v36 = vpop.xlane.xlu1 %958 }
 0x1f2   : > { %8708 = vrsqrt.f32 %v1021_v47  ;;  %v991_v22 = vmul.f32 0.03125, %v959_v36 }
 0x1f3   : > { %8710 = vrsqrt.f32 %v1022_v61 }
 0x1f4   : > { %v1023_v32 = vadd.f32 1e-05, %v991_v22 }
 0x1f6   : > { %8712 = vrsqrt.f32 %v1023_v32 }
 0x1f8   : > { %v8707_v54 = vpop.eup %8706 }
 0x1f9   : > { %v1084_v12 = vmul.f32 %v8707_v54, %v10087_v48 }
 0x1fb   : > { %v1120_v0 = vmul.f32 %v10103_v11, %v1084_v12 }
 0x1fc   : > { %v8709_v49 = vpop.eup %8708 }
 0x1fd   : > { %v8711_v63 = vpop.eup %8710  ;;  %v1085_v46 = vmul.f32 %v8709_v49, %v10094_v62  ;;  %v1156_v1 = vadd.f32 %v10119_v39, %v1120_v0 }
 0x1fe   : > { %v1086_v41 = vmul.f32 %v8711_v63, %v10097_v52 }
 0x1ff   : > { %v1121_v34 = vmul.f32 %v10103_v11, %v1085_v46 }
 0x200   : > { %v8713_v37 = vpop.eup %8712  ;;  %v1122_v48 = vmul.f32 %v10103_v11, %v1086_v41 }
 0x201   : > { %v1157_v44 = vadd.f32 %v10119_v39, %v1121_v34  ;;  %v1087_v14 = vmul.f32 %v8713_v37, %v10111_v23  ;;  %v10238_v23 = vld [vmem:[%s547_s19] ss:$0 sm:$0xff]  ;;  %s9511_s19 = smov 64  }
 0x202   : > { %v1158_v62 = vadd.f32 %v10119_v39, %v1122_v48 }
 0x203   : > { %v1174_v59 = vpack.c.bf16 %v1157_v44, %v1156_v1  ;;  %v1123_v55 = vmul.f32 %v10103_v11, %v1087_v14 }
 0x205   : > { %7878 = vmatprep.mubr.msk.bf16.mxu0 %vm670_vm1, %v1174_v59  ;;  %v1159_v52 = vadd.f32 %v10119_v39, %v1123_v55 }
 0x207   : > { %v1175_v53 = vpack.c.bf16 %v1159_v52, %v1158_v62 }
 0x209   : > { %7879 = vmatmul.mubr.msk.bf16.gmra.mrb[28].mxu0 %vm670_vm1, %v1175_v53 }
 0x23f   : > { %v7852_v35 = vpop.f32.mrb[0].mxu0 }
 0x240   : > { %v1281_v58 = vpop.f32.mrb[1].mxu0  ;;  %v1290_v11 = vadd.f32 %v7852_v35, %v10238_v23 }
 0x241   : > { %v7853_v24 = vpop.f32.mrb[2].mxu0  ;;  %v1282_v6 = vadd.f32 %v10238_v23, %v1281_v58 }
 0x242   : > { %v1293_v20 = vadd.f32 %v7853_v24, %v10238_v23  ;;  %v1284_v18 = vpop.f32.mrb[3].mxu0 }
 0x243   : > { %v1285_v39 = vadd.f32 %v10238_v23, %v1284_v18 }
 0x244   : > { %v10244_v4 = vpack.c.bf16 %v1293_v20, %v1290_v11 }
 0x245   : > { %v10246_v42 = vpack.c.bf16 %v1285_v39, %v1282_v6 }
 0x246   : > { %13953 = vst [vmem:[#allocation10_spill] sm:$0xff] %v10244_v4  ;;  %1531 = vrot.lane.b32.xlu1 %v10244_v4, %s9510_s15 }
 0x247   : > { %13954 = vst [vmem:[#allocation11_spill] sm:$0xff] %v10246_v42  ;;  %7898 = vmatprep.mubr.msk.bf16.mxu1 %vm1545_vm2, %v10246_v42  ;;  %1529 = vrot.lane.b32.xlu0 %v10246_v42, %s9510_s15 }
 0x24f   : > { %v7856_v15 = vpop.f32.mrb[4].mxu0 }
 0x250   : > { %v1297_v5 = vpop.f32.mrb[5].mxu0  ;;  %v1306_v29 = vadd.f32 %v7856_v15, %v10238_v23 }
 0x251   : > { %v7857_v2 = vpop.f32.mrb[6].mxu0  ;;  %v1298_v9 = vadd.f32 %v10238_v23, %v1297_v5 }
 0x252   : > { %v1309_v43 = vadd.f32 %v7857_v2, %v10238_v23  ;;  %v1300_v7 = vpop.f32.mrb[7].mxu0 }
 0x253   : > { %v1301_v3 = vadd.f32 %v10238_v23, %v1300_v7 }
 0x254   : > { %v10258_v33 = vpack.c.bf16 %v1309_v43, %v1306_v29 }
 0x255   : > { %v10260_v50 = vpack.c.bf16 %v1301_v3, %v1298_v9 }
 0x256   : > { %13955 = vst [vmem:[#allocation12_spill] sm:$0xff] %v10258_v33 }
 0x257   : > { %13956 = vst [vmem:[#allocation13_spill] sm:$0xff] %v10260_v50  ;;  %1533 = vrot.lane.b32.xlu1 %v10260_v50, %s9510_s15  ;;  %v7860_v57 = vpop.f32.mrb[8].mxu0 }
 0x258   : > { %v1313_v40 = vpop.f32.mrb[9].mxu0  ;;  %v1322_v28 = vadd.f32 %v7860_v57, %v10238_v23 }
 0x259   : > { %v7861_v56 = vpop.f32.mrb[10].mxu0  ;;  %v1314_v16 = vadd.f32 %v10238_v23, %v1313_v40 }
 0x25a   : > { %v1325_v8 = vadd.f32 %v7861_v56, %v10238_v23  ;;  %v1316_v13 = vpop.f32.mrb[11].mxu0 }
 0x25b   : > { %v1317_v10 = vadd.f32 %v10238_v23, %v1316_v13  ;;  %1535 = vrot.lane.b32.xlu1 %v10258_v33, %s9510_s15 }
 0x25c   : > { %v10270_v38 = vpack.c.bf16 %v1325_v8, %v1322_v28 }
 0x25d   : > { %v10272_v26 = vpack.c.bf16 %v1317_v10, %v1314_v16 }
 0x25e   : > { %13957 = vst [vmem:[#allocation14_spill] sm:$0xff] %v10270_v38 }
 0x25f   : > { %13958 = vst [vmem:[#allocation15_spill] sm:$0xff] %v10272_v26  ;;  %1537 = vrot.lane.b32.xlu0 %v10272_v26, %s9510_s15  ;;  %v7864_v45 = vpop.f32.mrb[12].mxu0 }
 0x260   : > { %v1329_v27 = vpop.f32.mrb[13].mxu0  ;;  %v1338_v30 = vadd.f32 %v7864_v45, %v10238_v23 }
 0x261   : > { %v7865_v19 = vpop.f32.mrb[14].mxu0  ;;  %v1330_v47 = vadd.f32 %v10238_v23, %v1329_v27 }
 0x262   : > { %v1341_v17 = vadd.f32 %v7865_v19, %v10238_v23  ;;  %v1332_v31 = vpop.f32.mrb[15].mxu0 }
 0x263   : > { %v1333_v61 = vadd.f32 %v10238_v23, %v1332_v31  ;;  %1539 = vrot.lane.b32.xlu0 %v10270_v38, %s9510_s15 }
 0x264   : > { %v10282_v36 = vpack.c.bf16 %v1341_v17, %v1338_v30 }
 0x265   : > { %v10284_v22 = vpack.c.bf16 %v1333_v61, %v1330_v47 }
 0x266   : > { %13959 = vst [vmem:[#allocation16_spill] sm:$0xff] %v10282_v36 }
 0x267   : > { %13960 = vst [vmem:[#allocation17_spill] sm:$0xff] %v10284_v22  ;;  %1541 = vrot.lane.b32.xlu0 %v10284_v22, %s9510_s15  ;;  %v7868_v32 = vpop.f32.mrb[16].mxu0 }
 0x268   : > { %v1345_v54 = vpop.f32.mrb[17].mxu0  ;;  %v1354_v49 = vadd.f32 %v7868_v32, %v10238_v23 }
 0x269   : > { %v7869_v12 = vpop.f32.mrb[18].mxu0  ;;  %v1346_v0 = vadd.f32 %v10238_v23, %v1345_v54 }
 0x26a   : > { %v1357_v63 = vadd.f32 %v7869_v12, %v10238_v23  ;;  %v1348_v46 = vpop.f32.mrb[19].mxu0 }
 0x26b   : > { %v1349_v41 = vadd.f32 %v10238_v23, %v1348_v46  ;;  %1543 = vrot.lane.b32.xlu0 %v10282_v36, %s9510_s15 }
 0x26c   : > { %v10294_v34 = vpack.c.bf16 %v1357_v63, %v1354_v49 }
 0x26d   : > { %v10296_v37 = vpack.c.bf16 %v1349_v41, %v1346_v0 }
 0x26e   : > { %13961 = vst [vmem:[#allocation18_spill] sm:$0xff] %v10294_v34 }
 0x26f   : > { %1699 = vrot.lane.b32.xlu1 %v10296_v37, %s9510_s15  ;;  %v7872_v1 = vpop.f32.mrb[20].mxu0  ;;  %7930 = vmatprep.mubr.msk.bf16.mxu0 %vm1545_vm2, %v10296_v37 }
 0x270   : > { %v1361_v44 = vpop.f32.mrb[21].mxu0  ;;  %v1370_v48 = vadd.f32 %v7872_v1, %v10238_v23 }
 0x271   : > { %v7873_v14 = vpop.f32.mrb[22].mxu0  ;;  %v1362_v62 = vadd.f32 %v10238_v23, %v1361_v44 }
 0x272   : > { %v1373_v59 = vadd.f32 %v7873_v14, %v10238_v23  ;;  %v1364_v55 = vpop.f32.mrb[23].mxu0 }
 0x273   : > { %v1365_v52 = vadd.f32 %v10238_v23, %v1364_v55  ;;  %1701 = vrot.lane.b32.xlu1 %v10294_v34, %s9510_s15 }
 0x274   : > { %v10308_v53 = vpack.c.bf16 %v1373_v59, %v1370_v48 }
 0x275   : > { %v10310_v35 = vpack.c.bf16 %v1365_v52, %v1362_v62 }
 0x276   : > { %13962 = vst [vmem:[#allocation19_spill] sm:$0xff] %v10308_v53 }
 0x277   : > { %13963 = vst [vmem:[#allocation20_spill] sm:$0xff] %v10310_v35  ;;  %1703 = vrot.lane.b32.xlu1 %v10310_v35, %s9510_s15  ;;  %v7876_v58 = vpop.f32.mrb[24].mxu0 }
 0x278   : > { %v1377_v24 = vpop.f32.mrb[25].mxu0  ;;  %v1386_v20 = vadd.f32 %v7876_v58, %v10238_v23 }
 0x279   : > { %v7877_v11 = vpop.f32.mrb[26].mxu0  ;;  %v1378_v39 = vadd.f32 %v10238_v23, %v1377_v24 }
 0x27a   : > { %v1389_v18 = vadd.f32 %v7877_v11, %v10238_v23  ;;  %v1380_v6 = vpop.f32.mrb[27].mxu0 }
 0x27b   : > { %v1381_v15 = vadd.f32 %v10238_v23, %v1380_v6  ;;  %1705 = vrot.lane.b32.xlu1 %v10308_v53, %s9510_s15 }
 0x27c   : > { %v10320_v5 = vpack.c.bf16 %v1389_v18, %v1386_v20 }
 0x27d   : > { %v10322_v2 = vpack.c.bf16 %v1381_v15, %v1378_v39 }
 0x27f   : > { %13964 = vst [vmem:[#allocation21_spill] sm:$0xff] %v10322_v2  ;;  %1709 = vrot.lane.b32.xlu1 %v10320_v5, %s9510_s15  ;;  %1707 = vrot.lane.b32.xlu0 %v10322_v2, %s9510_s15 }
 0x2b8   : > { %v1532_v7 = vpop.permute.xlu1 %1531 }
 0x2b9   : > { %v1530_v29 = vpop.permute.xlu0 %1529  ;;  %v1574_v9 = vsel %vm1545_vm2, %v1532_v7, 0 }
 0x2ba   : > { %8522 = vmatprep.subr.msk.bf16.mxu1 %vm1545_vm2, %v1530_v29  ;;  %v1571_v43 = vsel %vm1545_vm2, %v1530_v29, 0 }
 0x2bb   : > { %7883 = vmatpush3.bf16.xpose.msra.mxu1 %v1571_v43 }
 0x2bc   : > { %8523 = vmatprep.subr.msk.bf16.mxu1 %vm1545_vm2, %v1532_v7 }
 0x2c3   : > { %7885 = vmatpush3.bf16.xpose.msra.mxu1 %v1574_v9 }
 0x2c9   : > { %v1534_v3 = vpop.permute.xlu1 %1533 }
 0x2ca   : > { %8524 = vmatprep.subr.msk.bf16.mxu1 %vm1545_vm2, %v1534_v3  ;;  %v1577_v57 = vsel %vm1545_vm2, %v1534_v3, 0 }
 0x2cb   : > { %7887 = vmatpush3.bf16.xpose.msra.mxu1 %v1577_v57 }
 0x2cd   : > { %v1536_v40 = vpop.permute.xlu1 %1535 }
 0x2ce   : > { %8525 = vmatprep.subr.msk.bf16.mxu1 %vm1545_vm2, %v1536_v40  ;;  %v1580_v56 = vsel %vm1545_vm2, %v1536_v40, 0 }
 0x2d1   : > { %v1538_v28 = vpop.permute.xlu0 %1537 }
 0x2d2   : > { %v1583_v8 = vsel %vm1545_vm2, %v1538_v28, 0 }
 0x2d3   : > { %7889 = vmatpush3.bf16.xpose.msra.mxu1 %v1580_v56 }
 0x2d4   : > { %8526 = vmatprep.subr.msk.bf16.mxu1 %vm1545_vm2, %v1538_v28 }
 0x2d5   : > { %v1540_v13 = vpop.permute.xlu0 %1539 }
 0x2d6   : > { %v1586_v12 = vsel %vm1545_vm2, %v1540_v13, 0 }
 0x2d9   : > { %v1542_v49 = vpop.permute.xlu0 %1541 }
 0x2da   : > { %v1589_v0 = vsel %vm1545_vm2, %v1542_v49, 0 }
 0x2db   : > { %7891 = vmatpush3.bf16.xpose.msra.mxu1 %v1583_v8 }
 0x2dc   : > { %v7880_v16 = vpop.f32.mrb[28].mxu0  ;;  %8527 = vmatprep.subr.msk.bf16.mxu1 %vm1545_vm2, %v1540_v13 }
 0x2dd   : > { %v1393_v10 = vpop.f32.mrb[29].mxu0  ;;  %v1402_v27 = vadd.f32 %v7880_v16, %v10238_v23  ;;  %v1544_v41 = vpop.permute.xlu0 %1543 }
 0x2de   : > { %v7881_v45 = vpop.f32.mrb[30].mxu0  ;;  %v1394_v17 = vadd.f32 %v10238_v23, %v1393_v10  ;;  %v1592_v14 = vsel %vm1545_vm2, %v1544_v41, 0 }
 0x2df   : > { %v1405_v19 = vadd.f32 %v7881_v45, %v10238_v23  ;;  %v1396_v30 = vpop.f32.mrb[31].mxu0 }
 0x2e0   : > { %v1397_v31 = vadd.f32 %v10238_v23, %v1396_v30 }
 0x2e1   : > { %v10343_v47 = vpack.c.bf16 %v1405_v19, %v1402_v27  ;;  %v1700_v61 = vpop.permute.xlu1 %1699 }
 0x2e2   : > { %v10345_v32 = vpack.c.bf16 %v1397_v31, %v1394_v17  ;;  %8530 = vmatprep.subr.msk.bf16.mxu0 %vm1545_vm2, %v1700_v61  ;;  %v1740_v54 = vsel %vm1545_vm2, %v1700_v61, 0 }
 0x2e3   : > { %13965 = vst [vmem:[#allocation22_spill] sm:$0xff] %v10343_v47  ;;  %7915 = vmatpush3.bf16.xpose.msra.mxu0 %v1740_v54  ;;  %1713 = vrot.lane.b32.xlu1 %v10343_v47, %s9510_s15 }
 0x2e4   : > { %7893 = vmatpush3.bf16.xpose.msra.mxu1 %v1586_v12  ;;  %1711 = vrot.lane.b32.xlu0 %v10345_v32, %s9510_s15  ;;  %s9520_s15 = smov 104  }
 0x2e5   : > { %8528 = vmatprep.subr.msk.bf16.mxu1 %vm1545_vm2, %v1542_v49  ;;  %v1702_v23 = vpop.permute.xlu1 %1701 }
 0x2e6   : > { %8531 = vmatprep.subr.msk.bf16.mxu0 %vm1545_vm2, %v1702_v23  ;;  %v1743_v63 = vsel %vm1545_vm2, %v1702_v23, 0 }
 0x2e7   : > { %2168 = vrot.lane.b32.xlu1 %v10260_v50, %s9511_s19 }
 0x2e8   : > { %2164 = vrot.lane.b32.xlu0 %v10246_v42, %s9511_s19 }
 0x2e9   : > { %v1704_v46 = vpop.permute.xlu1 %1703 }
 0x2ea   : > { %v1746_v1 = vsel %vm1545_vm2, %v1704_v46, 0 }
 0x2eb   : > { %7917 = vmatpush3.bf16.xpose.msra.mxu0 %v1743_v63  ;;  %2172 = vrot.lane.b32.xlu1 %v10272_v26, %s9511_s19 }
 0x2ec   : > { %7895 = vmatpush3.bf16.xpose.msra.mxu1 %v1589_v0  ;;  %8532 = vmatprep.subr.msk.bf16.mxu0 %vm1545_vm2, %v1704_v46 }
 0x2ed   : > { %2166 = vrot.lane.b32.xlu0 %v10244_v4, %s9511_s19  ;;  %8529 = vmatprep.subr.msk.bf16.mxu1 %vm1545_vm2, %v1544_v41  ;;  %v1706_v44 = vpop.permute.xlu1 %1705 }
 0x2ee   : > { %v1749_v48 = vsel %vm1545_vm2, %v1706_v44, 0 }
 0x2ef   : > { %2176 = vrot.lane.b32.xlu1 %v10284_v22, %s9511_s19 }
 0x2f1   : > { %2170 = vrot.lane.b32.xlu0 %v10258_v33, %s9511_s19  ;;  %v1708_v59 = vpop.permute.xlu0 %1707  ;;  %v1710_v62 = vpop.permute.xlu1 %1709 }
 0x2f2   : > { %v1752_v55 = vsel %vm1545_vm2, %v1708_v59, 0  ;;  %v1755_v52 = vsel %vm1545_vm2, %v1710_v62, 0 }
 0x2f3   : > { %7919 = vmatpush3.bf16.xpose.msra.mxu0 %v1746_v1  ;;  %2285 = vrot.lane.b32.xlu1 %v10296_v37, %s9511_s19 }
 0x2f4   : > { %7897 = vmatpush3.bf16.xpose.msra.mxu1 %v1592_v14  ;;  %8533 = vmatprep.subr.msk.bf16.mxu0 %vm1545_vm2, %v1706_v44  ;;  %v1427_v44 = vadd.s32 16, %v10084_v60  ;;  %v10493_v14 = vand.u32 127, %v1088_v25  ;;  %v1428_v25 = vadd.s32 24, %v10084_v60 }
 0x2f5   : > { %2174 = vrot.lane.b32.xlu0 %v10270_v38, %s9511_s19 }
 0x2f6   : > { %vm1445_vm3 = vcmp.le.s32.totalorder %v10493_v14, %v1427_v44  ;;  %vm1443_vm5 = vcmp.le.s32.totalorder %v10493_v14, %v10084_v60  ;;  %vm1446_vm6 = vcmp.le.s32.totalorder %v10493_v14, %v1428_v25 }
 0x2f7   : > { %2454 = vrot.lane.b32.xlu1 %v10246_v42, %s9512_s24 }
 0x2f9   : > { %2178 = vrot.lane.b32.xlu0 %v10282_v36, %s9511_s19 }
 0x2fb   : > { %7899 = vmatmul.mubr.msk.bf16.vlgmr.msra.gmra.mrb[0].mxu1 %vm1545_vm2, %v10244_v4  ;;  %7921 = vmatpush3.bf16.xpose.msra.mxu0 %v1749_v48  ;;  %v1426_v48 = vadd.s32 8, %v10084_v60 }
 0x2fc   : > { %2291 = vrot.lane.b32.xlu1 %v10308_v53, %s9511_s19  ;;  %7902 = vmatprep.mubr.msk.bf16.mxu1 %vm1545_vm2, %v10260_v50 }
 0x2fd   : > { %2287 = vrot.lane.b32.xlu0 %v10294_v34, %s9511_s19  ;;  %8534 = vmatprep.subr.msk.bf16.mxu0 %vm1545_vm2, %v1708_v59  ;;  %v9513_v59 = vmov -1e+09   ;;  %vm1444_vm4 = vcmp.le.s32.totalorder %v10493_v14, %v1426_v48 }
 0x300   : > { %2456 = vrot.lane.b32.xlu1 %v10244_v4, %s9512_s24 }
 0x301   : > { %2289 = vrot.lane.b32.xlu0 %v10310_v35, %s9511_s19 }
 0x303   : > { %7903 = vmatmul.mubr.msk.bf16.gmra.mrb[4].mxu1 %vm1545_vm2, %v10258_v33  ;;  %7923 = vmatpush3.bf16.xpose.msra.mxu0 %v1752_v55  ;;  %v10498_v55 = vsel %vm1445_vm3, 0.0, %v9513_v59 }
 0x304   : > { %2293 = vrot.lane.b32.xlu1 %v10322_v2, %s9511_s19  ;;  %7906 = vmatprep.mubr.msk.bf16.mxu1 %vm1545_vm2, %v10272_v26 }
 0x305   : > { %2458 = vrot.lane.b32.xlu0 %v10260_v50, %s9512_s24  ;;  %8535 = vmatprep.subr.msk.bf16.mxu0 %vm1545_vm2, %v1710_v62  ;;  %v10503_v62 = vld [vmem:[%s13744_s1] ss:$0 sm:$0xff] }
 0x308   : > { %2295 = vrot.lane.b32.xlu1 %v10320_v5, %s9511_s19 }
 0x309   : > { %2633 = vrot.lane.b32.xlu0 %v10294_v34, %s9512_s24 }
 0x30b   : > { %7907 = vmatmul.mubr.msk.bf16.gmra.mrb[8].mxu1 %vm1545_vm2, %v10270_v38  ;;  %7925 = vmatpush3.bf16.xpose.msra.mxu0 %v1755_v52  ;;  %v10511_v52 = vadd.f32 %v10503_v62, %v10498_v55 }
 0x30c   : > { %2299 = vrot.lane.b32.xlu1 %v10343_v47, %s9511_s19  ;;  %7910 = vmatprep.mubr.msk.bf16.mxu1 %vm1545_vm2, %v10284_v22 }
 0x30d   : > { %2466 = vrot.lane.b32.xlu0 %v10284_v22, %s9512_s24  ;;  %13967 = vst [vmem:[#allocation24_spill] sm:$0xff] %v10511_v52 }
 0x310   : > { %2460 = vrot.lane.b32.xlu1 %v10258_v33, %s9512_s24 }
 0x311   : > { %2468 = vrot.lane.b32.xlu0 %v10282_v36, %s9512_s24 }
 0x313   : > { %7911 = vmatmul.mubr.msk.bf16.gmra.mrb[12].mxu1 %vm1545_vm2, %v10282_v36 }
 0x314   : > { %2462 = vrot.lane.b32.xlu1 %v10272_v26, %s9512_s24 }
 0x318   : > { %2631 = vrot.lane.b32.xlu1 %v10296_v37, %s9512_s24 }
 0x31c   : > { %2464 = vrot.lane.b32.xlu1 %v10270_v38, %s9512_s24 }
 0x320   : > { %2635 = vrot.lane.b32.xlu1 %v10310_v35, %s9512_s24 }
 0x324   : > { %2637 = vrot.lane.b32.xlu1 %v10308_v53, %s9512_s24 }
 0x328   : > { %2297 = vrot.lane.b32.xlu1 %v10345_v32, %s9511_s19  ;;  %s9521_s19 = smov 40  }
 0x355   : > { %v1714_v58 = vpop.permute.xlu1 %1713 }
 0x356   : > { %v1712_v24 = vpop.permute.xlu0 %1711  ;;  %v1761_v15 = vsel %vm1545_vm2, %v1714_v58, 0 }
 0x357   : > { %8536 = vmatprep.subr.msk.bf16.mxu0 %vm1545_vm2, %v1712_v24  ;;  %v1758_v11 = vsel %vm1545_vm2, %v1712_v24, 0  ;;  %v1432_v24 = vadd.s32 56, %v10084_v60 }
 0x358   : > { %7927 = vmatpush3.bf16.xpose.msra.mxu0 %v1758_v11  ;;  %v10518_v11 = vsel %vm1443_vm5, 0.0, %v9513_v59  ;;  %vm4415_vm5 = vcmask 195712  }
 0x359   : > { %v2169_v20 = vpop.permute.xlu1 %2168  ;;  %8537 = vmatprep.subr.msk.bf16.mxu0 %vm1545_vm2, %v1714_v58  ;;  %v10514_v58 = vsel %vm1444_vm4, 0.0, %v9513_v59  ;;  %vm1450_vm7 = vcmp.le.s32.totalorder %v10493_v14, %v1432_v24 }
 0x35a   : > { %v2165_v18 = vpop.permute.xlu0 %2164 }
 0x35d   : > { %v2173_v6 = vpop.permute.xlu1 %2172 }
 0x35f   : > { %v2167_v39 = vpop.permute.xlu0 %2166 }
 0x360   : > { %7929 = vmatpush3.bf16.xpose.msra.mxu0 %v1761_v15  ;;  %v10531_v15 = vadd.f32 %v10503_v62, %v10518_v11 }
 0x361   : > { %v2177_v29 = vpop.permute.xlu1 %2176  ;;  %7946 = vmatprep.subr.bf16.mxu0 %v2165_v18 }
 0x362   : > { %13969 = vst [vmem:[#allocation26_spill] sm:$0xff] %v10531_v15 }
 0x363   : > { %v2171_v43 = vpop.permute.xlu0 %2170 }
 0x365   : > { %v10442_v7 = vpop.permute.xlu1 %2285 }
 0x367   : > { %v2175_v9 = vpop.permute.xlu0 %2174  ;;  %7931 = vmatmul.mubr.msk.bf16.vlgmr.msra.gmra.mrb[32].mxu0 %vm1545_vm2, %v10294_v34 }
 0x368   : > { %7934 = vmatprep.mubr.msk.bf16.mxu0 %vm1545_vm2, %v10310_v35  ;;  %7947 = vmatpush3.bf16.msra.mxu0 %v2165_v18 }
 0x369   : > { %v2455_v3 = vpop.permute.xlu1 %2454  ;;  %7948 = vmatprep.subr.bf16.mxu0 %v2167_v39 }
 0x36a   : > { %8538 = vmatprep.subr.msk.bf16.mxu1 %vm1545_vm2, %v2455_v3  ;;  %v2495_v57 = vsel %vm1545_vm2, %v2455_v3, 0 }
 0x36b   : > { %v2179_v40 = vpop.permute.xlu0 %2178  ;;  %8011 = vmatpush3.bf16.xpose.msra.mxu1 %v2495_v57 }
 0x36c   : > { %7949 = vmatpush3.bf16.msra.mxu0 %v2167_v39 }
 0x36d   : > { %7950 = vmatprep.subr.bf16.mxu0 %v2169_v20 }
 0x36e   : > { %v10450_v56 = vpop.permute.xlu1 %2291 }
 0x36f   : > { %v10452_v28 = vpop.permute.xlu0 %2287  ;;  %7935 = vmatmul.mubr.msk.bf16.gmra.mrb[36].mxu0 %vm1545_vm2, %v10308_v53 }
 0x370   : > { %7938 = vmatprep.mubr.msk.bf16.mxu0 %vm1545_vm2, %v10322_v2  ;;  %7951 = vmatpush3.bf16.msra.mxu0 %v2169_v20  ;;  %v1431_v20 = vadd.s32 48, %v10084_v60 }
 0x371   : > { %7952 = vmatprep.subr.bf16.mxu0 %v2171_v43 }
 0x372   : > { %v2457_v8 = vpop.permute.xlu1 %2456  ;;  %vm1449_vm8 = vcmp.le.s32.totalorder %v10493_v14, %v1431_v20 }
 0x373   : > { %8539 = vmatprep.subr.msk.bf16.mxu1 %vm1545_vm2, %v2457_v8  ;;  %v10459_v13 = vpop.permute.xlu0 %2289  ;;  %v2498_v16 = vsel %vm1545_vm2, %v2457_v8, 0 }
 0x374   : > { %8013 = vmatpush3.bf16.xpose.msra.mxu1 %v2498_v16  ;;  %7953 = vmatpush3.bf16.msra.mxu0 %v2171_v43  ;;  %v1430_v43 = vadd.s32 40, %v10084_v60  ;;  %v10545_v16 = vsel %vm1450_vm7, 0.0, %v9513_v59  ;;  %vm7015_vm7 = vcmask (!%p7496_p6), 1041409  }
 0x375   : > { %7954 = vmatprep.subr.bf16.mxu0 %v2173_v6 }
 0x376   : > { %v10462_v10 = vpop.permute.xlu1 %2293  ;;  %vm1448_vm9 = vcmp.le.s32.totalorder %v10493_v14, %v1430_v43 }
 0x377   : > { %v2459_v45 = vpop.permute.xlu0 %2458  ;;  %7939 = vmatmul.mubr.msk.bf16.gmra.mrb[40].mxu0 %vm1545_vm2, %v10320_v5 }
 0x378   : > { %8540 = vmatprep.subr.msk.bf16.mxu1 %vm1545_vm2, %v2459_v45  ;;  %7942 = vmatprep.mubr.msk.bf16.mxu0 %vm1545_vm2, %v10345_v32  ;;  %v2501_v19 = vsel %vm1545_vm2, %v2459_v45, 0 }
 0x379   : > { %7955 = vmatpush3.bf16.msra.mxu0 %v2173_v6  ;;  %v10524_v6 = vadd.f32 %v10503_v62, %v10514_v58 }
 0x37a   : > { %v10469_v27 = vpop.permute.xlu1 %2295  ;;  %7956 = vmatprep.subr.bf16.mxu0 %v2175_v9 }
 0x37b   : > { %v10483_v49 = vpop.permute.xlu0 %2633  ;;  %13968 = vst [vmem:[#allocation25_spill] sm:$0xff] %v10524_v6 }
 0x37c   : > { %8015 = vmatpush3.bf16.xpose.msra.mxu1 %v2501_v19  ;;  %13966 = vst [vmem:[#allocation23_spill] sm:$0xff] %v10483_v49 }
 0x37d   : > { %7957 = vmatpush3.bf16.msra.mxu0 %v2175_v9  ;;  %v10536_v9 = vsel %vm1446_vm6, 0.0, %v9513_v59  ;;  %vm5412_vm6 = vcmask 261312  }
 0x37e   : > { %v10472_v30 = vpop.permute.xlu1 %2299  ;;  %7958 = vmatprep.subr.bf16.mxu0 %v2177_v29  ;;  %v10552_v19 = vadd.f32 %v10503_v62, %v10536_v9 }
 0x37f   : > { %7943 = vmatmul.mubr.msk.bf16.gmra.mrb[44].mxu0 %vm1545_vm2, %v10343_v47  ;;  %v2467_v46 = vpop.permute.xlu0 %2466 }
 0x380   : > { %v2513_v0 = vsel %vm1545_vm2, %v2467_v46, 0  ;;  %13970 = vst [vmem:[#allocation27_spill] sm:$0xff] %v10552_v19 }
 0x381   : > { %7959 = vmatpush3.bf16.msra.mxu0 %v2177_v29 }
 0x382   : > { %v2461_v17 = vpop.permute.xlu1 %2460  ;;  %7960 = vmatprep.subr.bf16.mxu0 %v2179_v40 }
 0x383   : > { %8541 = vmatprep.subr.msk.bf16.mxu1 %vm1545_vm2, %v2461_v17  ;;  %v2504_v31 = vsel %vm1545_vm2, %v2461_v17, 0  ;;  %v2469_v41 = vpop.permute.xlu0 %2468  ;;  %v1436_v17 = vadd.s32 88, %v10084_v60 }
 0x384   : > { %8017 = vmatpush3.bf16.xpose.msra.mxu1 %v2504_v31  ;;  %v2516_v1 = vsel %vm1545_vm2, %v2469_v41, 0  ;;  %v10558_v31 = vsel %vm1449_vm8, 0.0, %v9513_v59  ;;  %vm7018_vm8 = vcmask (!%p7496_p6), 254976  }
 0x385   : > { %7961 = vmatpush3.bf16.msra.mxu0 %v2179_v40  ;;  %v1429_v40 = vadd.s32 32, %v10084_v60  ;;  %vm1454_vm11 = vcmp.le.s32.totalorder %v10493_v14, %v1436_v17 }
 0x386   : > { %v2463_v61 = vpop.permute.xlu1 %2462  ;;  %7978 = vmatprep.subr.bf16.mxu0 %v10442_v7 }
 0x387   : > { %8542 = vmatprep.subr.msk.bf16.mxu1 %vm1545_vm2, %v2463_v61  ;;  %v2507_v12 = vsel %vm1545_vm2, %v2463_v61, 0  ;;  %vm1447_vm10 = vcmp.le.s32.totalorder %v10493_v14, %v1429_v40  ;;  %v10564_v61 = vadd.f32 %v10503_v62, %v10545_v16 }
 0x388   : > { %v10580_v44 = vsel %vm1447_vm10, 0.0, %v9513_v59  ;;  %vm7160_vm10 = vcmask (!%p7496_p6), 122880  }
 0x389   : > { %13971 = vst [vmem:[#allocation28_spill] sm:$0xff] %v10564_v61 }
 0x38a   : > { %v10480_v54 = vpop.permute.xlu1 %2631 }
 0x38c   : > { %8019 = vmatpush3.bf16.xpose.msra.mxu1 %v2507_v12  ;;  %v1435_v12 = vadd.s32 80, %v10084_v60 }
 0x38e   : > { %v2465_v23 = vpop.permute.xlu1 %2464  ;;  %vm1453_vm12 = vcmp.le.s32.totalorder %v10493_v14, %v1435_v12 }
 0x38f   : > { %8543 = vmatprep.subr.msk.bf16.mxu1 %vm1545_vm2, %v2465_v23  ;;  %v2510_v63 = vsel %vm1545_vm2, %v2465_v23, 0  ;;  %v10606_v40 = vsel %vm1453_vm12, 0.0, %v9513_v59 }
 0x394   : > { %8021 = vmatpush3.bf16.xpose.msra.mxu1 %v2510_v63  ;;  %v10568_v63 = vsel %vm1448_vm9, 0.0, %v9513_v59  ;;  %vm9526_vm9 = vmmov (!%p7496_p6), 0  }
 0x395   : > { %8544 = vmatprep.subr.msk.bf16.mxu1 %vm1545_vm2, %v2467_v46  ;;  %v10587_v24 = vadd.f32 %v10503_v62, %v10568_v63 }
 0x397   : > { %13973 = vst [vmem:[#allocation30_spill] sm:$0xff] %v10587_v24 }
 0x39c   : > { %8023 = vmatpush3.bf16.xpose.msra.mxu1 %v2513_v0  ;;  %v10575_v0 = vadd.f32 %v10503_v62, %v10558_v31 }
 0x39d   : > { %8545 = vmatprep.subr.msk.bf16.mxu1 %vm1545_vm2, %v2469_v41 }
 0x39e   : > { %13972 = vst [vmem:[#allocation29_spill] sm:$0xff] %v10575_v0 }
 0x3a4   : > { %8025 = vmatpush3.bf16.xpose.msra.mxu1 %v2516_v1  ;;  %v1434_v1 = vadd.s32 72, %v10084_v60 }
 0x3a6   : > { %vm1452_vm13 = vcmp.le.s32.totalorder %v10493_v14, %v1434_v1 }
 0x3a7   : > { %v10619_v1 = vsel %vm1452_vm13, 0.0, %v9513_v59 }
 0x3ce   : > { %v7900_v18 = vpop.f32.mrb[0].mxu1 }
 0x3cf   : > { %v10527_v39 = vadd.f32 %v7900_v18, %v10511_v52  ;;  %v1628_v29 = vpop.f32.mrb[1].mxu1  ;;  %v1433_v18 = vadd.s32 64, %v10084_v60 }
 0x3d0   : > { %v7901_v3 = vpop.f32.mrb[2].mxu1  ;;  %v10548_v45 = vadd.f32 %v1628_v29, %v10531_v15  ;;  %v10593_v29 = vsel %vm1454_vm11, 0.0, %v9513_v59 }
 0x3d1   : > { %1864 = vmax.xlane.f32.xlu0 %v10527_v39  ;;  %v1631_v57 = vpop.f32.mrb[3].mxu1  ;;  %v10571_v46 = vadd.f32 %v7901_v3, %v10552_v19  ;;  %v10600_v3 = vadd.f32 %v10503_v62, %v10580_v44  ;;  %vm1451_vm14 = vcmp.le.s32.totalorder %v10493_v14, %v1433_v18  ;;  %v10615_v12 = vadd.f32 %v10503_v62, %v10593_v29 }
 0x3d2   : > { %v10542_v8 = vadd.f32 %v1631_v57, %v10524_v6  ;;  %v1440_v57 = vadd.s32 120, %v10084_v60  ;;  %v1438_v18 = vadd.s32 104, %v10084_v60 }
 0x3d3   : > { %13974 = vst [vmem:[#allocation31_spill] sm:$0xff] %v10600_v3  ;;  %13975 = vst [vmem:[#allocation32_spill] sm:$0xff] %v10615_v12 }
 0x3d4   : > { %1862 = vmax.xlane.f32.xlu1 %v10542_v8  ;;  %vm1458_vm15 = vcmp.le.s32.totalorder %v10493_v14, %v1440_v57  ;;  %v1437_v57 = vadd.s32 96, %v10084_v60  ;;  %vm1456_vm3 = vcmp.le.s32.totalorder %v10493_v14, %v1438_v18 }
 0x3d5   : > { %1860 = vmax.xlane.f32.xlu0 %v10548_v45  ;;  %v10645_v52 = vsel %vm1458_vm15, 0.0, %v9513_v59 }
 0x3d6   : > { %v7904_v23 = vpop.f32.mrb[4].mxu1  ;;  %vm1455_vm4 = vcmp.le.s32.totalorder %v10493_v14, %v1437_v57 }
 0x3d7   : > { %v1644_v41 = vpop.f32.mrb[5].mxu1  ;;  %v10596_v43 = vadd.f32 %v7904_v23, %v10575_v0  ;;  %v1439_v23 = vadd.s32 112, %v10084_v60 }
 0x3d8   : > { %v7905_v48 = vpop.f32.mrb[6].mxu1  ;;  %v10622_v21 = vadd.f32 %v1644_v41, %v10600_v3  ;;  %v10639_v41 = vadd.f32 %v10503_v62, %v10619_v1 }
 0x3d9   : > { %v10583_v25 = vadd.f32 %v7905_v48, %v10564_v61  ;;  %v1647_v20 = vpop.f32.mrb[7].mxu1  ;;  %1866 = vmax.xlane.f32.xlu0 %v10571_v46  ;;  %v10632_v61 = vsel %vm1451_vm14, 0.0, %v9513_v59  ;;  %vm1457_vm0 = vcmp.le.s32.totalorder %v10493_v14, %v1439_v23  ;;  %v10680_v14 = vsel %vm1455_vm4, 0.0, %v9513_v59 }
 0x3da   : > { %v10609_v17 = vadd.f32 %v1647_v20, %v10587_v24  ;;  %v10626_v20 = vadd.f32 %v10503_v62, %v10606_v40  ;;  %13977 = vst [vmem:[#allocation34_spill] sm:$0xff] %v10639_v41  ;;  %v10695_v49 = vadd.f32 %v10503_v62, %v10680_v14 }
 0x3db   : > { %1874 = vmax.xlane.f32.xlu1 %v10583_v25 }
 0x3dc   : > { %13976 = vst [vmem:[#allocation33_spill] sm:$0xff] %v10626_v20  ;;  %13982 = vst [vmem:[#allocation39_spill] sm:$0xff] %v10695_v49 }
 0x3dd   : > { %1872 = vmax.xlane.f32.xlu0 %v10596_v43 }
 0x3de   : > { %v7908_v48 = vpop.f32.mrb[8].mxu1 }
 0x3df   : > { %v1660_v51 = vpop.f32.mrb[9].mxu1  ;;  %1870 = vmax.xlane.f32.xlu1 %v10609_v17  ;;  %v10648_v19 = vadd.f32 %v7908_v48, %v10626_v20  ;;  %v10666_v48 = vadd.f32 %v10503_v62, %v10645_v52  ;;  %v10669_v20 = vsel %vm1456_vm3, 0.0, %v9513_v59 }
 0x3e0   : > { %v7909_v0 = vpop.f32.mrb[10].mxu1  ;;  %v10687_v15 = vadd.f32 %v10503_v62, %v10669_v20 }
 0x3e1   : > { %v10635_v24 = vadd.f32 %v7909_v0, %v10615_v12  ;;  %v1663_v3 = vpop.f32.mrb[11].mxu1  ;;  %1868 = vmax.xlane.f32.xlu0 %v10622_v21  ;;  %v10652_v0 = vadd.f32 %v10503_v62, %v10632_v61  ;;  %v10657_v12 = vsel %vm1457_vm0, 0.0, %v9513_v59  ;;  %13979 = vst [vmem:[#allocation36_spill] sm:$0xff] %v10666_v48 }
 0x3e2   : > { %v10660_v23 = vadd.f32 %v1663_v3, %v10639_v41  ;;  %v10676_v6 = vadd.f32 %v10503_v62, %v10657_v12  ;;  %13981 = vst [vmem:[#allocation38_spill] sm:$0xff] %v10687_v15 }
 0x3e3   : > { %13978 = vst [vmem:[#allocation35_spill] sm:$0xff] %v10652_v0  ;;  %1882 = vmax.xlane.f32.xlu1 %v10635_v24  ;;  %v10672_v18 = vadd.f32 %v1660_v51, %v10652_v0 }
 0x3e4   : > { %13980 = vst [vmem:[#allocation37_spill] sm:$0xff] %v10676_v6 }
 0x3e5   : > { %1880 = vmax.xlane.f32.xlu0 %v10648_v19 }
 0x3e6   : > { %v7912_v60 = vpop.f32.mrb[12].mxu1 }
 0x3e7   : > { %v1676_v3 = vpop.f32.mrb[13].mxu1  ;;  %1878 = vmax.xlane.f32.xlu1 %v10660_v23  ;;  %v10691_v0 = vadd.f32 %v7912_v60, %v10676_v6  ;;  %v10714_v60 = vld [vmem:[%s13744_s1 + $0x1] ss:$0 sm:$0xff] }
 0x3e8   : > { %v7913_v57 = vpop.f32.mrb[14].mxu1  ;;  %v10718_v62 = vadd.f32 %v10714_v60, %v10498_v55  ;;  %v10737_v55 = vadd.f32 %v10714_v60, %v10514_v58  ;;  %v10799_v35 = vadd.f32 %v10714_v60, %v10657_v12 }
 0x3e9   : > { %v10683_v41 = vadd.f32 %v7913_v57, %v10666_v48  ;;  %v1679_v51 = vpop.f32.mrb[15].mxu1  ;;  %1876 = vmax.xlane.f32.xlu0 %v10672_v18  ;;  %v10703_v57 = vadd.f32 %v1676_v3, %v10695_v49  ;;  %v10722_v3 = vadd.f32 %v10714_v60, %v10536_v9 }
 0x3ea   : > { %v10699_v59 = vadd.f32 %v1679_v51, %v10687_v15  ;;  %13983 = vst [vmem:[#allocation40_spill] sm:$0xff] %v10718_v62  ;;  %13986 = vst [vmem:[#allocation43_spill] sm:$0xff] %v10737_v55 }
 0x3eb   : > { %1890 = vmax.xlane.f32.xlu1 %v10683_v41  ;;  %13984 = vst [vmem:[#allocation41_spill] sm:$0xff] %v10722_v3  ;;  %13993 = vst [vmem:[#allocation50_spill] sm:$0xff] %v10799_v35 }
 0x3ed   : > { %1888 = vmax.xlane.f32.xlu0 %v10691_v0 }
 0x3ef   : > { %1886 = vmax.xlane.f32.xlu1 %v10699_v59 }
 0x3f1   : > { %1884 = vmax.xlane.f32.xlu0 %v10703_v57 }
 0x400   : > { %2440 = vrot.lane.b32.xlu1 %v10244_v4, %s9514_s22  ;;  %v10729_v4 = vadd.f32 %v10714_v60, %v10518_v11 }
 0x402   : > { %13985 = vst [vmem:[#allocation42_spill] sm:$0xff] %v10729_v4 }
 0x404   : > { %2639 = vrot.lane.b32.xlu1 %v10322_v2, %s9512_s24 }
 0x43a   : > { %v7932_v51 = vpop.f32.mrb[32].mxu0 }
 0x43b   : > { %v10725_v48 = vadd.f32 %v7932_v51, %v10718_v62  ;;  %v1797_v6 = vpop.f32.mrb[33].mxu0 }
 0x43c   : > { %v7933_v15 = vpop.f32.mrb[34].mxu0  ;;  %v10740_v53 = vadd.f32 %v1797_v6, %v10729_v4 }
 0x43d   : > { %v10732_v49 = vadd.f32 %v7933_v15, %v10722_v3  ;;  %1896 = vmax.xlane.f32.xlu0 %v10725_v48  ;;  %v1800_v9 = vpop.f32.mrb[35].mxu0  ;;  %v10749_v15 = vadd.f32 %v10714_v60, %v10545_v16 }
 0x43e   : > { %v10744_v11 = vadd.f32 %v1800_v9, %v10737_v55  ;;  %v10761_v9 = vadd.f32 %v10714_v60, %v10568_v63  ;;  %v10769_v55 = vadd.f32 %v10714_v60, %v10606_v40  ;;  %v10779_v63 = vadd.f32 %v10714_v60, %v10593_v29 }
 0x43f   : > { %1898 = vmax.xlane.f32.xlu1 %v10732_v49  ;;  %13987 = vst [vmem:[#allocation44_spill] sm:$0xff] %v10749_v15  ;;  %v10787_v40 = vadd.f32 %v10714_v60, %v10619_v1 }
 0x440   : > { %13988 = vst [vmem:[#allocation45_spill] sm:$0xff] %v10761_v9  ;;  %13989 = vst [vmem:[#allocation46_spill] sm:$0xff] %v10769_v55 }
 0x441   : > { %1892 = vmax.xlane.f32.xlu0 %v10740_v53  ;;  %13990 = vst [vmem:[#allocation47_spill] sm:$0xff] %v10779_v63  ;;  %13991 = vst [vmem:[#allocation48_spill] sm:$0xff] %v10787_v40 }
 0x442   : > { %v10751_v51 = vpop.f32.mrb[36].mxu0 }
 0x443   : > { %v10753_v62 = vpop.f32.mrb[37].mxu0  ;;  %1894 = vmax.xlane.f32.xlu1 %v10744_v11 }
 0x444   : > { %v7937_v58 = vpop.f32.mrb[38].mxu0 }
 0x445   : > { %v10757_v6 = vadd.f32 %v7937_v58, %v10749_v15  ;;  %v1816_v4 = vpop.f32.mrb[39].mxu0 }
 0x446   : > { %v10765_v16 = vadd.f32 %v1816_v4, %v10761_v9 }
 0x447   : > { %1906 = vmax.xlane.f32.xlu1 %v10757_v6 }
 0x44a   : > { %v7940_v3 = vpop.f32.mrb[40].mxu0 }
 0x44b   : > { %v10771_v36 = vpop.f32.mrb[41].mxu0  ;;  %1902 = vmax.xlane.f32.xlu1 %v10765_v16  ;;  %v10775_v15 = vadd.f32 %v7940_v3, %v10769_v55  ;;  %v10790_v3 = vpop.permute.xlu1 %2635 }
 0x44c   : > { %v7941_v58 = vpop.f32.mrb[42].mxu0  ;;  %13992 = vst [vmem:[#allocation49_spill] sm:$0xff] %v10790_v3 }
 0x44d   : > { %v1832_v2 = vpop.f32.mrb[43].mxu0  ;;  %v10783_v4 = vadd.f32 %v7941_v58, %v10779_v63  ;;  %v10811_v63 = vadd.f32 %v10714_v60, %v10680_v14 }
 0x44e   : > { %v10795_v29 = vadd.f32 %v1832_v2, %v10787_v40 }
 0x44f   : > { %1912 = vmax.xlane.f32.xlu1 %v10775_v15  ;;  %13994 = vst [vmem:[#allocation51_spill] sm:$0xff] %v10811_v63  ;;  %v10813_v2 = vpop.permute.xlu1 %2637 }
 0x450   : > { %13995 = vst [vmem:[#allocation52_spill] sm:$0xff] %v10813_v2 }
 0x452   : > { %v7944_v9 = vpop.f32.mrb[44].mxu0 }
 0x453   : > { %v1845_v38 = vpop.f32.mrb[45].mxu0  ;;  %1914 = vmax.xlane.f32.xlu1 %v10783_v4  ;;  %v10807_v1 = vadd.f32 %v7944_v9, %v10799_v35 }
 0x454   : > { %v10792_v55 = vpop.f32.mrb[46].mxu0  ;;  %v10817_v12 = vadd.f32 %v1845_v38, %v10811_v63 }
 0x455   : > { %v10801_v58 = vpop.f32.mrb[47].mxu0 }
 0x457   : > { %1910 = vmax.xlane.f32.xlu1 %v10795_v29  ;;  %2438 = vrot.lane.b32.xlu0 %v10246_v42, %s9514_s22  ;;  %v10821_v42 = vpop.permute.xlu1 %2297 }
 0x45b   : > { %1920 = vmax.xlane.f32.xlu1 %v10807_v1 }
 0x45e   : > { %v1865_v40 = vpop.xlane.xlu0 %1864 }
 0x45f   : > { %v1926_v3 = vsub.f32 %v10527_v39, %v1865_v40  ;;  %1916 = vmax.xlane.f32.xlu1 %v10817_v12 }
 0x461   : > { %v1960_v9 = vmul.f32 1.442695, %v1926_v3  ;;  %v1863_v33 = vpop.xlane.xlu1 %1862 }
 0x462   : > { %v1861_v35 = vpop.xlane.xlu0 %1860  ;;  %v1925_v34 = vsub.f32 %v10542_v8, %v1863_v33  ;;  %v10833_v33 = vadd.f32 %v10714_v60, %v10558_v31 }
 0x463   : > { %8714 = vpow2.f32 %v1960_v9  ;;  %v1924_v14 = vsub.f32 %v10548_v45, %v1861_v35 }
 0x464   : > { %v1958_v40 = vmul.f32 1.442695, %v1925_v34  ;;  %13996 = vst [vmem:[#allocation53_spill] sm:$0xff] %v10833_v33 }
 0x465   : > { %v1956_v22 = vmul.f32 1.442695, %v1924_v14 }
 0x466   : > { %v1867_v2 = vpop.xlane.xlu0 %1866 }
 0x467   : > { %8716 = vpow2.f32 %v1956_v22  ;;  %v1927_v38 = vsub.f32 %v10571_v46, %v1867_v2 }
 0x468   : > { %v1875_v26 = vpop.xlane.xlu1 %1874 }
 0x469   : > { %v1962_v63 = vmul.f32 1.442695, %v1927_v38  ;;  %v1931_v31 = vsub.f32 %v10583_v25, %v1875_v26 }
 0x46a   : > { %v1873_v39 = vpop.xlane.xlu0 %1872 }
 0x46b   : > { %8718 = vpow2.f32 %v1962_v63  ;;  %v1930_v47 = vsub.f32 %v10596_v43, %v1873_v39  ;;  %v10841_v63 = vadd.f32 %v10751_v51, %v10833_v33  ;;  %v1970_v26 = vmul.f32 1.442695, %v1931_v31 }
 0x46c   : > { %8720 = vpow2.f32 %v1958_v40  ;;  %v1871_v22 = vpop.xlane.xlu1 %1870 }
 0x46d   : > { %v10827_v3 = vpop.eup %8714  ;;  %v1968_v45 = vmul.f32 1.442695, %v1930_v47  ;;  %v1929_v25 = vsub.f32 %v10609_v17, %v1871_v22 }
 0x46e   : > { %2024 = vadd.xlane.f32.xlu1 %v10827_v3  ;;  %v1869_v35 = vpop.xlane.xlu0 %1868 }
 0x46f   : > { %v1928_v9 = vsub.f32 %v10622_v21, %v1869_v35  ;;  %8722 = vpow2.f32 %v1968_v45  ;;  %v10845_v21 = vadd.f32 %v10714_v60, %v10580_v44  ;;  %v10859_v44 = vadd.f32 %v10714_v60, %v10632_v61 }
 0x470   : > { %v1883_v2 = vpop.xlane.xlu1 %1882  ;;  %v10873_v61 = vadd.f32 %v10714_v60, %v10645_v52  ;;  %v1966_v17 = vmul.f32 1.442695, %v1929_v25 }
 0x471   : > { %v10835_v8 = vpop.eup %8716  ;;  %v1964_v46 = vmul.f32 1.442695, %v1928_v9  ;;  %13997 = vst [vmem:[#allocation54_spill] sm:$0xff] %v10845_v21  ;;  %v10855_v51 = vadd.f32 %v10753_v62, %v10845_v21  ;;  %13998 = vst [vmem:[#allocation55_spill] sm:$0xff] %v10859_v44  ;;  %v10869_v62 = vadd.f32 %v10771_v36, %v10859_v44  ;;  %v1935_v22 = vsub.f32 %v10635_v24, %v1883_v2 }
 0x472   : > { %2020 = vadd.xlane.f32.xlu1 %v10835_v8  ;;  %v1881_v34 = vpop.xlane.xlu0 %1880  ;;  %13999 = vst [vmem:[#allocation56_spill] sm:$0xff] %v10873_v61  ;;  %v10883_v52 = vadd.f32 %v10792_v55, %v10873_v61 }
 0x473   : > { %v1934_v43 = vsub.f32 %v10648_v19, %v1881_v34  ;;  %8724 = vpow2.f32 %v1964_v46  ;;  %v10887_v46 = vadd.f32 %v10714_v60, %v10669_v20  ;;  %v1978_v24 = vmul.f32 1.442695, %v1935_v22 }
 0x474   : > { %v1879_v45 = vpop.xlane.xlu1 %1878 }
 0x475   : > { %v10847_v47 = vpop.eup %8718  ;;  %v1976_v19 = vmul.f32 1.442695, %v1934_v43  ;;  %14000 = vst [vmem:[#allocation57_spill] sm:$0xff] %v10887_v46  ;;  %v1933_v2 = vsub.f32 %v10660_v23, %v1879_v45  ;;  %v10896_v55 = vadd.f32 %v10801_v58, %v10887_v46 }
 0x476   : > { %2026 = vadd.xlane.f32.xlu1 %v10847_v47  ;;  %v1877_v14 = vpop.xlane.xlu0 %1876  ;;  %1904 = vmax.xlane.f32.xlu0 %v10841_v63  ;;  %v10861_v39 = vpop.eup %8720 }
 0x477   : > { %v1932_v38 = vsub.f32 %v10672_v18, %v1877_v14  ;;  %8726 = vpow2.f32 %v1976_v19  ;;  %v1974_v20 = vmul.f32 1.442695, %v1933_v2 }
 0x478   : > { %8728 = vpow2.f32 %v1970_v26  ;;  %v1891_v31 = vpop.xlane.xlu1 %1890 }
 0x479   : > { %v1972_v18 = vmul.f32 1.442695, %v1932_v38  ;;  %v10875_v9 = vpop.eup %8722  ;;  %v1939_v60 = vsub.f32 %v10683_v41, %v1891_v31 }
 0x47a   : > { %2022 = vadd.xlane.f32.xlu1 %v10861_v39  ;;  %v1889_v40 = vpop.xlane.xlu0 %1888  ;;  %1900 = vmax.xlane.f32.xlu0 %v10855_v51 }
 0x47b   : > { %v1938_v35 = vsub.f32 %v10691_v0, %v1889_v40  ;;  %8730 = vpow2.f32 %v1972_v18  ;;  %v1986_v58 = vmul.f32 1.442695, %v1939_v60 }
 0x47c   : > { %8732 = vpow2.f32 %v1966_v17  ;;  %v1887_v23 = vpop.xlane.xlu1 %1886 }
 0x47d   : > { %v1984_v0 = vmul.f32 1.442695, %v1938_v35  ;;  %v10889_v43 = vpop.eup %8724  ;;  %v1937_v26 = vsub.f32 %v10699_v59, %v1887_v23 }
 0x47e   : > { %2032 = vadd.xlane.f32.xlu1 %v10875_v9  ;;  %v1885_v34 = vpop.xlane.xlu0 %1884  ;;  %1908 = vmax.xlane.f32.xlu0 %v10869_v62 }
 0x47f   : > { %v1936_v36 = vsub.f32 %v10703_v57, %v1885_v34  ;;  %8734 = vpow2.f32 %v1984_v0  ;;  %v1982_v41 = vmul.f32 1.442695, %v1937_v26 }
 0x480   : > { %8736 = vpow2.f32 %v1978_v24  ;;  %v2441_v22 = vpop.permute.xlu1 %2440 }
 0x481   : > { %v1980_v57 = vmul.f32 1.442695, %v1936_v36  ;;  %v10898_v14 = vpop.eup %8726 }
 0x482   : > { %2028 = vadd.xlane.f32.xlu1 %v10889_v43  ;;  %1922 = vmax.xlane.f32.xlu0 %v10883_v52  ;;  %v10903_v19 = vpop.eup %8728 }
 0x483   : > { %8738 = vpow2.f32 %v1980_v57 }
 0x484   : > { %8740 = vpow2.f32 %v1974_v20  ;;  %v10931_v34 = vpop.permute.xlu1 %2639 }
 0x485   : > { %v10905_v38 = vpop.eup %8730  ;;  %8742 = vpow2.f32 %v1986_v58  ;;  %14001 = vst [vmem:[#allocation58_spill] sm:$0xff] %v10931_v34 }
 0x486   : > { %2040 = vadd.xlane.f32.xlu1 %v10898_v14  ;;  %1918 = vmax.xlane.f32.xlu0 %v10896_v55  ;;  %v10910_v25 = vpop.eup %8732  ;;  %8744 = vpow2.f32 %v1982_v41 }
 0x489   : > { %v10912_v40 = vpop.eup %8734 }
 0x48a   : > { %2036 = vadd.xlane.f32.xlu1 %v10905_v38  ;;  %2034 = vadd.xlane.f32.xlu0 %v10903_v19  ;;  %v10916_v18 = vpop.eup %8736 }
 0x48d   : > { %v10918_v35 = vpop.eup %8738 }
 0x48e   : > { %2048 = vadd.xlane.f32.xlu1 %v10912_v40  ;;  %2030 = vadd.xlane.f32.xlu0 %v10910_v25  ;;  %v10922_v59 = vpop.eup %8740 }
 0x48f   : > { %v10925_v45 = vpop.eup %8742 }
 0x490   : > { %v10928_v17 = vpop.eup %8744 }
 0x492   : > { %2044 = vadd.xlane.f32.xlu1 %v10918_v35  ;;  %2042 = vadd.xlane.f32.xlu0 %v10916_v18 }
 0x496   : > { %2038 = vadd.xlane.f32.xlu0 %v10922_v59 }
 0x49a   : > { %2050 = vadd.xlane.f32.xlu0 %v10925_v45 }
 0x49e   : > { %2046 = vadd.xlane.f32.xlu0 %v10928_v17 }
 0x4ca   : > { %v1897_v0 = vpop.xlane.xlu0 %1896 }
 0x4cb   : > { %v1942_v36 = vsub.f32 %v10725_v48, %v1897_v0 }
 0x4cc   : > { %v1899_v24 = vpop.xlane.xlu1 %1898 }
 0x4cd   : > { %v1992_v31 = vmul.f32 1.442695, %v1942_v36  ;;  %v1943_v57 = vsub.f32 %v10732_v49, %v1899_v24 }
 0x4ce   : > { %v1893_v2 = vpop.xlane.xlu0 %1892 }
 0x4cf   : > { %8746 = vpow2.f32 %v1992_v31  ;;  %v1940_v20 = vsub.f32 %v10740_v53, %v1893_v2  ;;  %v1994_v41 = vmul.f32 1.442695, %v1943_v57 }
 0x4d0   : > { %v1895_v60 = vpop.xlane.xlu1 %1894 }
 0x4d1   : > { %v1988_v23 = vmul.f32 1.442695, %v1940_v20  ;;  %v1941_v58 = vsub.f32 %v10744_v11, %v1895_v60 }
 0x4d2   : > { %v2439_v26 = vpop.permute.xlu0 %2438 }
 0x4d3   : > { %8748 = vpow2.f32 %v1988_v23  ;;  %v1990_v46 = vmul.f32 1.442695, %v1941_v58  ;;  %8026 = vmatprep.mubr.msk.bf16.mxu1 %vm1545_vm2, %v2439_v26 }
 0x4d4   : > { %v1907_v61 = vpop.xlane.xlu1 %1906  ;;  %8027 = vmatmul.mubr.msk.bf16.vlgmr.msra.gmra.mrb[16].mxu1 %vm1545_vm2, %v2441_v22 }
 0x4d5   : > { %8750 = vpow2.f32 %v1990_v46  ;;  %v1947_v33 = vsub.f32 %v10757_v6, %v1907_v61 }
 0x4d6   : > { %8752 = vpow2.f32 %v1994_v41 }
 0x4d8   : > { %v1903_v49 = vpop.xlane.xlu1 %1902 }
 0x4d9   : > { %v10939_v48 = vpop.eup %8746  ;;  %v1945_v44 = vsub.f32 %v10765_v16, %v1903_v49 }
 0x4da   : > { %14002 = vst [vmem:[#allocation59_spill] sm:$0xff] %v10939_v48  ;;  %2056 = vadd.xlane.f32.xlu1 %v10939_v48 }
 0x4dc   : > { %v1913_v0 = vpop.xlane.xlu1 %1912 }
 0x4dd   : > { %v10942_v53 = vpop.eup %8748 }
 0x4de   : > { %2052 = vadd.xlane.f32.xlu0 %v10942_v53 }
 0x4df   : > { %v10945_v11 = vpop.eup %8750 }
 0x4e0   : > { %14003 = vst [vmem:[#allocation60_spill] sm:$0xff] %v10945_v11  ;;  %2054 = vadd.xlane.f32.xlu1 %v10945_v11  ;;  %v10948_v36 = vpop.eup %8752  ;;  %v1915_v46 = vpop.xlane.xlu1 %1914  ;;  %v1998_v11 = vmul.f32 1.442695, %v1945_v44 }
 0x4e1   : > { %14004 = vst [vmem:[#allocation61_spill] sm:$0xff] %v10948_v36 }
 0x4e2   : > { %2058 = vadd.xlane.f32.xlu0 %v10948_v36 }
 0x4e4   : > { %v1911_v22 = vpop.xlane.xlu1 %1910 }
 0x4e5   : > { %v1949_v16 = vsub.f32 %v10795_v29, %v1911_v22 }
 0x4e8   : > { %v1921_v24 = vpop.xlane.xlu1 %1920 }
 0x4ec   : > { %v1917_v31 = vpop.xlane.xlu1 %1916 }
 0x4ed   : > { %v1952_v44 = vsub.f32 %v10817_v12, %v1917_v31 }
 0x4f1   : > { %2643 = vrot.lane.b32.xlu1 %v10345_v32, %s9512_s24 }
 0x4f8   : > { %2641 = vrot.lane.b32.xlu0 %v10320_v5, %s9512_s24 }
 0x4fb   : > { %v2025_v2 = vpop.xlane.xlu1 %2024 }
 0x4ff   : > { %v2021_v57 = vpop.xlane.xlu1 %2020 }
 0x503   : > { %v2027_v20 = vpop.xlane.xlu1 %2026  ;;  %v1905_v60 = vpop.xlane.xlu0 %1904 }
 0x504   : > { %v1946_v23 = vsub.f32 %v10841_v63, %v1905_v60  ;;  %8754 = vrcp.f32 %v2027_v20  ;;  %v1950_v63 = vsub.f32 %v10775_v15, %v1913_v0  ;;  %v1951_v60 = vsub.f32 %v10783_v4, %v1915_v46 }
 0x505   : > { %8756 = vrcp.f32 %v2021_v57  ;;  %v2002_v57 = vmul.f32 1.442695, %v1947_v33 }
 0x506   : > { %v2000_v58 = vmul.f32 1.442695, %v1946_v23  ;;  %8758 = vrcp.f32 %v2025_v2  ;;  %v2008_v6 = vmul.f32 1.442695, %v1950_v63  ;;  %v2010_v33 = vmul.f32 1.442695, %v1951_v60 }
 0x507   : > { %v2023_v26 = vpop.xlane.xlu1 %2022  ;;  %v1901_v41 = vpop.xlane.xlu0 %1900 }
 0x508   : > { %v1944_v21 = vsub.f32 %v10855_v51, %v1901_v41  ;;  %8760 = vrcp.f32 %v2023_v26 }
 0x509   : > { %8762 = vpow2.f32 %v2000_v58 }
 0x50a   : > { %v1996_v34 = vmul.f32 1.442695, %v1944_v21  ;;  %v1954_v21 = vsub.f32 %v10807_v1, %v1921_v24  ;;  %v2012_v24 = vmul.f32 1.442695, %v1952_v44 }
 0x50b   : > { %v2033_v36 = vpop.xlane.xlu1 %2032  ;;  %v1909_v48 = vpop.xlane.xlu0 %1908 }
 0x50c   : > { %8764 = vpow2.f32 %v1996_v34  ;;  %v1948_v20 = vsub.f32 %v10869_v62, %v1909_v48  ;;  %v2006_v62 = vmul.f32 1.442695, %v1949_v16  ;;  %v2016_v29 = vmul.f32 1.442695, %v1954_v21 }
 0x50d   : > { %8766 = vpow2.f32 %v1998_v11 }
 0x50e   : > { %v8755_v2 = vpop.eup %8754  ;;  %8768 = vpow2.f32 %v2002_v57  ;;  %v2004_v15 = vmul.f32 1.442695, %v1948_v20 }
 0x50f   : > { %v2029_v49 = vpop.xlane.xlu1 %2028  ;;  %v1923_v51 = vpop.xlane.xlu0 %1922  ;;  %v2119_v4 = vmul.f32 %v8755_v2, %v10847_v47  ;;  %8770 = vpow2.f32 %v2008_v6 }
 0x510   : > { %v8757_v61 = vpop.eup %8756  ;;  %8772 = vpow2.f32 %v2004_v15  ;;  %v1955_v47 = vsub.f32 %v10883_v52, %v1923_v51 }
 0x511   : > { %v8759_v34 = vpop.eup %8758  ;;  %v2116_v11 = vmul.f32 %v8757_v61, %v10835_v8  ;;  %8774 = vpow2.f32 %v2010_v33 }
 0x512   : > { %v8761_v0 = vpop.eup %8760  ;;  %v2118_v12 = vmul.f32 %v8759_v34, %v10827_v3  ;;  %8776 = vpow2.f32 %v2006_v62  ;;  %v2018_v52 = vmul.f32 1.442695, %v1955_v47 }
 0x513   : > { %v1919_v48 = vpop.xlane.xlu0 %1918  ;;  %v2041_v46 = vpop.xlane.xlu1 %2040  ;;  %v2117_v22 = vmul.f32 %v8761_v0, %v10861_v39  ;;  %8778 = vpow2.f32 %v2016_v29 }
 0x514   : > { %v10968_v1 = vpop.eup %8762  ;;  %v2149_v58 = vpack.c.bf16 %v2119_v4, %v2118_v12  ;;  %v1953_v39 = vsub.f32 %v10896_v55, %v1919_v48  ;;  %8780 = vpow2.f32 %v2012_v24 }
 0x515   : > { %v2148_v23 = vpack.c.bf16 %v2117_v22, %v2116_v11 }
 0x516   : > { %v10971_v31 = vpop.eup %8764  ;;  %v2014_v55 = vmul.f32 1.442695, %v1953_v39  ;;  %v14010_v39 = vld [vmem:[#allocation20_spill] sm:$0xff] }
 0x517   : > { %2064 = vadd.xlane.f32.xlu0 %v10968_v1  ;;  %2060 = vadd.xlane.f32.xlu1 %v10971_v31  ;;  %v2035_v8 = vpop.xlane.xlu0 %2034  ;;  %v10977_v3 = vpop.eup %8766 }
 0x518   : > { %7962 = vmatprep.mubr.bf16.mxu0 %v2148_v23  ;;  %v2037_v26 = vpop.xlane.xlu1 %2036  ;;  %8782 = vrcp.f32 %v2035_v8  ;;  %v10980_v41 = vpop.eup %8768 }
 0x519   : > { %7963 = vmatmul.mubr.bf16.vlgmr.msra.gmra.mrb[48].mxu0 %v2149_v58  ;;  %8784 = vrcp.f32 %v2029_v49  ;;  %v10985_v57 = vpop.eup %8770 }
 0x51a   : > { %7979 = vmatpush3.bf16.msra.mxu0 %v10442_v7  ;;  %8786 = vrcp.f32 %v2033_v36  ;;  %v10988_v7 = vpop.eup %8772 }
 0x51b   : > { %7980 = vmatprep.subr.bf16.mxu0 %v10452_v28  ;;  %2062 = vadd.xlane.f32.xlu0 %v10977_v3  ;;  %v2031_v63 = vpop.xlane.xlu0 %2030  ;;  %v10992_v60 = vpop.eup %8774 }
 0x51c   : > { %2066 = vadd.xlane.f32.xlu1 %v10980_v41  ;;  %8788 = vrcp.f32 %v2031_v63  ;;  %v2049_v36 = vpop.xlane.xlu1 %2048  ;;  %v10995_v16 = vpop.eup %8776  ;;  %v14013_v63 = vld [vmem:[#allocation16_spill] sm:$0xff] }
 0x51d   : > { %8790 = vpow2.f32 %v2018_v52  ;;  %v10997_v49 = vpop.eup %8778  ;;  %v14012_v52 = vld [vmem:[#allocation21_spill] sm:$0xff] }
 0x51e   : > { %7981 = vmatpush3.bf16.msra.mxu0 %v10452_v28  ;;  %8792 = vpow2.f32 %v2014_v55  ;;  %v11000_v28 = vpop.eup %8780  ;;  %v14014_v55 = vld [vmem:[#allocation19_spill] sm:$0xff] }
 0x51f   : > { %7982 = vmatprep.subr.bf16.mxu0 %v10459_v13  ;;  %2072 = vadd.xlane.f32.xlu0 %v10985_v57  ;;  %v2043_v20 = vpop.xlane.xlu0 %2042  ;;  %8794 = vrcp.f32 %v2037_v26  ;;  %v14011_v26 = vld [vmem:[#allocation14_spill] sm:$0xff] }
 0x520   : > { %2068 = vadd.xlane.f32.xlu1 %v10988_v7  ;;  %8796 = vrcp.f32 %v2043_v20  ;;  %v2045_v61 = vpop.xlane.xlu1 %2044 }
 0x521   : > { %8798 = vrcp.f32 %v2041_v46 }
 0x522   : > { %7983 = vmatpush3.bf16.msra.mxu0 %v10459_v13  ;;  %v8783_v2 = vpop.eup %8782 }
 0x523   : > { %7984 = vmatprep.subr.bf16.mxu0 %v10450_v56  ;;  %2070 = vadd.xlane.f32.xlu0 %v10995_v16  ;;  %v2039_v51 = vpop.xlane.xlu0 %2038  ;;  %v8785_v6 = vpop.eup %8784  ;;  %v2123_v15 = vmul.f32 %v8783_v2, %v10903_v19 }
 0x524   : > { %2074 = vadd.xlane.f32.xlu1 %v10992_v60  ;;  %8800 = vrcp.f32 %v2039_v51  ;;  %v8787_v21 = vpop.eup %8786  ;;  %v2120_v34 = vmul.f32 %v8785_v6, %v10889_v43 }
 0x525   : > { %8802 = vrcp.f32 %v2045_v61  ;;  %v2122_v62 = vmul.f32 %v8787_v21, %v10875_v9 }
 0x526   : > { %7985 = vmatpush3.bf16.msra.mxu0 %v10450_v56  ;;  %v8789_v44 = vpop.eup %8788 }
 0x527   : > { %7986 = vmatprep.subr.bf16.mxu0 %v10462_v10  ;;  %2080 = vadd.xlane.f32.xlu0 %v10997_v49  ;;  %v2051_v13 = vpop.xlane.xlu0 %2050  ;;  %v2121_v33 = vmul.f32 %v8789_v44, %v10910_v25  ;;  %v11012_v0 = vpop.eup %8790  ;;  %v2151_v19 = vpack.c.bf16 %v2123_v15, %v2122_v62 }
 0x528   : > { %2076 = vadd.xlane.f32.xlu1 %v11000_v28  ;;  %v11015_v56 = vpop.eup %8792  ;;  %8804 = vrcp.f32 %v2051_v13  ;;  %v14015_v13 = vld [vmem:[#allocation60_spill] sm:$0xff] }
 0x529   : > { %v2150_v4 = vpack.c.bf16 %v2121_v33, %v2120_v34  ;;  %v8795_v48 = vpop.eup %8794  ;;  %8806 = vrcp.f32 %v2049_v36  ;;  %v14016_v33 = vld [vmem:[#allocation59_spill] sm:$0xff] }
 0x52a   : > { %7987 = vmatpush3.bf16.msra.mxu0 %v10462_v10  ;;  %v8797_v25 = vpop.eup %8796  ;;  %v2124_v10 = vmul.f32 %v8795_v48, %v10905_v38 }
 0x52b   : > { %7988 = vmatprep.subr.bf16.mxu0 %v10469_v27  ;;  %2078 = vadd.xlane.f32.xlu0 %v11015_v56  ;;  %v2047_v43 = vpop.xlane.xlu0 %2046  ;;  %v8799_v9 = vpop.eup %8798  ;;  %v2127_v11 = vmul.f32 %v8797_v25, %v10916_v18  ;;  %v2672_v25 = vsel %vm1545_vm2, %v10480_v54, 0 }
 0x52c   : > { %2082 = vadd.xlane.f32.xlu1 %v11012_v0  ;;  %7966 = vmatprep.mubr.bf16.mxu0 %v2150_v4  ;;  %8808 = vrcp.f32 %v2047_v43  ;;  %v2126_v24 = vmul.f32 %v8799_v9, %v10898_v14  ;;  %v14017_v4 = vld [vmem:[#allocation61_spill] sm:$0xff]  ;;  %v14018_v9 = vld [vmem:[#allocation23_spill] sm:$0xff] }
 0x52d   : > { %7967 = vmatmul.mubr.bf16.gmra.mrb[52].mxu0 %v2151_v19 }
 0x52e   : > { %v8801_v29 = vpop.eup %8800  ;;  %7989 = vmatpush3.bf16.msra.mxu0 %v10469_v27  ;;  %v2153_v23 = vpack.c.bf16 %v2127_v11, %v2126_v24  ;;  %v14021_v11 = vld [vmem:[#allocation58_spill] sm:$0xff] }
 0x52f   : > { %7990 = vmatprep.subr.bf16.mxu0 %v10821_v42  ;;  %v2125_v46 = vmul.f32 %v8801_v29, %v10922_v59  ;;  %v8803_v12 = vpop.eup %8802  ;;  %v14019_v29 = vld [vmem:[#allocation49_spill] sm:$0xff] }
 0x530   : > { %v2128_v38 = vmul.f32 %v8803_v12, %v10918_v35  ;;  %v14006_v35 = vld [vmem:[#allocation15_spill] sm:$0xff] }
 0x531   : > { %v2152_v22 = vpack.c.bf16 %v2125_v46, %v2124_v10  ;;  %v2678_v10 = vsel %vm1545_vm2, %v14019_v29, 0  ;;  %v14020_v46 = vld [vmem:[#allocation52_spill] sm:$0xff] }
 0x532   : > { %7991 = vmatpush3.bf16.msra.mxu0 %v10821_v42  ;;  %v8805_v47 = vpop.eup %8804 }
 0x533   : > { %7992 = vmatprep.subr.bf16.mxu0 %v10472_v30  ;;  %7970 = vmatprep.mubr.bf16.mxu0 %v2152_v22  ;;  %v8807_v27 = vpop.eup %8806  ;;  %v2131_v42 = vmul.f32 %v8805_v47, %v10925_v45  ;;  %v14007_v45 = vld [vmem:[#allocation18_spill] sm:$0xff]  ;;  %v2684_v22 = vsel %vm1545_vm2, %v14021_v11, 0 }
 0x534   : > { %v2130_v59 = vmul.f32 %v8807_v27, %v10912_v40  ;;  %v14008_v40 = vld [vmem:[#allocation17_spill] sm:$0xff] }
 0x535   : > { %7971 = vmatmul.mubr.bf16.gmra.mrb[56].mxu0 %v2153_v23 }
 0x536   : > { %v8809_v58 = vpop.eup %8808  ;;  %7993 = vmatpush3.bf16.msra.mxu0 %v10472_v30  ;;  %v2155_v8 = vpack.c.bf16 %v2131_v42, %v2130_v59  ;;  %v14005_v30 = vld [vmem:[#allocation22_spill] sm:$0xff] }
 0x537   : > { %8546 = vmatprep.subr.msk.bf16.mxu0 %vm1545_vm2, %v10480_v54  ;;  %v2129_v14 = vmul.f32 %v8809_v58, %v10928_v17  ;;  %v14009_v17 = vld [vmem:[#allocation12_spill] sm:$0xff]  ;;  %v2681_v54 = vsel %vm1545_vm2, %v14020_v46, 0  ;;  %v14022_v42 = vld [vmem:[#allocation26_spill] sm:$0xff] }
 0x539   : > { %v2154_v18 = vpack.c.bf16 %v2129_v14, %v2128_v38 }
 0x53b   : > { %7974 = vmatprep.mubr.bf16.mxu0 %v2154_v18 }
 0x53d   : > { %2615 = vrot.lane.b32.xlu1 %v10296_v37, %s9514_s22  ;;  %7975 = vmatmul.mubr.bf16.gmra.mrb[60].mxu0 %v2155_v8 }
 0x541   : > { %2442 = vrot.lane.b32.xlu1 %v10260_v50, %s9514_s22  ;;  %2645 = vrot.lane.b32.xlu0 %v14005_v30, %s9512_s24  ;;  %s9522_s24 = smov 8  }
 0x545   : > { %2446 = vrot.lane.b32.xlu1 %v14006_v35, %s9514_s22  ;;  %2617 = vrot.lane.b32.xlu0 %v14007_v45, %s9514_s22 }
 0x549   : > { %2450 = vrot.lane.b32.xlu1 %v14008_v40, %s9514_s22  ;;  %2444 = vrot.lane.b32.xlu0 %v14009_v17, %s9514_s22 }
 0x54d   : > { %2619 = vrot.lane.b32.xlu1 %v14010_v39, %s9514_s22  ;;  %2448 = vrot.lane.b32.xlu0 %v14011_v26, %s9514_s22 }
 0x551   : > { %2623 = vrot.lane.b32.xlu1 %v14012_v52, %s9514_s22  ;;  %2452 = vrot.lane.b32.xlu0 %v14013_v63, %s9514_s22 }
 0x555   : > { %2627 = vrot.lane.b32.xlu1 %v10345_v32, %s9514_s22  ;;  %2621 = vrot.lane.b32.xlu0 %v14014_v55, %s9514_s22 }
 0x559   : > { %2625 = vrot.lane.b32.xlu0 %v10320_v5, %s9514_s22 }
 0x55d   : > { %2629 = vrot.lane.b32.xlu0 %v14005_v30, %s9514_s22 }
 0x567   : > { %v2057_v20 = vpop.xlane.xlu1 %2056 }
 0x56b   : > { %v2053_v36 = vpop.xlane.xlu0 %2052 }
 0x56c   : > { %8810 = vrcp.f32 %v2053_v36  ;;  %v14023_v36 = vld [vmem:[#allocation25_spill] sm:$0xff] }
 0x56d   : > { %8812 = vrcp.f32 %v2057_v20  ;;  %v2055_v51 = vpop.xlane.xlu1 %2054 }
 0x56e   : > { %8814 = vrcp.f32 %v2055_v51 }
 0x56f   : > { %v2059_v2 = vpop.xlane.xlu0 %2058 }
 0x570   : > { %8816 = vrcp.f32 %v2059_v2 }
 0x571   : > { %v2644_v24 = vpop.permute.xlu1 %2643 }
 0x573   : > { %v2642_v12 = vpop.permute.xlu0 %2641 }
 0x574   : > { %v2687_v58 = vsel %vm1545_vm2, %v2642_v12, 0 }
 0x576   : > { %v8811_v6 = vpop.eup %8810 }
 0x577   : > { %v8813_v21 = vpop.eup %8812  ;;  %v2132_v44 = vmul.f32 %v8811_v6, %v10942_v53  ;;  %v2675_v53 = vsel %vm1545_vm2, %v14018_v9, 0  ;;  %v14024_v6 = vld [vmem:[#allocation27_spill] sm:$0xff] }
 0x578   : > { %v8815_v61 = vpop.eup %8814  ;;  %v2134_v62 = vmul.f32 %v8813_v21, %v14016_v33 }
 0x579   : > { %v2133_v15 = vmul.f32 %v8815_v61, %v14015_v13 }
 0x57a   : > { %v8817_v34 = vpop.eup %8816 }
 0x57b   : > { %v2135_v48 = vmul.f32 %v8817_v34, %v14017_v4  ;;  %v2156_v43 = vpack.c.bf16 %v2133_v15, %v2132_v44  ;;  %v14025_v44 = vld [vmem:[#allocation24_spill] sm:$0xff]  ;;  %v2690_v15 = vsel %vm1545_vm2, %v2644_v24, 0 }
 0x57d   : > { %7994 = vmatprep.mubr.bf16.mxu0 %v2156_v43  ;;  %v2157_v19 = vpack.c.bf16 %v2135_v48, %v2134_v62 }
 0x57f   : > { %7995 = vmatmul.mubr.bf16.vlgmr.msra.gmra.mrb[64].mxu0 %v2157_v19 }
 0x580   : > { %8043 = vmatpush3.bf16.xpose.msra.mxu0 %v2672_v25 }
 0x581   : > { %8547 = vmatprep.subr.msk.bf16.mxu0 %vm1545_vm2, %v14018_v9 }
 0x588   : > { %8045 = vmatpush3.bf16.xpose.msra.mxu0 %v2675_v53 }
 0x589   : > { %8548 = vmatprep.subr.msk.bf16.mxu0 %vm1545_vm2, %v14019_v29 }
 0x590   : > { %8047 = vmatpush3.bf16.xpose.msra.mxu0 %v2678_v10 }
 0x591   : > { %8549 = vmatprep.subr.msk.bf16.mxu0 %vm1545_vm2, %v14020_v46 }
 0x598   : > { %8049 = vmatpush3.bf16.xpose.msra.mxu0 %v2681_v54 }
 0x599   : > { %8550 = vmatprep.subr.msk.bf16.mxu0 %vm1545_vm2, %v14021_v11 }
 0x5a0   : > { %8051 = vmatpush3.bf16.xpose.msra.mxu0 %v2684_v22 }
 0x5a1   : > { %8551 = vmatprep.subr.msk.bf16.mxu0 %vm1545_vm2, %v2642_v12 }
 0x5a4   : > { %v2061_v23 = vpop.xlane.xlu1 %2060  ;;  %v2065_v47 = vpop.xlane.xlu0 %2064 }
 0x5a5   : > { %8818 = vrcp.f32 %v2061_v23 }
 0x5a6   : > { %8820 = vrcp.f32 %v2065_v47 }
 0x5a7   : > { %v8028_v27 = vpop.f32.mrb[16].mxu1 }
 0x5a8   : > { %8053 = vmatpush3.bf16.xpose.msra.mxu0 %v2687_v58  ;;  %v2552_v38 = vpop.f32.mrb[17].mxu1  ;;  %v2063_v14 = vpop.xlane.xlu0 %2062  ;;  %v11103_v13 = vadd.f32 %v8028_v27, %v14025_v44 }
 0x5a9   : > { %v11091_v18 = vadd.f32 %v2552_v38, %v14022_v42  ;;  %v2067_v59 = vpop.xlane.xlu1 %2066  ;;  %8552 = vmatprep.subr.msk.bf16.mxu0 %vm1545_vm2, %v2644_v24  ;;  %8822 = vrcp.f32 %v2063_v14  ;;  %v8029_v8 = vpop.f32.mrb[18].mxu1 }
 0x5aa   : > { %8824 = vrcp.f32 %v2067_v59  ;;  %v2555_v20 = vpop.f32.mrb[19].mxu1  ;;  %v11099_v21 = vadd.f32 %v8029_v8, %v14024_v6 }
 0x5ab   : > { %v11095_v51 = vadd.f32 %v2555_v20, %v14023_v36  ;;  %2792 = vmax.xlane.f32.xlu1 %v11091_v18 }
 0x5ac   : > { %v2073_v2 = vpop.xlane.xlu0 %2072 }
 0x5ad   : > { %v2069_v61 = vpop.xlane.xlu1 %2068  ;;  %2794 = vmax.xlane.f32.xlu0 %v11095_v51 }
 0x5ae   : > { %8826 = vrcp.f32 %v2069_v61 }
 0x5af   : > { %2798 = vmax.xlane.f32.xlu1 %v11099_v21  ;;  %8828 = vrcp.f32 %v2073_v2  ;;  %v8819_v33 = vpop.eup %8818 }
 0x5b0   : > { %8055 = vmatpush3.bf16.xpose.msra.mxu0 %v2690_v15  ;;  %v2071_v34 = vpop.xlane.xlu0 %2070  ;;  %v8821_v4 = vpop.eup %8820  ;;  %v2136_v25 = vmul.f32 %v8819_v33, %v10971_v31 }
 0x5b1   : > { %v2075_v62 = vpop.xlane.xlu1 %2074  ;;  %8830 = vrcp.f32 %v2071_v34  ;;  %2796 = vmax.xlane.f32.xlu0 %v11103_v13  ;;  %v2138_v29 = vmul.f32 %v8821_v4, %v10968_v1 }
 0x5b2   : > { %8832 = vrcp.f32 %v2075_v62 }
 0x5b3   : > { %v8823_v48 = vpop.eup %8822 }
 0x5b4   : > { %v8825_v43 = vpop.eup %8824  ;;  %v2081_v19 = vpop.xlane.xlu0 %2080  ;;  %v2137_v9 = vmul.f32 %v8823_v48, %v10977_v3 }
 0x5b5   : > { %v2077_v53 = vpop.xlane.xlu1 %2076  ;;  %v2139_v10 = vmul.f32 %v8825_v43, %v10980_v41 }
 0x5b6   : > { %v2158_v46 = vpack.c.bf16 %v2137_v9, %v2136_v25  ;;  %8834 = vrcp.f32 %v2077_v53 }
 0x5b7   : > { %v2159_v54 = vpack.c.bf16 %v2139_v10, %v2138_v29  ;;  %8836 = vrcp.f32 %v2081_v19 }
 0x5b8   : > { %7998 = vmatprep.mubr.bf16.mxu0 %v2158_v46  ;;  %v2079_v11 = vpop.xlane.xlu0 %2078  ;;  %v8827_v22 = vpop.eup %8826 }
 0x5b9   : > { %v2083_v24 = vpop.xlane.xlu1 %2082  ;;  %8838 = vrcp.f32 %v2079_v11  ;;  %7999 = vmatmul.mubr.bf16.gmra.mrb[68].mxu0 %v2159_v54  ;;  %v8829_v12 = vpop.eup %8828  ;;  %v2140_v47 = vmul.f32 %v8827_v22, %v10988_v7 }
 0x5ba   : > { %8840 = vrcp.f32 %v2083_v24  ;;  %v2142_v58 = vmul.f32 %v8829_v12, %v10985_v57 }
 0x5bb   : > { %v8831_v31 = vpop.eup %8830 }
 0x5bc   : > { %v8833_v23 = vpop.eup %8832  ;;  %v2646_v3 = vpop.permute.xlu0 %2645  ;;  %v2141_v1 = vmul.f32 %v8831_v31, %v10995_v16 }
 0x5bd   : > { %v2616_v41 = vpop.permute.xlu1 %2615  ;;  %8553 = vmatprep.subr.msk.bf16.mxu0 %vm1545_vm2, %v2646_v3  ;;  %v2693_v27 = vsel %vm1545_vm2, %v2646_v3, 0  ;;  %v2143_v38 = vmul.f32 %v8833_v23, %v10992_v60 }
 0x5be   : > { %8057 = vmatpush3.bf16.xpose.msra.mxu0 %v2693_v27  ;;  %v2160_v14 = vpack.c.bf16 %v2141_v1, %v2140_v47 }
 0x5bf   : > { %v2161_v59 = vpack.c.bf16 %v2143_v38, %v2142_v58 }
 0x5c0   : > { %8002 = vmatprep.mubr.bf16.mxu0 %v2160_v14  ;;  %v2618_v8 = vpop.permute.xlu0 %2617  ;;  %v8835_v20 = vpop.eup %8834 }
 0x5c1   : > { %v2443_v2 = vpop.permute.xlu1 %2442  ;;  %8003 = vmatmul.mubr.bf16.gmra.mrb[72].mxu0 %v2161_v59  ;;  %v8837_v7 = vpop.eup %8836  ;;  %v2144_v34 = vmul.f32 %v8835_v20, %v11000_v28 }
 0x5c2   : > { %8030 = vmatprep.mubr.msk.bf16.mxu1 %vm1545_vm2, %v2443_v2  ;;  %v2146_v60 = vmul.f32 %v8837_v7, %v10997_v49 }
 0x5c3   : > { %v8839_v16 = vpop.eup %8838 }
 0x5c4   : > { %v8841_v61 = vpop.eup %8840  ;;  %v2445_v15 = vpop.permute.xlu0 %2444  ;;  %v2145_v57 = vmul.f32 %v8839_v16, %v11015_v56 }
 0x5c5   : > { %v2447_v33 = vpop.permute.xlu1 %2446  ;;  %8031 = vmatmul.mubr.msk.bf16.gmra.mrb[20].mxu1 %vm1545_vm2, %v2445_v15  ;;  %v2147_v62 = vmul.f32 %v8841_v61, %v11012_v0 }
 0x5c6   : > { %8034 = vmatprep.mubr.msk.bf16.mxu1 %vm1545_vm2, %v2447_v33  ;;  %v2162_v4 = vpack.c.bf16 %v2145_v57, %v2144_v34 }
 0x5c7   : > { %v2163_v48 = vpack.c.bf16 %v2147_v62, %v2146_v60 }
 0x5c8   : > { %8006 = vmatprep.mubr.bf16.mxu0 %v2162_v4  ;;  %v2449_v19 = vpop.permute.xlu0 %2448 }
 0x5c9   : > { %8007 = vmatmul.mubr.bf16.gmra.mrb[76].mxu0 %v2163_v48  ;;  %v2451_v43 = vpop.permute.xlu1 %2450 }
 0x5ca   : > { %8058 = vmatprep.mubr.msk.bf16.mxu0 %vm1545_vm2, %v2616_v41 }
 0x5cc   : > { %v2453_v49 = vpop.permute.xlu0 %2452 }
 0x5cd   : > { %8035 = vmatmul.mubr.msk.bf16.gmra.mrb[24].mxu1 %vm1545_vm2, %v2449_v19  ;;  %v2620_v28 = vpop.permute.xlu1 %2619 }
 0x5ce   : > { %8038 = vmatprep.mubr.msk.bf16.mxu1 %vm1545_vm2, %v2451_v43 }
 0x5d0   : > { %v2622_v0 = vpop.permute.xlu0 %2621 }
 0x5d1   : > { %8059 = vmatmul.mubr.msk.bf16.vlgmr.msra.gmra.mrb[80].mxu0 %vm1545_vm2, %v2618_v8  ;;  %v2624_v56 = vpop.permute.xlu1 %2623 }
 0x5d2   : > { %8062 = vmatprep.mubr.msk.bf16.mxu0 %vm1545_vm2, %v2620_v28 }
 0x5d4   : > { %v2626_v25 = vpop.permute.xlu0 %2625 }
 0x5d5   : > { %8039 = vmatmul.mubr.msk.bf16.gmra.mrb[28].mxu1 %vm1545_vm2, %v2453_v49  ;;  %v2628_v9 = vpop.permute.xlu1 %2627 }
 0x5d8   : > { %v2630_v53 = vpop.permute.xlu0 %2629 }
 0x5d9   : > { %8063 = vmatmul.mubr.msk.bf16.gmra.mrb[84].mxu0 %vm1545_vm2, %v2622_v0 }
 0x5da   : > { %8066 = vmatprep.mubr.msk.bf16.mxu0 %vm1545_vm2, %v2624_v56 }
 0x5e1   : > { %8067 = vmatmul.mubr.msk.bf16.gmra.mrb[88].mxu0 %vm1545_vm2, %v2626_v25 }
 0x5e2   : > { %8070 = vmatprep.mubr.msk.bf16.mxu0 %vm1545_vm2, %v2628_v9 }
 0x5e9   : > { %8071 = vmatmul.mubr.msk.bf16.gmra.mrb[92].mxu0 %vm1545_vm2, %v2630_v53 }
 0x5ec   : > { %v7964_v29 = vpop.f32.mrb[48].mxu0 }
 0x5ed   : > { %v2222_v10 = vpop.f32.mrb[49].mxu0 }
 0x5ee   : > { %v7965_v46 = vpop.f32.mrb[50].mxu0 }
 0x5ef   : > { %v2407_v54 = vpack.c.bf16 %v7965_v46, %v7964_v29  ;;  %v2225_v11 = vpop.f32.mrb[51].mxu0  ;;  %v14026_v46 = vld [vmem:[#allocation31_spill] sm:$0xff] }
 0x5f0   : > { %v2406_v22 = vpack.c.bf16 %v2225_v11, %v2222_v10 }
 0x5f1   : > { %2423 = vst.msk [vmem:[#allocation3 + $0x8] sm:$0xff] %vm1545_vm2, %v2407_v54 }
 0x5f2   : > { %2422 = vst.msk [vmem:[#allocation3] sm:$0xff] %vm1545_vm2, %v2406_v22 }
 0x600   : > { %v7968_v24 = vpop.f32.mrb[52].mxu0 }
 0x601   : > { %v2238_v12 = vpop.f32.mrb[53].mxu0 }
 0x602   : > { %v7969_v31 = vpop.f32.mrb[54].mxu0 }
 0x603   : > { %v2409_v23 = vpack.c.bf16 %v7969_v31, %v7968_v24  ;;  %v2241_v3 = vpop.f32.mrb[55].mxu0  ;;  %v14027_v24 = vld [vmem:[#allocation30_spill] sm:$0xff] }
 0x604   : > { %v2408_v47 = vpack.c.bf16 %v2241_v3, %v2238_v12  ;;  %v14028_v3 = vld [vmem:[#allocation29_spill] sm:$0xff] }
 0x605   : > { %2425 = vst.msk [vmem:[#allocation3 + $0x18] sm:$0xff] %vm1545_vm2, %v2409_v23 }
 0x606   : > { %2424 = vst.msk [vmem:[#allocation3 + $0x10] sm:$0xff] %vm1545_vm2, %v2408_v47 }
 0x608   : > { %v7972_v1 = vpop.f32.mrb[56].mxu0 }
 0x609   : > { %v2254_v41 = vpop.f32.mrb[57].mxu0 }
 0x60a   : > { %v7973_v27 = vpop.f32.mrb[58].mxu0 }
 0x60b   : > { %v2411_v58 = vpack.c.bf16 %v7973_v27, %v7972_v1  ;;  %v2257_v38 = vpop.f32.mrb[59].mxu0 }
 0x60c   : > { %v2410_v14 = vpack.c.bf16 %v2257_v38, %v2254_v41 }
 0x60d   : > { %2427 = vst.msk [vmem:[#allocation3 + $0x28] sm:$0xff] %vm1545_vm2, %v2411_v58  ;;  %v14029_v58 = vld [vmem:[#allocation28_spill] sm:$0xff] }
 0x60e   : > { %2426 = vst.msk [vmem:[#allocation3 + $0x20] sm:$0xff] %vm1545_vm2, %v2410_v14 }
 0x610   : > { %v7976_v59 = vpop.f32.mrb[60].mxu0 }
 0x611   : > { %v2270_v8 = vpop.f32.mrb[61].mxu0 }
 0x612   : > { %v7977_v20 = vpop.f32.mrb[62].mxu0 }
 0x613   : > { %v2413_v2 = vpack.c.bf16 %v7977_v20, %v7976_v59  ;;  %v2273_v7 = vpop.f32.mrb[63].mxu0  ;;  %v14030_v20 = vld [vmem:[#allocation35_spill] sm:$0xff] }
 0x614   : > { %v2412_v16 = vpack.c.bf16 %v2273_v7, %v2270_v8 }
 0x615   : > { %2429 = vst.msk [vmem:[#allocation3 + $0x38] sm:$0xff] %vm1545_vm2, %v2413_v2 }
 0x616   : > { %2428 = vst.msk [vmem:[#allocation3 + $0x30] sm:$0xff] %vm1545_vm2, %v2412_v16 }
 0x652   : > { %v7996_v61 = vpop.f32.mrb[64].mxu0 }
 0x653   : > { %v2343_v15 = vpop.f32.mrb[65].mxu0 }
 0x654   : > { %v7997_v34 = vpop.f32.mrb[66].mxu0 }
 0x655   : > { %v2415_v57 = vpack.c.bf16 %v7997_v34, %v7996_v61  ;;  %v2346_v33 = vpop.f32.mrb[67].mxu0  ;;  %v14031_v61 = vld [vmem:[#allocation34_spill] sm:$0xff] }
 0x656   : > { %v2414_v60 = vpack.c.bf16 %v2346_v33, %v2343_v15  ;;  %v14032_v33 = vld [vmem:[#allocation33_spill] sm:$0xff] }
 0x657   : > { %2431 = vst.msk [vmem:[#allocation3 + $0x48] sm:$0xff] %vm1545_vm2, %v2415_v57 }
 0x658   : > { %2430 = vst.msk [vmem:[#allocation3 + $0x40] sm:$0xff] %vm1545_vm2, %v2414_v60 }
 0x68c   : > { %v8000_v62 = vpop.f32.mrb[68].mxu0 }
 0x68d   : > { %v2359_v4 = vpop.f32.mrb[69].mxu0 }
 0x68e   : > { %v8001_v48 = vpop.f32.mrb[70].mxu0 }
 0x68f   : > { %v2417_v43 = vpack.c.bf16 %v8001_v48, %v8000_v62  ;;  %v2362_v19 = vpop.f32.mrb[71].mxu0  ;;  %v14033_v48 = vld [vmem:[#allocation32_spill] sm:$0xff] }
 0x690   : > { %v2416_v28 = vpack.c.bf16 %v2362_v19, %v2359_v4 }
 0x691   : > { %2433 = vst.msk [vmem:[#allocation3 + $0x58] sm:$0xff] %vm1545_vm2, %v2417_v43 }
 0x692   : > { %2432 = vst.msk [vmem:[#allocation3 + $0x50] sm:$0xff] %vm1545_vm2, %v2416_v28 }
 0x694   : > { %v8004_v49 = vpop.f32.mrb[72].mxu0 }
 0x695   : > { %v2375_v0 = vpop.f32.mrb[73].mxu0 }
 0x696   : > { %v8005_v56 = vpop.f32.mrb[74].mxu0 }
 0x697   : > { %v2419_v25 = vpack.c.bf16 %v8005_v56, %v8004_v49  ;;  %v2378_v9 = vpop.f32.mrb[75].mxu0  ;;  %v14034_v49 = vld [vmem:[#allocation39_spill] sm:$0xff] }
 0x698   : > { %v2418_v53 = vpack.c.bf16 %v2378_v9, %v2375_v0  ;;  %v8032_v29 = vpop.f32.mrb[20].mxu1  ;;  %v14035_v9 = vld [vmem:[#allocation38_spill] sm:$0xff] }
 0x699   : > { %2435 = vst.msk [vmem:[#allocation3 + $0x68] sm:$0xff] %vm1545_vm2, %v2419_v25  ;;  %v2568_v10 = vpop.f32.mrb[21].mxu1  ;;  %v11158_v47 = vadd.f32 %v8032_v29, %v14028_v3 }
 0x69a   : > { %2434 = vst.msk [vmem:[#allocation3 + $0x60] sm:$0xff] %vm1545_vm2, %v2418_v53  ;;  %v11151_v54 = vadd.f32 %v2568_v10, %v14026_v46  ;;  %v8033_v11 = vpop.f32.mrb[22].mxu1 }
 0x69b   : > { %v2571_v22 = vpop.f32.mrb[23].mxu1  ;;  %v11162_v38 = vadd.f32 %v8033_v11, %v14029_v58  ;;  %v14036_v11 = vld [vmem:[#allocation37_spill] sm:$0xff] }
 0x69c   : > { %v11154_v12 = vadd.f32 %v2571_v22, %v14027_v24  ;;  %v8008_v31 = vpop.f32.mrb[76].mxu0  ;;  %2800 = vmax.xlane.f32.xlu0 %v11151_v54 }
 0x69d   : > { %v2391_v23 = vpop.f32.mrb[77].mxu0 }
 0x69e   : > { %v8009_v1 = vpop.f32.mrb[78].mxu0  ;;  %2802 = vmax.xlane.f32.xlu1 %v11154_v12 }
 0x69f   : > { %v2421_v41 = vpack.c.bf16 %v8009_v1, %v8008_v31  ;;  %v2394_v27 = vpop.f32.mrb[79].mxu0  ;;  %v14037_v1 = vld [vmem:[#allocation36_spill] sm:$0xff] }
 0x6a0   : > { %v2420_v14 = vpack.c.bf16 %v2394_v27, %v2391_v23  ;;  %2804 = vmax.xlane.f32.xlu0 %v11158_v47  ;;  %v8036_v59 = vpop.f32.mrb[24].mxu1 }
 0x6a1   : > { %2437 = vst.msk [vmem:[#allocation3 + $0x78] sm:$0xff] %vm1545_vm2, %v2421_v41  ;;  %v2584_v8 = vpop.f32.mrb[25].mxu1  ;;  %v11180_v60 = vadd.f32 %v8036_v59, %v14032_v33 }
 0x6a2   : > { %2436 = vst.msk [vmem:[#allocation3 + $0x70] sm:$0xff] %vm1545_vm2, %v2420_v14  ;;  %v11168_v2 = vadd.f32 %v2584_v8, %v14030_v20  ;;  %2806 = vmax.xlane.f32.xlu1 %v11162_v38  ;;  %v8037_v7 = vpop.f32.mrb[26].mxu1 }
 0x6a3   : > { %v2587_v16 = vpop.f32.mrb[27].mxu1  ;;  %v11188_v43 = vadd.f32 %v8037_v7, %v14033_v48 }
 0x6a4   : > { %v11172_v15 = vadd.f32 %v2587_v16, %v14031_v61  ;;  %v11174_v34 = vpop.f32.mrb[80].mxu0  ;;  %2808 = vmax.xlane.f32.xlu0 %v11168_v2 }
 0x6a5   : > { %v11177_v57 = vpop.f32.mrb[81].mxu0 }
 0x6a6   : > { %v11182_v62 = vpop.f32.mrb[82].mxu0  ;;  %2810 = vmax.xlane.f32.xlu1 %v11172_v15 }
 0x6a7   : > { %v11185_v4 = vpop.f32.mrb[83].mxu0 }
 0x6a8   : > { %2812 = vmax.xlane.f32.xlu0 %v11180_v60  ;;  %v8040_v19 = vpop.f32.mrb[28].mxu1 }
 0x6a9   : > { %v2600_v28 = vpop.f32.mrb[29].mxu1  ;;  %v11204_v22 = vadd.f32 %v8040_v19, %v14036_v11  ;;  %v2793_v11 = vpop.xlane.xlu1 %2792 }
 0x6aa   : > { %v11192_v0 = vadd.f32 %v2600_v28, %v14034_v49  ;;  %2814 = vmax.xlane.f32.xlu1 %v11188_v43  ;;  %v8041_v56 = vpop.f32.mrb[30].mxu1  ;;  %v2856_v20 = vsub.f32 %v11091_v18, %v2793_v11 }
 0x6ab   : > { %v2603_v25 = vpop.f32.mrb[31].mxu1  ;;  %v11212_v41 = vadd.f32 %v8041_v56, %v14037_v1  ;;  %v14038_v56 = vld [vmem:[#allocation10_spill] sm:$0xff]  ;;  %v2795_v1 = vpop.xlane.xlu0 %2794 }
 0x6ac   : > { %v11196_v53 = vadd.f32 %v2603_v25, %v14035_v9  ;;  %2816 = vmax.xlane.f32.xlu0 %v11192_v0  ;;  %v11199_v29 = vpop.f32.mrb[84].mxu0  ;;  %v14039_v25 = vld [vmem:[#allocation11_spill] sm:$0xff]  ;;  %v2888_v3 = vmul.f32 1.442695, %v2856_v20  ;;  %v2857_v24 = vsub.f32 %v11095_v51, %v2795_v1 }
 0x6ad   : > { %v11201_v10 = vpop.f32.mrb[85].mxu0  ;;  %v2799_v48 = vpop.xlane.xlu1 %2798 }
 0x6ae   : > { %2818 = vmax.xlane.f32.xlu1 %v11196_v53  ;;  %v11207_v31 = vpop.f32.mrb[86].mxu0  ;;  %v2859_v33 = vsub.f32 %v11099_v21, %v2799_v48  ;;  %v2890_v46 = vmul.f32 1.442695, %v2857_v24 }
 0x6af   : > { %v11209_v23 = vpop.f32.mrb[87].mxu0  ;;  %v2797_v9 = vpop.xlane.xlu0 %2796 }
 0x6b0   : > { %2820 = vmax.xlane.f32.xlu0 %v11204_v22  ;;  %v2858_v49 = vsub.f32 %v11103_v13, %v2797_v9  ;;  %v2894_v58 = vmul.f32 1.442695, %v2859_v33 }
 0x6b2   : > { %2822 = vmax.xlane.f32.xlu1 %v11212_v41  ;;  %v2892_v61 = vmul.f32 1.442695, %v2858_v49 }
 0x6b4   : > { %v11216_v27 = vpop.f32.mrb[88].mxu0  ;;  %8842 = vpow2.f32 %v2892_v61 }
 0x6b5   : > { %v11218_v14 = vpop.f32.mrb[89].mxu0  ;;  %8844 = vpow2.f32 %v2894_v58 }
 0x6b6   : > { %v11220_v59 = vpop.f32.mrb[90].mxu0  ;;  %8846 = vpow2.f32 %v2888_v3 }
 0x6b7   : > { %v11222_v8 = vpop.f32.mrb[91].mxu0  ;;  %8848 = vpow2.f32 %v2890_v46 }
 0x6bc   : > { %v11224_v7 = vpop.f32.mrb[92].mxu0 }
 0x6bd   : > { %v11226_v16 = vpop.f32.mrb[93].mxu0 }
 0x6be   : > { %v11228_v19 = vpop.f32.mrb[94].mxu0  ;;  %v11268_v44 = vpop.eup %8842 }
 0x6bf   : > { %v11230_v28 = vpop.f32.mrb[95].mxu0  ;;  %v11271_v13 = vpop.eup %8844 }
 0x6c0   : > { %v11274_v21 = vpop.eup %8846 }
 0x6c1   : > { %v11277_v18 = vpop.eup %8848 }
 0x6c3   : > { %3098 = vrot.lane.b32.xlu1 %v14038_v56, %s9515_s2 }
 0x6c6   : > { %3096 = vrot.lane.b32.xlu0 %v14039_v25, %s9515_s2 }
 0x6c7   : > { %3102 = vrot.lane.b32.xlu1 %v14009_v17, %s9515_s2 }
 0x6ca   : > { %3100 = vrot.lane.b32.xlu0 %v10260_v50, %s9515_s2 }
 0x6cb   : > { %3217 = vrot.lane.b32.xlu1 %v10296_v37, %s9515_s2 }
 0x6ce   : > { %3104 = vrot.lane.b32.xlu0 %v14006_v35, %s9515_s2 }
 0x6cf   : > { %3451 = vrot.lane.b32.xlu1 %v14039_v25, %s9516_s3 }
 0x6d2   : > { %3106 = vrot.lane.b32.xlu0 %v14011_v26, %s9515_s2 }
 0x6d3   : > { %3223 = vrot.lane.b32.xlu1 %v14014_v55, %s9515_s2 }
 0x6d6   : > { %3108 = vrot.lane.b32.xlu0 %v14008_v40, %s9515_s2 }
 0x6d7   : > { %3227 = vrot.lane.b32.xlu1 %v10320_v5, %s9515_s2 }
 0x6da   : > { %3110 = vrot.lane.b32.xlu0 %v14013_v63, %s9515_s2 }
 0x6db   : > { %3455 = vrot.lane.b32.xlu1 %v10260_v50, %s9516_s3 }
 0x6de   : > { %3219 = vrot.lane.b32.xlu0 %v14007_v45, %s9515_s2 }
 0x6df   : > { %3229 = vrot.lane.b32.xlu1 %v10345_v32, %s9515_s2 }
 0x6e2   : > { %3221 = vrot.lane.b32.xlu0 %v14010_v39, %s9515_s2 }
 0x6e3   : > { %3457 = vrot.lane.b32.xlu1 %v14009_v17, %s9516_s3 }
 0x6e6   : > { %3453 = vrot.lane.b32.xlu0 %v14038_v56, %s9516_s3 }
 0x6e7   : > { %3628 = vrot.lane.b32.xlu1 %v10296_v37, %s9516_s3 }
 0x6ea   : > { %3225 = vrot.lane.b32.xlu0 %v14012_v52, %s9515_s2 }
 0x6eb   : > { %3461 = vrot.lane.b32.xlu1 %v14011_v26, %s9516_s3 }
 0x6ee   : > { %3231 = vrot.lane.b32.xlu0 %v14005_v30, %s9515_s2 }
 0x6f2   : > { %3459 = vrot.lane.b32.xlu0 %v14006_v35, %s9516_s3 }
 0x6f6   : > { %3630 = vrot.lane.b32.xlu0 %v14007_v45, %s9516_s3 }
 0x70f   : > { %2956 = vadd.xlane.f32.xlu1 %v11268_v44 }
 0x713   : > { %2958 = vadd.xlane.f32.xlu1 %v11271_v13 }
 0x715   : > { %2952 = vadd.xlane.f32.xlu0 %v11274_v21 }
 0x719   : > { %2954 = vadd.xlane.f32.xlu0 %v11277_v18 }
 0x729   : > { %v2801_v51 = vpop.xlane.xlu0 %2800 }
 0x72a   : > { %v2860_v46 = vsub.f32 %v11151_v54, %v2801_v51 }
 0x72b   : > { %v2803_v3 = vpop.xlane.xlu1 %2802 }
 0x72c   : > { %v2861_v24 = vsub.f32 %v11154_v12, %v2803_v3  ;;  %v2896_v9 = vmul.f32 1.442695, %v2860_v46 }
 0x72d   : > { %v2805_v58 = vpop.xlane.xlu0 %2804 }
 0x72e   : > { %v2898_v20 = vmul.f32 1.442695, %v2861_v24  ;;  %v2862_v61 = vsub.f32 %v11158_v47, %v2805_v58 }
 0x72f   : > { %v2807_v33 = vpop.xlane.xlu1 %2806 }
 0x730   : > { %8850 = vpow2.f32 %v2898_v20  ;;  %v2900_v48 = vmul.f32 1.442695, %v2862_v61  ;;  %v2863_v11 = vsub.f32 %v11162_v38, %v2807_v33 }
 0x731   : > { %v2809_v49 = vpop.xlane.xlu0 %2808 }
 0x732   : > { %8852 = vpow2.f32 %v2900_v48  ;;  %v2902_v12 = vmul.f32 1.442695, %v2863_v11  ;;  %v2864_v46 = vsub.f32 %v11168_v2, %v2809_v49 }
 0x733   : > { %v2811_v1 = vpop.xlane.xlu1 %2810  ;;  %8854 = vpow2.f32 %v2896_v9 }
 0x734   : > { %v2865_v6 = vsub.f32 %v11172_v15, %v2811_v1 }
 0x735   : > { %v2813_v36 = vpop.xlane.xlu0 %2812 }
 0x736   : > { %v2906_v3 = vmul.f32 1.442695, %v2865_v6  ;;  %v2866_v54 = vsub.f32 %v11180_v60, %v2813_v36  ;;  %v2904_v6 = vmul.f32 1.442695, %v2864_v46 }
 0x737   : > { %v2815_v51 = vpop.xlane.xlu1 %2814 }
 0x738   : > { %8856 = vpow2.f32 %v2906_v3  ;;  %v2908_v47 = vmul.f32 1.442695, %v2866_v54  ;;  %v2867_v60 = vsub.f32 %v11188_v43, %v2815_v51 }
 0x739   : > { %v2817_v24 = vpop.xlane.xlu0 %2816  ;;  %8858 = vpow2.f32 %v2902_v12 }
 0x73a   : > { %v11286_v58 = vpop.eup %8850  ;;  %v2868_v38 = vsub.f32 %v11192_v0, %v2817_v24  ;;  %8860 = vpow2.f32 %v2908_v47  ;;  %v2910_v9 = vmul.f32 1.442695, %v2867_v60 }
 0x73b   : > { %v2819_v20 = vpop.xlane.xlu1 %2818  ;;  %2962 = vadd.xlane.f32.xlu1 %v11286_v58 }
 0x73c   : > { %v11291_v15 = vpop.eup %8852  ;;  %v2912_v61 = vmul.f32 1.442695, %v2868_v38  ;;  %v2869_v3 = vsub.f32 %v11196_v53, %v2819_v20 }
 0x73d   : > { %2964 = vadd.xlane.f32.xlu0 %v11291_v15  ;;  %v2821_v36 = vpop.xlane.xlu0 %2820  ;;  %v11295_v48 = vpop.eup %8854 }
 0x73e   : > { %8862 = vpow2.f32 %v2912_v61  ;;  %v2870_v11 = vsub.f32 %v11204_v22, %v2821_v36  ;;  %v2914_v46 = vmul.f32 1.442695, %v2869_v3 }
 0x73f   : > { %v2823_v33 = vpop.xlane.xlu1 %2822  ;;  %8864 = vpow2.f32 %v2904_v6 }
 0x740   : > { %v2871_v2 = vsub.f32 %v11212_v41, %v2823_v33  ;;  %v2916_v54 = vmul.f32 1.442695, %v2870_v11 }
 0x741   : > { %2960 = vadd.xlane.f32.xlu0 %v11295_v48  ;;  %v3097_v0 = vpop.permute.xlu0 %3096 }
 0x742   : > { %v11299_v49 = vpop.eup %8856  ;;  %v2918_v1 = vmul.f32 1.442695, %v2871_v2  ;;  %8074 = vmatprep.subr.bf16.mxu1 %v3097_v0 }
 0x743   : > { %v3099_v12 = vpop.permute.xlu1 %3098  ;;  %2970 = vadd.xlane.f32.xlu1 %v11299_v49  ;;  %8075 = vmatpush3.bf16.msra.mxu1 %v3097_v0  ;;  %v11303_v43 = vpop.eup %8858 }
 0x744   : > { %8866 = vpow2.f32 %v2918_v1  ;;  %8076 = vmatprep.subr.bf16.mxu1 %v3099_v12  ;;  %v11307_v51 = vpop.eup %8860 }
 0x745   : > { %2966 = vadd.xlane.f32.xlu0 %v11303_v43  ;;  %v3101_v41 = vpop.permute.xlu0 %3100  ;;  %8868 = vpow2.f32 %v2910_v9 }
 0x746   : > { %8870 = vpow2.f32 %v2916_v54 }
 0x747   : > { %v3103_v22 = vpop.permute.xlu1 %3102  ;;  %8077 = vmatpush3.bf16.msra.mxu1 %v3099_v12  ;;  %8872 = vpow2.f32 %v2914_v46 }
 0x748   : > { %v11309_v47 = vpop.eup %8862  ;;  %8078 = vmatprep.subr.bf16.mxu1 %v3101_v41 }
 0x749   : > { %2972 = vadd.xlane.f32.xlu0 %v11307_v51  ;;  %2976 = vadd.xlane.f32.xlu1 %v11309_v47  ;;  %v3105_v24 = vpop.permute.xlu0 %3104  ;;  %v11313_v61 = vpop.eup %8864 }
 0x74b   : > { %v3218_v38 = vpop.permute.xlu1 %3217  ;;  %8079 = vmatpush3.bf16.msra.mxu1 %v3101_v41 }
 0x74c   : > { %8080 = vmatprep.subr.bf16.mxu1 %v3103_v22  ;;  %8106 = vmatprep.subr.bf16.mxu0 %v3218_v38 }
 0x74d   : > { %8107 = vmatpush3.bf16.msra.mxu0 %v3218_v38  ;;  %2968 = vadd.xlane.f32.xlu0 %v11313_v61  ;;  %v3107_v53 = vpop.permute.xlu0 %3106 }
 0x74e   : > { %v11316_v20 = vpop.eup %8866 }
 0x74f   : > { %v11318_v36 = vpop.permute.xlu1 %3451  ;;  %2982 = vadd.xlane.f32.xlu1 %v11316_v20  ;;  %8081 = vmatpush3.bf16.msra.mxu1 %v3103_v22  ;;  %v11321_v6 = vpop.eup %8868 }
 0x750   : > { %8082 = vmatprep.subr.bf16.mxu1 %v3105_v24  ;;  %v11324_v33 = vpop.eup %8870 }
 0x751   : > { %2974 = vadd.xlane.f32.xlu0 %v11321_v6  ;;  %v3109_v60 = vpop.permute.xlu0 %3108  ;;  %v11327_v9 = vpop.eup %8872 }
 0x753   : > { %8083 = vmatpush3.bf16.msra.mxu1 %v3105_v24  ;;  %v3224_v2 = vpop.permute.xlu1 %3223 }
 0x754   : > { %8084 = vmatprep.subr.bf16.mxu1 %v3107_v53 }
 0x755   : > { %2980 = vadd.xlane.f32.xlu0 %v11324_v33  ;;  %v3111_v0 = vpop.permute.xlu0 %3110 }
 0x757   : > { %8085 = vmatpush3.bf16.msra.mxu1 %v3107_v53  ;;  %v3228_v1 = vpop.permute.xlu1 %3227  ;;  %v14041_v53 = vld [vmem:[#allocation41_spill] sm:$0xff] }
 0x758   : > { %8086 = vmatprep.subr.bf16.mxu1 %v3109_v60 }
 0x759   : > { %2978 = vadd.xlane.f32.xlu0 %v11327_v9  ;;  %v3220_v11 = vpop.permute.xlu0 %3219 }
 0x75a   : > { %8108 = vmatprep.subr.bf16.mxu0 %v3220_v11 }
 0x75b   : > { %8087 = vmatpush3.bf16.msra.mxu1 %v3109_v60  ;;  %8109 = vmatpush3.bf16.msra.mxu0 %v3220_v11  ;;  %v11332_v41 = vpop.permute.xlu1 %3455  ;;  %v11358_v60 = vadd.f32 %v11182_v62, %v14041_v53  ;;  %v14043_v11 = vld [vmem:[#allocation40_spill] sm:$0xff]  ;;  %v14045_v62 = vld [vmem:[#allocation42_spill] sm:$0xff] }
 0x75c   : > { %8088 = vmatprep.subr.bf16.mxu1 %v3111_v0 }
 0x75d   : > { %v3222_v12 = vpop.permute.xlu0 %3221 }
 0x75e   : > { %8110 = vmatprep.subr.bf16.mxu0 %v3222_v12 }
 0x75f   : > { %8089 = vmatpush3.bf16.msra.mxu1 %v3111_v0  ;;  %8111 = vmatpush3.bf16.msra.mxu0 %v3222_v12  ;;  %v3230_v22 = vpop.permute.xlu1 %3229  ;;  %v14044_v12 = vld [vmem:[#allocation44_spill] sm:$0xff] }
 0x760   : > { %3632 = vrot.lane.b32.xlu1 %v14010_v39, %s9516_s3  ;;  %8112 = vmatprep.subr.bf16.mxu0 %v3224_v2 }
 0x761   : > { %8554 = vmatprep.subr.msk.bf16.mxu1 %vm1545_vm2, %v11318_v36  ;;  %v11336_v3 = vpop.permute.xlu0 %3453 }
 0x763   : > { %8113 = vmatpush3.bf16.msra.mxu0 %v3224_v2  ;;  %v11344_v24 = vpop.permute.xlu1 %3457  ;;  %v14042_v2 = vld [vmem:[#allocation43_spill] sm:$0xff] }
 0x764   : > { %3634 = vrot.lane.b32.xlu1 %v14014_v55, %s9516_s3  ;;  %v11363_v0 = vadd.f32 %v11185_v4, %v14042_v2  ;;  %v3492_v55 = vsel %vm1545_vm2, %v11318_v36, 0 }
 0x765   : > { %v3226_v54 = vpop.permute.xlu0 %3225 }
 0x766   : > { %8114 = vmatprep.subr.bf16.mxu0 %v3226_v54 }
 0x767   : > { %8115 = vmatpush3.bf16.msra.mxu0 %v3226_v54  ;;  %v11348_v38 = vpop.permute.xlu1 %3628  ;;  %v11372_v54 = vadd.f32 %v11207_v31, %v14044_v12  ;;  %v14047_v31 = vld [vmem:[#allocation53_spill] sm:$0xff] }
 0x768   : > { %3437 = vrot.lane.b32.xlu1 %v14038_v56, %s9517_s27  ;;  %8116 = vmatprep.subr.bf16.mxu0 %v3228_v1  ;;  %14040 = vst [vmem:[#allocation22_spill] sm:$0xff] %v11348_v38  ;;  %v11391_v12 = vadd.f32 %v11199_v29, %v14047_v31  ;;  %v14051_v29 = vld [vmem:[#allocation47_spill] sm:$0xff] }
 0x769   : > { %v3232_v46 = vpop.permute.xlu0 %3231  ;;  %v11408_v31 = vadd.f32 %v11220_v59, %v14051_v29  ;;  %v14054_v29 = vld [vmem:[#allocation51_spill] sm:$0xff] }
 0x76b   : > { %8117 = vmatpush3.bf16.msra.mxu0 %v3228_v1  ;;  %v11367_v1 = vadd.f32 %v11174_v34, %v14043_v11  ;;  %v14046_v34 = vld [vmem:[#allocation45_spill] sm:$0xff] }
 0x76c   : > { %3636 = vrot.lane.b32.xlu1 %v14012_v52, %s9516_s3  ;;  %8118 = vmatprep.subr.bf16.mxu0 %v3230_v22  ;;  %v11386_v11 = vadd.f32 %v11209_v23, %v14046_v34 }
 0x76d   : > { %v11381_v4 = vpop.permute.xlu0 %3459 }
 0x76f   : > { %3463 = vrot.lane.b32.xlu0 %v14008_v40, %s9516_s3  ;;  %8119 = vmatpush3.bf16.msra.mxu0 %v3230_v22  ;;  %v11377_v22 = vadd.f32 %v11177_v57, %v14045_v62  ;;  %v14048_v57 = vld [vmem:[#allocation46_spill] sm:$0xff] }
 0x770   : > { %8120 = vmatprep.subr.bf16.mxu0 %v3232_v46  ;;  %v11396_v62 = vadd.f32 %v11216_v27, %v14048_v57  ;;  %v14052_v27 = vld [vmem:[#allocation55_spill] sm:$0xff] }
 0x771   : > { %v11398_v53 = vpop.permute.xlu0 %3630  ;;  %v11413_v57 = vadd.f32 %v11218_v14, %v14052_v27  ;;  %v14055_v14 = vld [vmem:[#allocation50_spill] sm:$0xff]  ;;  %v14057_v27 = vld [vmem:[#allocation57_spill] sm:$0xff] }
 0x772   : > { %14049 = vst [vmem:[#allocation15_spill] sm:$0xff] %v11398_v53  ;;  %v11423_v53 = vadd.f32 %v11226_v16, %v14054_v29 }
 0x773   : > { %3465 = vrot.lane.b32.xlu0 %v14013_v63, %s9516_s3  ;;  %8121 = vmatpush3.bf16.msra.mxu0 %v3232_v46  ;;  %v11379_v46 = vpop.permute.xlu1 %3461 }
 0x774   : > { %8562 = vmatprep.subr.msk.bf16.mxu0 %vm1545_vm2, %v11348_v38 }
 0x777   : > { %3435 = vrot.lane.b32.xlu0 %v14039_v25, %s9517_s27  ;;  %v14050_v25 = vld [vmem:[#allocation54_spill] sm:$0xff] }
 0x778   : > { %v11403_v23 = vadd.f32 %v11201_v10, %v14050_v25  ;;  %v14053_v10 = vld [vmem:[#allocation48_spill] sm:$0xff] }
 0x779   : > { %v11418_v25 = vadd.f32 %v11222_v8, %v14053_v10 }
 0x790   : > { %2830 = vmax.xlane.f32.xlu1 %v11358_v60 }
 0x794   : > { %2826 = vmax.xlane.f32.xlu1 %v11363_v0 }
 0x796   : > { %2828 = vmax.xlane.f32.xlu0 %v11367_v1 }
 0x798   : > { %2838 = vmax.xlane.f32.xlu1 %v11372_v54 }
 0x79a   : > { %2824 = vmax.xlane.f32.xlu0 %v11377_v22 }
 0x79c   : > { %v2957_v2 = vpop.xlane.xlu1 %2956  ;;  %2834 = vmax.xlane.f32.xlu1 %v11386_v11 }
 0x79e   : > { %2836 = vmax.xlane.f32.xlu0 %v11391_v12 }
 0x7a0   : > { %2844 = vmax.xlane.f32.xlu1 %v11396_v62  ;;  %v2959_v34 = vpop.xlane.xlu1 %2958 }
 0x7a1   : > { %8874 = vrcp.f32 %v2959_v34  ;;  %v11428_v34 = vadd.f32 %v11224_v7, %v14055_v14  ;;  %v11440_v7 = vadd.f32 %v11230_v28, %v14057_v27  ;;  %v3495_v28 = vsel %vm1545_vm2, %v11336_v3, 0 }
 0x7a2   : > { %2832 = vmax.xlane.f32.xlu0 %v11403_v23  ;;  %v2953_v56 = vpop.xlane.xlu0 %2952 }
 0x7a3   : > { %8876 = vrcp.f32 %v2953_v56  ;;  %v14056_v56 = vld [vmem:[#allocation56_spill] sm:$0xff] }
 0x7a4   : > { %2846 = vmax.xlane.f32.xlu1 %v11408_v31  ;;  %8878 = vrcp.f32 %v2957_v2  ;;  %v11434_v2 = vadd.f32 %v11228_v19, %v14056_v56 }
 0x7a6   : > { %2840 = vmax.xlane.f32.xlu0 %v11413_v57  ;;  %v2955_v59 = vpop.xlane.xlu0 %2954 }
 0x7a7   : > { %8880 = vrcp.f32 %v2955_v59 }
 0x7a8   : > { %2842 = vmax.xlane.f32.xlu1 %v11418_v25 }
 0x7aa   : > { %2848 = vmax.xlane.f32.xlu0 %v11423_v53 }
 0x7ab   : > { %v8875_v8 = vpop.eup %8874 }
 0x7ac   : > { %2852 = vmax.xlane.f32.xlu1 %v11428_v34  ;;  %v3051_v29 = vmul.f32 %v8875_v8, %v11271_v13 }
 0x7ad   : > { %v8877_v59 = vpop.eup %8876 }
 0x7ae   : > { %v8879_v10 = vpop.eup %8878  ;;  %v3048_v14 = vmul.f32 %v8877_v59, %v11274_v21  ;;  %v3501_v21 = vsel %vm1545_vm2, %v11344_v24, 0 }
 0x7af   : > { %v3050_v42 = vmul.f32 %v8879_v10, %v11268_v44 }
 0x7b0   : > { %2854 = vmax.xlane.f32.xlu1 %v11434_v2 }
 0x7b1   : > { %v8881_v16 = vpop.eup %8880  ;;  %v3081_v56 = vpack.c.bf16 %v3051_v29, %v3050_v42  ;;  %v3498_v42 = vsel %vm1545_vm2, %v11332_v41, 0 }
 0x7b2   : > { %v3049_v38 = vmul.f32 %v8881_v16, %v11277_v18 }
 0x7b4   : > { %2850 = vmax.xlane.f32.xlu1 %v11440_v7  ;;  %v3080_v19 = vpack.c.bf16 %v3049_v38, %v3048_v14  ;;  %v3504_v38 = vsel %vm1545_vm2, %v11381_v4, 0 }
 0x7b6   : > { %8090 = vmatprep.mubr.bf16.mxu1 %v3080_v19 }
 0x7b7   : > { %8091 = vmatmul.mubr.bf16.vlgmr.msra.gmra.mrb[32].mxu1 %v3081_v56 }
 0x7b8   : > { %8139 = vmatpush3.bf16.xpose.msra.mxu1 %v3492_v55 }
 0x7b9   : > { %8555 = vmatprep.subr.msk.bf16.mxu1 %vm1545_vm2, %v11336_v3 }
 0x7c0   : > { %8141 = vmatpush3.bf16.xpose.msra.mxu1 %v3495_v28  ;;  %3638 = vrot.lane.b32.xlu0 %v10320_v5, %s9516_s3 }
 0x7c1   : > { %8556 = vmatprep.subr.msk.bf16.mxu1 %vm1545_vm2, %v11332_v41 }
 0x7c5   : > { %3640 = vrot.lane.b32.xlu1 %v10345_v32, %s9516_s3 }
 0x7c8   : > { %8143 = vmatpush3.bf16.xpose.msra.mxu1 %v3498_v42  ;;  %v2963_v55 = vpop.xlane.xlu1 %2962  ;;  %v3507_v42 = vsel %vm1545_vm2, %v11379_v46, 0 }
 0x7c9   : > { %8557 = vmatprep.subr.msk.bf16.mxu1 %vm1545_vm2, %v11344_v24  ;;  %8882 = vrcp.f32 %v2963_v55 }
 0x7ca   : > { %v2965_v44 = vpop.xlane.xlu0 %2964 }
 0x7ce   : > { %v2961_v13 = vpop.xlane.xlu0 %2960 }
 0x7cf   : > { %8884 = vrcp.f32 %v2961_v13 }
 0x7d0   : > { %8145 = vmatpush3.bf16.xpose.msra.mxu1 %v3501_v21  ;;  %8886 = vrcp.f32 %v2965_v44  ;;  %v2971_v36 = vpop.xlane.xlu1 %2970 }
 0x7d1   : > { %8558 = vmatprep.subr.msk.bf16.mxu1 %vm1545_vm2, %v11381_v4 }
 0x7d2   : > { %v2967_v18 = vpop.xlane.xlu0 %2966 }
 0x7d3   : > { %8888 = vrcp.f32 %v2967_v18  ;;  %v8883_v3 = vpop.eup %8882 }
 0x7d4   : > { %8890 = vrcp.f32 %v2971_v36  ;;  %v3053_v14 = vmul.f32 %v8883_v3, %v11286_v58 }
 0x7d6   : > { %v2973_v41 = vpop.xlane.xlu0 %2972  ;;  %v2977_v28 = vpop.xlane.xlu1 %2976 }
 0x7d8   : > { %8147 = vmatpush3.bf16.xpose.msra.mxu1 %v3504_v38 }
 0x7d9   : > { %v8885_v29 = vpop.eup %8884  ;;  %8559 = vmatprep.subr.msk.bf16.mxu1 %vm1545_vm2, %v11379_v46 }
 0x7da   : > { %v2969_v24 = vpop.xlane.xlu0 %2968  ;;  %v3052_v10 = vmul.f32 %v8885_v29, %v11295_v48  ;;  %v8887_v8 = vpop.eup %8886 }
 0x7db   : > { %8892 = vrcp.f32 %v2969_v24  ;;  %v3054_v4 = vmul.f32 %v8887_v8, %v11291_v15 }
 0x7dc   : > { %v3082_v56 = vpack.c.bf16 %v3053_v14, %v3052_v10  ;;  %8894 = vrcp.f32 %v2973_v41  ;;  %v2983_v44 = vpop.xlane.xlu1 %2982 }
 0x7dd   : > { %v8889_v59 = vpop.eup %8888 }
 0x7de   : > { %8094 = vmatprep.mubr.bf16.mxu1 %v3082_v56  ;;  %v2975_v16 = vpop.xlane.xlu0 %2974  ;;  %v3055_v19 = vmul.f32 %v8889_v59, %v11303_v43  ;;  %v8891_v55 = vpop.eup %8890 }
 0x7df   : > { %8896 = vrcp.f32 %v2975_v16  ;;  %v3057_v43 = vmul.f32 %v8891_v55, %v11299_v49 }
 0x7e0   : > { %8149 = vmatpush3.bf16.xpose.msra.mxu1 %v3507_v42  ;;  %v3083_v48 = vpack.c.bf16 %v3055_v19, %v3054_v4  ;;  %v11484_v59 = vpop.permute.xlu1 %3632 }
 0x7e2   : > { %8095 = vmatmul.mubr.bf16.gmra.mrb[36].mxu1 %v3083_v48  ;;  %v2981_v58 = vpop.xlane.xlu0 %2980 }
 0x7e3   : > { %8898 = vrcp.f32 %v2981_v58 }
 0x7e4   : > { %8900 = vrcp.f32 %v2977_v28  ;;  %v11490_v48 = vpop.permute.xlu1 %3634 }
 0x7e5   : > { %v8893_v13 = vpop.eup %8892  ;;  %8902 = vrcp.f32 %v2983_v44 }
 0x7e6   : > { %v2979_v21 = vpop.xlane.xlu0 %2978  ;;  %v3056_v15 = vmul.f32 %v8893_v13, %v11313_v61  ;;  %v8895_v18 = vpop.eup %8894 }
 0x7e7   : > { %8904 = vrcp.f32 %v2979_v21  ;;  %v3058_v3 = vmul.f32 %v8895_v18, %v11307_v51 }
 0x7e8   : > { %v3084_v36 = vpack.c.bf16 %v3057_v43, %v3056_v15 }
 0x7e9   : > { %v8897_v41 = vpop.eup %8896 }
 0x7ea   : > { %8098 = vmatprep.mubr.bf16.mxu1 %v3084_v36  ;;  %v3464_v46 = vpop.permute.xlu0 %3463  ;;  %v3059_v38 = vmul.f32 %v8897_v41, %v11321_v6 }
 0x7eb   : > { %8560 = vmatprep.subr.msk.bf16.mxu1 %vm1545_vm2, %v3464_v46  ;;  %v3510_v29 = vsel %vm1545_vm2, %v3464_v46, 0 }
 0x7ec   : > { %8151 = vmatpush3.bf16.xpose.msra.mxu1 %v3510_v29  ;;  %v3085_v24 = vpack.c.bf16 %v3059_v38, %v3058_v3 }
 0x7ed   : > { %v8899_v10 = vpop.eup %8898 }
 0x7ee   : > { %8099 = vmatmul.mubr.bf16.gmra.mrb[40].mxu1 %v3085_v24  ;;  %v3466_v61 = vpop.permute.xlu0 %3465  ;;  %v8901_v49 = vpop.eup %8900  ;;  %v3062_v56 = vmul.f32 %v8899_v10, %v11324_v33 }
 0x7ef   : > { %8561 = vmatprep.subr.msk.bf16.mxu1 %vm1545_vm2, %v3466_v61  ;;  %v8903_v14 = vpop.eup %8902  ;;  %v3060_v51 = vmul.f32 %v8901_v49, %v11309_v47  ;;  %v3513_v16 = vsel %vm1545_vm2, %v3466_v61, 0  ;;  %v3438_v33 = vpop.permute.xlu1 %3437 }
 0x7f0   : > { %v3063_v4 = vmul.f32 %v8903_v14, %v11316_v20 }
 0x7f1   : > { %v8905_v8 = vpop.eup %8904 }
 0x7f2   : > { %v3061_v6 = vmul.f32 %v8905_v8, %v11327_v9  ;;  %v3087_v28 = vpack.c.bf16 %v3063_v4, %v3062_v56  ;;  %v3436_v42 = vpop.permute.xlu0 %3435 }
 0x7f3   : > { %v11494_v47 = vpop.permute.xlu1 %3636 }
 0x7f4   : > { %8153 = vmatpush3.bf16.xpose.msra.mxu1 %v3513_v16  ;;  %v3086_v19 = vpack.c.bf16 %v3061_v6, %v3060_v51 }
 0x7f6   : > { %8102 = vmatprep.mubr.bf16.mxu1 %v3086_v19 }
 0x7f7   : > { %8103 = vmatmul.mubr.bf16.gmra.mrb[44].mxu1 %v3087_v28 }
 0x7f8   : > { %8154 = vmatprep.mubr.msk.bf16.mxu1 %vm1545_vm2, %v3436_v42 }
 0x7ff   : > { %8155 = vmatmul.mubr.msk.bf16.vlgmr.msra.gmra.mrb[48].mxu1 %vm1545_vm2, %v3438_v33 }
 0x81d   : > { %v2831_v9 = vpop.xlane.xlu1 %2830 }
 0x81e   : > { %v2875_v58 = vsub.f32 %v11358_v60, %v2831_v9 }
 0x820   : > { %v2926_v21 = vmul.f32 1.442695, %v2875_v58 }
 0x821   : > { %v2827_v44 = vpop.xlane.xlu1 %2826 }
 0x822   : > { %v2873_v43 = vsub.f32 %v11363_v0, %v2827_v44 }
 0x823   : > { %v2829_v55 = vpop.xlane.xlu0 %2828 }
 0x824   : > { %v2874_v20 = vsub.f32 %v11367_v1, %v2829_v55  ;;  %v2922_v41 = vmul.f32 1.442695, %v2873_v43 }
 0x826   : > { %v2924_v13 = vmul.f32 1.442695, %v2874_v20 }
 0x827   : > { %v2825_v15 = vpop.xlane.xlu0 %2824 }
 0x828   : > { %8906 = vpow2.f32 %v2924_v13  ;;  %v2872_v18 = vsub.f32 %v11377_v22, %v2825_v15  ;;  %v2839_v22 = vpop.xlane.xlu1 %2838 }
 0x829   : > { %8908 = vpow2.f32 %v2926_v21  ;;  %v2879_v6 = vsub.f32 %v11372_v54, %v2839_v22 }
 0x82a   : > { %v2920_v36 = vmul.f32 1.442695, %v2872_v18 }
 0x82b   : > { %v2837_v24 = vpop.xlane.xlu0 %2836  ;;  %v2934_v42 = vmul.f32 1.442695, %v2879_v6 }
 0x82c   : > { %8910 = vpow2.f32 %v2920_v36  ;;  %v2835_v3 = vpop.xlane.xlu1 %2834  ;;  %v2878_v61 = vsub.f32 %v11391_v12, %v2837_v24 }
 0x82d   : > { %8912 = vpow2.f32 %v2922_v41  ;;  %v2877_v14 = vsub.f32 %v11386_v11, %v2835_v3 }
 0x82e   : > { %v2932_v8 = vmul.f32 1.442695, %v2878_v61 }
 0x82f   : > { %v2833_v49 = vpop.xlane.xlu0 %2832  ;;  %v2930_v16 = vmul.f32 1.442695, %v2877_v14 }
 0x830   : > { %v2845_v38 = vpop.xlane.xlu1 %2844  ;;  %v2876_v56 = vsub.f32 %v11403_v23, %v2833_v49  ;;  %8914 = vpow2.f32 %v2932_v8 }
 0x831   : > { %v2882_v4 = vsub.f32 %v11396_v62, %v2845_v38  ;;  %8916 = vpow2.f32 %v2930_v16 }
 0x832   : > { %v11500_v46 = vpop.eup %8906  ;;  %v2928_v19 = vmul.f32 1.442695, %v2876_v56  ;;  %v14075_v56 = vld [vmem:[#allocation26_spill] sm:$0xff] }
 0x833   : > { %2988 = vadd.xlane.f32.xlu1 %v11500_v46  ;;  %v11503_v60 = vpop.eup %8908  ;;  %v2841_v28 = vpop.xlane.xlu0 %2840  ;;  %v2940_v9 = vmul.f32 1.442695, %v2882_v4 }
 0x834   : > { %v2847_v29 = vpop.xlane.xlu1 %2846  ;;  %v2880_v33 = vsub.f32 %v11413_v57, %v2841_v28  ;;  %8918 = vpow2.f32 %v2928_v19 }
 0x835   : > { %8920 = vpow2.f32 %v2934_v42  ;;  %v2883_v23 = vsub.f32 %v11408_v31, %v2847_v29 }
 0x836   : > { %v11505_v1 = vpop.eup %8910  ;;  %v2936_v58 = vmul.f32 1.442695, %v2880_v33  ;;  %8922 = vpow2.f32 %v2940_v9 }
 0x837   : > { %2990 = vadd.xlane.f32.xlu1 %v11503_v60  ;;  %2984 = vadd.xlane.f32.xlu0 %v11505_v1  ;;  %v11509_v0 = vpop.eup %8912  ;;  %v2849_v55 = vpop.xlane.xlu0 %2848  ;;  %v2942_v13 = vmul.f32 1.442695, %v2883_v23 }
 0x838   : > { %v2843_v10 = vpop.xlane.xlu1 %2842  ;;  %8924 = vpow2.f32 %v2936_v58  ;;  %v2884_v57 = vsub.f32 %v11423_v53, %v2849_v55 }
 0x839   : > { %v2881_v11 = vsub.f32 %v11418_v25, %v2843_v10 }
 0x83a   : > { %v11525_v44 = vpop.eup %8914  ;;  %v2944_v43 = vmul.f32 1.442695, %v2884_v57 }
 0x83b   : > { %2986 = vadd.xlane.f32.xlu1 %v11509_v0  ;;  %v2938_v54 = vmul.f32 1.442695, %v2881_v11  ;;  %v11530_v31 = vpop.eup %8916  ;;  %v11616_v9 = vpop.permute.xlu0 %3638 }
 0x83c   : > { %v2853_v51 = vpop.xlane.xlu1 %2852 }
 0x83d   : > { %v2886_v62 = vsub.f32 %v11428_v34, %v2853_v51  ;;  %8926 = vpow2.f32 %v2938_v54  ;;  %v14062_v51 = vld [vmem:[#allocation19_spill] sm:$0xff] }
 0x83e   : > { %v11532_v15 = vpop.eup %8918  ;;  %8928 = vpow2.f32 %v2942_v13 }
 0x83f   : > { %v2948_v25 = vmul.f32 1.442695, %v2886_v62  ;;  %v11537_v18 = vpop.eup %8920 }
 0x840   : > { %v2855_v12 = vpop.xlane.xlu1 %2854  ;;  %v11539_v36 = vpop.eup %8922 }
 0x841   : > { %8930 = vpow2.f32 %v2948_v25  ;;  %v2887_v34 = vsub.f32 %v11434_v2, %v2855_v12 }
 0x842   : > { %8932 = vpow2.f32 %v2944_v43  ;;  %v11543_v41 = vpop.eup %8924 }
 0x844   : > { %v2851_v20 = vpop.xlane.xlu1 %2850 }
 0x845   : > { %v2885_v21 = vsub.f32 %v11440_v7, %v2851_v20  ;;  %v2950_v7 = vmul.f32 1.442695, %v2887_v34 }
 0x847   : > { %v2946_v53 = vmul.f32 1.442695, %v2885_v21  ;;  %v11545_v22 = vpop.eup %8926 }
 0x848   : > { %v11549_v2 = vpop.eup %8928  ;;  %v11614_v33 = vpop.permute.xlu1 %3640 }
 0x849   : > { %8934 = vpow2.f32 %v2946_v53 }
 0x84a   : > { %8936 = vpow2.f32 %v2950_v7  ;;  %v14076_v7 = vld [vmem:[#allocation25_spill] sm:$0xff] }
 0x84b   : > { %v11551_v3 = vpop.eup %8930 }
 0x84c   : > { %3612 = vrot.lane.b32.xlu1 %v10296_v37, %s9517_s27  ;;  %v11555_v38 = vpop.eup %8932 }
 0x84d   : > { %3642 = vrot.lane.b32.xlu0 %v14005_v30, %s9516_s3 }
 0x853   : > { %v11557_v29 = vpop.eup %8934 }
 0x854   : > { %v11561_v24 = vpop.eup %8936 }
 0x86c   : > { %2996 = vadd.xlane.f32.xlu0 %v11525_v44 }
 0x870   : > { %2994 = vadd.xlane.f32.xlu0 %v11530_v31  ;;  %2992 = vadd.xlane.f32.xlu1 %v11532_v15 }
 0x874   : > { %3004 = vadd.xlane.f32.xlu0 %v11539_v36  ;;  %2998 = vadd.xlane.f32.xlu1 %v11537_v18 }
 0x878   : > { %3002 = vadd.xlane.f32.xlu0 %v11545_v22  ;;  %3000 = vadd.xlane.f32.xlu1 %v11543_v41 }
 0x87c   : > { %3012 = vadd.xlane.f32.xlu0 %v11551_v3  ;;  %3006 = vadd.xlane.f32.xlu1 %v11549_v2 }
 0x880   : > { %3010 = vadd.xlane.f32.xlu0 %v11557_v29  ;;  %3008 = vadd.xlane.f32.xlu1 %v11555_v38 }
 0x884   : > { %3014 = vadd.xlane.f32.xlu1 %v11561_v24 }
 0x88a   : > { %v11564_v10 = vpop.f32.mrb[32].mxu1 }
 0x88b   : > { %14058 = vst [vmem:[#allocation18_spill] sm:$0xff] %v11564_v10  ;;  %v11566_v61 = vpop.f32.mrb[33].mxu1 }
 0x88c   : > { %14059 = vst [vmem:[#allocation17_spill] sm:$0xff] %v11566_v61  ;;  %v11568_v49 = vpop.f32.mrb[34].mxu1 }
 0x88d   : > { %14060 = vst [vmem:[#allocation20_spill] sm:$0xff] %v11568_v49  ;;  %v11572_v8 = vpop.f32.mrb[35].mxu1 }
 0x88e   : > { %14061 = vst [vmem:[#allocation14_spill] sm:$0xff] %v11572_v8 }
 0x895   : > { %3439 = vrot.lane.b32.xlu1 %v10260_v50, %s9517_s27 }
 0x896   : > { %3614 = vrot.lane.b32.xlu0 %v14007_v45, %s9517_s27 }
 0x899   : > { %3443 = vrot.lane.b32.xlu1 %v14006_v35, %s9517_s27 }
 0x89a   : > { %3441 = vrot.lane.b32.xlu0 %v14009_v17, %s9517_s27 }
 0x89d   : > { %3447 = vrot.lane.b32.xlu1 %v14008_v40, %s9517_s27 }
 0x89e   : > { %3445 = vrot.lane.b32.xlu0 %v14011_v26, %s9517_s27 }
 0x8a1   : > { %3616 = vrot.lane.b32.xlu1 %v14010_v39, %s9517_s27 }
 0x8a2   : > { %3449 = vrot.lane.b32.xlu0 %v14013_v63, %s9517_s27 }
 0x8a5   : > { %3620 = vrot.lane.b32.xlu1 %v14012_v52, %s9517_s27 }
 0x8a6   : > { %3618 = vrot.lane.b32.xlu0 %v14062_v51, %s9517_s27 }
 0x8a9   : > { %3624 = vrot.lane.b32.xlu1 %v10345_v32, %s9517_s27 }
 0x8aa   : > { %3622 = vrot.lane.b32.xlu0 %v10320_v5, %s9517_s27 }
 0x8ae   : > { %3626 = vrot.lane.b32.xlu0 %v14005_v30, %s9517_s27 }
 0x8b5   : > { %v11602_v6 = vpop.f32.mrb[36].mxu1 }
 0x8b6   : > { %14063 = vst [vmem:[#allocation21_spill] sm:$0xff] %v11602_v6  ;;  %v11604_v16 = vpop.f32.mrb[37].mxu1 }
 0x8b7   : > { %14064 = vst [vmem:[#allocation16_spill] sm:$0xff] %v11604_v16  ;;  %v11606_v4 = vpop.f32.mrb[38].mxu1  ;;  %v14109_v16 = vld [vmem:[#allocation10_spill] sm:$0xff] }
 0x8b8   : > { %14065 = vst [vmem:[#allocation60_spill] sm:$0xff] %v11606_v4  ;;  %v11610_v28 = vpop.f32.mrb[39].mxu1 }
 0x8b9   : > { %14066 = vst [vmem:[#allocation59_spill] sm:$0xff] %v11610_v28 }
 0x8c0   : > { %v2989_v12 = vpop.xlane.xlu1 %2988 }
 0x8c1   : > { %v11618_v11 = vpop.f32.mrb[40].mxu1 }
 0x8c2   : > { %14067 = vst [vmem:[#allocation61_spill] sm:$0xff] %v11618_v11  ;;  %v11620_v23 = vpop.f32.mrb[41].mxu1 }
 0x8c3   : > { %14068 = vst [vmem:[#allocation23_spill] sm:$0xff] %v11620_v23  ;;  %v11622_v58 = vpop.f32.mrb[42].mxu1 }
 0x8c4   : > { %14069 = vst [vmem:[#allocation49_spill] sm:$0xff] %v11622_v58  ;;  %v11626_v55 = vpop.f32.mrb[43].mxu1  ;;  %v2991_v62 = vpop.xlane.xlu1 %2990 }
 0x8c5   : > { %14070 = vst [vmem:[#allocation52_spill] sm:$0xff] %v11626_v55  ;;  %v2985_v13 = vpop.xlane.xlu0 %2984  ;;  %8938 = vrcp.f32 %v2991_v62 }
 0x8c6   : > { %8940 = vrcp.f32 %v2985_v13 }
 0x8c7   : > { %8942 = vrcp.f32 %v2989_v12 }
 0x8c8   : > { %v2987_v57 = vpop.xlane.xlu1 %2986 }
 0x8c9   : > { %8944 = vrcp.f32 %v2987_v57 }
 0x8ca   : > { %v11630_v25 = vpop.f32.mrb[44].mxu1 }
 0x8cb   : > { %14071 = vst [vmem:[#allocation58_spill] sm:$0xff] %v11630_v25  ;;  %v11632_v21 = vpop.f32.mrb[45].mxu1 }
 0x8cc   : > { %14072 = vst [vmem:[#allocation19_spill] sm:$0xff] %v11632_v21  ;;  %v11634_v43 = vpop.f32.mrb[46].mxu1 }
 0x8cd   : > { %14073 = vst [vmem:[#allocation62_spill] sm:$0xff] %v11634_v43  ;;  %v11638_v53 = vpop.f32.mrb[47].mxu1 }
 0x8ce   : > { %14074 = vst [vmem:[#allocation63_spill] sm:$0xff] %v11638_v53 }
 0x8cf   : > { %v8939_v54 = vpop.eup %8938 }
 0x8d0   : > { %v8941_v62 = vpop.eup %8940  ;;  %v3067_v57 = vmul.f32 %v8939_v54, %v11503_v60  ;;  %v14077_v60 = vld [vmem:[#allocation27_spill] sm:$0xff] }
 0x8d1   : > { %v8943_v13 = vpop.eup %8942  ;;  %v3064_v11 = vmul.f32 %v8941_v62, %v11505_v1  ;;  %v14078_v1 = vld [vmem:[#allocation22_spill] sm:$0xff] }
 0x8d2   : > { %v8156_v12 = vpop.f32.mrb[48].mxu1  ;;  %v3066_v25 = vmul.f32 %v8943_v13, %v11500_v46  ;;  %v3684_v13 = vsel %vm1545_vm2, %v11616_v9, 0 }
 0x8d3   : > { %v8945_v19 = vpop.eup %8944  ;;  %v3549_v20 = vpop.f32.mrb[49].mxu1 }
 0x8d4   : > { %v11644_v42 = vadd.f32 %v3549_v20, %v14075_v56  ;;  %v8157_v14 = vpop.f32.mrb[50].mxu1  ;;  %v3065_v34 = vmul.f32 %v8945_v19, %v11509_v0  ;;  %v3089_v53 = vpack.c.bf16 %v3067_v57, %v3066_v25  ;;  %v3669_v0 = vsel %vm1545_vm2, %v14078_v1, 0  ;;  %v14079_v19 = vld [vmem:[#allocation24_spill] sm:$0xff]  ;;  %v14080_v20 = vld [vmem:[#allocation15_spill] sm:$0xff] }
 0x8d5   : > { %v3552_v43 = vpop.f32.mrb[51].mxu1  ;;  %v11654_v54 = vadd.f32 %v8157_v14, %v14077_v60  ;;  %v11660_v46 = vadd.f32 %v8156_v12, %v14079_v19  ;;  %v3672_v14 = vsel %vm1545_vm2, %v14080_v20, 0  ;;  %v3678_v25 = vsel %vm1545_vm2, %v11490_v48, 0 }
 0x8d6   : > { %v11650_v58 = vadd.f32 %v3552_v43, %v14076_v7  ;;  %3789 = vmax.xlane.f32.xlu1 %v11644_v42  ;;  %v3088_v21 = vpack.c.bf16 %v3065_v34, %v3064_v11  ;;  %v3675_v11 = vsel %vm1545_vm2, %v11484_v59, 0  ;;  %v11678_v43 = vpop.permute.xlu1 %3612  ;;  %v3681_v34 = vsel %vm1545_vm2, %v11494_v47, 0 }
 0x8d8   : > { %3791 = vmax.xlane.f32.xlu0 %v11650_v58  ;;  %8122 = vmatprep.mubr.bf16.mxu0 %v3088_v21  ;;  %v3643_v21 = vpop.permute.xlu0 %3642 }
 0x8d9   : > { %8123 = vmatmul.mubr.bf16.vlgmr.msra.gmra.mrb[96].mxu0 %v3089_v53 }
 0x8da   : > { %8171 = vmatpush3.bf16.xpose.msra.mxu0 %v3669_v0  ;;  %3795 = vmax.xlane.f32.xlu1 %v11654_v54 }
 0x8db   : > { %8563 = vmatprep.subr.msk.bf16.mxu0 %vm1545_vm2, %v14080_v20 }
 0x8dc   : > { %3793 = vmax.xlane.f32.xlu0 %v11660_v46 }
 0x8e2   : > { %8173 = vmatpush3.bf16.xpose.msra.mxu0 %v3672_v14  ;;  %v3687_v14 = vsel %vm1545_vm2, %v11614_v33, 0 }
 0x8e3   : > { %8564 = vmatprep.subr.msk.bf16.mxu0 %vm1545_vm2, %v11484_v59 }
 0x8ea   : > { %8175 = vmatpush3.bf16.xpose.msra.mxu0 %v3675_v11 }
 0x8eb   : > { %8565 = vmatprep.subr.msk.bf16.mxu0 %vm1545_vm2, %v11490_v48 }
 0x8f2   : > { %8177 = vmatpush3.bf16.xpose.msra.mxu0 %v3678_v25 }
 0x8f3   : > { %8566 = vmatprep.subr.msk.bf16.mxu0 %vm1545_vm2, %v11494_v47 }
 0x8f9   : > { %v2997_v53 = vpop.xlane.xlu0 %2996 }
 0x8fa   : > { %8179 = vmatpush3.bf16.xpose.msra.mxu0 %v3681_v34 }
 0x8fb   : > { %8567 = vmatprep.subr.msk.bf16.mxu0 %vm1545_vm2, %v11616_v9 }
 0x8fd   : > { %v2993_v59 = vpop.xlane.xlu1 %2992  ;;  %v2995_v62 = vpop.xlane.xlu0 %2994 }
 0x8fe   : > { %8946 = vrcp.f32 %v2993_v59 }
 0x8ff   : > { %8948 = vrcp.f32 %v2995_v62 }
 0x900   : > { %8950 = vrcp.f32 %v2997_v53 }
 0x901   : > { %v2999_v48 = vpop.xlane.xlu1 %2998  ;;  %v3005_v12 = vpop.xlane.xlu0 %3004 }
 0x902   : > { %8952 = vrcp.f32 %v2999_v48  ;;  %8181 = vmatpush3.bf16.xpose.msra.mxu0 %v3684_v13 }
 0x903   : > { %8568 = vmatprep.subr.msk.bf16.mxu0 %vm1545_vm2, %v11614_v33 }
 0x905   : > { %v3001_v47 = vpop.xlane.xlu1 %3000  ;;  %v3003_v57 = vpop.xlane.xlu0 %3002 }
 0x906   : > { %8954 = vrcp.f32 %v3001_v47 }
 0x907   : > { %8956 = vrcp.f32 %v3003_v57 }
 0x908   : > { %v8947_v1 = vpop.eup %8946  ;;  %8958 = vrcp.f32 %v3005_v12 }
 0x909   : > { %v8949_v0 = vpop.eup %8948  ;;  %v3007_v20 = vpop.xlane.xlu1 %3006  ;;  %v3068_v9 = vmul.f32 %v8947_v1, %v11532_v15 }
 0x90a   : > { %v3013_v11 = vpop.xlane.xlu0 %3012  ;;  %v8951_v25 = vpop.eup %8950  ;;  %8960 = vrcp.f32 %v3007_v20  ;;  %8183 = vmatpush3.bf16.xpose.msra.mxu0 %v3687_v14  ;;  %v3069_v34 = vmul.f32 %v8949_v0, %v11530_v31  ;;  %v3690_v31 = vsel %vm1545_vm2, %v3643_v21, 0 }
 0x90b   : > { %8569 = vmatprep.subr.msk.bf16.mxu0 %vm1545_vm2, %v3643_v21  ;;  %v3070_v13 = vmul.f32 %v8951_v25, %v11525_v44 }
 0x90c   : > { %v8953_v53 = vpop.eup %8952  ;;  %v3090_v59 = vpack.c.bf16 %v3069_v34, %v3068_v9 }
 0x90d   : > { %v3009_v62 = vpop.xlane.xlu1 %3008  ;;  %v3071_v12 = vmul.f32 %v8953_v53, %v11537_v18 }
 0x90e   : > { %v3011_v48 = vpop.xlane.xlu0 %3010  ;;  %8962 = vrcp.f32 %v3009_v62  ;;  %8126 = vmatprep.mubr.bf16.mxu0 %v3090_v59 }
 0x90f   : > { %8964 = vrcp.f32 %v3011_v48  ;;  %v3091_v33 = vpack.c.bf16 %v3071_v12, %v3070_v13 }
 0x910   : > { %v8955_v15 = vpop.eup %8954  ;;  %8966 = vrcp.f32 %v3013_v11 }
 0x911   : > { %v8957_v47 = vpop.eup %8956  ;;  %v3015_v57 = vpop.xlane.xlu1 %3014  ;;  %8127 = vmatmul.mubr.bf16.gmra.mrb[100].mxu0 %v3091_v33  ;;  %v3072_v0 = vmul.f32 %v8955_v15, %v11543_v41 }
 0x912   : > { %v3615_v1 = vpop.permute.xlu0 %3614  ;;  %v8959_v20 = vpop.eup %8958  ;;  %8968 = vrcp.f32 %v3015_v57  ;;  %8185 = vmatpush3.bf16.xpose.msra.mxu0 %v3690_v31  ;;  %v3073_v44 = vmul.f32 %v8957_v47, %v11545_v22 }
 0x913   : > { %v3074_v34 = vmul.f32 %v8959_v20, %v11539_v36 }
 0x914   : > { %v8961_v18 = vpop.eup %8960  ;;  %v3092_v14 = vpack.c.bf16 %v3073_v44, %v3072_v0 }
 0x915   : > { %v3440_v9 = vpop.permute.xlu1 %3439  ;;  %v3075_v11 = vmul.f32 %v8961_v18, %v11549_v2 }
 0x916   : > { %v3442_v25 = vpop.permute.xlu0 %3441  ;;  %8130 = vmatprep.mubr.bf16.mxu0 %v3092_v14  ;;  %8158 = vmatprep.mubr.msk.bf16.mxu1 %vm1545_vm2, %v3440_v9  ;;  %v14100_v14 = vld [vmem:[#allocation34_spill] sm:$0xff] }
 0x917   : > { %8159 = vmatmul.mubr.msk.bf16.gmra.mrb[52].mxu1 %vm1545_vm2, %v3442_v25  ;;  %v3093_v21 = vpack.c.bf16 %v3075_v11, %v3074_v34 }
 0x918   : > { %v8963_v41 = vpop.eup %8962 }
 0x919   : > { %v8965_v53 = vpop.eup %8964  ;;  %v3444_v59 = vpop.permute.xlu1 %3443  ;;  %8131 = vmatmul.mubr.bf16.gmra.mrb[104].mxu0 %v3093_v21  ;;  %v3076_v22 = vmul.f32 %v8963_v41, %v11555_v38 }
 0x91a   : > { %v8967_v62 = vpop.eup %8966  ;;  %8162 = vmatprep.mubr.msk.bf16.mxu1 %vm1545_vm2, %v3444_v59  ;;  %v3077_v48 = vmul.f32 %v8965_v53, %v11557_v29  ;;  %v3446_v33 = vpop.permute.xlu0 %3445 }
 0x91b   : > { %v3078_v2 = vmul.f32 %v8967_v62, %v11551_v3 }
 0x91c   : > { %v8969_v36 = vpop.eup %8968  ;;  %v3094_v13 = vpack.c.bf16 %v3077_v48, %v3076_v22  ;;  %v14089_v22 = vld [vmem:[#allocation31_spill] sm:$0xff] }
 0x91d   : > { %v3079_v12 = vmul.f32 %v8969_v36, %v11561_v24  ;;  %v3448_v15 = vpop.permute.xlu1 %3447 }
 0x91e   : > { %8134 = vmatprep.mubr.bf16.mxu0 %v3094_v13  ;;  %v3450_v38 = vpop.permute.xlu0 %3449 }
 0x91f   : > { %8163 = vmatmul.mubr.msk.bf16.gmra.mrb[56].mxu1 %vm1545_vm2, %v3446_v33  ;;  %v3095_v47 = vpack.c.bf16 %v3079_v12, %v3078_v2  ;;  %v14092_v12 = vld [vmem:[#allocation30_spill] sm:$0xff] }
 0x920   : > { %8166 = vmatprep.mubr.msk.bf16.mxu1 %vm1545_vm2, %v3448_v15 }
 0x921   : > { %8135 = vmatmul.mubr.bf16.gmra.mrb[108].mxu0 %v3095_v47  ;;  %v3617_v29 = vpop.permute.xlu1 %3616 }
 0x922   : > { %8186 = vmatprep.mubr.msk.bf16.mxu0 %vm1545_vm2, %v11678_v43  ;;  %v3619_v3 = vpop.permute.xlu0 %3618 }
 0x925   : > { %v3621_v24 = vpop.permute.xlu1 %3620 }
 0x926   : > { %v3623_v57 = vpop.permute.xlu0 %3622 }
 0x927   : > { %8167 = vmatmul.mubr.msk.bf16.gmra.mrb[60].mxu1 %vm1545_vm2, %v3450_v38 }
 0x929   : > { %8187 = vmatmul.mubr.msk.bf16.vlgmr.msra.gmra.mrb[112].mxu0 %vm1545_vm2, %v3615_v1  ;;  %v3625_v31 = vpop.permute.xlu1 %3624 }
 0x92a   : > { %8190 = vmatprep.mubr.msk.bf16.mxu0 %vm1545_vm2, %v3617_v29  ;;  %v3627_v43 = vpop.permute.xlu0 %3626  ;;  %v14095_v29 = vld [vmem:[#allocation29_spill] sm:$0xff] }
 0x931   : > { %8191 = vmatmul.mubr.msk.bf16.gmra.mrb[116].mxu0 %vm1545_vm2, %v3619_v3 }
 0x932   : > { %8194 = vmatprep.mubr.msk.bf16.mxu0 %vm1545_vm2, %v3621_v24 }
 0x939   : > { %8195 = vmatmul.mubr.msk.bf16.gmra.mrb[120].mxu0 %vm1545_vm2, %v3623_v57  ;;  %v14096_v57 = vld [vmem:[#allocation28_spill] sm:$0xff] }
 0x93a   : > { %8198 = vmatprep.mubr.msk.bf16.mxu0 %vm1545_vm2, %v3625_v31 }
 0x941   : > { %8199 = vmatmul.mubr.msk.bf16.gmra.mrb[124].mxu0 %vm1545_vm2, %v3627_v43 }
 0x9ac   : > { %v11719_v0 = vpop.f32.mrb[96].mxu0 }
 0x9ad   : > { %14081 = vst [vmem:[#allocation22_spill] sm:$0xff] %v11719_v0  ;;  %v11721_v1 = vpop.f32.mrb[97].mxu0  ;;  %v14108_v0 = vld [vmem:[#allocation36_spill] sm:$0xff] }
 0x9ae   : > { %14082 = vst [vmem:[#allocation15_spill] sm:$0xff] %v11721_v1  ;;  %v11723_v20 = vpop.f32.mrb[98].mxu0 }
 0x9af   : > { %14083 = vst [vmem:[#allocation64_spill] sm:$0xff] %v11723_v20  ;;  %v11727_v18 = vpop.f32.mrb[99].mxu0 }
 0x9b0   : > { %14084 = vst [vmem:[#allocation65_spill] sm:$0xff] %v11727_v18  ;;  %v14107_v18 = vld [vmem:[#allocation37_spill] sm:$0xff] }
 0x9e4   : > { %v11731_v9 = vpop.f32.mrb[100].mxu0 }
 0x9e5   : > { %14085 = vst [vmem:[#allocation66_spill] sm:$0xff] %v11731_v9  ;;  %v11733_v25 = vpop.f32.mrb[101].mxu0 }
 0x9e6   : > { %14086 = vst [vmem:[#allocation67_spill] sm:$0xff] %v11733_v25  ;;  %v11735_v34 = vpop.f32.mrb[102].mxu0  ;;  %v14104_v25 = vld [vmem:[#allocation32_spill] sm:$0xff] }
 0x9e7   : > { %14087 = vst [vmem:[#allocation68_spill] sm:$0xff] %v11735_v34  ;;  %v11739_v21 = vpop.f32.mrb[103].mxu0  ;;  %v14105_v34 = vld [vmem:[#allocation39_spill] sm:$0xff] }
 0x9e8   : > { %14088 = vst [vmem:[#allocation69_spill] sm:$0xff] %v11739_v21 }
 0x9ea   : > { %v8160_v53 = vpop.f32.mrb[52].mxu1 }
 0x9eb   : > { %v3565_v59 = vpop.f32.mrb[53].mxu1  ;;  %v11761_v3 = vadd.f32 %v8160_v53, %v14095_v29 }
 0x9ec   : > { %v11744_v62 = vadd.f32 %v3565_v59, %v14089_v22  ;;  %v11746_v48 = vpop.f32.mrb[104].mxu0  ;;  %v8161_v36 = vpop.f32.mrb[54].mxu1 }
 0x9ed   : > { %14090 = vst [vmem:[#allocation70_spill] sm:$0xff] %v11746_v48  ;;  %v11748_v13 = vpop.f32.mrb[105].mxu0  ;;  %v3568_v2 = vpop.f32.mrb[55].mxu1  ;;  %v11767_v31 = vadd.f32 %v8161_v36, %v14096_v57 }
 0x9ee   : > { %14091 = vst [vmem:[#allocation71_spill] sm:$0xff] %v11748_v13  ;;  %v11751_v33 = vadd.f32 %v3568_v2, %v14092_v12  ;;  %v11753_v15 = vpop.f32.mrb[106].mxu0  ;;  %3797 = vmax.xlane.f32.xlu0 %v11744_v62  ;;  %v14097_v2 = vld [vmem:[#allocation35_spill] sm:$0xff] }
 0x9ef   : > { %14093 = vst [vmem:[#allocation72_spill] sm:$0xff] %v11753_v15  ;;  %v11758_v38 = vpop.f32.mrb[107].mxu0  ;;  %v14106_v15 = vld [vmem:[#allocation38_spill] sm:$0xff] }
 0x9f0   : > { %14094 = vst [vmem:[#allocation73_spill] sm:$0xff] %v11758_v38  ;;  %3799 = vmax.xlane.f32.xlu1 %v11751_v33  ;;  %v14103_v38 = vld [vmem:[#allocation33_spill] sm:$0xff] }
 0x9f2   : > { %3801 = vmax.xlane.f32.xlu0 %v11761_v3  ;;  %v8164_v43 = vpop.f32.mrb[56].mxu1 }
 0x9f3   : > { %v3581_v59 = vpop.f32.mrb[57].mxu1  ;;  %v11789_v48 = vadd.f32 %v8164_v43, %v14103_v38 }
 0x9f4   : > { %v11771_v41 = vadd.f32 %v3581_v59, %v14097_v2  ;;  %v11773_v47 = vpop.f32.mrb[108].mxu0  ;;  %3803 = vmax.xlane.f32.xlu1 %v11767_v31  ;;  %v8165_v53 = vpop.f32.mrb[58].mxu1 }
 0x9f5   : > { %14098 = vst [vmem:[#allocation74_spill] sm:$0xff] %v11773_v47  ;;  %v11776_v11 = vpop.f32.mrb[109].mxu0  ;;  %v3584_v24 = vpop.f32.mrb[59].mxu1 }
 0x9f6   : > { %14099 = vst [vmem:[#allocation75_spill] sm:$0xff] %v11776_v11  ;;  %v11779_v44 = vadd.f32 %v3584_v24, %v14100_v14  ;;  %v11781_v36 = vpop.f32.mrb[110].mxu0  ;;  %3805 = vmax.xlane.f32.xlu0 %v11771_v41  ;;  %v11795_v24 = vadd.f32 %v8165_v53, %v14104_v25 }
 0x9f7   : > { %14101 = vst [vmem:[#allocation76_spill] sm:$0xff] %v11781_v36  ;;  %v11786_v59 = vpop.f32.mrb[111].mxu0 }
 0x9f8   : > { %14102 = vst [vmem:[#allocation77_spill] sm:$0xff] %v11786_v59  ;;  %3807 = vmax.xlane.f32.xlu1 %v11779_v44 }
 0x9fa   : > { %3809 = vmax.xlane.f32.xlu0 %v11789_v48  ;;  %v8168_v21 = vpop.f32.mrb[60].mxu1 }
 0x9fb   : > { %v3597_v9 = vpop.f32.mrb[61].mxu1 }
 0x9fc   : > { %v11799_v1 = vadd.f32 %v3597_v9, %v14105_v34  ;;  %v11801_v13 = vpop.f32.mrb[112].mxu0  ;;  %3811 = vmax.xlane.f32.xlu1 %v11795_v24  ;;  %v8169_v43 = vpop.f32.mrb[62].mxu1  ;;  %v11815_v9 = vadd.f32 %v8168_v21, %v14107_v18 }
 0x9fd   : > { %v3600_v47 = vpop.f32.mrb[63].mxu1  ;;  %v11804_v36 = vpop.f32.mrb[113].mxu0  ;;  %v11819_v20 = vadd.f32 %v8169_v43, %v14108_v0  ;;  %v14110_v0 = vld [vmem:[#allocation11_spill] sm:$0xff] }
 0x9fe   : > { %v11807_v11 = vadd.f32 %v3600_v47, %v14106_v15  ;;  %v11809_v53 = vpop.f32.mrb[114].mxu0  ;;  %3813 = vmax.xlane.f32.xlu0 %v11799_v1  ;;  %v3792_v18 = vpop.xlane.xlu0 %3791 }
 0x9ff   : > { %v11812_v59 = vpop.f32.mrb[115].mxu0  ;;  %v3790_v15 = vpop.xlane.xlu1 %3789  ;;  %v3854_v22 = vsub.f32 %v11650_v58, %v3792_v18 }
 0xa00   : > { %3815 = vmax.xlane.f32.xlu1 %v11807_v11  ;;  %v3853_v57 = vsub.f32 %v11644_v42, %v3790_v15 }
 0xa01   : > { %v3887_v19 = vmul.f32 1.442695, %v3854_v22 }
 0xa02   : > { %3817 = vmax.xlane.f32.xlu0 %v11815_v9  ;;  %v3794_v34 = vpop.xlane.xlu0 %3793  ;;  %v3885_v12 = vmul.f32 1.442695, %v3853_v57 }
 0xa03   : > { %v3855_v25 = vsub.f32 %v11660_v46, %v3794_v34  ;;  %v3796_v38 = vpop.xlane.xlu1 %3795 }
 0xa04   : > { %3819 = vmax.xlane.f32.xlu1 %v11819_v20  ;;  %v11823_v47 = vpop.f32.mrb[116].mxu0  ;;  %v3856_v14 = vsub.f32 %v11654_v54, %v3796_v38 }
 0xa05   : > { %v11825_v6 = vpop.f32.mrb[117].mxu0  ;;  %v3889_v2 = vmul.f32 1.442695, %v3855_v25 }
 0xa06   : > { %v11827_v4 = vpop.f32.mrb[118].mxu0  ;;  %v3891_v29 = vmul.f32 1.442695, %v3856_v14 }
 0xa07   : > { %v11829_v23 = vpop.f32.mrb[119].mxu0  ;;  %8970 = vpow2.f32 %v3889_v2 }
 0xa08   : > { %8972 = vpow2.f32 %v3891_v29 }
 0xa09   : > { %8974 = vpow2.f32 %v3885_v12 }
 0xa0a   : > { %8976 = vpow2.f32 %v3887_v19 }
 0xa0c   : > { %v11831_v55 = vpop.f32.mrb[120].mxu0 }
 0xa0d   : > { %v11833_v21 = vpop.f32.mrb[121].mxu0 }
 0xa0e   : > { %v11835_v61 = vpop.f32.mrb[122].mxu0 }
 0xa0f   : > { %v11837_v43 = vpop.f32.mrb[123].mxu0 }
 0xa11   : > { %v11875_v60 = vpop.eup %8970 }
 0xa12   : > { %v11878_v46 = vpop.eup %8972 }
 0xa13   : > { %v11881_v54 = vpop.eup %8974 }
 0xa14   : > { %v11839_v8 = vpop.f32.mrb[124].mxu0  ;;  %v11884_v42 = vpop.eup %8976 }
 0xa15   : > { %4095 = vrot.lane.b32.xlu1 %v14109_v16, %s9518_s16  ;;  %v11842_v28 = vpop.f32.mrb[125].mxu0 }
 0xa16   : > { %v11844_v10 = vpop.f32.mrb[126].mxu0 }
 0xa17   : > { %v11846_v49 = vpop.f32.mrb[127].mxu0 }
 0xa18   : > { %4093 = vrot.lane.b32.xlu0 %v14110_v0, %s9518_s16 }
 0xa19   : > { %4099 = vrot.lane.b32.xlu1 %v14009_v17, %s9518_s16 }
 0xa1c   : > { %4097 = vrot.lane.b32.xlu0 %v10260_v50, %s9518_s16 }
 0xa1d   : > { %4214 = vrot.lane.b32.xlu1 %v10296_v37, %s9518_s16 }
 0xa20   : > { %4101 = vrot.lane.b32.xlu0 %v14006_v35, %s9518_s16 }
 0xa21   : > { %4448 = vrot.lane.b32.xlu1 %v14110_v0, %s9519_s30 }
 0xa24   : > { %4103 = vrot.lane.b32.xlu0 %v14011_v26, %s9518_s16 }
 0xa25   : > { %4220 = vrot.lane.b32.xlu1 %v14062_v51, %s9518_s16 }
 0xa28   : > { %4105 = vrot.lane.b32.xlu0 %v14008_v40, %s9518_s16 }
 0xa29   : > { %4224 = vrot.lane.b32.xlu1 %v10320_v5, %s9518_s16 }
 0xa2c   : > { %4107 = vrot.lane.b32.xlu0 %v14013_v63, %s9518_s16 }
 0xa2d   : > { %4452 = vrot.lane.b32.xlu1 %v10260_v50, %s9519_s30 }
 0xa30   : > { %4216 = vrot.lane.b32.xlu0 %v14007_v45, %s9518_s16 }
 0xa31   : > { %4226 = vrot.lane.b32.xlu1 %v10345_v32, %s9518_s16 }
 0xa34   : > { %4218 = vrot.lane.b32.xlu0 %v14010_v39, %s9518_s16 }
 0xa35   : > { %4454 = vrot.lane.b32.xlu1 %v14009_v17, %s9519_s30 }
 0xa38   : > { %4450 = vrot.lane.b32.xlu0 %v14109_v16, %s9519_s30 }
 0xa3c   : > { %4222 = vrot.lane.b32.xlu0 %v14012_v52, %s9518_s16 }
 0xa40   : > { %4228 = vrot.lane.b32.xlu0 %v14005_v30, %s9518_s16 }
 0xa59   : > { %3953 = vadd.xlane.f32.xlu1 %v11875_v60 }
 0xa5d   : > { %3955 = vadd.xlane.f32.xlu1 %v11878_v46 }
 0xa5f   : > { %3949 = vadd.xlane.f32.xlu0 %v11881_v54 }
 0xa63   : > { %3951 = vadd.xlane.f32.xlu0 %v11884_v42 }
 0xa7b   : > { %v3798_v58 = vpop.xlane.xlu0 %3797 }
 0xa7c   : > { %v3857_v19 = vsub.f32 %v11744_v62, %v3798_v58 }
 0xa7d   : > { %v3800_v18 = vpop.xlane.xlu1 %3799 }
 0xa7e   : > { %v3858_v14 = vsub.f32 %v11751_v33, %v3800_v18  ;;  %v3893_v29 = vmul.f32 1.442695, %v3857_v19 }
 0xa7f   : > { %v3802_v25 = vpop.xlane.xlu0 %3801 }
 0xa80   : > { %v3895_v34 = vmul.f32 1.442695, %v3858_v14  ;;  %v3859_v22 = vsub.f32 %v11761_v3, %v3802_v25 }
 0xa81   : > { %v3804_v12 = vpop.xlane.xlu1 %3803 }
 0xa82   : > { %8978 = vpow2.f32 %v3895_v34  ;;  %v3897_v15 = vmul.f32 1.442695, %v3859_v22  ;;  %v3860_v57 = vsub.f32 %v11767_v31, %v3804_v12 }
 0xa83   : > { %v3806_v38 = vpop.xlane.xlu0 %3805 }
 0xa84   : > { %8980 = vpow2.f32 %v3897_v15  ;;  %v3899_v33 = vmul.f32 1.442695, %v3860_v57  ;;  %v3861_v19 = vsub.f32 %v11771_v41, %v3806_v38 }
 0xa85   : > { %v3808_v2 = vpop.xlane.xlu1 %3807  ;;  %8982 = vpow2.f32 %v3893_v29 }
 0xa86   : > { %v3862_v7 = vsub.f32 %v11779_v44, %v3808_v2 }
 0xa87   : > { %v3810_v56 = vpop.xlane.xlu0 %3809 }
 0xa88   : > { %v3903_v18 = vmul.f32 1.442695, %v3862_v7  ;;  %v3863_v62 = vsub.f32 %v11789_v48, %v3810_v56  ;;  %v3901_v7 = vmul.f32 1.442695, %v3861_v19 }
 0xa89   : > { %v3812_v58 = vpop.xlane.xlu1 %3811 }
 0xa8a   : > { %8984 = vpow2.f32 %v3903_v18  ;;  %v3905_v3 = vmul.f32 1.442695, %v3863_v62  ;;  %v3864_v48 = vsub.f32 %v11795_v24, %v3812_v58 }
 0xa8b   : > { %v3814_v14 = vpop.xlane.xlu0 %3813  ;;  %8986 = vpow2.f32 %v3899_v33 }
 0xa8c   : > { %v11893_v25 = vpop.eup %8978  ;;  %v3865_v31 = vsub.f32 %v11799_v1, %v3814_v14  ;;  %8988 = vpow2.f32 %v3905_v3  ;;  %v3907_v29 = vmul.f32 1.442695, %v3864_v48 }
 0xa8d   : > { %v3816_v34 = vpop.xlane.xlu1 %3815  ;;  %3959 = vadd.xlane.f32.xlu1 %v11893_v25 }
 0xa8e   : > { %v11898_v44 = vpop.eup %8980  ;;  %v3909_v22 = vmul.f32 1.442695, %v3865_v31  ;;  %v3866_v18 = vsub.f32 %v11807_v11, %v3816_v34 }
 0xa8f   : > { %3961 = vadd.xlane.f32.xlu0 %v11898_v44  ;;  %v3818_v56 = vpop.xlane.xlu0 %3817  ;;  %v11902_v15 = vpop.eup %8982 }
 0xa90   : > { %8990 = vpow2.f32 %v3909_v22  ;;  %v3867_v57 = vsub.f32 %v11815_v9, %v3818_v56  ;;  %v3911_v19 = vmul.f32 1.442695, %v3866_v18 }
 0xa91   : > { %v3820_v12 = vpop.xlane.xlu1 %3819  ;;  %8992 = vpow2.f32 %v3901_v7 }
 0xa92   : > { %v3868_v41 = vsub.f32 %v11819_v20, %v3820_v12  ;;  %v3913_v62 = vmul.f32 1.442695, %v3867_v57 }
 0xa93   : > { %3957 = vadd.xlane.f32.xlu0 %v11902_v15  ;;  %v4094_v1 = vpop.permute.xlu0 %4093 }
 0xa94   : > { %v11906_v38 = vpop.eup %8984  ;;  %v3915_v2 = vmul.f32 1.442695, %v3868_v41  ;;  %8202 = vmatprep.subr.bf16.mxu1 %v4094_v1 }
 0xa95   : > { %v4096_v33 = vpop.permute.xlu1 %4095  ;;  %3967 = vadd.xlane.f32.xlu1 %v11906_v38  ;;  %8203 = vmatpush3.bf16.msra.mxu1 %v4094_v1  ;;  %v11910_v24 = vpop.eup %8986 }
 0xa96   : > { %8994 = vpow2.f32 %v3915_v2  ;;  %8204 = vmatprep.subr.bf16.mxu1 %v4096_v33  ;;  %v11914_v58 = vpop.eup %8988 }
 0xa97   : > { %3963 = vadd.xlane.f32.xlu0 %v11910_v24  ;;  %v4098_v20 = vpop.permute.xlu0 %4097  ;;  %8996 = vpow2.f32 %v3907_v29 }
 0xa98   : > { %8998 = vpow2.f32 %v3913_v62 }
 0xa99   : > { %v4100_v9 = vpop.permute.xlu1 %4099  ;;  %8205 = vmatpush3.bf16.msra.mxu1 %v4096_v33  ;;  %9000 = vpow2.f32 %v3911_v19 }
 0xa9a   : > { %v11916_v3 = vpop.eup %8990  ;;  %8206 = vmatprep.subr.bf16.mxu1 %v4098_v20 }
 0xa9b   : > { %3969 = vadd.xlane.f32.xlu0 %v11914_v58  ;;  %3973 = vadd.xlane.f32.xlu1 %v11916_v3  ;;  %v4102_v14 = vpop.permute.xlu0 %4101  ;;  %v11920_v22 = vpop.eup %8992 }
 0xa9d   : > { %v4215_v31 = vpop.permute.xlu1 %4214  ;;  %8207 = vmatpush3.bf16.msra.mxu1 %v4098_v20 }
 0xa9e   : > { %8208 = vmatprep.subr.bf16.mxu1 %v4100_v9  ;;  %8234 = vmatprep.subr.bf16.mxu0 %v4215_v31 }
 0xa9f   : > { %8235 = vmatpush3.bf16.msra.mxu0 %v4215_v31  ;;  %3965 = vadd.xlane.f32.xlu0 %v11920_v22  ;;  %v4104_v11 = vpop.permute.xlu0 %4103 }
 0xaa0   : > { %v11923_v34 = vpop.eup %8994 }
 0xaa1   : > { %3979 = vadd.xlane.f32.xlu1 %v11923_v34  ;;  %8209 = vmatpush3.bf16.msra.mxu1 %v4100_v9  ;;  %v11926_v56 = vpop.eup %8996  ;;  %v11929_v48 = vpop.permute.xlu1 %4448 }
 0xaa2   : > { %8210 = vmatprep.subr.bf16.mxu1 %v4102_v14  ;;  %v11931_v12 = vpop.eup %8998 }
 0xaa3   : > { %3971 = vadd.xlane.f32.xlu0 %v11926_v56  ;;  %v4106_v7 = vpop.permute.xlu0 %4105  ;;  %v11934_v1 = vpop.eup %9000 }
 0xaa5   : > { %8211 = vmatpush3.bf16.msra.mxu1 %v4102_v14  ;;  %v4221_v29 = vpop.permute.xlu1 %4220 }
 0xaa6   : > { %8212 = vmatprep.subr.bf16.mxu1 %v4104_v11 }
 0xaa7   : > { %3977 = vadd.xlane.f32.xlu0 %v11931_v12  ;;  %v4108_v41 = vpop.permute.xlu0 %4107 }
 0xaa9   : > { %8213 = vmatpush3.bf16.msra.mxu1 %v4104_v11  ;;  %v4225_v33 = vpop.permute.xlu1 %4224 }
 0xaaa   : > { %8214 = vmatprep.subr.bf16.mxu1 %v4106_v7 }
 0xaab   : > { %3975 = vadd.xlane.f32.xlu0 %v11934_v1  ;;  %v4217_v57 = vpop.permute.xlu0 %4216 }
 0xaac   : > { %8236 = vmatprep.subr.bf16.mxu0 %v4217_v57 }
 0xaad   : > { %8215 = vmatpush3.bf16.msra.mxu1 %v4106_v7  ;;  %8237 = vmatpush3.bf16.msra.mxu0 %v4217_v57  ;;  %v11945_v18 = vpop.permute.xlu1 %4452 }
 0xaae   : > { %8216 = vmatprep.subr.bf16.mxu1 %v4108_v41 }
 0xaaf   : > { %v4219_v2 = vpop.permute.xlu0 %4218 }
 0xab0   : > { %8238 = vmatprep.subr.bf16.mxu0 %v4219_v2 }
 0xab1   : > { %8217 = vmatpush3.bf16.msra.mxu1 %v4108_v41  ;;  %8239 = vmatpush3.bf16.msra.mxu0 %v4219_v2  ;;  %v4227_v9 = vpop.permute.xlu1 %4226  ;;  %v14111_v41 = vld [vmem:[#allocation41_spill] sm:$0xff]  ;;  %v14112_v2 = vld [vmem:[#allocation43_spill] sm:$0xff] }
 0xab2   : > { %4625 = vrot.lane.b32.xlu1 %v10296_v37, %s9519_s30  ;;  %8240 = vmatprep.subr.bf16.mxu0 %v4221_v29 }
 0xab3   : > { %8570 = vmatprep.subr.msk.bf16.mxu1 %vm1545_vm2, %v11929_v48  ;;  %v11941_v20 = vpop.permute.xlu0 %4450 }
 0xab5   : > { %8241 = vmatpush3.bf16.msra.mxu0 %v4221_v29  ;;  %v4455_v19 = vpop.permute.xlu1 %4454  ;;  %v11975_v29 = vadd.f32 %v11809_v53, %v14111_v41 }
 0xab6   : > { %4458 = vrot.lane.b32.xlu1 %v14011_v26, %s9519_s30 }
 0xab7   : > { %v4223_v62 = vpop.permute.xlu0 %4222 }
 0xab8   : > { %8242 = vmatprep.subr.bf16.mxu0 %v4223_v62 }
 0xab9   : > { %8243 = vmatpush3.bf16.msra.mxu0 %v4223_v62  ;;  %v14113_v62 = vld [vmem:[#allocation40_spill] sm:$0xff] }
 0xaba   : > { %4629 = vrot.lane.b32.xlu1 %v14010_v39, %s9519_s30  ;;  %8244 = vmatprep.subr.bf16.mxu0 %v4225_v33 }
 0xabb   : > { %v4229_v14 = vpop.permute.xlu0 %4228 }
 0xabd   : > { %8245 = vmatpush3.bf16.msra.mxu0 %v4225_v33  ;;  %v11980_v33 = vadd.f32 %v11812_v59, %v14112_v2  ;;  %v14116_v2 = vld [vmem:[#allocation45_spill] sm:$0xff] }
 0xabe   : > { %4631 = vrot.lane.b32.xlu1 %v14062_v51, %s9519_s30  ;;  %8246 = vmatprep.subr.bf16.mxu0 %v4227_v9 }
 0xac1   : > { %4456 = vrot.lane.b32.xlu0 %v14006_v35, %s9519_s30  ;;  %8247 = vmatpush3.bf16.msra.mxu0 %v4227_v9  ;;  %v11984_v9 = vadd.f32 %v11801_v13, %v14113_v62  ;;  %v12000_v62 = vadd.f32 %v11829_v23, %v14116_v2 }
 0xac2   : > { %4434 = vrot.lane.b32.xlu1 %v14109_v16, %s9520_s15  ;;  %8248 = vmatprep.subr.bf16.mxu0 %v4229_v14 }
 0xac5   : > { %4627 = vrot.lane.b32.xlu0 %v14007_v45, %s9519_s30  ;;  %8249 = vmatpush3.bf16.msra.mxu0 %v4229_v14 }
 0xac6   : > { %4633 = vrot.lane.b32.xlu1 %v14012_v52, %s9519_s30 }
 0xac9   : > { %4460 = vrot.lane.b32.xlu0 %v14008_v40, %s9519_s30 }
 0xaca   : > { %4438 = vrot.lane.b32.xlu1 %v14009_v17, %s9520_s15 }
 0xacd   : > { %4462 = vrot.lane.b32.xlu0 %v14013_v63, %s9519_s30 }
 0xace   : > { %4440 = vrot.lane.b32.xlu1 %v14006_v35, %s9520_s15 }
 0xad1   : > { %4432 = vrot.lane.b32.xlu0 %v14110_v0, %s9520_s15 }
 0xad5   : > { %4436 = vrot.lane.b32.xlu0 %v10260_v50, %s9520_s15  ;;  %v14117_v50 = vld [vmem:[#allocation53_spill] sm:$0xff] }
 0xad9   : > { %4635 = vrot.lane.b32.xlu0 %v10320_v5, %s9519_s30 }
 0xae6   : > { %v3954_v31 = vpop.xlane.xlu1 %3953 }
 0xaea   : > { %v3956_v11 = vpop.xlane.xlu1 %3955 }
 0xaeb   : > { %9002 = vrcp.f32 %v3956_v11  ;;  %v14114_v11 = vld [vmem:[#allocation44_spill] sm:$0xff] }
 0xaec   : > { %v3950_v7 = vpop.xlane.xlu0 %3949  ;;  %v11989_v53 = vadd.f32 %v11827_v4, %v14114_v11 }
 0xaed   : > { %9004 = vrcp.f32 %v3950_v7 }
 0xaee   : > { %9006 = vrcp.f32 %v3954_v31 }
 0xaf0   : > { %v3952_v57 = vpop.xlane.xlu0 %3951 }
 0xaf1   : > { %9008 = vrcp.f32 %v3952_v57  ;;  %v14115_v57 = vld [vmem:[#allocation42_spill] sm:$0xff] }
 0xaf2   : > { %3827 = vmax.xlane.f32.xlu1 %v11975_v29  ;;  %v11994_v41 = vadd.f32 %v11804_v36, %v14115_v57  ;;  %v12008_v36 = vadd.f32 %v11823_v47, %v14117_v50  ;;  %v14121_v47 = vld [vmem:[#allocation55_spill] sm:$0xff] }
 0xaf5   : > { %v9003_v14 = vpop.eup %9002 }
 0xaf6   : > { %3823 = vmax.xlane.f32.xlu1 %v11980_v33  ;;  %v4048_v13 = vmul.f32 %v9003_v14, %v11878_v46  ;;  %v14118_v14 = vld [vmem:[#allocation46_spill] sm:$0xff] }
 0xaf7   : > { %v9005_v31 = vpop.eup %9004  ;;  %v12013_v23 = vadd.f32 %v11831_v55, %v14118_v14 }
 0xaf8   : > { %3825 = vmax.xlane.f32.xlu0 %v11984_v9  ;;  %v9007_v7 = vpop.eup %9006  ;;  %v4045_v4 = vmul.f32 %v9005_v31, %v11881_v54  ;;  %v4489_v54 = vsel %vm1545_vm2, %v11929_v48, 0  ;;  %v4492_v31 = vsel %vm1545_vm2, %v11941_v20, 0 }
 0xaf9   : > { %v4047_v17 = vmul.f32 %v9007_v7, %v11875_v60  ;;  %v14119_v60 = vld [vmem:[#allocation54_spill] sm:$0xff]  ;;  %v14123_v7 = vld [vmem:[#allocation51_spill] sm:$0xff] }
 0xafa   : > { %3835 = vmax.xlane.f32.xlu1 %v11989_v53 }
 0xafb   : > { %v9009_v59 = vpop.eup %9008  ;;  %v4078_v46 = vpack.c.bf16 %v4048_v13, %v4047_v17  ;;  %v14120_v17 = vld [vmem:[#allocation47_spill] sm:$0xff] }
 0xafc   : > { %3821 = vmax.xlane.f32.xlu0 %v11994_v41  ;;  %v4046_v11 = vmul.f32 %v9009_v59, %v11884_v42  ;;  %v12020_v42 = vadd.f32 %v11825_v6, %v14119_v60  ;;  %v12027_v55 = vadd.f32 %v11835_v61, %v14120_v17  ;;  %v14122_v6 = vld [vmem:[#allocation48_spill] sm:$0xff]  ;;  %v12044_v61 = vadd.f32 %v11842_v28, %v14123_v7 }
 0xafd   : > { %v12037_v48 = vadd.f32 %v11837_v43, %v14122_v6  ;;  %v14125_v43 = vld [vmem:[#allocation56_spill] sm:$0xff]  ;;  %v4495_v28 = vsel %vm1545_vm2, %v11945_v18, 0  ;;  %v4498_v59 = vsel %vm1545_vm2, %v4455_v19, 0 }
 0xafe   : > { %3831 = vmax.xlane.f32.xlu1 %v12000_v62  ;;  %v4077_v57 = vpack.c.bf16 %v4046_v11, %v4045_v4  ;;  %v12032_v11 = vadd.f32 %v11833_v21, %v14121_v47  ;;  %v14124_v21 = vld [vmem:[#allocation50_spill] sm:$0xff] }
 0xb00   : > { %3833 = vmax.xlane.f32.xlu0 %v12008_v36  ;;  %8218 = vmatprep.mubr.bf16.mxu1 %v4077_v57  ;;  %v12051_v57 = vadd.f32 %v11839_v8, %v14124_v21  ;;  %v12065_v8 = vadd.f32 %v11846_v49, %v14057_v27 }
 0xb01   : > { %8219 = vmatmul.mubr.bf16.vlgmr.msra.gmra.mrb[64].mxu1 %v4078_v46 }
 0xb02   : > { %8267 = vmatpush3.bf16.xpose.msra.mxu1 %v4489_v54  ;;  %3841 = vmax.xlane.f32.xlu1 %v12013_v23 }
 0xb03   : > { %8571 = vmatprep.subr.msk.bf16.mxu1 %vm1545_vm2, %v11941_v20  ;;  %v12057_v20 = vadd.f32 %v11844_v10, %v14125_v43 }
 0xb04   : > { %3829 = vmax.xlane.f32.xlu0 %v12020_v42 }
 0xb06   : > { %3843 = vmax.xlane.f32.xlu1 %v12027_v55 }
 0xb08   : > { %3837 = vmax.xlane.f32.xlu0 %v12032_v11 }
 0xb0a   : > { %8269 = vmatpush3.bf16.xpose.msra.mxu1 %v4492_v31  ;;  %3839 = vmax.xlane.f32.xlu1 %v12037_v48 }
 0xb0b   : > { %8572 = vmatprep.subr.msk.bf16.mxu1 %vm1545_vm2, %v11945_v18 }
 0xb0c   : > { %3845 = vmax.xlane.f32.xlu0 %v12044_v61 }
 0xb0e   : > { %3849 = vmax.xlane.f32.xlu1 %v12051_v57 }
 0xb12   : > { %8271 = vmatpush3.bf16.xpose.msra.mxu1 %v4495_v28  ;;  %3851 = vmax.xlane.f32.xlu1 %v12057_v20 }
 0xb13   : > { %8573 = vmatprep.subr.msk.bf16.mxu1 %vm1545_vm2, %v4455_v19 }
 0xb16   : > { %3847 = vmax.xlane.f32.xlu1 %v12065_v8 }
 0xb1a   : > { %8273 = vmatpush3.bf16.xpose.msra.mxu1 %v4498_v59  ;;  %v3960_v13 = vpop.xlane.xlu1 %3959 }
 0xb1b   : > { %9010 = vrcp.f32 %v3960_v13 }
 0xb1c   : > { %v3962_v10 = vpop.xlane.xlu0 %3961 }
 0xb20   : > { %v3958_v4 = vpop.xlane.xlu0 %3957 }
 0xb21   : > { %9012 = vrcp.f32 %v3958_v4 }
 0xb22   : > { %4442 = vrot.lane.b32.xlu0 %v14011_v26, %s9520_s15  ;;  %9014 = vrcp.f32 %v3962_v10  ;;  %v3968_v46 = vpop.xlane.xlu1 %3967 }
 0xb24   : > { %v3964_v18 = vpop.xlane.xlu0 %3963 }
 0xb25   : > { %9016 = vrcp.f32 %v3964_v18  ;;  %v9011_v54 = vpop.eup %9010 }
 0xb26   : > { %9018 = vrcp.f32 %v3968_v46  ;;  %v4050_v13 = vmul.f32 %v9011_v54, %v11893_v25 }
 0xb27   : > { %4637 = vrot.lane.b32.xlu1 %v10345_v32, %s9519_s30 }
 0xb28   : > { %v3970_v49 = vpop.xlane.xlu0 %3969  ;;  %v3974_v31 = vpop.xlane.xlu1 %3973 }
 0xb2b   : > { %v9013_v19 = vpop.eup %9012 }
 0xb2c   : > { %v3966_v28 = vpop.xlane.xlu0 %3965  ;;  %v4049_v59 = vmul.f32 %v9013_v19, %v11902_v15  ;;  %v9015_v4 = vpop.eup %9014 }
 0xb2d   : > { %9020 = vrcp.f32 %v3966_v28  ;;  %v4051_v21 = vmul.f32 %v9015_v4, %v11898_v44 }
 0xb2e   : > { %v3980_v7 = vpop.xlane.xlu1 %3979  ;;  %v4079_v10 = vpack.c.bf16 %v4050_v13, %v4049_v59  ;;  %9022 = vrcp.f32 %v3970_v49 }
 0xb2f   : > { %v9017_v27 = vpop.eup %9016 }
 0xb30   : > { %8222 = vmatprep.mubr.bf16.mxu1 %v4079_v10  ;;  %v3972_v18 = vpop.xlane.xlu0 %3971  ;;  %v4052_v43 = vmul.f32 %v9017_v27, %v11910_v24  ;;  %v9019_v15 = vpop.eup %9018 }
 0xb31   : > { %9024 = vrcp.f32 %v3972_v18  ;;  %v4054_v44 = vmul.f32 %v9019_v15, %v11906_v38 }
 0xb32   : > { %v12077_v47 = vpop.permute.xlu1 %4625  ;;  %v4080_v46 = vpack.c.bf16 %v4052_v43, %v4051_v21 }
 0xb33   : > { %8578 = vmatprep.subr.msk.bf16.mxu0 %vm1545_vm2, %v12077_v47 }
 0xb34   : > { %8223 = vmatmul.mubr.bf16.gmra.mrb[68].mxu1 %v4080_v46  ;;  %v3978_v25 = vpop.xlane.xlu0 %3977 }
 0xb35   : > { %9026 = vrcp.f32 %v3978_v25 }
 0xb36   : > { %9028 = vrcp.f32 %v3974_v31 }
 0xb37   : > { %v9021_v54 = vpop.eup %9020  ;;  %9030 = vrcp.f32 %v3980_v7  ;;  %v4459_v7 = vpop.permute.xlu1 %4458 }
 0xb38   : > { %v3976_v49 = vpop.xlane.xlu0 %3975  ;;  %v4053_v19 = vmul.f32 %v9021_v54, %v11920_v22  ;;  %v9023_v27 = vpop.eup %9022  ;;  %v4504_v15 = vsel %vm1545_vm2, %v4459_v7, 0 }
 0xb39   : > { %9032 = vrcp.f32 %v3976_v49  ;;  %v4055_v43 = vmul.f32 %v9023_v27, %v11914_v58 }
 0xb3a   : > { %v4081_v24 = vpack.c.bf16 %v4054_v44, %v4053_v19 }
 0xb3b   : > { %v9025_v28 = vpop.eup %9024  ;;  %v12095_v19 = vpop.permute.xlu1 %4629 }
 0xb3c   : > { %8226 = vmatprep.mubr.bf16.mxu1 %v4081_v24  ;;  %v4457_v21 = vpop.permute.xlu0 %4456  ;;  %v4056_v59 = vmul.f32 %v9025_v28, %v11926_v56 }
 0xb3d   : > { %8574 = vmatprep.subr.msk.bf16.mxu1 %vm1545_vm2, %v4457_v21  ;;  %v4501_v31 = vsel %vm1545_vm2, %v4457_v21, 0 }
 0xb3e   : > { %8275 = vmatpush3.bf16.xpose.msra.mxu1 %v4501_v31  ;;  %v4082_v13 = vpack.c.bf16 %v4056_v59, %v4055_v43 }
 0xb3f   : > { %8575 = vmatprep.subr.msk.bf16.mxu1 %vm1545_vm2, %v4459_v7  ;;  %v9027_v38 = vpop.eup %9026  ;;  %v12098_v24 = vpop.permute.xlu1 %4631 }
 0xb40   : > { %8227 = vmatmul.mubr.bf16.gmra.mrb[72].mxu1 %v4082_v13  ;;  %v12088_v22 = vpop.permute.xlu0 %4627  ;;  %v9029_v4 = vpop.eup %9028  ;;  %v4059_v58 = vmul.f32 %v9027_v38, %v11931_v12 }
 0xb41   : > { %v9031_v10 = vpop.eup %9030  ;;  %v4057_v56 = vmul.f32 %v9029_v4, %v11916_v3 }
 0xb42   : > { %v4060_v54 = vmul.f32 %v9031_v10, %v11923_v34 }
 0xb43   : > { %v9033_v18 = vpop.eup %9032  ;;  %v4435_v34 = vpop.permute.xlu1 %4434 }
 0xb44   : > { %v4461_v46 = vpop.permute.xlu0 %4460  ;;  %v4058_v25 = vmul.f32 %v9033_v18, %v11934_v1  ;;  %v4084_v44 = vpack.c.bf16 %v4060_v54, %v4059_v58 }
 0xb45   : > { %v4507_v3 = vsel %vm1545_vm2, %v4461_v46, 0 }
 0xb46   : > { %8277 = vmatpush3.bf16.xpose.msra.mxu1 %v4504_v15  ;;  %v4083_v49 = vpack.c.bf16 %v4058_v25, %v4057_v56 }
 0xb47   : > { %8576 = vmatprep.subr.msk.bf16.mxu1 %vm1545_vm2, %v4461_v46  ;;  %v12104_v28 = vpop.permute.xlu1 %4633 }
 0xb48   : > { %8230 = vmatprep.mubr.bf16.mxu1 %v4083_v49  ;;  %v4463_v27 = vpop.permute.xlu0 %4462 }
 0xb49   : > { %8231 = vmatmul.mubr.bf16.gmra.mrb[76].mxu1 %v4084_v44  ;;  %v4510_v1 = vsel %vm1545_vm2, %v4463_v27, 0 }
 0xb4b   : > { %v4439_v43 = vpop.permute.xlu1 %4438 }
 0xb4c   : > { %v4433_v12 = vpop.permute.xlu0 %4432 }
 0xb4d   : > { %8282 = vmatprep.mubr.msk.bf16.mxu1 %vm1545_vm2, %v4433_v12 }
 0xb4e   : > { %8279 = vmatpush3.bf16.xpose.msra.mxu1 %v4507_v3 }
 0xb4f   : > { %8577 = vmatprep.subr.msk.bf16.mxu1 %vm1545_vm2, %v4463_v27  ;;  %v4441_v59 = vpop.permute.xlu1 %4440 }
 0xb50   : > { %v4437_v21 = vpop.permute.xlu0 %4436 }
 0xb54   : > { %v12110_v31 = vpop.permute.xlu0 %4635 }
 0xb56   : > { %8281 = vmatpush3.bf16.xpose.msra.mxu1 %v4510_v1 }
 0xb5d   : > { %8283 = vmatmul.mubr.msk.bf16.vlgmr.msra.gmra.mrb[80].mxu1 %vm1545_vm2, %v4435_v34 }
 0xb5e   : > { %8286 = vmatprep.mubr.msk.bf16.mxu1 %vm1545_vm2, %v4437_v21 }
 0xb65   : > { %8287 = vmatmul.mubr.msk.bf16.gmra.mrb[84].mxu1 %vm1545_vm2, %v4439_v43 }
 0xb66   : > { %8290 = vmatprep.mubr.msk.bf16.mxu1 %vm1545_vm2, %v4441_v59 }
 0xb7f   : > { %v3828_v7 = vpop.xlane.xlu1 %3827 }
 0xb80   : > { %v3872_v13 = vsub.f32 %v11975_v29, %v3828_v7 }
 0xb82   : > { %v3923_v58 = vmul.f32 1.442695, %v3872_v13 }
 0xb83   : > { %v3824_v10 = vpop.xlane.xlu1 %3823 }
 0xb84   : > { %v3870_v56 = vsub.f32 %v11980_v33, %v3824_v10 }
 0xb85   : > { %v3826_v38 = vpop.xlane.xlu0 %3825 }
 0xb86   : > { %v3871_v4 = vsub.f32 %v11984_v9, %v3826_v38  ;;  %v3919_v49 = vmul.f32 1.442695, %v3870_v56 }
 0xb87   : > { %v3836_v34 = vpop.xlane.xlu1 %3835 }
 0xb88   : > { %v3921_v18 = vmul.f32 1.442695, %v3871_v4 }
 0xb89   : > { %v3822_v46 = vpop.xlane.xlu0 %3821 }
 0xb8a   : > { %9034 = vpow2.f32 %v3921_v18  ;;  %v3869_v25 = vsub.f32 %v11994_v41, %v3822_v46  ;;  %v3876_v18 = vsub.f32 %v11989_v53, %v3836_v34 }
 0xb8b   : > { %9036 = vpow2.f32 %v3923_v58  ;;  %v3832_v1 = vpop.xlane.xlu1 %3831 }
 0xb8c   : > { %v3917_v15 = vmul.f32 1.442695, %v3869_v25  ;;  %v3874_v13 = vsub.f32 %v12000_v62, %v3832_v1  ;;  %v3931_v25 = vmul.f32 1.442695, %v3876_v18 }
 0xb8d   : > { %v3834_v54 = vpop.xlane.xlu0 %3833 }
 0xb8e   : > { %9038 = vpow2.f32 %v3917_v15  ;;  %v3875_v7 = vsub.f32 %v12008_v36, %v3834_v54  ;;  %v3927_v58 = vmul.f32 1.442695, %v3874_v13 }
 0xb8f   : > { %9040 = vpow2.f32 %v3919_v49  ;;  %v3842_v21 = vpop.xlane.xlu1 %3841 }
 0xb90   : > { %v3929_v38 = vmul.f32 1.442695, %v3875_v7  ;;  %v3879_v46 = vsub.f32 %v12013_v23, %v3842_v21 }
 0xb91   : > { %v3830_v44 = vpop.xlane.xlu0 %3829 }
 0xb92   : > { %v3873_v4 = vsub.f32 %v12020_v42, %v3830_v44  ;;  %9042 = vpow2.f32 %v3929_v38 }
 0xb93   : > { %v3844_v43 = vpop.xlane.xlu1 %3843  ;;  %9044 = vpow2.f32 %v3927_v58 }
 0xb94   : > { %v12116_v29 = vpop.eup %9034  ;;  %v3925_v56 = vmul.f32 1.442695, %v3873_v4  ;;  %v3880_v36 = vsub.f32 %v12027_v55, %v3844_v43 }
 0xb95   : > { %3985 = vadd.xlane.f32.xlu1 %v12116_v29  ;;  %v3838_v9 = vpop.xlane.xlu0 %3837  ;;  %v12119_v27 = vpop.eup %9036 }
 0xb96   : > { %v3877_v15 = vsub.f32 %v12032_v11, %v3838_v9  ;;  %9046 = vpow2.f32 %v3925_v56  ;;  %v3939_v34 = vmul.f32 1.442695, %v3880_v36 }
 0xb97   : > { %v3840_v59 = vpop.xlane.xlu1 %3839  ;;  %9048 = vpow2.f32 %v3931_v25 }
 0xb98   : > { %v12121_v12 = vpop.eup %9038  ;;  %v3878_v62 = vsub.f32 %v12037_v48, %v3840_v59  ;;  %v3933_v42 = vmul.f32 1.442695, %v3877_v15 }
 0xb99   : > { %3987 = vadd.xlane.f32.xlu1 %v12119_v27  ;;  %3981 = vadd.xlane.f32.xlu0 %v12121_v12  ;;  %v3846_v41 = vpop.xlane.xlu0 %3845  ;;  %v12125_v33 = vpop.eup %9040 }
 0xb9a   : > { %v3935_v53 = vmul.f32 1.442695, %v3878_v62  ;;  %v3881_v11 = vsub.f32 %v12044_v61, %v3846_v41 }
 0xb9b   : > { %v3850_v10 = vpop.xlane.xlu1 %3849 }
 0xb9c   : > { %v3883_v54 = vsub.f32 %v12051_v57, %v3850_v10  ;;  %v12142_v23 = vpop.eup %9042  ;;  %v3941_v21 = vmul.f32 1.442695, %v3881_v11 }
 0xb9d   : > { %3983 = vadd.xlane.f32.xlu1 %v12125_v33  ;;  %v4443_v3 = vpop.permute.xlu0 %4442  ;;  %v12147_v1 = vpop.eup %9044 }
 0xb9e   : > { %8291 = vmatmul.mubr.msk.bf16.gmra.mrb[88].mxu1 %vm1545_vm2, %v4443_v3  ;;  %v3937_v3 = vmul.f32 1.442695, %v3879_v46  ;;  %v3945_v9 = vmul.f32 1.442695, %v3883_v54 }
 0xb9f   : > { %v3852_v49 = vpop.xlane.xlu1 %3851 }
 0xba0   : > { %9050 = vpow2.f32 %v3937_v3  ;;  %v12149_v55 = vpop.eup %9046  ;;  %v3884_v57 = vsub.f32 %v12057_v20, %v3852_v49 }
 0xba1   : > { %9052 = vpow2.f32 %v3933_v42  ;;  %v12154_v41 = vpop.eup %9048 }
 0xba2   : > { %9054 = vpow2.f32 %v3935_v53  ;;  %v3947_v13 = vmul.f32 1.442695, %v3884_v57 }
 0xba3   : > { %v3848_v44 = vpop.xlane.xlu1 %3847  ;;  %9056 = vpow2.f32 %v3939_v34 }
 0xba4   : > { %v3882_v48 = vsub.f32 %v12065_v8, %v3848_v44  ;;  %9058 = vpow2.f32 %v3945_v9 }
 0xba5   : > { %9060 = vpow2.f32 %v3941_v21 }
 0xba6   : > { %v3943_v61 = vmul.f32 1.442695, %v3882_v48 }
 0xba8   : > { %9062 = vpow2.f32 %v3943_v61  ;;  %v12239_v61 = vpop.permute.xlu1 %4637 }
 0xba9   : > { %9064 = vpow2.f32 %v3947_v13 }
 0xbaa   : > { %v12158_v59 = vpop.eup %9050 }
 0xbab   : > { %v12170_v4 = vpop.eup %9052 }
 0xbac   : > { %v12174_v18 = vpop.eup %9054 }
 0xbad   : > { %v12178_v58 = vpop.eup %9056 }
 0xbae   : > { %4446 = vrot.lane.b32.xlu1 %v14013_v63, %s9520_s15  ;;  %v12180_v46 = vpop.eup %9058 }
 0xbaf   : > { %4444 = vrot.lane.b32.xlu0 %v14008_v40, %s9520_s15  ;;  %v12184_v56 = vpop.eup %9060 }
 0xbb2   : > { %v12186_v25 = vpop.eup %9062 }
 0xbb3   : > { %v12190_v15 = vpop.eup %9064 }
 0xbce   : > { %3993 = vadd.xlane.f32.xlu0 %v12142_v23 }
 0xbd2   : > { %3991 = vadd.xlane.f32.xlu0 %v12147_v1  ;;  %3989 = vadd.xlane.f32.xlu1 %v12149_v55 }
 0xbd4   : > { %v12156_v43 = vpop.f32.mrb[64].mxu1 }
 0xbd5   : > { %14126 = vst [vmem:[#allocation10_spill] sm:$0xff] %v12156_v43  ;;  %v12160_v8 = vpop.f32.mrb[65].mxu1 }
 0xbd6   : > { %v12162_v7 = vpop.f32.mrb[66].mxu1  ;;  %4001 = vadd.xlane.f32.xlu0 %v12158_v59  ;;  %3995 = vadd.xlane.f32.xlu1 %v12154_v41 }
 0xbd7   : > { %14127 = vst [vmem:[#allocation11_spill] sm:$0xff] %v12162_v7  ;;  %v12168_v38 = vpop.f32.mrb[67].mxu1  ;;  %v14143_v7 = vld [vmem:[#allocation24_spill] sm:$0xff] }
 0xbda   : > { %3999 = vadd.xlane.f32.xlu0 %v12174_v18  ;;  %3997 = vadd.xlane.f32.xlu1 %v12170_v4 }
 0xbde   : > { %4009 = vadd.xlane.f32.xlu0 %v12180_v46  ;;  %4003 = vadd.xlane.f32.xlu1 %v12178_v58 }
 0xbe2   : > { %4007 = vadd.xlane.f32.xlu0 %v12186_v25  ;;  %4005 = vadd.xlane.f32.xlu1 %v12184_v56 }
 0xbe6   : > { %4011 = vadd.xlane.f32.xlu1 %v12190_v15 }
 0xbf7   : > { %4609 = vrot.lane.b32.xlu1 %v10296_v37, %s9520_s15 }
 0xbf8   : > { %4639 = vrot.lane.b32.xlu0 %v14005_v30, %s9519_s30 }
 0xbfb   : > { %4613 = vrot.lane.b32.xlu1 %v14010_v39, %s9520_s15 }
 0xbfc   : > { %4611 = vrot.lane.b32.xlu0 %v14007_v45, %s9520_s15 }
 0xbff   : > { %4617 = vrot.lane.b32.xlu1 %v14012_v52, %s9520_s15 }
 0xc00   : > { %4615 = vrot.lane.b32.xlu0 %v14062_v51, %s9520_s15 }
 0xc03   : > { %4621 = vrot.lane.b32.xlu1 %v10345_v32, %s9520_s15 }
 0xc04   : > { %4619 = vrot.lane.b32.xlu0 %v10320_v5, %s9520_s15 }
 0xc07   : > { %v12209_v49 = vpop.f32.mrb[68].mxu1 }
 0xc08   : > { %14128 = vst [vmem:[#allocation45_spill] sm:$0xff] %v12209_v49  ;;  %v12211_v3 = vpop.f32.mrb[69].mxu1  ;;  %4623 = vrot.lane.b32.xlu0 %v14005_v30, %s9520_s15 }
 0xc09   : > { %14129 = vst [vmem:[#allocation53_spill] sm:$0xff] %v12211_v3  ;;  %v12215_v62 = vpop.f32.mrb[70].mxu1 }
 0xc0a   : > { %14130 = vst [vmem:[#allocation46_spill] sm:$0xff] %v12215_v62  ;;  %v12219_v42 = vpop.f32.mrb[71].mxu1  ;;  %v14140_v62 = vld [vmem:[#allocation26_spill] sm:$0xff] }
 0xc0b   : > { %14131 = vst [vmem:[#allocation54_spill] sm:$0xff] %v12219_v42 }
 0xc13   : > { %v12223_v54 = vpop.f32.mrb[72].mxu1 }
 0xc14   : > { %14132 = vst [vmem:[#allocation47_spill] sm:$0xff] %v12223_v54  ;;  %v12225_v44 = vpop.f32.mrb[73].mxu1 }
 0xc15   : > { %14133 = vst [vmem:[#allocation48_spill] sm:$0xff] %v12225_v44  ;;  %v12227_v34 = vpop.f32.mrb[74].mxu1 }
 0xc16   : > { %14134 = vst [vmem:[#allocation78_spill] sm:$0xff] %v12227_v34  ;;  %v12231_v9 = vpop.f32.mrb[75].mxu1 }
 0xc17   : > { %14135 = vst [vmem:[#allocation79_spill] sm:$0xff] %v12231_v9  ;;  %v14142_v9 = vld [vmem:[#allocation27_spill] sm:$0xff] }
 0xc1c   : > { %v12235_v21 = vpop.f32.mrb[76].mxu1 }
 0xc1d   : > { %14136 = vst [vmem:[#allocation80_spill] sm:$0xff] %v12235_v21  ;;  %v12237_v57 = vpop.f32.mrb[77].mxu1 }
 0xc1e   : > { %14137 = vst [vmem:[#allocation81_spill] sm:$0xff] %v12237_v57  ;;  %v12241_v13 = vpop.f32.mrb[78].mxu1 }
 0xc1f   : > { %14138 = vst [vmem:[#allocation82_spill] sm:$0xff] %v12241_v13  ;;  %v12245_v20 = vpop.f32.mrb[79].mxu1 }
 0xc20   : > { %14139 = vst [vmem:[#allocation83_spill] sm:$0xff] %v12245_v20 }
 0xc22   : > { %v3986_v53 = vpop.xlane.xlu1 %3985 }
 0xc26   : > { %v3988_v10 = vpop.xlane.xlu1 %3987  ;;  %v3982_v54 = vpop.xlane.xlu0 %3981 }
 0xc27   : > { %9066 = vrcp.f32 %v3988_v10 }
 0xc28   : > { %9068 = vrcp.f32 %v3982_v54  ;;  %v14141_v54 = vld [vmem:[#allocation25_spill] sm:$0xff] }
 0xc29   : > { %9070 = vrcp.f32 %v3986_v53 }
 0xc2a   : > { %v3984_v48 = vpop.xlane.xlu1 %3983  ;;  %v4445_v34 = vpop.permute.xlu0 %4444 }
 0xc2b   : > { %9072 = vrcp.f32 %v3984_v48  ;;  %8294 = vmatprep.mubr.msk.bf16.mxu1 %vm1545_vm2, %v4445_v34 }
 0xc2e   : > { %v4447_v49 = vpop.permute.xlu1 %4446 }
 0xc2f   : > { %8295 = vmatmul.mubr.msk.bf16.gmra.mrb[92].mxu1 %vm1545_vm2, %v4447_v49 }
 0xc30   : > { %v8284_v36 = vpop.f32.mrb[80].mxu1 }
 0xc31   : > { %v4546_v21 = vpop.f32.mrb[81].mxu1  ;;  %v9067_v13 = vpop.eup %9066  ;;  %v12267_v3 = vadd.f32 %v8284_v36, %v14143_v7  ;;  %v14145_v7 = vld [vmem:[#allocation30_spill] sm:$0xff] }
 0xc32   : > { %v12252_v44 = vadd.f32 %v4546_v21, %v14140_v62  ;;  %v8285_v11 = vpop.f32.mrb[82].mxu1  ;;  %v9069_v57 = vpop.eup %9068  ;;  %v4064_v34 = vmul.f32 %v9067_v13, %v12119_v27 }
 0xc33   : > { %v4549_v20 = vpop.f32.mrb[83].mxu1  ;;  %v9071_v10 = vpop.eup %9070  ;;  %v12260_v49 = vadd.f32 %v8285_v11, %v14142_v9  ;;  %v4061_v62 = vmul.f32 %v9069_v57, %v12121_v12  ;;  %v4666_v12 = vsel %vm1545_vm2, %v12077_v47, 0  ;;  %v14147_v57 = vld [vmem:[#allocation28_spill] sm:$0xff]  ;;  %v4669_v47 = vsel %vm1545_vm2, %v12088_v22, 0 }
 0xc34   : > { %v12255_v53 = vadd.f32 %v4549_v20, %v14141_v54  ;;  %4786 = vmax.xlane.f32.xlu1 %v12252_v44  ;;  %v4063_v43 = vmul.f32 %v9071_v10, %v12116_v29 }
 0xc35   : > { %v9073_v48 = vpop.eup %9072 }
 0xc36   : > { %4788 = vmax.xlane.f32.xlu0 %v12255_v53  ;;  %v4062_v21 = vmul.f32 %v9073_v48, %v12125_v33  ;;  %v4086_v27 = vpack.c.bf16 %v4064_v34, %v4063_v43  ;;  %v14144_v33 = vld [vmem:[#allocation31_spill] sm:$0xff]  ;;  %v14146_v43 = vld [vmem:[#allocation29_spill] sm:$0xff]  ;;  %v4675_v48 = vsel %vm1545_vm2, %v12098_v24, 0 }
 0xc38   : > { %v8288_v20 = vpop.f32.mrb[84].mxu1  ;;  %4792 = vmax.xlane.f32.xlu1 %v12260_v49  ;;  %v4085_v54 = vpack.c.bf16 %v4062_v21, %v4061_v62 }
 0xc39   : > { %v4562_v42 = vpop.f32.mrb[85].mxu1  ;;  %v12284_v9 = vadd.f32 %v8288_v20, %v14146_v43 }
 0xc3a   : > { %v8289_v13 = vpop.f32.mrb[86].mxu1  ;;  %4790 = vmax.xlane.f32.xlu0 %v12267_v3  ;;  %8250 = vmatprep.mubr.bf16.mxu0 %v4085_v54  ;;  %v12274_v29 = vadd.f32 %v4562_v42, %v14144_v33  ;;  %v4672_v42 = vsel %vm1545_vm2, %v12095_v19, 0 }
 0xc3b   : > { %8251 = vmatmul.mubr.bf16.vlgmr.msra.gmra.mrb[128].mxu0 %v4086_v27  ;;  %v4565_v11 = vpop.f32.mrb[87].mxu1  ;;  %v12287_v10 = vadd.f32 %v8289_v13, %v14147_v57 }
 0xc3c   : > { %v12277_v36 = vadd.f32 %v4565_v11, %v14145_v7  ;;  %8299 = vmatpush3.bf16.xpose.msra.mxu0 %v4666_v12  ;;  %v4684_v12 = vsel %vm1545_vm2, %v12239_v61, 0 }
 0xc3d   : > { %8579 = vmatprep.subr.msk.bf16.mxu0 %vm1545_vm2, %v12088_v22  ;;  %v4678_v22 = vsel %vm1545_vm2, %v12104_v28, 0 }
 0xc3e   : > { %4794 = vmax.xlane.f32.xlu0 %v12274_v29  ;;  %4796 = vmax.xlane.f32.xlu1 %v12277_v36 }
 0xc42   : > { %4798 = vmax.xlane.f32.xlu0 %v12284_v9  ;;  %4800 = vmax.xlane.f32.xlu1 %v12287_v10 }
 0xc44   : > { %8301 = vmatpush3.bf16.xpose.msra.mxu0 %v4669_v47 }
 0xc45   : > { %8580 = vmatprep.subr.msk.bf16.mxu0 %vm1545_vm2, %v12095_v19 }
 0xc4c   : > { %8303 = vmatpush3.bf16.xpose.msra.mxu0 %v4672_v42 }
 0xc4d   : > { %8581 = vmatprep.subr.msk.bf16.mxu0 %vm1545_vm2, %v12098_v24  ;;  %v4681_v24 = vsel %vm1545_vm2, %v12110_v31, 0 }
 0xc54   : > { %8305 = vmatpush3.bf16.xpose.msra.mxu0 %v4675_v48 }
 0xc55   : > { %8582 = vmatprep.subr.msk.bf16.mxu0 %vm1545_vm2, %v12104_v28 }
 0xc5b   : > { %v3994_v34 = vpop.xlane.xlu0 %3993 }
 0xc5c   : > { %8307 = vmatpush3.bf16.xpose.msra.mxu0 %v4678_v22 }
 0xc5d   : > { %8583 = vmatprep.subr.msk.bf16.mxu0 %vm1545_vm2, %v12110_v31 }
 0xc5f   : > { %v3990_v19 = vpop.xlane.xlu1 %3989  ;;  %v3992_v62 = vpop.xlane.xlu0 %3991 }
 0xc60   : > { %9074 = vrcp.f32 %v3990_v19 }
 0xc61   : > { %9076 = vrcp.f32 %v3992_v62 }
 0xc62   : > { %9078 = vrcp.f32 %v3994_v34 }
 0xc63   : > { %v3996_v21 = vpop.xlane.xlu1 %3995  ;;  %v4002_v20 = vpop.xlane.xlu0 %4001 }
 0xc64   : > { %9080 = vrcp.f32 %v3996_v21  ;;  %8309 = vmatpush3.bf16.xpose.msra.mxu0 %v4681_v24  ;;  %v14148_v24 = vld [vmem:[#allocation35_spill] sm:$0xff] }
 0xc65   : > { %8584 = vmatprep.subr.msk.bf16.mxu0 %vm1545_vm2, %v12239_v61 }
 0xc67   : > { %v3998_v28 = vpop.xlane.xlu1 %3997  ;;  %v4000_v54 = vpop.xlane.xlu0 %3999 }
 0xc68   : > { %9082 = vrcp.f32 %v3998_v28 }
 0xc69   : > { %9084 = vrcp.f32 %v4000_v54 }
 0xc6a   : > { %v9075_v27 = vpop.eup %9074  ;;  %9086 = vrcp.f32 %v4002_v20 }
 0xc6b   : > { %v9077_v13 = vpop.eup %9076  ;;  %v4004_v11 = vpop.xlane.xlu1 %4003  ;;  %v4065_v31 = vmul.f32 %v9075_v27, %v12149_v55 }
 0xc6c   : > { %v4010_v33 = vpop.xlane.xlu0 %4009  ;;  %v9079_v7 = vpop.eup %9078  ;;  %9088 = vrcp.f32 %v4004_v11  ;;  %8311 = vmatpush3.bf16.xpose.msra.mxu0 %v4684_v12  ;;  %v4066_v43 = vmul.f32 %v9077_v13, %v12147_v1  ;;  %v14149_v11 = vld [vmem:[#allocation34_spill] sm:$0xff] }
 0xc6d   : > { %v4067_v22 = vmul.f32 %v9079_v7, %v12142_v23 }
 0xc6e   : > { %v9081_v57 = vpop.eup %9080  ;;  %v4087_v47 = vpack.c.bf16 %v4066_v43, %v4065_v31  ;;  %v14150_v43 = vld [vmem:[#allocation33_spill] sm:$0xff] }
 0xc6f   : > { %v4006_v42 = vpop.xlane.xlu1 %4005  ;;  %v4068_v34 = vmul.f32 %v9081_v57, %v12154_v41 }
 0xc70   : > { %v4008_v48 = vpop.xlane.xlu0 %4007  ;;  %9090 = vrcp.f32 %v4006_v42  ;;  %8254 = vmatprep.mubr.bf16.mxu0 %v4087_v47  ;;  %v14151_v47 = vld [vmem:[#allocation32_spill] sm:$0xff] }
 0xc71   : > { %9092 = vrcp.f32 %v4008_v48  ;;  %v8292_v61 = vpop.f32.mrb[88].mxu1  ;;  %v4088_v19 = vpack.c.bf16 %v4068_v34, %v4067_v22 }
 0xc72   : > { %v9083_v62 = vpop.eup %9082  ;;  %9094 = vrcp.f32 %v4010_v33  ;;  %v4578_v55 = vpop.f32.mrb[89].mxu1 }
 0xc73   : > { %v9085_v21 = vpop.eup %9084  ;;  %v12318_v20 = vadd.f32 %v4578_v55, %v14148_v24  ;;  %v4012_v1 = vpop.xlane.xlu1 %4011  ;;  %8255 = vmatmul.mubr.bf16.gmra.mrb[132].mxu0 %v4088_v19  ;;  %v4069_v54 = vmul.f32 %v9083_v62, %v12170_v4  ;;  %v12329_v4 = vadd.f32 %v8292_v61, %v14150_v43 }
 0xc74   : > { %v8293_v28 = vpop.f32.mrb[90].mxu1  ;;  %v9087_v23 = vpop.eup %9086  ;;  %9096 = vrcp.f32 %v4012_v1  ;;  %v4070_v13 = vmul.f32 %v9085_v21, %v12174_v18 }
 0xc75   : > { %v4640_v41 = vpop.permute.xlu0 %4639  ;;  %v4581_v27 = vpop.f32.mrb[91].mxu1  ;;  %4802 = vmax.xlane.f32.xlu0 %v12318_v20  ;;  %v4071_v57 = vmul.f32 %v9087_v23, %v12158_v59  ;;  %v12335_v42 = vadd.f32 %v8293_v28, %v14151_v47  ;;  %v14155_v47 = vld [vmem:[#allocation36_spill] sm:$0xff] }
 0xc76   : > { %v12323_v12 = vadd.f32 %v4581_v27, %v14149_v11  ;;  %8585 = vmatprep.subr.msk.bf16.mxu0 %vm1545_vm2, %v4640_v41  ;;  %v4687_v33 = vsel %vm1545_vm2, %v4640_v41, 0  ;;  %v9089_v31 = vpop.eup %9088  ;;  %v4089_v7 = vpack.c.bf16 %v4070_v13, %v4069_v54  ;;  %v14152_v13 = vld [vmem:[#allocation39_spill] sm:$0xff] }
 0xc77   : > { %8313 = vmatpush3.bf16.xpose.msra.mxu0 %v4687_v33  ;;  %v4072_v18 = vmul.f32 %v9089_v31, %v12178_v58  ;;  %v4610_v1 = vpop.permute.xlu1 %4609 }
 0xc78   : > { %4804 = vmax.xlane.f32.xlu1 %v12323_v12  ;;  %8258 = vmatprep.mubr.bf16.mxu0 %v4089_v7  ;;  %v14153_v7 = vld [vmem:[#allocation38_spill] sm:$0xff] }
 0xc79   : > { %4806 = vmax.xlane.f32.xlu0 %v12329_v4  ;;  %v4090_v48 = vpack.c.bf16 %v4072_v18, %v4071_v57  ;;  %v4612_v28 = vpop.permute.xlu0 %4611  ;;  %v14154_v57 = vld [vmem:[#allocation37_spill] sm:$0xff] }
 0xc7a   : > { %v9091_v22 = vpop.eup %9090 }
 0xc7b   : > { %v9093_v34 = vpop.eup %9092  ;;  %8259 = vmatmul.mubr.bf16.gmra.mrb[136].mxu0 %v4090_v48  ;;  %v4073_v61 = vmul.f32 %v9091_v22, %v12184_v56  ;;  %v4614_v54 = vpop.permute.xlu1 %4613 }
 0xc7c   : > { %4808 = vmax.xlane.f32.xlu1 %v12335_v42  ;;  %v9095_v19 = vpop.eup %9094  ;;  %v4074_v62 = vmul.f32 %v9093_v34, %v12186_v25 }
 0xc7d   : > { %v4075_v58 = vmul.f32 %v9095_v19, %v12180_v46  ;;  %v4616_v56 = vpop.permute.xlu0 %4615 }
 0xc7e   : > { %v9097_v59 = vpop.eup %9096  ;;  %v4091_v55 = vpack.c.bf16 %v4074_v62, %v4073_v61 }
 0xc7f   : > { %v4076_v21 = vmul.f32 %v9097_v59, %v12190_v15  ;;  %v4618_v25 = vpop.permute.xlu1 %4617 }
 0xc80   : > { %8262 = vmatprep.mubr.bf16.mxu0 %v4091_v55  ;;  %v14157_v55 = vld [vmem:[#allocation13_spill] sm:$0xff] }
 0xc81   : > { %v4092_v24 = vpack.c.bf16 %v4076_v21, %v4075_v58  ;;  %v4620_v46 = vpop.permute.xlu0 %4619  ;;  %v14158_v21 = vld [vmem:[#allocation12_spill] sm:$0xff] }
 0xc83   : > { %8263 = vmatmul.mubr.bf16.gmra.mrb[140].mxu0 %v4092_v24  ;;  %v4622_v15 = vpop.permute.xlu1 %4621 }
 0xc84   : > { %8314 = vmatprep.mubr.msk.bf16.mxu0 %vm1545_vm2, %v4610_v1 }
 0xc85   : > { %v4624_v23 = vpop.permute.xlu0 %4623 }
 0xc8b   : > { %8315 = vmatmul.mubr.msk.bf16.vlgmr.msra.gmra.mrb[144].mxu0 %vm1545_vm2, %v4612_v28 }
 0xc8c   : > { %8318 = vmatprep.mubr.msk.bf16.mxu0 %vm1545_vm2, %v4614_v54 }
 0xc93   : > { %8319 = vmatmul.mubr.msk.bf16.gmra.mrb[148].mxu0 %vm1545_vm2, %v4616_v56 }
 0xc94   : > { %8322 = vmatprep.mubr.msk.bf16.mxu0 %vm1545_vm2, %v4618_v25 }
 0xc9b   : > { %8323 = vmatmul.mubr.msk.bf16.gmra.mrb[152].mxu0 %vm1545_vm2, %v4620_v46 }
 0xc9c   : > { %8326 = vmatprep.mubr.msk.bf16.mxu0 %vm1545_vm2, %v4622_v15 }
 0xca3   : > { %8327 = vmatmul.mubr.msk.bf16.gmra.mrb[156].mxu0 %vm1545_vm2, %v4624_v23  ;;  %vm3418_vm2 = vcmask 130112  }
 0xcc3   : > { %v4789_v58 = vpop.xlane.xlu0 %4788 }
 0xd02   : > { %v8296_v41 = vpop.f32.mrb[92].mxu1 }
 0xd03   : > { %v4594_v27 = vpop.f32.mrb[93].mxu1  ;;  %v12359_v18 = vadd.f32 %v8296_v41, %v14154_v57 }
 0xd04   : > { %v12352_v11 = vadd.f32 %v4594_v27, %v14152_v13  ;;  %v8297_v33 = vpop.f32.mrb[94].mxu1 }
 0xd05   : > { %v4597_v31 = vpop.f32.mrb[95].mxu1  ;;  %v12363_v48 = vadd.f32 %v8297_v33, %v14155_v47 }
 0xd06   : > { %v12355_v43 = vadd.f32 %v4597_v31, %v14153_v7  ;;  %4810 = vmax.xlane.f32.xlu0 %v12352_v11 }
 0xd08   : > { %4812 = vmax.xlane.f32.xlu1 %v12355_v43 }
 0xd0a   : > { %4814 = vmax.xlane.f32.xlu0 %v12359_v18 }
 0xd0c   : > { %4816 = vmax.xlane.f32.xlu1 %v12363_v48 }
 0xd0e   : > { %v12367_v22 = vpop.f32.mrb[128].mxu0 }
 0xd0f   : > { %v12369_v34 = vpop.f32.mrb[129].mxu0 }
 0xd10   : > { %14156 = vst [vmem:[#allocation26_spill] sm:$0xff] %v12369_v34  ;;  %v12371_v61 = vpop.f32.mrb[130].mxu0 }
 0xd11   : > { %v12375_v62 = vpop.f32.mrb[131].mxu0 }
 0xd1d   : > { %5092 = vrot.lane.b32.xlu1 %v14109_v16, %s9521_s19  ;;  %v4791_v16 = vpop.xlane.xlu0 %4790 }
 0xd1e   : > { %v4852_v54 = vsub.f32 %v12267_v3, %v4791_v16 }
 0xd20   : > { %5090 = vrot.lane.b32.xlu0 %v14110_v0, %s9521_s19 }
 0xd21   : > { %5098 = vrot.lane.b32.xlu1 %v14006_v35, %s9521_s19  ;;  %v4787_v35 = vpop.xlane.xlu1 %4786  ;;  %v4795_v0 = vpop.xlane.xlu0 %4794 }
 0xd22   : > { %v4854_v56 = vsub.f32 %v12274_v29, %v4795_v0  ;;  %v4850_v46 = vsub.f32 %v12252_v44, %v4787_v35 }
 0xd24   : > { %5094 = vrot.lane.b32.xlu0 %v14157_v55, %s9521_s19  ;;  %v4890_v15 = vmul.f32 1.442695, %v4854_v56  ;;  %v4882_v41 = vmul.f32 1.442695, %v4850_v46 }
 0xd25   : > { %5100 = vrot.lane.b32.xlu1 %v14011_v26, %s9521_s19  ;;  %v4793_v26 = vpop.xlane.xlu1 %4792  ;;  %v4799_v24 = vpop.xlane.xlu0 %4798 }
 0xd26   : > { %v4856_v28 = vsub.f32 %v12284_v9, %v4799_v24  ;;  %v4853_v27 = vsub.f32 %v12260_v49, %v4793_v26  ;;  %v4851_v49 = vsub.f32 %v12255_v53, %v4789_v58 }
 0xd28   : > { %5096 = vrot.lane.b32.xlu0 %v14158_v21, %s9521_s19  ;;  %v4888_v7 = vmul.f32 1.442695, %v4853_v27  ;;  %v4884_v16 = vmul.f32 1.442695, %v4851_v49 }
 0xd29   : > { %5104 = vrot.lane.b32.xlu1 %v14013_v63, %s9521_s19  ;;  %v4797_v1 = vpop.xlane.xlu1 %4796  ;;  %v4803_v63 = vpop.xlane.xlu0 %4802 }
 0xd2a   : > { %v4858_v47 = vsub.f32 %v12318_v20, %v4803_v63  ;;  %v4855_v35 = vsub.f32 %v12277_v36, %v4797_v1 }
 0xd2c   : > { %5102 = vrot.lane.b32.xlu0 %v14008_v40, %s9521_s19  ;;  %v4894_v40 = vmul.f32 1.442695, %v4856_v28  ;;  %v4898_v58 = vmul.f32 1.442695, %v4858_v47  ;;  %v4892_v1 = vmul.f32 1.442695, %v4855_v35 }
 0xd2d   : > { %5213 = vrot.lane.b32.xlu1 %v14007_v45, %s9521_s19  ;;  %v4801_v25 = vpop.xlane.xlu1 %4800  ;;  %v4886_v45 = vmul.f32 1.442695, %v4852_v54  ;;  %v4807_v23 = vpop.xlane.xlu0 %4806 }
 0xd2e   : > { %9098 = vpow2.f32 %v4894_v40  ;;  %v4860_v33 = vsub.f32 %v12329_v4, %v4807_v23 }
 0xd2f   : > { %9100 = vpow2.f32 %v4886_v45 }
 0xd30   : > { %5211 = vrot.lane.b32.xlu0 %v10296_v37, %s9521_s19  ;;  %v4857_v37 = vsub.f32 %v12287_v10, %v4801_v25  ;;  %9102 = vpow2.f32 %v4890_v15  ;;  %v4902_v55 = vmul.f32 1.442695, %v4860_v33 }
 0xd31   : > { %v4805_v3 = vpop.xlane.xlu1 %4804  ;;  %9104 = vpow2.f32 %v4882_v41 }
 0xd32   : > { %v4896_v29 = vmul.f32 1.442695, %v4857_v37  ;;  %v4859_v63 = vsub.f32 %v12323_v12, %v4805_v3 }
 0xd34   : > { %9106 = vpow2.f32 %v4896_v29  ;;  %v4900_v46 = vmul.f32 1.442695, %v4859_v63 }
 0xd35   : > { %v4809_v21 = vpop.xlane.xlu1 %4808  ;;  %9108 = vpow2.f32 %v4888_v7 }
 0xd36   : > { %9110 = vpow2.f32 %v4902_v55  ;;  %v4861_v20 = vsub.f32 %v12335_v42, %v4809_v21 }
 0xd37   : > { %9112 = vpow2.f32 %v4884_v16 }
 0xd38   : > { %v12420_v4 = vpop.eup %9098  ;;  %9114 = vpow2.f32 %v4898_v58  ;;  %v4904_v40 = vmul.f32 1.442695, %v4861_v20 }
 0xd39   : > { %v12428_v53 = vpop.eup %9100  ;;  %9116 = vpow2.f32 %v4892_v1 }
 0xd3a   : > { %v12438_v36 = vpop.eup %9102  ;;  %9118 = vpow2.f32 %v4904_v40 }
 0xd3b   : > { %v12444_v42 = vpop.eup %9104  ;;  %9120 = vpow2.f32 %v4900_v46 }
 0xd3e   : > { %v12447_v25 = vpop.eup %9106 }
 0xd3f   : > { %v12454_v12 = vpop.eup %9108 }
 0xd40   : > { %v12463_v27 = vpop.eup %9110 }
 0xd41   : > { %v12468_v29 = vpop.eup %9112 }
 0xd42   : > { %v12471_v33 = vpop.eup %9114 }
 0xd43   : > { %v12478_v47 = vpop.eup %9116 }
 0xd44   : > { %v12485_v16 = vpop.eup %9118 }
 0xd45   : > { %v12488_v35 = vpop.eup %9120 }
 0xd46   : > { %v12405_v9 = vpop.f32.mrb[132].mxu0 }
 0xd47   : > { %14159 = vst [vmem:[#allocation25_spill] sm:$0xff] %v12405_v9  ;;  %v12407_v13 = vpop.f32.mrb[133].mxu0 }
 0xd48   : > { %14160 = vst [vmem:[#allocation27_spill] sm:$0xff] %v12407_v13  ;;  %v12410_v44 = vpop.f32.mrb[134].mxu0 }
 0xd49   : > { %14161 = vst [vmem:[#allocation24_spill] sm:$0xff] %v12410_v44  ;;  %v12414_v31 = vpop.f32.mrb[135].mxu0 }
 0xd4a   : > { %14162 = vst [vmem:[#allocation31_spill] sm:$0xff] %v12414_v31 }
 0xd4e   : > { %v12423_v0 = vpop.f32.mrb[136].mxu0 }
 0xd4f   : > { %14163 = vst [vmem:[#allocation30_spill] sm:$0xff] %v12423_v0  ;;  %v12425_v26 = vpop.f32.mrb[137].mxu0  ;;  %4958 = vadd.xlane.f32.xlu0 %v12420_v4 }
 0xd50   : > { %14164 = vst [vmem:[#allocation29_spill] sm:$0xff] %v12425_v26  ;;  %v12431_v24 = vpop.f32.mrb[138].mxu0 }
 0xd51   : > { %14165 = vst [vmem:[#allocation28_spill] sm:$0xff] %v12431_v24  ;;  %v12435_v54 = vpop.f32.mrb[139].mxu0  ;;  %4950 = vadd.xlane.f32.xlu1 %v12428_v53 }
 0xd52   : > { %14166 = vst [vmem:[#allocation35_spill] sm:$0xff] %v12435_v54 }
 0xd53   : > { %4954 = vadd.xlane.f32.xlu0 %v12438_v36 }
 0xd55   : > { %4946 = vadd.xlane.f32.xlu1 %v12444_v42 }
 0xd56   : > { %v12449_v45 = vpop.f32.mrb[140].mxu0 }
 0xd57   : > { %14167 = vst [vmem:[#allocation34_spill] sm:$0xff] %v12449_v45  ;;  %v12451_v15 = vpop.f32.mrb[141].mxu0  ;;  %4960 = vadd.xlane.f32.xlu0 %v12447_v25 }
 0xd58   : > { %14168 = vst [vmem:[#allocation33_spill] sm:$0xff] %v12451_v15  ;;  %v12456_v37 = vpop.f32.mrb[142].mxu0 }
 0xd59   : > { %14169 = vst [vmem:[#allocation32_spill] sm:$0xff] %v12456_v37  ;;  %v12460_v41 = vpop.f32.mrb[143].mxu0  ;;  %4952 = vadd.xlane.f32.xlu1 %v12454_v12 }
 0xd5a   : > { %14170 = vst [vmem:[#allocation39_spill] sm:$0xff] %v12460_v41 }
 0xd5b   : > { %4966 = vadd.xlane.f32.xlu0 %v12463_v27 }
 0xd5d   : > { %4948 = vadd.xlane.f32.xlu1 %v12468_v29 }
 0xd5e   : > { %v12473_v49 = vpop.f32.mrb[144].mxu0 }
 0xd5f   : > { %v12475_v7 = vpop.f32.mrb[145].mxu0  ;;  %4962 = vadd.xlane.f32.xlu0 %v12471_v33 }
 0xd60   : > { %v12480_v55 = vpop.f32.mrb[146].mxu0 }
 0xd61   : > { %v12482_v21 = vpop.f32.mrb[147].mxu0  ;;  %4956 = vadd.xlane.f32.xlu1 %v12478_v47 }
 0xd63   : > { %4968 = vadd.xlane.f32.xlu0 %v12485_v16 }
 0xd65   : > { %4964 = vadd.xlane.f32.xlu1 %v12488_v35 }
 0xd66   : > { %v12491_v58 = vpop.f32.mrb[148].mxu0 }
 0xd67   : > { %v12493_v20 = vpop.f32.mrb[149].mxu0 }
 0xd68   : > { %v12495_v1 = vpop.f32.mrb[150].mxu0 }
 0xd69   : > { %v12497_v63 = vpop.f32.mrb[151].mxu0 }
 0xd6e   : > { %v12499_v40 = vpop.f32.mrb[152].mxu0 }
 0xd6f   : > { %v12501_v46 = vpop.f32.mrb[153].mxu0 }
 0xd70   : > { %v12503_v3 = vpop.f32.mrb[154].mxu0 }
 0xd71   : > { %v12505_v23 = vpop.f32.mrb[155].mxu0 }
 0xd76   : > { %v12507_v56 = vpop.f32.mrb[156].mxu0 }
 0xd77   : > { %v12509_v28 = vpop.f32.mrb[157].mxu0 }
 0xd78   : > { %v12511_v57 = vpop.f32.mrb[158].mxu0 }
 0xd79   : > { %v12513_v10 = vpop.f32.mrb[159].mxu0 }
 0xd93   : > { %v4811_v59 = vpop.xlane.xlu0 %4810 }
 0xd94   : > { %v4862_v41 = vsub.f32 %v12352_v11, %v4811_v59 }
 0xd95   : > { %v4813_v19 = vpop.xlane.xlu1 %4812 }
 0xd96   : > { %v4863_v26 = vsub.f32 %v12355_v43, %v4813_v19  ;;  %v4906_v13 = vmul.f32 1.442695, %v4862_v41  ;;  %v14173_v41 = vld [vmem:[#allocation43_spill] sm:$0xff] }
 0xd97   : > { %v4815_v15 = vpop.xlane.xlu0 %4814 }
 0xd98   : > { %v4864_v45 = vsub.f32 %v12359_v18, %v4815_v15  ;;  %v4908_v44 = vmul.f32 1.442695, %v4863_v26  ;;  %v14171_v26 = vld [vmem:[#allocation41_spill] sm:$0xff] }
 0xd99   : > { %v4817_v37 = vpop.xlane.xlu1 %4816 }
 0xd9a   : > { %v4910_v54 = vmul.f32 1.442695, %v4864_v45  ;;  %v4865_v0 = vsub.f32 %v12363_v48, %v4817_v37  ;;  %v14172_v45 = vld [vmem:[#allocation40_spill] sm:$0xff] }
 0xd9b   : > { %v5091_v24 = vpop.permute.xlu0 %5090  ;;  %v12541_v15 = vadd.f32 %v12473_v49, %v14172_v45  ;;  %v14177_v45 = vld [vmem:[#allocation56_spill] sm:$0xff] }
 0xd9c   : > { %9122 = vpow2.f32 %v4910_v54  ;;  %v4912_v31 = vmul.f32 1.442695, %v4865_v0  ;;  %8330 = vmatprep.subr.bf16.mxu1 %v5091_v24 }
 0xd9d   : > { %v5093_v9 = vpop.permute.xlu1 %5092  ;;  %8331 = vmatpush3.bf16.msra.mxu1 %v5091_v24  ;;  %v12537_v24 = vadd.f32 %v12480_v55, %v14171_v26  ;;  %v14176_v26 = vld [vmem:[#allocation55_spill] sm:$0xff] }
 0xd9e   : > { %9124 = vpow2.f32 %v4912_v31  ;;  %8332 = vmatprep.subr.bf16.mxu1 %v5093_v9 }
 0xd9f   : > { %v5095_v34 = vpop.permute.xlu0 %5094  ;;  %9126 = vpow2.f32 %v4906_v13 }
 0xda0   : > { %9128 = vpow2.f32 %v4908_v44 }
 0xda1   : > { %v5099_v11 = vpop.permute.xlu1 %5098  ;;  %8333 = vmatpush3.bf16.msra.mxu1 %v5093_v9 }
 0xda2   : > { %8334 = vmatprep.subr.bf16.mxu1 %v5095_v34 }
 0xda3   : > { %v5097_v43 = vpop.permute.xlu0 %5096 }
 0xda5   : > { %v5101_v18 = vpop.permute.xlu1 %5100  ;;  %8335 = vmatpush3.bf16.msra.mxu1 %v5095_v34 }
 0xda6   : > { %v12519_v48 = vpop.eup %9122  ;;  %8336 = vmatprep.subr.bf16.mxu1 %v5097_v43 }
 0xda7   : > { %4974 = vadd.xlane.f32.xlu1 %v12519_v48  ;;  %v5103_v19 = vpop.permute.xlu0 %5102 }
 0xda8   : > { %v12522_v59 = vpop.eup %9124 }
 0xda9   : > { %v5105_v0 = vpop.permute.xlu1 %5104  ;;  %4976 = vadd.xlane.f32.xlu0 %v12522_v59  ;;  %8337 = vmatpush3.bf16.msra.mxu1 %v5097_v43  ;;  %v12525_v13 = vpop.eup %9126 }
 0xdaa   : > { %8338 = vmatprep.subr.bf16.mxu1 %v5099_v11  ;;  %v12528_v44 = vpop.eup %9128 }
 0xdab   : > { %4970 = vadd.xlane.f32.xlu1 %v12525_v13  ;;  %v5212_v9 = vpop.permute.xlu0 %5211 }
 0xdac   : > { %8362 = vmatprep.subr.bf16.mxu0 %v5212_v9 }
 0xdad   : > { %v5214_v34 = vpop.permute.xlu1 %5213  ;;  %4972 = vadd.xlane.f32.xlu0 %v12528_v44  ;;  %8339 = vmatpush3.bf16.msra.mxu1 %v5099_v11  ;;  %v12546_v11 = vadd.f32 %v12482_v21, %v14173_v41  ;;  %v12561_v21 = vadd.f32 %v12491_v58, %v14117_v50  ;;  %v12576_v50 = vadd.f32 %v12503_v3, %v14120_v17 }
 0xdae   : > { %8363 = vmatpush3.bf16.msra.mxu0 %v5212_v9  ;;  %8340 = vmatprep.subr.bf16.mxu1 %v5101_v18 }
 0xdaf   : > { %8364 = vmatprep.subr.bf16.mxu0 %v5214_v34 }
 0xdb1   : > { %8341 = vmatpush3.bf16.msra.mxu1 %v5101_v18  ;;  %v14175_v18 = vld [vmem:[#allocation44_spill] sm:$0xff] }
 0xdb2   : > { %8365 = vmatpush3.bf16.msra.mxu0 %v5214_v34  ;;  %8342 = vmatprep.subr.bf16.mxu1 %v5103_v19  ;;  %v12556_v49 = vadd.f32 %v12495_v1, %v14175_v18  ;;  %v12571_v1 = vadd.f32 %v12493_v20, %v14119_v60  ;;  %v12586_v20 = vadd.f32 %v12505_v23, %v14122_v6 }
 0xdb3   : > { %v12597_v6 = vadd.f32 %v12511_v57, %v14177_v45 }
 0xdb5   : > { %8343 = vmatpush3.bf16.msra.mxu1 %v5103_v19 }
 0xdb6   : > { %8344 = vmatprep.subr.bf16.mxu1 %v5105_v0 }
 0xdb9   : > { %8345 = vmatpush3.bf16.msra.mxu1 %v5105_v0  ;;  %v12566_v0 = vadd.f32 %v12497_v63, %v14116_v2  ;;  %v12581_v63 = vadd.f32 %v12499_v40, %v14118_v14  ;;  %v12591_v14 = vadd.f32 %v12501_v46, %v14176_v26 }
 0xdbc   : > { %5217 = vrot.lane.b32.xlu1 %v14062_v51, %s9521_s19 }
 0xdc3   : > { %5215 = vrot.lane.b32.xlu0 %v14010_v39, %s9521_s19  ;;  %v14174_v39 = vld [vmem:[#allocation42_spill] sm:$0xff] }
 0xdc4   : > { %v12551_v43 = vadd.f32 %v12475_v7, %v14174_v39 }
 0xddc   : > { %v4959_v31 = vpop.xlane.xlu0 %4958 }
 0xdde   : > { %v4951_v54 = vpop.xlane.xlu1 %4950 }
 0xde0   : > { %4824 = vmax.xlane.f32.xlu1 %v12537_v24  ;;  %v4955_v37 = vpop.xlane.xlu0 %4954 }
 0xde2   : > { %v4947_v51 = vpop.xlane.xlu1 %4946  ;;  %4822 = vmax.xlane.f32.xlu0 %v12541_v15 }
 0xde4   : > { %4820 = vmax.xlane.f32.xlu1 %v12546_v11  ;;  %v4961_v55 = vpop.xlane.xlu0 %4960 }
 0xde6   : > { %v4953_v19 = vpop.xlane.xlu1 %4952  ;;  %4818 = vmax.xlane.f32.xlu0 %v12551_v43 }
 0xde7   : > { %9130 = vrcp.f32 %v4953_v19  ;;  %v14179_v19 = vld [vmem:[#allocation57_spill] sm:$0xff] }
 0xde8   : > { %4832 = vmax.xlane.f32.xlu1 %v12556_v49  ;;  %9132 = vrcp.f32 %v4947_v51  ;;  %v4967_v7 = vpop.xlane.xlu0 %4966  ;;  %v14178_v51 = vld [vmem:[#allocation50_spill] sm:$0xff] }
 0xde9   : > { %9134 = vrcp.f32 %v4951_v54  ;;  %v12605_v39 = vadd.f32 %v12507_v56, %v14178_v51 }
 0xdea   : > { %v4949_v9 = vpop.xlane.xlu1 %4948  ;;  %4830 = vmax.xlane.f32.xlu0 %v12561_v21 }
 0xdeb   : > { %9136 = vrcp.f32 %v4949_v9  ;;  %v12610_v9 = vadd.f32 %v12513_v10, %v14179_v19 }
 0xdec   : > { %4828 = vmax.xlane.f32.xlu1 %v12566_v0  ;;  %9138 = vrcp.f32 %v4955_v37  ;;  %v4963_v2 = vpop.xlane.xlu0 %4962 }
 0xdee   : > { %v4957_v58 = vpop.xlane.xlu1 %4956  ;;  %4826 = vmax.xlane.f32.xlu0 %v12571_v1 }
 0xdef   : > { %9140 = vrcp.f32 %v4957_v58  ;;  %v14180_v58 = vld [vmem:[#allocation51_spill] sm:$0xff] }
 0xdf0   : > { %9142 = vrcp.f32 %v4961_v55  ;;  %4840 = vmax.xlane.f32.xlu1 %v12576_v50  ;;  %v4969_v54 = vpop.xlane.xlu0 %4968 }
 0xdf1   : > { %9144 = vrcp.f32 %v4959_v31  ;;  %v9131_v60 = vpop.eup %9130 }
 0xdf2   : > { %9146 = vrcp.f32 %v4963_v2  ;;  %v4965_v17 = vpop.xlane.xlu1 %4964  ;;  %4838 = vmax.xlane.f32.xlu0 %v12581_v63  ;;  %v9133_v3 = vpop.eup %9132  ;;  %v5045_v31 = vmul.f32 %v9131_v60, %v12454_v12  ;;  %v12617_v2 = vadd.f32 %v12509_v28, %v14180_v58 }
 0xdf3   : > { %9148 = vrcp.f32 %v4965_v17  ;;  %v9135_v34 = vpop.eup %9134  ;;  %v5042_v23 = vmul.f32 %v9133_v3, %v12444_v42 }
 0xdf4   : > { %4836 = vmax.xlane.f32.xlu1 %v12586_v20  ;;  %v5044_v46 = vmul.f32 %v9135_v34, %v12428_v53  ;;  %9150 = vrcp.f32 %v4969_v54 }
 0xdf5   : > { %v9137_v40 = vpop.eup %9136  ;;  %9152 = vrcp.f32 %v4967_v7 }
 0xdf6   : > { %4834 = vmax.xlane.f32.xlu0 %v12591_v14  ;;  %v5043_v37 = vmul.f32 %v9137_v40, %v12468_v29  ;;  %v9139_v41 = vpop.eup %9138  ;;  %v5075_v57 = vpack.c.bf16 %v5045_v31, %v5044_v46 }
 0xdf7   : > { %v5046_v53 = vmul.f32 %v9139_v41, %v12438_v36 }
 0xdf8   : > { %4848 = vmax.xlane.f32.xlu1 %v12597_v6  ;;  %v5074_v12 = vpack.c.bf16 %v5043_v37, %v5042_v23 }
 0xdf9   : > { %v9141_v55 = vpop.eup %9140 }
 0xdfa   : > { %v9143_v18 = vpop.eup %9142  ;;  %8346 = vmatprep.mubr.bf16.mxu1 %v5074_v12  ;;  %4846 = vmax.xlane.f32.xlu0 %v12605_v39  ;;  %v5047_v56 = vmul.f32 %v9141_v55, %v12478_v47 }
 0xdfb   : > { %v9145_v42 = vpop.eup %9144  ;;  %8347 = vmatmul.mubr.bf16.vlgmr.msra.gmra.mrb[96].mxu1 %v5075_v57  ;;  %v5049_v7 = vmul.f32 %v9143_v18, %v12447_v25 }
 0xdfc   : > { %v9147_v29 = vpop.eup %9146  ;;  %4844 = vmax.xlane.f32.xlu1 %v12610_v9  ;;  %v5076_v60 = vpack.c.bf16 %v5047_v56, %v5046_v53  ;;  %v5048_v47 = vmul.f32 %v9145_v42, %v12420_v4 }
 0xdfd   : > { %v9149_v10 = vpop.eup %9148  ;;  %v5050_v17 = vmul.f32 %v9147_v29, %v12471_v33 }
 0xdfe   : > { %4842 = vmax.xlane.f32.xlu0 %v12617_v2  ;;  %8350 = vmatprep.mubr.bf16.mxu1 %v5076_v60  ;;  %v5051_v36 = vmul.f32 %v9149_v10, %v12488_v35  ;;  %v5077_v3 = vpack.c.bf16 %v5049_v7, %v5048_v47  ;;  %v9151_v34 = vpop.eup %9150 }
 0xdff   : > { %v9153_v28 = vpop.eup %9152  ;;  %v5053_v40 = vmul.f32 %v9151_v34, %v12485_v16 }
 0xe00   : > { %v5078_v26 = vpack.c.bf16 %v5051_v36, %v5050_v17  ;;  %v5052_v31 = vmul.f32 %v9153_v28, %v12463_v27 }
 0xe02   : > { %v5079_v25 = vpack.c.bf16 %v5053_v40, %v5052_v31 }
 0xe03   : > { %8351 = vmatmul.mubr.bf16.gmra.mrb[100].mxu1 %v5077_v3 }
 0xe04   : > { %8354 = vmatprep.mubr.bf16.mxu1 %v5078_v26 }
 0xe0b   : > { %8355 = vmatmul.mubr.bf16.gmra.mrb[104].mxu1 %v5079_v25 }
 0xe0d   : > { %5221 = vrot.lane.b32.xlu1 %v10320_v5, %s9521_s19 }
 0xe14   : > { %5219 = vrot.lane.b32.xlu0 %v14012_v52, %s9521_s19 }
 0xe34   : > { %v4975_v4 = vpop.xlane.xlu1 %4974 }
 0xe36   : > { %v4977_v33 = vpop.xlane.xlu0 %4976 }
 0xe37   : > { %9154 = vrcp.f32 %v4977_v33 }
 0xe38   : > { %v4971_v35 = vpop.xlane.xlu1 %4970 }
 0xe39   : > { %9156 = vrcp.f32 %v4971_v35 }
 0xe3a   : > { %9158 = vrcp.f32 %v4975_v4  ;;  %v4973_v54 = vpop.xlane.xlu0 %4972 }
 0xe3b   : > { %9160 = vrcp.f32 %v4973_v54 }
 0xe3c   : > { %v5218_v16 = vpop.permute.xlu1 %5217 }
 0xe3e   : > { %v5216_v45 = vpop.permute.xlu0 %5215 }
 0xe3f   : > { %8366 = vmatprep.subr.bf16.mxu0 %v5216_v45 }
 0xe40   : > { %8367 = vmatpush3.bf16.msra.mxu0 %v5216_v45 }
 0xe41   : > { %8368 = vmatprep.subr.bf16.mxu0 %v5218_v16  ;;  %v9155_v27 = vpop.eup %9154 }
 0xe42   : > { %v5057_v52 = vmul.f32 %v9155_v27, %v12522_v59 }
 0xe43   : > { %v9157_v23 = vpop.eup %9156 }
 0xe44   : > { %v9159_v37 = vpop.eup %9158  ;;  %8369 = vmatpush3.bf16.msra.mxu0 %v5218_v16  ;;  %v5054_v41 = vmul.f32 %v9157_v23, %v12525_v13 }
 0xe45   : > { %v9161_v5 = vpop.eup %9160  ;;  %v5056_v51 = vmul.f32 %v9159_v37, %v12519_v48 }
 0xe46   : > { %v5055_v46 = vmul.f32 %v9161_v5, %v12528_v44 }
 0xe47   : > { %v5081_v55 = vpack.c.bf16 %v5057_v52, %v5056_v51 }
 0xe48   : > { %v5080_v12 = vpack.c.bf16 %v5055_v46, %v5054_v41 }
 0xe4a   : > { %8358 = vmatprep.mubr.bf16.mxu1 %v5080_v12 }
 0xe4b   : > { %8359 = vmatmul.mubr.bf16.gmra.mrb[108].mxu1 %v5081_v55 }
 0xe6d   : > { %v4825_v57 = vpop.xlane.xlu1 %4824 }
 0xe6e   : > { %v4869_v18 = vsub.f32 %v12537_v24, %v4825_v57 }
 0xe6f   : > { %v4823_v19 = vpop.xlane.xlu0 %4822 }
 0xe70   : > { %v4920_v53 = vmul.f32 1.442695, %v4869_v18  ;;  %v4868_v56 = vsub.f32 %v12541_v15, %v4823_v19 }
 0xe71   : > { %v4821_v42 = vpop.xlane.xlu1 %4820 }
 0xe72   : > { %9162 = vpow2.f32 %v4920_v53  ;;  %v4918_v59 = vmul.f32 1.442695, %v4868_v56  ;;  %v4867_v13 = vsub.f32 %v12546_v11, %v4821_v42  ;;  %v14181_v42 = vld [vmem:[#allocation20_spill] sm:$0xff] }
 0xe73   : > { %v4819_v29 = vpop.xlane.xlu0 %4818 }
 0xe74   : > { %9164 = vpow2.f32 %v4918_v59  ;;  %v4916_v44 = vmul.f32 1.442695, %v4867_v13  ;;  %v4866_v48 = vsub.f32 %v12551_v43, %v4819_v29  ;;  %v14182_v59 = vld [vmem:[#allocation18_spill] sm:$0xff] }
 0xe75   : > { %v4833_v58 = vpop.xlane.xlu1 %4832  ;;  %v14183_v13 = vpack.c.bf16 %v14181_v42, %v14182_v59  ;;  %v8639_v42 = vld [vmem:[%s9639_s25 + $0x8] sm:$0xff]   ;;  %v14203_v59 = vld [vmem:[#allocation60_spill] sm:$0xff] }
 0xe76   : > { %9166 = vpow2.f32 %v4916_v44  ;;  %v4914_v60 = vmul.f32 1.442695, %v4866_v48  ;;  %v4873_v10 = vsub.f32 %v12556_v49, %v4833_v58  ;;  %v14184_v44 = vpack.c.bf16 %v12168_v38, %v12160_v8 }
 0xe77   : > { %v4831_v24 = vpop.xlane.xlu0 %4830 }
 0xe78   : > { %9168 = vpow2.f32 %v4914_v60  ;;  %v4928_v7 = vmul.f32 1.442695, %v4873_v10  ;;  %v4872_v15 = vsub.f32 %v12561_v21, %v4831_v24 }
 0xe79   : > { %v4829_v36 = vpop.xlane.xlu1 %4828 }
 0xe7a   : > { %9170 = vpow2.f32 %v4928_v7  ;;  %v4926_v47 = vmul.f32 1.442695, %v4872_v15  ;;  %v4871_v11 = vsub.f32 %v12566_v0, %v4829_v36 }
 0xe7b   : > { %v4827_v17 = vpop.xlane.xlu0 %4826 }
 0xe7c   : > { %v12642_v3 = vpop.eup %9162  ;;  %9172 = vpow2.f32 %v4926_v47  ;;  %v4924_v43 = vmul.f32 1.442695, %v4871_v11  ;;  %v4870_v34 = vsub.f32 %v12571_v1, %v4827_v17  ;;  %v14185_v47 = vld [vmem:[#allocation59_spill] sm:$0xff]  ;;  %v14186_v11 = vld [vmem:[#allocation16_spill] sm:$0xff] }
 0xe7d   : > { %4984 = vadd.xlane.f32.xlu0 %v12642_v3  ;;  %v4841_v49 = vpop.xlane.xlu1 %4840  ;;  %v14187_v17 = vpack.c.bf16 %v14185_v47, %v14186_v11  ;;  %v14219_v47 = vld [vmem:[#allocation47_spill] sm:$0xff] }
 0xe7e   : > { %v12646_v26 = vpop.eup %9164  ;;  %9174 = vpow2.f32 %v4924_v43  ;;  %v4922_v28 = vmul.f32 1.442695, %v4870_v34  ;;  %v4877_v21 = vsub.f32 %v12576_v50, %v4841_v49 }
 0xe7f   : > { %4982 = vadd.xlane.f32.xlu1 %v12646_v26  ;;  %v4839_v40 = vpop.xlane.xlu0 %4838 }
 0xe80   : > { %v12650_v0 = vpop.eup %9166  ;;  %9176 = vpow2.f32 %v4922_v28  ;;  %v4936_v31 = vmul.f32 1.442695, %v4877_v21  ;;  %v4876_v25 = vsub.f32 %v12581_v63, %v4839_v40  ;;  %v14188_v28 = vld [vmem:[#allocation54_spill] sm:$0xff]  ;;  %v14189_v21 = vld [vmem:[#allocation53_spill] sm:$0xff] }
 0xe81   : > { %4980 = vadd.xlane.f32.xlu0 %v12650_v0  ;;  %v4837_v1 = vpop.xlane.xlu1 %4836  ;;  %v14190_v40 = vpack.c.bf16 %v14188_v28, %v14189_v21  ;;  %v14225_v28 = vld [vmem:[#allocation80_spill] sm:$0xff] }
 0xe82   : > { %v12654_v4 = vpop.eup %9168  ;;  %9178 = vpow2.f32 %v4936_v31  ;;  %v4934_v33 = vmul.f32 1.442695, %v4876_v25  ;;  %v4875_v35 = vsub.f32 %v12586_v20, %v4837_v1  ;;  %v14191_v1 = vld [vmem:[#allocation14_spill] sm:$0xff] }
 0xe83   : > { %4978 = vadd.xlane.f32.xlu1 %v12654_v4  ;;  %v4835_v50 = vpop.xlane.xlu0 %4834 }
 0xe84   : > { %v12658_v54 = vpop.eup %9170  ;;  %9180 = vpow2.f32 %v4934_v33  ;;  %v4932_v45 = vmul.f32 1.442695, %v4875_v35  ;;  %v4874_v16 = vsub.f32 %v12591_v14, %v4835_v50  ;;  %v14192_v33 = vld [vmem:[#allocation17_spill] sm:$0xff] }
 0xe85   : > { %4992 = vadd.xlane.f32.xlu0 %v12658_v54  ;;  %v4849_v63 = vpop.xlane.xlu1 %4848  ;;  %v14193_v35 = vpack.c.bf16 %v14191_v1, %v14192_v33 }
 0xe86   : > { %v12662_v27 = vpop.eup %9172  ;;  %9182 = vpow2.f32 %v4932_v45  ;;  %v4930_v23 = vmul.f32 1.442695, %v4874_v16  ;;  %v4881_v48 = vsub.f32 %v12597_v6, %v4849_v63 }
 0xe87   : > { %4990 = vadd.xlane.f32.xlu1 %v12662_v27  ;;  %v4847_v37 = vpop.xlane.xlu0 %4846 }
 0xe88   : > { %v12665_v20 = vpop.eup %9174  ;;  %9184 = vpow2.f32 %v4930_v23  ;;  %v4880_v5 = vsub.f32 %v12605_v39, %v4847_v37  ;;  %v4944_v58 = vmul.f32 1.442695, %v4881_v48  ;;  %v14194_v23 = vld [vmem:[#allocation11_spill] sm:$0xff]  ;;  %v14195_v37 = vld [vmem:[#allocation10_spill] sm:$0xff]  ;;  %v14207_v48 = vld [vmem:[#allocation45_spill] sm:$0xff] }
 0xe89   : > { %4988 = vadd.xlane.f32.xlu0 %v12665_v20  ;;  %v4845_v41 = vpop.xlane.xlu1 %4844 }
 0xe8a   : > { %v12669_v52 = vpop.eup %9176  ;;  %v4942_v14 = vmul.f32 1.442695, %v4880_v5  ;;  %v4879_v29 = vsub.f32 %v12610_v9, %v4845_v41  ;;  %v14196_v5 = vpack.c.bf16 %v14194_v23, %v14195_v37  ;;  %v14198_v41 = vld [vmem:[#allocation23_spill] sm:$0xff] }
 0xe8b   : > { %4986 = vadd.xlane.f32.xlu1 %v12669_v52  ;;  %v4843_v46 = vpop.xlane.xlu0 %4842 }
 0xe8c   : > { %v12672_v51 = vpop.eup %9178  ;;  %9186 = vpow2.f32 %v4942_v14  ;;  %v4878_v12 = vsub.f32 %v12617_v2, %v4843_v46  ;;  %v14197_v14 = vld [vmem:[#allocation52_spill] sm:$0xff] }
 0xe8d   : > { %5000 = vadd.xlane.f32.xlu0 %v12672_v51  ;;  %v5222_v19 = vpop.permute.xlu1 %5221  ;;  %v14199_v46 = vpack.c.bf16 %v14197_v14, %v14198_v41 }
 0xe8e   : > { %v12676_v55 = vpop.eup %9180  ;;  %v4938_v57 = vmul.f32 1.442695, %v4878_v12  ;;  %v8638_v12 = vld [vmem:[%s9639_s25] sm:$0xff]  }
 0xe8f   : > { %4998 = vadd.xlane.f32.xlu1 %v12676_v55  ;;  %v5220_v39 = vpop.permute.xlu0 %5219  ;;  %8394 = vmatprep.subr.bf16.mxu1 %v8638_v12 }
 0xe90   : > { %v12679_v18 = vpop.eup %9182  ;;  %9188 = vpow2.f32 %v4938_v57  ;;  %8370 = vmatprep.subr.bf16.mxu0 %v5220_v39  ;;  %8395 = vmatpush3.bf16.msra.mxu1 %v8638_v12  ;;  %v14200_v57 = vld [vmem:[#allocation79_spill] sm:$0xff] }
 0xe91   : > { %4996 = vadd.xlane.f32.xlu0 %v12679_v18  ;;  %8371 = vmatpush3.bf16.msra.mxu0 %v5220_v39  ;;  %v14201_v39 = vld [vmem:[#allocation48_spill] sm:$0xff] }
 0xe92   : > { %v12682_v53 = vpop.eup %9184  ;;  %8372 = vmatprep.subr.bf16.mxu0 %v5222_v19  ;;  %8396 = vmatprep.subr.bf16.mxu1 %v8639_v42 }
 0xe93   : > { %4994 = vadd.xlane.f32.xlu1 %v12682_v53 }
 0xe94   : > { %8397 = vmatpush3.bf16.msra.mxu1 %v8639_v42 }
 0xe95   : > { %8373 = vmatpush3.bf16.msra.mxu0 %v5222_v19  ;;  %v14202_v19 = vpack.c.bf16 %v14200_v57, %v14201_v39 }
 0xe96   : > { %v12685_v2 = vpop.eup %9186 }
 0xe97   : > { %5006 = vadd.xlane.f32.xlu1 %v12685_v2 }
 0xe9a   : > { %v12688_v56 = vpop.eup %9188 }
 0xe9b   : > { %5002 = vadd.xlane.f32.xlu1 %v12688_v56 }
 0xea7   : > { %5223 = vrot.lane.b32.xlu0 %v10345_v32, %s9521_s19  ;;  %v4940_v32 = vmul.f32 1.442695, %v4879_v29 }
 0xea9   : > { %9190 = vpow2.f32 %v4940_v32 }
 0xeaa   : > { %9192 = vpow2.f32 %v4944_v58  ;;  %v14209_v58 = vld [vmem:[#allocation63_spill] sm:$0xff] }
 0xeac   : > { %5225 = vrot.lane.b32.xlu1 %v14005_v30, %s9521_s19 }
 0xeb0   : > { %3372 = vrot.lane.b32.xlu1 %v14183_v13, %s9522_s24  ;;  %v14204_v13 = vld [vmem:[#allocation21_spill] sm:$0xff] }
 0xeb1   : > { %v14205_v29 = vpack.c.bf16 %v14203_v59, %v14204_v13 }
 0xeb3   : > { %v12705_v30 = vpop.eup %9190 }
 0xeb4   : > { %4367 = vrot.lane.b32.xlu1 %v14184_v44, %s9523_s18  ;;  %v12708_v60 = vpop.eup %9192  ;;  %v14206_v44 = vld [vmem:[#allocation46_spill] sm:$0xff] }
 0xeb5   : > { %v14208_v32 = vpack.c.bf16 %v14206_v44, %v14207_v48  ;;  %v14228_v44 = vld [vmem:[#allocation22_spill] sm:$0xff] }
 0xec6   : > { %5004 = vadd.xlane.f32.xlu0 %v12705_v30 }
 0xeca   : > { %5008 = vadd.xlane.f32.xlu0 %v12708_v60 }
 0xece   : > { %v8348_v9 = vpop.f32.mrb[96].mxu1 }
 0xecf   : > { %v5148_v10 = vpop.f32.mrb[97].mxu1 }
 0xed0   : > { %v8349_v24 = vpop.f32.mrb[98].mxu1 }
 0xed1   : > { %v5333_v7 = vpack.c.bf16 %v8349_v24, %v8348_v9  ;;  %v5151_v8 = vpop.f32.mrb[99].mxu1  ;;  %v14210_v9 = vld [vmem:[#allocation19_spill] sm:$0xff] }
 0xed2   : > { %v5332_v38 = vpack.c.bf16 %v5151_v8, %v5148_v10  ;;  %v14211_v10 = vpack.c.bf16 %v14209_v58, %v14210_v9  ;;  %v14212_v24 = vld [vmem:[#allocation83_spill] sm:$0xff]  ;;  %v14230_v58 = vld [vmem:[#allocation65_spill] sm:$0xff] }
 0xed3   : > { %v14231_v9 = vld [vmem:[#allocation15_spill] sm:$0xff] }
 0xed4   : > { %5364 = vrot.lane.b32.xlu1 %v5332_v38, %s9524_s12  ;;  %v14215_v38 = vld [vmem:[#allocation49_spill] sm:$0xff] }
 0xed6   : > { %v8352_v6 = vpop.f32.mrb[100].mxu1 }
 0xed7   : > { %v5164_v15 = vpop.f32.mrb[101].mxu1 }
 0xed8   : > { %v8353_v36 = vpop.f32.mrb[102].mxu1  ;;  %3374 = vrot.lane.b32.xlu1 %v14187_v17, %s9522_s24  ;;  %v14221_v17 = vld [vmem:[#allocation62_spill] sm:$0xff] }
 0xed9   : > { %v5335_v43 = vpack.c.bf16 %v8353_v36, %v8352_v6  ;;  %v5167_v34 = vpop.f32.mrb[103].mxu1  ;;  %v14216_v6 = vld [vmem:[#allocation61_spill] sm:$0xff]  ;;  %v14218_v36 = vld [vmem:[#allocation78_spill] sm:$0xff] }
 0xeda   : > { %v5334_v49 = vpack.c.bf16 %v5167_v34, %v5164_v15  ;;  %v14217_v15 = vpack.c.bf16 %v14215_v38, %v14216_v6  ;;  %v14220_v11 = vpack.c.bf16 %v14218_v36, %v14219_v47  ;;  %v14234_v36 = vld [vmem:[#allocation26_spill] sm:$0xff] }
 0xedb   : > { %v14235_v47 = vpack.c.bf16 %v12375_v62, %v14234_v36  ;;  %v14239_v62 = vld [vmem:[#allocation69_spill] sm:$0xff] }
 0xedc   : > { %4371 = vrot.lane.b32.xlu1 %v14190_v40, %s9523_s18 }
 0xede   : > { %v8356_v31 = vpop.f32.mrb[104].mxu1 }
 0xedf   : > { %v5180_v25 = vpop.f32.mrb[105].mxu1 }
 0xee0   : > { %3370 = vrot.lane.b32.xlu0 %v14193_v35, %s9522_s24  ;;  %v8357_v50 = vpop.f32.mrb[106].mxu1  ;;  %5368 = vrot.lane.b32.xlu1 %v5334_v49, %s9524_s12  ;;  %v14224_v49 = vld [vmem:[#allocation82_spill] sm:$0xff] }
 0xee1   : > { %v5337_v45 = vpack.c.bf16 %v8357_v50, %v8356_v31  ;;  %v5183_v16 = vpop.f32.mrb[107].mxu1  ;;  %v14226_v21 = vpack.c.bf16 %v14224_v49, %v14225_v28 }
 0xee2   : > { %v5336_v63 = vpack.c.bf16 %v5183_v16, %v5180_v25 }
 0xee4   : > { %4369 = vrot.lane.b32.xlu0 %v14196_v5, %s9523_s18  ;;  %3378 = vrot.lane.b32.xlu1 %v14199_v46, %s9522_s24 }
 0xee8   : > { %5366 = vrot.lane.b32.xlu0 %v5333_v7, %s9524_s12  ;;  %4375 = vrot.lane.b32.xlu1 %v14202_v19, %s9523_s18  ;;  %v14213_v7 = vld [vmem:[#allocation81_spill] sm:$0xff] }
 0xee9   : > { %v14214_v8 = vpack.c.bf16 %v14212_v24, %v14213_v7 }
 0xeec   : > { %3376 = vrot.lane.b32.xlu0 %v14205_v29, %s9522_s24  ;;  %5372 = vrot.lane.b32.xlu1 %v5336_v63, %s9524_s12 }
 0xef0   : > { %4373 = vrot.lane.b32.xlu0 %v14208_v32, %s9523_s18  ;;  %3382 = vrot.lane.b32.xlu1 %v14211_v10, %s9522_s24  ;;  %v14232_v10 = vpack.c.bf16 %v14230_v58, %v14231_v9 }
 0xef4   : > { %5370 = vrot.lane.b32.xlu0 %v5335_v43, %s9524_s12  ;;  %4379 = vrot.lane.b32.xlu1 %v14214_v8, %s9523_s18  ;;  %v14222_v43 = vld [vmem:[#allocation58_spill] sm:$0xff] }
 0xef5   : > { %v14223_v34 = vpack.c.bf16 %v14221_v17, %v14222_v43 }
 0xef8   : > { %3380 = vrot.lane.b32.xlu0 %v14217_v15, %s9522_s24  ;;  %v14233_v15 = vpack.c.bf16 %v12371_v61, %v12367_v22  ;;  %v14237_v22 = vld [vmem:[#allocation66_spill] sm:$0xff] }
 0xefc   : > { %4377 = vrot.lane.b32.xlu0 %v14220_v11, %s9523_s18 }
 0xf00   : > { %5374 = vrot.lane.b32.xlu0 %v5337_v45, %s9524_s12 }
 0xf04   : > { %3384 = vrot.lane.b32.xlu0 %v14223_v34, %s9522_s24  ;;  %v14236_v34 = vld [vmem:[#allocation68_spill] sm:$0xff] }
 0xf05   : > { %v14238_v61 = vpack.c.bf16 %v14236_v34, %v14237_v22 }
 0xf08   : > { %4381 = vrot.lane.b32.xlu0 %v14226_v21, %s9523_s18  ;;  %v14240_v21 = vld [vmem:[#allocation67_spill] sm:$0xff] }
 0xf0a   : > { %v4985_v40 = vpop.xlane.xlu0 %4984 }
 0xf0c   : > { %v4983_v31 = vpop.xlane.xlu1 %4982 }
 0xf0e   : > { %v4981_v25 = vpop.xlane.xlu0 %4980 }
 0xf0f   : > { %9194 = vrcp.f32 %v4981_v25 }
 0xf10   : > { %v4979_v1 = vpop.xlane.xlu1 %4978 }
 0xf11   : > { %9196 = vrcp.f32 %v4979_v1  ;;  %v14242_v1 = vld [vmem:[#allocation24_spill] sm:$0xff] }
 0xf12   : > { %v4993_v33 = vpop.xlane.xlu0 %4992  ;;  %9198 = vrcp.f32 %v4983_v31 }
 0xf14   : > { %v4991_v35 = vpop.xlane.xlu1 %4990 }
 0xf16   : > { %v4989_v50 = vpop.xlane.xlu0 %4988 }
 0xf18   : > { %v4987_v45 = vpop.xlane.xlu1 %4986 }
 0xf19   : > { %v9195_v16 = vpop.eup %9194  ;;  %9200 = vrcp.f32 %v4987_v45  ;;  %v14245_v45 = vld [vmem:[#allocation31_spill] sm:$0xff] }
 0xf1a   : > { %v5001_v63 = vpop.xlane.xlu0 %5000  ;;  %v5059_v14 = vmul.f32 %v9195_v16, %v12650_v0  ;;  %9202 = vrcp.f32 %v4985_v40  ;;  %v14227_v0 = vld [vmem:[#allocation64_spill] sm:$0xff]  ;;  %v14246_v16 = vld [vmem:[#allocation27_spill] sm:$0xff] }
 0xf1b   : > { %v9197_v23 = vpop.eup %9196  ;;  %9204 = vrcp.f32 %v4989_v50  ;;  %v14229_v48 = vpack.c.bf16 %v14227_v0, %v14228_v44 }
 0xf1c   : > { %v4999_v37 = vpop.xlane.xlu1 %4998  ;;  %v5058_v5 = vmul.f32 %v9197_v23, %v12654_v4  ;;  %9206 = vrcp.f32 %v4991_v35  ;;  %v9199_v32 = vpop.eup %9198 }
 0xf1d   : > { %v5060_v6 = vmul.f32 %v9199_v32, %v12646_v26 }
 0xf1e   : > { %v8360_v41 = vpop.f32.mrb[108].mxu1  ;;  %v4997_v46 = vpop.xlane.xlu0 %4996  ;;  %v5082_v12 = vpack.c.bf16 %v5059_v14, %v5058_v5  ;;  %v14248_v14 = vld [vmem:[#allocation72_spill] sm:$0xff] }
 0xf1f   : > { %v5196_v57 = vpop.f32.mrb[109].mxu1 }
 0xf20   : > { %v8361_v39 = vpop.f32.mrb[110].mxu1  ;;  %v4995_v19 = vpop.xlane.xlu1 %4994  ;;  %8378 = vmatprep.mubr.bf16.mxu0 %v5082_v12 }
 0xf21   : > { %v5339_v42 = vpack.c.bf16 %v8361_v39, %v8360_v41  ;;  %v5199_v59 = vpop.f32.mrb[111].mxu1  ;;  %9208 = vrcp.f32 %v4995_v19  ;;  %v14249_v41 = vld [vmem:[#allocation70_spill] sm:$0xff]  ;;  %v14252_v39 = vld [vmem:[#allocation71_spill] sm:$0xff] }
 0xf22   : > { %v5338_v13 = vpack.c.bf16 %v5199_v59, %v5196_v57  ;;  %v5224_v29 = vpop.permute.xlu0 %5223  ;;  %9210 = vrcp.f32 %v4993_v33  ;;  %v14243_v33 = vld [vmem:[#allocation25_spill] sm:$0xff] }
 0xf23   : > { %5378 = vrot.lane.b32.xlu0 %v5339_v42, %s9524_s12  ;;  %8374 = vmatprep.subr.bf16.mxu0 %v5224_v29  ;;  %v9201_v7 = vpop.eup %9200  ;;  %9212 = vrcp.f32 %v4997_v46  ;;  %v14244_v35 = vpack.c.bf16 %v14242_v1, %v14243_v33  ;;  %v14250_v46 = vpack.c.bf16 %v14248_v14, %v14249_v41 }
 0xf24   : > { %v12778_v4 = vpop.xlane.xlu1 %5006  ;;  %5376 = vrot.lane.b32.xlu1 %v5338_v13, %s9524_s12  ;;  %8375 = vmatpush3.bf16.msra.mxu0 %v5224_v29  ;;  %v9203_v8 = vpop.eup %9202  ;;  %v5062_v17 = vmul.f32 %v9201_v7, %v12669_v52  ;;  %9214 = vrcp.f32 %v4999_v37  ;;  %v14241_v52 = vpack.c.bf16 %v14239_v62, %v14240_v21 }
 0xf25   : > { %v9205_v38 = vpop.eup %9204  ;;  %v5061_v43 = vmul.f32 %v9203_v8, %v12642_v3  ;;  %9216 = vrcp.f32 %v5001_v63  ;;  %v14247_v63 = vpack.c.bf16 %v14245_v45, %v14246_v16 }
 0xf26   : > { %v5063_v26 = vmul.f32 %v9205_v38, %v12665_v20  ;;  %v9207_v28 = vpop.eup %9206 }
 0xf27   : > { %3388 = vrot.lane.b32.xlu0 %v14229_v48, %s9522_s24  ;;  %v5083_v49 = vpack.c.bf16 %v5061_v43, %v5060_v6  ;;  %v5064_v50 = vmul.f32 %v9207_v28, %v12662_v27  ;;  %v14251_v27 = vld [vmem:[#allocation73_spill] sm:$0xff] }
 0xf28   : > { %3386 = vrot.lane.b32.xlu1 %v14232_v10, %s9522_s24  ;;  %v5003_v24 = vpop.xlane.xlu1 %5002  ;;  %v5084_v40 = vpack.c.bf16 %v5063_v26, %v5062_v17  ;;  %v14253_v19 = vpack.c.bf16 %v14251_v27, %v14252_v39 }
 0xf29   : > { %9218 = vrcp.f32 %v5003_v24 }
 0xf2b   : > { %4385 = vrot.lane.b32.xlu0 %v14233_v15, %s9523_s18  ;;  %v9209_v31 = vpop.eup %9208 }
 0xf2c   : > { %4383 = vrot.lane.b32.xlu1 %v14235_v47, %s9523_s18  ;;  %v5226_v11 = vpop.permute.xlu1 %5225  ;;  %v9211_v20 = vpop.eup %9210  ;;  %v5066_v23 = vmul.f32 %v9209_v31, %v12682_v53 }
 0xf2d   : > { %8376 = vmatprep.subr.bf16.mxu0 %v5226_v11  ;;  %v9213_v25 = vpop.eup %9212  ;;  %v5065_v37 = vmul.f32 %v9211_v20, %v12658_v54 }
 0xf2e   : > { %8377 = vmatpush3.bf16.msra.mxu0 %v5226_v11  ;;  %v5067_v5 = vmul.f32 %v9213_v25, %v12679_v18  ;;  %v9215_v57 = vpop.eup %9214 }
 0xf2f   : > { %3392 = vrot.lane.b32.xlu0 %v14238_v61, %s9522_s24  ;;  %v5085_v12 = vpack.c.bf16 %v5065_v37, %v5064_v50  ;;  %v9217_v59 = vpop.eup %9216  ;;  %v5068_v54 = vmul.f32 %v9215_v57, %v12676_v55 }
 0xf30   : > { %3390 = vrot.lane.b32.xlu1 %v14241_v52, %s9522_s24  ;;  %v3373_v3 = vpop.permute.xlu1 %3372  ;;  %v5086_v42 = vpack.c.bf16 %v5067_v5, %v5066_v23  ;;  %v5069_v18 = vmul.f32 %v9217_v59, %v12672_v51  ;;  %v14254_v59 = vld [vmem:[#allocation28_spill] sm:$0xff] }
 0xf31   : > { %3420 = vst.msk [vmem:[#allocation3 + $0x8] sm:$0xff] %vm3418_vm2, %v3373_v3  ;;  %8379 = vmatmul.mubr.bf16.vlgmr.msra.gmra.mrb[160].mxu0 %v5083_v49 }
 0xf32   : > { %8382 = vmatprep.mubr.bf16.mxu0 %v5084_v40  ;;  %v5087_v53 = vpack.c.bf16 %v5069_v18, %v5068_v54  ;;  %v14255_v54 = vld [vmem:[#allocation30_spill] sm:$0xff] }
 0xf33   : > { %4389 = vrot.lane.b32.xlu0 %v14244_v35, %s9523_s18  ;;  %v9219_v10 = vpop.eup %9218  ;;  %v14256_v18 = vpack.c.bf16 %v14254_v59, %v14255_v54  ;;  %v9422_v59 = vld [vmem:[#allocation2 + $0x20] sm:$0xff] }
 0xf34   : > { %4387 = vrot.lane.b32.xlu1 %v14247_v63, %s9523_s18  ;;  %v4368_v13 = vpop.permute.xlu1 %4367  ;;  %v5070_v8 = vmul.f32 %v9219_v10, %v12688_v56 }
 0xf37   : > { %3396 = vrot.lane.b32.xlu0 %v14250_v46, %s9522_s24 }
 0xf38   : > { %3394 = vrot.lane.b32.xlu1 %v14253_v19, %s9522_s24 }
 0xf39   : > { %8383 = vmatmul.mubr.bf16.gmra.mrb[164].mxu0 %v5085_v12 }
 0xf3a   : > { %8386 = vmatprep.mubr.bf16.mxu0 %v5086_v42 }
 0xf41   : > { %8387 = vmatmul.mubr.bf16.gmra.mrb[168].mxu0 %v5087_v53 }
 0xf46   : > { %v5365_v29 = vpop.permute.xlu1 %5364 }
 0xf4a   : > { %v3375_v0 = vpop.permute.xlu1 %3374 }
 0xf4b   : > { %3421 = vst.msk [vmem:[#allocation3 + $0x10] sm:$0xff] %vm3418_vm2, %v3375_v0 }
 0xf4e   : > { %v4372_v44 = vpop.permute.xlu1 %4371 }
 0xf4f   : > { %4418 = vst.msk [vmem:[#allocation3 + $0x10] sm:$0xff] %vm4415_vm5, %v4372_v44 }
 0xf52   : > { %v5369_v48 = vpop.permute.xlu1 %5368 }
 0xf53   : > { %5415 = vst.msk [vmem:[#allocation3 + $0x10] sm:$0xff] %vm5412_vm6, %v5369_v48  ;;  %v5005_v32 = vpop.xlane.xlu0 %5004 }
 0xf54   : > { %9220 = vrcp.f32 %v5005_v32 }
 0xf55   : > { %9222 = vrcp.f32 %v12778_v4 }
 0xf56   : > { %v3379_v51 = vpop.permute.xlu1 %3378 }
 0xf57   : > { %3423 = vst.msk [vmem:[#allocation3 + $0x20] sm:$0xff] %vm3418_vm2, %v3379_v51  ;;  %v5009_v55 = vpop.xlane.xlu0 %5008 }
 0xf58   : > { %9224 = vrcp.f32 %v5009_v55 }
 0xf5a   : > { %v4376_v58 = vpop.permute.xlu1 %4375 }
 0xf5b   : > { %4420 = vst.msk [vmem:[#allocation3 + $0x20] sm:$0xff] %vm4415_vm5, %v4376_v58  ;;  %v3371_v9 = vpop.permute.xlu0 %3370  ;;  %v14260_v58 = vld [vmem:[#allocation76_spill] sm:$0xff] }
 0xf5c   : > { %3419 = vst.msk [vmem:[#allocation3] sm:$0xff] %vm3418_vm2, %v3371_v9  ;;  %v14261_v9 = vld [vmem:[#allocation74_spill] sm:$0xff] }
 0xf5d   : > { %4416 = vst.msk [vmem:[#allocation3] sm:$0xff] %vm4415_vm5, %v4368_v13  ;;  %v14257_v13 = vld [vmem:[#allocation35_spill] sm:$0xff]  ;;  %v14262_v10 = vpack.c.bf16 %v14260_v58, %v14261_v9  ;;  %v9425_v58 = vld [vmem:[#allocation2 + $0x28] sm:$0xff] }
 0xf5e   : > { %v9221_v24 = vpop.eup %9220  ;;  %5413 = vst.msk [vmem:[#allocation3] sm:$0xff] %vm5412_vm6, %v5365_v29  ;;  %v5373_v7 = vpop.permute.xlu1 %5372  ;;  %v14258_v29 = vld [vmem:[#allocation29_spill] sm:$0xff] }
 0xf5f   : > { %5417 = vst.msk [vmem:[#allocation3 + $0x20] sm:$0xff] %vm5412_vm6, %v5373_v7  ;;  %v4370_v4 = vpop.permute.xlu0 %4369  ;;  %v5071_v38 = vmul.f32 %v9221_v24, %v12705_v30  ;;  %v9223_v6 = vpop.eup %9222  ;;  %v14259_v0 = vpack.c.bf16 %v14257_v13, %v14258_v29  ;;  %v14263_v7 = vld [vmem:[#allocation77_spill] sm:$0xff] }
 0xf60   : > { %4417 = vst.msk [vmem:[#allocation3 + $0x8] sm:$0xff] %vm4415_vm5, %v4370_v4  ;;  %v5072_v17 = vmul.f32 %v9223_v6, %v12685_v2  ;;  %v5431_v2 = vld [vmem:[#allocation3 + $0x10] sm:$0xff] }
 0xf61   : > { %v5088_v15 = vpack.c.bf16 %v5071_v38, %v5070_v8  ;;  %v14264_v4 = vld [vmem:[#allocation75_spill] sm:$0xff] }
 0xf62   : > { %v9225_v36 = vpop.eup %9224  ;;  %v3383_v47 = vpop.permute.xlu1 %3382  ;;  %v14265_v8 = vpack.c.bf16 %v14263_v7, %v14264_v4  ;;  %v9426_v7 = vld [vmem:[#allocation2 + $0x40] sm:$0xff] }
 0xf63   : > { %3425 = vst.msk [vmem:[#allocation3 + $0x30] sm:$0xff] %vm3418_vm2, %v3383_v47  ;;  %8390 = vmatprep.mubr.bf16.mxu0 %v5088_v15  ;;  %v5367_v11 = vpop.permute.xlu0 %5366  ;;  %v5073_v43 = vmul.f32 %v9225_v36, %v12708_v60  ;;  %v14266_v47 = vld [vmem:[#allocation32_spill] sm:$0xff] }
 0xf64   : > { %5414 = vst.msk [vmem:[#allocation3 + $0x8] sm:$0xff] %vm5412_vm6, %v5367_v11  ;;  %v14267_v11 = vld [vmem:[#allocation34_spill] sm:$0xff] }
 0xf65   : > { %v5429_v26 = vld [vmem:[#allocation3] sm:$0xff]  ;;  %v5089_v56 = vpack.c.bf16 %v5073_v43, %v5072_v17  ;;  %v14268_v17 = vpack.c.bf16 %v14266_v47, %v14267_v11  ;;  %v14269_v43 = vld [vmem:[#allocation39_spill] sm:$0xff] }
 0xf66   : > { %v4380_v34 = vpop.permute.xlu1 %4379  ;;  %8398 = vmatprep.mubr.msk.bf16.mxu1 %vm670_vm1, %v5429_v26  ;;  %v5433_v21 = vld [vmem:[#allocation3 + $0x20] sm:$0xff]  ;;  %v9428_v47 = vld [vmem:[#allocation2 + $0x50] sm:$0xff] }
 0xf67   : > { %4422 = vst.msk [vmem:[#allocation3 + $0x30] sm:$0xff] %vm4415_vm5, %v4380_v34  ;;  %8391 = vmatmul.mubr.bf16.gmra.mrb[172].mxu0 %v5089_v56  ;;  %v3377_v30 = vpop.permute.xlu0 %3376  ;;  %v14270_v26 = vld [vmem:[#allocation33_spill] sm:$0xff] }
 0xf68   : > { %3422 = vst.msk [vmem:[#allocation3 + $0x18] sm:$0xff] %vm3418_vm2, %v3377_v30  ;;  %v14271_v56 = vpack.c.bf16 %v14269_v43, %v14270_v26  ;;  %v9429_v26 = vld [vmem:[#allocation2 + $0x48] sm:$0xff] }
 0xf6b   : > { %v4374_v22 = vpop.permute.xlu0 %4373  ;;  %v5430_v61 = vld [vmem:[#allocation3 + $0x8] sm:$0xff] }
 0xf6c   : > { %4419 = vst.msk [vmem:[#allocation3 + $0x18] sm:$0xff] %vm4415_vm5, %v4374_v22  ;;  %8399 = vmatmul.mubr.msk.bf16.vlgmr.msra.gmra.mrb[112].mxu1 %vm670_vm1, %v5430_v61 }
 0xf6d   : > { %8402 = vmatprep.mubr.msk.bf16.mxu1 %vm670_vm1, %v5431_v2 }
 0xf6f   : > { %v5371_v60 = vpop.permute.xlu0 %5370 }
 0xf70   : > { %5416 = vst.msk [vmem:[#allocation3 + $0x18] sm:$0xff] %vm5412_vm6, %v5371_v60 }
 0xf73   : > { %v3381_v49 = vpop.permute.xlu0 %3380 }
 0xf74   : > { %3424 = vst.msk [vmem:[#allocation3 + $0x28] sm:$0xff] %vm3418_vm2, %v3381_v49 }
 0xf77   : > { %v4378_v28 = vpop.permute.xlu0 %4377  ;;  %v5432_v62 = vld [vmem:[#allocation3 + $0x18] sm:$0xff] }
 0xf78   : > { %4421 = vst.msk [vmem:[#allocation3 + $0x28] sm:$0xff] %vm4415_vm5, %v4378_v28  ;;  %8403 = vmatmul.mubr.msk.bf16.gmra.mrb[116].mxu1 %vm670_vm1, %v5432_v62 }
 0xf79   : > { %8406 = vmatprep.mubr.msk.bf16.mxu1 %vm670_vm1, %v5433_v21 }
 0xf7b   : > { %v5375_v52 = vpop.permute.xlu0 %5374 }
 0xf7c   : > { %5418 = vst.msk [vmem:[#allocation3 + $0x28] sm:$0xff] %vm5412_vm6, %v5375_v52 }
 0xf7f   : > { %v3385_v3 = vpop.permute.xlu0 %3384 }
 0xf80   : > { %3426 = vst.msk [vmem:[#allocation3 + $0x38] sm:$0xff] %vm3418_vm2, %v3385_v3 }
 0xf83   : > { %v4382_v40 = vpop.permute.xlu0 %4381  ;;  %v5434_v31 = vld [vmem:[#allocation3 + $0x28] sm:$0xff] }
 0xf84   : > { %4423 = vst.msk [vmem:[#allocation3 + $0x38] sm:$0xff] %vm4415_vm5, %v4382_v40  ;;  %8407 = vmatmul.mubr.msk.bf16.gmra.mrb[120].mxu1 %vm670_vm1, %v5434_v31 }
 0xf95   : > { %v5379_v20 = vpop.permute.xlu0 %5378 }
 0xf96   : > { %5420 = vst.msk [vmem:[#allocation3 + $0x38] sm:$0xff] %vm5412_vm6, %v5379_v20  ;;  %v5377_v25 = vpop.permute.xlu1 %5376  ;;  %v14272_v20 = vld [vmem:[#allocation9_spill] sm:$0xff] }
 0xf97   : > { %5419 = vst.msk [vmem:[#allocation3 + $0x30] sm:$0xff] %vm5412_vm6, %v5377_v25  ;;  %v5451_v25 = vsub.s32 4, %v14272_v20 }
 0xf99   : > { %v3389_v1 = vpop.permute.xlu0 %3388 }
 0xf9a   : > { %3428 = vst.msk [vmem:[#allocation3 + $0x48] sm:$0xff] %vm3418_vm2, %v3389_v1  ;;  %v3387_v33 = vpop.permute.xlu1 %3386  ;;  %v12912_v1 = vld [vmem:[%s9625_s13] sm:$0x3f] }
 0xf9b   : > { %3427 = vst.msk [vmem:[#allocation3 + $0x40] sm:$0xff] %vm3418_vm2, %v3387_v33  ;;  %v12915_v33 = vrot.slane %v12912_v1, %v5451_v25 }
 0xf9d   : > { %v4386_v35 = vpop.permute.xlu0 %4385  ;;  %v5436_v16 = vld [vmem:[#allocation3 + $0x38] sm:$0xff] }
 0xf9e   : > { %4425 = vst.msk [vmem:[#allocation3 + $0x48] sm:$0xff] %vm4415_vm5, %v4386_v35  ;;  %v4384_v50 = vpop.permute.xlu1 %4383  ;;  %v5435_v45 = vld [vmem:[#allocation3 + $0x30] sm:$0xff] }
 0xf9f   : > { %4424 = vst.msk [vmem:[#allocation3 + $0x40] sm:$0xff] %vm4415_vm5, %v4384_v50  ;;  %8410 = vmatprep.mubr.msk.bf16.mxu1 %vm670_vm1, %v5435_v45 }
 0xfa0   : > { %8411 = vmatmul.mubr.msk.bf16.gmra.mrb[124].mxu1 %vm670_vm1, %v5436_v16 }
 0xfa1   : > { %v3393_v63 = vpop.permute.xlu0 %3392 }
 0xfa2   : > { %3430 = vst.msk [vmem:[#allocation3 + $0x58] sm:$0xff] %vm3418_vm2, %v3393_v63  ;;  %v3391_v23 = vpop.permute.xlu1 %3390  ;;  %v9419_v63 = vld [vmem:[#allocation2 + $0x8] sm:$0xff] }
 0xfa3   : > { %3429 = vst.msk [vmem:[#allocation3 + $0x50] sm:$0xff] %vm3418_vm2, %v3391_v23 }
 0xfa5   : > { %v4390_v37 = vpop.permute.xlu0 %4389 }
 0xfa6   : > { %4427 = vst.msk [vmem:[#allocation3 + $0x58] sm:$0xff] %vm4415_vm5, %v4390_v37  ;;  %v4388_v5 = vpop.permute.xlu1 %4387 }
 0xfa7   : > { %4426 = vst.msk [vmem:[#allocation3 + $0x50] sm:$0xff] %vm4415_vm5, %v4388_v5 }
 0xfa9   : > { %v3397_v14 = vpop.permute.xlu0 %3396 }
 0xfaa   : > { %3432 = vst.msk [vmem:[#allocation3 + $0x68] sm:$0xff] %vm3418_vm2, %v3397_v14  ;;  %v3395_v41 = vpop.permute.xlu1 %3394 }
 0xfab   : > { %3431 = vst.msk [vmem:[#allocation3 + $0x60] sm:$0xff] %vm3418_vm2, %v3395_v41  ;;  %v9420_v41 = vld [vmem:[#allocation2 + $0x10] sm:$0xff] }
0x1004   : > { %v8380_v46 = vpop.f32.mrb[160].mxu0 }
0x1005   : > { %v5269_v12 = vpop.f32.mrb[161].mxu0 }
0x1006   : > { %v8381_v57 = vpop.f32.mrb[162].mxu0 }
0x1007   : > { %v5341_v27 = vpack.c.bf16 %v8381_v57, %v8380_v46  ;;  %v5272_v39 = vpop.f32.mrb[163].mxu0 }
0x1008   : > { %v5340_v19 = vpack.c.bf16 %v5272_v39, %v5269_v12 }
0x1009   : > { %5382 = vrot.lane.b32.xlu0 %v5341_v27, %s9524_s12  ;;  %v9421_v27 = vld [vmem:[#allocation2] sm:$0xff] }
0x100a   : > { %5380 = vrot.lane.b32.xlu1 %v5340_v19, %s9524_s12 }
0x100c   : > { %v8384_v42 = vpop.f32.mrb[164].mxu0 }
0x100d   : > { %4393 = vrot.lane.b32.xlu0 %v14256_v18, %s9523_s18  ;;  %v5285_v53 = vpop.f32.mrb[165].mxu0 }
0x100e   : > { %4391 = vrot.lane.b32.xlu1 %v14259_v0, %s9523_s18  ;;  %v8385_v44 = vpop.f32.mrb[166].mxu0 }
0x100f   : > { %v5343_v48 = vpack.c.bf16 %v8385_v44, %v8384_v42  ;;  %v5288_v32 = vpop.f32.mrb[167].mxu0  ;;  %v9424_v44 = vld [vmem:[#allocation2 + $0x30] sm:$0xff] }
0x1010   : > { %v5342_v51 = vpack.c.bf16 %v5288_v32, %v5285_v53  ;;  %v9423_v53 = vld [vmem:[#allocation2 + $0x18] sm:$0xff] }
0x1011   : > { %5386 = vrot.lane.b32.xlu0 %v5343_v48, %s9524_s12 }
0x1012   : > { %5384 = vrot.lane.b32.xlu1 %v5342_v51, %s9524_s12 }
0x1014   : > { %v8388_v55 = vpop.f32.mrb[168].mxu0 }
0x1015   : > { %3400 = vrot.lane.b32.xlu0 %v14262_v10, %s9522_s24  ;;  %v5301_v24 = vpop.f32.mrb[169].mxu0 }
0x1016   : > { %3398 = vrot.lane.b32.xlu1 %v14265_v8, %s9522_s24  ;;  %v8389_v38 = vpop.f32.mrb[170].mxu0 }
0x1017   : > { %v5345_v6 = vpack.c.bf16 %v8389_v38, %v8388_v55  ;;  %v5304_v15 = vpop.f32.mrb[171].mxu0  ;;  %v9427_v38 = vld [vmem:[#allocation2 + $0x38] sm:$0xff] }
0x1018   : > { %v5344_v36 = vpack.c.bf16 %v5304_v15, %v5301_v24 }
0x1019   : > { %5390 = vrot.lane.b32.xlu0 %v5345_v6, %s9524_s12 }
0x101a   : > { %5388 = vrot.lane.b32.xlu1 %v5344_v36, %s9524_s12 }
0x101d   : > { %4397 = vrot.lane.b32.xlu0 %v14268_v17, %s9523_s18 }
0x101e   : > { %4395 = vrot.lane.b32.xlu1 %v14271_v56, %s9523_s18 }
0x103a   : > { %v8392_v34 = vpop.f32.mrb[172].mxu0 }
0x103b   : > { %v5317_v30 = vpop.f32.mrb[173].mxu0 }
0x103c   : > { %v8393_v22 = vpop.f32.mrb[174].mxu0 }
0x103d   : > { %v5347_v61 = vpack.c.bf16 %v8393_v22, %v8392_v34  ;;  %v5320_v2 = vpop.f32.mrb[175].mxu0  ;;  %v9430_v22 = vld [vmem:[#allocation2 + $0x58] sm:$0xff] }
0x103e   : > { %v5346_v60 = vpack.c.bf16 %v5320_v2, %v5317_v30 }
0x103f   : > { %5394 = vrot.lane.b32.xlu0 %v5347_v61, %s9524_s12  ;;  %v8400_v49 = vpop.f32.mrb[112].mxu1 }
0x1040   : > { %5392 = vrot.lane.b32.xlu1 %v5346_v60, %s9524_s12  ;;  %v5547_v28 = vpop.f32.mrb[113].mxu1  ;;  %v5556_v16 = vadd.f32 %v8400_v49, %v12915_v33 }
0x1041   : > { %v8401_v62 = vpop.f32.mrb[114].mxu1  ;;  %v5548_v14 = vadd.f32 %v5547_v28, %v12915_v33 }
0x1042   : > { %v5550_v21 = vpop.f32.mrb[115].mxu1  ;;  %v12922_v46 = vadd.f32 %v9420_v41, %v5556_v16  ;;  %v5559_v19 = vadd.f32 %v8401_v62, %v12915_v33  ;;  %v9433_v16 = vld [vmem:[#allocation2 + $0x68] sm:$0xff] }
0x1043   : > { %v5551_v35 = vadd.f32 %v5550_v21, %v12915_v33  ;;  %v12927_v39 = vadd.f32 %v9421_v27, %v5548_v14 }
0x1044   : > { %v5712_v18 = vsel %vm670_vm1, %v12922_v46, 0.0  ;;  %v12935_v13 = vadd.f32 %v9423_v53, %v5559_v19 }
0x1045   : > { %v12919_v23 = vadd.f32 %v9419_v63, %v5551_v35  ;;  %v5706_v0 = vsel %vm670_vm1, %v12927_v39, 0.0 }
0x1046   : > { %v5715_v10 = vsel %vm670_vm1, %v12935_v13, 0.0 }
0x1047   : > { %v5709_v57 = vsel %vm670_vm1, %v12919_v23, 0.0 }
0x104b   : > { %v8404_v52 = vpop.f32.mrb[116].mxu1 }
0x104c   : > { %v5563_v3 = vpop.f32.mrb[117].mxu1  ;;  %v5572_v42 = vadd.f32 %v8404_v52, %v12915_v33 }
0x104d   : > { %v8405_v40 = vpop.f32.mrb[118].mxu1  ;;  %v5564_v12 = vadd.f32 %v5563_v3, %v12915_v33  ;;  %v9431_v3 = vld [vmem:[#allocation2 + $0x60] sm:$0xff] }
0x104e   : > { %v5566_v31 = vpop.f32.mrb[119].mxu1  ;;  %v12940_v48 = vadd.f32 %v9424_v44, %v5572_v42  ;;  %v5575_v55 = vadd.f32 %v8405_v40, %v12915_v33 }
0x104f   : > { %v12931_v54 = vadd.f32 %v9422_v59, %v5564_v12  ;;  %v5567_v29 = vadd.f32 %v5566_v31, %v12915_v33 }
0x1050   : > { %v5724_v8 = vsel %vm670_vm1, %v12940_v48, 0.0  ;;  %v12955_v6 = vadd.f32 %v9427_v38, %v5575_v55 }
0x1051   : > { %v5718_v51 = vsel %vm670_vm1, %v12931_v54, 0.0  ;;  %v12946_v9 = vadd.f32 %v9425_v58, %v5567_v29 }
0x1052   : > { %v5727_v34 = vsel %vm670_vm1, %v12955_v6, 0.0 }
0x1053   : > { %v5721_v36 = vsel %vm670_vm1, %v12946_v9, 0.0 }
0x1057   : > { %v8408_v50 = vpop.f32.mrb[120].mxu1 }
0x1058   : > { %v5579_v45 = vpop.f32.mrb[121].mxu1  ;;  %v5588_v24 = vadd.f32 %v8408_v50, %v12915_v33  ;;  %v9432_v50 = vld [vmem:[#allocation2 + $0x70] sm:$0xff] }
0x1059   : > { %v8409_v37 = vpop.f32.mrb[122].mxu1  ;;  %v5580_v32 = vadd.f32 %v5579_v45, %v12915_v33 }
0x105a   : > { %v5582_v5 = vpop.f32.mrb[123].mxu1  ;;  %v12960_v11 = vadd.f32 %v9428_v47, %v5588_v24  ;;  %v5591_v43 = vadd.f32 %v8409_v37, %v12915_v33 }
0x105b   : > { %v12951_v4 = vadd.f32 %v9426_v7, %v5580_v32  ;;  %v5583_v15 = vadd.f32 %v5582_v5, %v12915_v33  ;;  %v9434_v5 = vld [vmem:[#allocation2 + $0x78] sm:$0xff] }
0x105c   : > { %v5736_v30 = vsel %vm670_vm1, %v12960_v11, 0.0  ;;  %v12971_v61 = vadd.f32 %v9430_v22, %v5591_v43 }
0x105d   : > { %v5730_v17 = vsel %vm670_vm1, %v12951_v4, 0.0  ;;  %v12965_v56 = vadd.f32 %v9429_v26, %v5583_v15 }
0x105e   : > { %5710 = vadd.xlane.f32.xlu0 %v5709_v57  ;;  %v5739_v35 = vsel %vm670_vm1, %v12971_v61, 0.0 }
0x105f   : > { %v5733_v60 = vsel %vm670_vm1, %v12965_v56, 0.0 }
0x1062   : > { %5713 = vadd.xlane.f32.xlu0 %v5712_v18 }
0x1064   : > { %5707 = vadd.xlane.f32.xlu1 %v5706_v0 }
0x1066   : > { %5719 = vadd.xlane.f32.xlu0 %v5718_v51 }
0x1068   : > { %5716 = vadd.xlane.f32.xlu1 %v5715_v10 }
0x106a   : > { %5725 = vadd.xlane.f32.xlu0 %v5724_v8 }
0x106c   : > { %5722 = vadd.xlane.f32.xlu1 %v5721_v36 }
0x106e   : > { %5731 = vadd.xlane.f32.xlu0 %v5730_v17 }
0x1070   : > { %5728 = vadd.xlane.f32.xlu1 %v5727_v34 }
0x1072   : > { %5737 = vadd.xlane.f32.xlu0 %v5736_v30 }
0x1073   : > { %v8412_v2 = vpop.f32.mrb[124].mxu1 }
0x1074   : > { %5734 = vadd.xlane.f32.xlu1 %v5733_v60  ;;  %v5595_v49 = vpop.f32.mrb[125].mxu1  ;;  %v5604_v28 = vadd.f32 %v8412_v2, %v12915_v33  ;;  %v9435_v60 = vld [vmem:[#allocation2 + $0x80] sm:$0xff] }
0x1075   : > { %v5596_v62 = vadd.f32 %v5595_v49, %v12915_v33  ;;  %v8413_v21 = vpop.f32.mrb[126].mxu1 }
0x1076   : > { %v5598_v52 = vpop.f32.mrb[127].mxu1  ;;  %v5607_v31 = vadd.f32 %v8413_v21, %v12915_v33  ;;  %v12983_v45 = vadd.f32 %v9432_v50, %v5604_v28  ;;  %v9436_v21 = vld [vmem:[#allocation2 + $0x90] sm:$0xff] }
0x1077   : > { %v12977_v40 = vadd.f32 %v9431_v3, %v5596_v62  ;;  %v5599_v25 = vadd.f32 %v5598_v52, %v12915_v33  ;;  %v9437_v3 = vld [vmem:[#allocation2 + $0x88] sm:$0xff] }
0x1078   : > { %5740 = vadd.xlane.f32.xlu1 %v5739_v35  ;;  %14274 = vst [vmem:[#allocation37_spill] sm:$0xff] %v12983_v45  ;;  %v12989_v14 = vadd.f32 %v9434_v5, %v5607_v31  ;;  %v5748_v27 = vsel %vm670_vm1, %v12983_v45, 0.0  ;;  %v9438_v35 = vld [vmem:[#allocation2 + $0x98] sm:$0xff] }
0x1079   : > { %14273 = vst [vmem:[#allocation38_spill] sm:$0xff] %v12977_v40  ;;  %v12985_v63 = vadd.f32 %v9433_v16, %v5599_v25  ;;  %v5742_v37 = vsel %vm670_vm1, %v12977_v40, 0.0 }
0x107a   : > { %5743 = vadd.xlane.f32.xlu0 %v5742_v37  ;;  %14276 = vst [vmem:[#allocation13_spill] sm:$0xff] %v12989_v14  ;;  %v5751_v42 = vsel %vm670_vm1, %v12989_v14, 0.0 }
0x107b   : > { %14275 = vst [vmem:[#allocation36_spill] sm:$0xff] %v12985_v63  ;;  %v5383_v41 = vpop.permute.xlu0 %5382  ;;  %v5745_v12 = vsel %vm670_vm1, %v12985_v63, 0.0 }
0x107c   : > { %5422 = vst.msk [vmem:[#allocation3 + $0x48] sm:$0xff] %vm5412_vm6, %v5383_v41  ;;  %v5381_v57 = vpop.permute.xlu1 %5380  ;;  %5746 = vadd.xlane.f32.xlu1 %v5745_v12 }
0x107d   : > { %5421 = vst.msk [vmem:[#allocation3 + $0x40] sm:$0xff] %vm5412_vm6, %v5381_v57 }
0x107e   : > { %5749 = vadd.xlane.f32.xlu0 %v5748_v27 }
0x107f   : > { %v4394_v19 = vpop.permute.xlu0 %4393 }
0x1080   : > { %4429 = vst.msk [vmem:[#allocation3 + $0x68] sm:$0xff] %vm4415_vm5, %v4394_v19  ;;  %v4392_v59 = vpop.permute.xlu1 %4391  ;;  %5752 = vadd.xlane.f32.xlu1 %v5751_v42  ;;  %v9439_v42 = vld [vmem:[#allocation2 + $0xa0] sm:$0xff] }
0x1081   : > { %4428 = vst.msk [vmem:[#allocation3 + $0x60] sm:$0xff] %vm4415_vm5, %v4392_v59 }
0x1083   : > { %v5387_v18 = vpop.permute.xlu0 %5386  ;;  %v5438_v0 = vld [vmem:[#allocation3 + $0x48] sm:$0xff] }
0x1084   : > { %5424 = vst.msk [vmem:[#allocation3 + $0x58] sm:$0xff] %vm5412_vm6, %v5387_v18  ;;  %v5385_v53 = vpop.permute.xlu1 %5384  ;;  %v5437_v29 = vld [vmem:[#allocation3 + $0x40] sm:$0xff] }
0x1085   : > { %5423 = vst.msk [vmem:[#allocation3 + $0x50] sm:$0xff] %vm5412_vm6, %v5385_v53  ;;  %8414 = vmatprep.mubr.msk.bf16.mxu1 %vm670_vm1, %v5437_v29 }
0x1086   : > { %8415 = vmatmul.mubr.msk.bf16.gmra.mrb[128].mxu1 %vm670_vm1, %v5438_v0  ;;  %v9440_v0 = vld [vmem:[#allocation2 + $0xb0] sm:$0xff] }
0x1087   : > { %v3401_v44 = vpop.permute.xlu0 %3400 }
0x1088   : > { %3434 = vst.msk [vmem:[#allocation3 + $0x78] sm:$0xff] %vm3418_vm2, %v3401_v44  ;;  %v3399_v32 = vpop.permute.xlu1 %3398 }
0x1089   : > { %3433 = vst.msk [vmem:[#allocation3 + $0x70] sm:$0xff] %vm3418_vm2, %v3399_v32  ;;  %v9441_v32 = vld [vmem:[#allocation2 + $0xa8] sm:$0xff] }
0x108b   : > { %v5391_v51 = vpop.permute.xlu0 %5390  ;;  %v5440_v10 = vld [vmem:[#allocation3 + $0x58] sm:$0xff] }
0x108c   : > { %5426 = vst.msk [vmem:[#allocation3 + $0x68] sm:$0xff] %vm5412_vm6, %v5391_v51  ;;  %v5389_v55 = vpop.permute.xlu1 %5388  ;;  %v5439_v58 = vld [vmem:[#allocation3 + $0x50] sm:$0xff] }
0x108d   : > { %5425 = vst.msk [vmem:[#allocation3 + $0x60] sm:$0xff] %vm5412_vm6, %v5389_v55  ;;  %8418 = vmatprep.mubr.msk.bf16.mxu1 %vm670_vm1, %v5439_v58  ;;  %v9442_v58 = vld [vmem:[#allocation2 + $0xb8] sm:$0xff] }
0x108e   : > { %8419 = vmatmul.mubr.msk.bf16.gmra.mrb[132].mxu1 %vm670_vm1, %v5440_v10 }
0x108f   : > { %v4398_v24 = vpop.permute.xlu0 %4397 }
0x1090   : > { %4431 = vst.msk [vmem:[#allocation3 + $0x78] sm:$0xff] %vm4415_vm5, %v4398_v24  ;;  %v4396_v7 = vpop.permute.xlu1 %4395 }
0x1091   : > { %4430 = vst.msk [vmem:[#allocation3 + $0x70] sm:$0xff] %vm4415_vm5, %v4396_v7 }
0x1093   : > { %v5442_v38 = vld [vmem:[#allocation3 + $0x68] sm:$0xff] }
0x1094   : > { %v5441_v8 = vld [vmem:[#allocation3 + $0x60] sm:$0xff] }
0x1095   : > { %8422 = vmatprep.mubr.msk.bf16.mxu1 %vm670_vm1, %v5441_v8 }
0x1096   : > { %8423 = vmatmul.mubr.msk.bf16.gmra.mrb[136].mxu1 %vm670_vm1, %v5442_v38 }
0x10b1   : > { %v5395_v15 = vpop.permute.xlu0 %5394 }
0x10b2   : > { %5428 = vst.msk [vmem:[#allocation3 + $0x78] sm:$0xff] %vm5412_vm6, %v5395_v15  ;;  %v5393_v36 = vpop.permute.xlu1 %5392 }
0x10b3   : > { %5427 = vst.msk [vmem:[#allocation3 + $0x70] sm:$0xff] %vm5412_vm6, %v5393_v36 }
0x10b9   : > { %v5444_v17 = vld [vmem:[#allocation3 + $0x78] sm:$0xff] }
0x10ba   : > { %v5443_v47 = vld [vmem:[#allocation3 + $0x70] sm:$0xff] }
0x10bb   : > { %8426 = vmatprep.mubr.msk.bf16.mxu1 %vm670_vm1, %v5443_v47 }
0x10bc   : > { %8427 = vmatmul.mubr.msk.bf16.gmra.mrb[140].mxu1 %vm670_vm1, %v5444_v17 }
0x1159   : > { %v8416_v43 = vpop.f32.mrb[128].mxu1 }
0x115a   : > { %v5611_v26 = vpop.f32.mrb[129].mxu1  ;;  %v5620_v34 = vadd.f32 %v8416_v43, %v12915_v33  ;;  %v9443_v43 = vld [vmem:[#allocation2 + $0xc0] sm:$0xff] }
0x115b   : > { %v5612_v30 = vadd.f32 %v5611_v26, %v12915_v33  ;;  %v8417_v22 = vpop.f32.mrb[130].mxu1 }
0x115c   : > { %v5614_v2 = vpop.f32.mrb[131].mxu1  ;;  %v5623_v28 = vadd.f32 %v8417_v22, %v12915_v33  ;;  %v13025_v52 = vadd.f32 %v9436_v21, %v5620_v34 }
0x115d   : > { %v13021_v49 = vadd.f32 %v9435_v60, %v5612_v30  ;;  %v5615_v62 = vadd.f32 %v5614_v2, %v12915_v33  ;;  %v9444_v2 = vld [vmem:[#allocation2 + $0xd0] sm:$0xff] }
0x115e   : > { %14278 = vst [vmem:[#allocation41_spill] sm:$0xff] %v13025_v52  ;;  %v13031_v50 = vadd.f32 %v9438_v35, %v5623_v28  ;;  %v5760_v27 = vsel %vm670_vm1, %v13025_v52, 0.0  ;;  %v9445_v28 = vld [vmem:[#allocation2 + $0xc8] sm:$0xff] }
0x115f   : > { %14277 = vst [vmem:[#allocation12_spill] sm:$0xff] %v13021_v49  ;;  %v13027_v31 = vadd.f32 %v9437_v3, %v5615_v62  ;;  %v5754_v25 = vsel %vm670_vm1, %v13021_v49, 0.0  ;;  %v9446_v3 = vld [vmem:[#allocation2 + $0xd8] sm:$0xff] }
0x1160   : > { %5755 = vadd.xlane.f32.xlu0 %v5754_v25  ;;  %14280 = vst [vmem:[#allocation43_spill] sm:$0xff] %v13031_v50  ;;  %v5763_v29 = vsel %vm670_vm1, %v13031_v50, 0.0 }
0x1161   : > { %14279 = vst [vmem:[#allocation40_spill] sm:$0xff] %v13027_v31  ;;  %v8420_v16 = vpop.f32.mrb[132].mxu1  ;;  %v5757_v37 = vsel %vm670_vm1, %v13027_v31, 0.0 }
0x1162   : > { %5758 = vadd.xlane.f32.xlu1 %v5757_v37  ;;  %v5627_v5 = vpop.f32.mrb[133].mxu1  ;;  %v5636_v41 = vadd.f32 %v8420_v16, %v12915_v33 }
0x1163   : > { %v5628_v12 = vadd.f32 %v5627_v5, %v12915_v33  ;;  %v8421_v57 = vpop.f32.mrb[134].mxu1  ;;  %v5711_v5 = vpop.xlane.xlu0 %5710 }
0x1164   : > { %5761 = vadd.xlane.f32.xlu0 %v5760_v27  ;;  %v5630_v19 = vpop.f32.mrb[135].mxu1  ;;  %v5639_v18 = vadd.f32 %v8421_v57, %v12915_v33  ;;  %v13045_v44 = vadd.f32 %v9440_v0, %v5636_v41  ;;  %v5708_v41 = vpop.xlane.xlu1 %5707 }
0x1165   : > { %v13039_v59 = vadd.f32 %v9439_v42, %v5628_v12  ;;  %v5631_v53 = vadd.f32 %v5630_v19, %v12915_v33 }
0x1166   : > { %5764 = vadd.xlane.f32.xlu1 %v5763_v29  ;;  %14282 = vst [vmem:[#allocation44_spill] sm:$0xff] %v13045_v44  ;;  %v13051_v10 = vadd.f32 %v9442_v58, %v5639_v18  ;;  %v5772_v47 = vsel %vm670_vm1, %v13045_v44, 0.0  ;;  %v5803_v58 = vmul.f32 0.03125, %v5711_v5 }
0x1167   : > { %14281 = vst [vmem:[#allocation42_spill] sm:$0xff] %v13039_v59  ;;  %v13047_v51 = vadd.f32 %v9441_v32, %v5631_v53  ;;  %v5766_v55 = vsel %vm670_vm1, %v13039_v59, 0.0  ;;  %v5714_v12 = vpop.xlane.xlu0 %5713  ;;  %v5802_v53 = vmul.f32 0.03125, %v5708_v41 }
0x1168   : > { %5767 = vadd.xlane.f32.xlu0 %v5766_v55  ;;  %14284 = vst [vmem:[#allocation56_spill] sm:$0xff] %v13051_v10  ;;  %v5775_v22 = vsel %vm670_vm1, %v13051_v10, 0.0  ;;  %v5717_v57 = vpop.xlane.xlu1 %5716 }
0x1169   : > { %14283 = vst [vmem:[#allocation55_spill] sm:$0xff] %v13047_v51  ;;  %v8424_v24 = vpop.f32.mrb[136].mxu1  ;;  %v5769_v7 = vsel %vm670_vm1, %v13047_v51, 0.0 }
0x116a   : > { %5770 = vadd.xlane.f32.xlu1 %v5769_v7  ;;  %v5643_v8 = vpop.f32.mrb[137].mxu1  ;;  %v5652_v38 = vadd.f32 %v8424_v24, %v12915_v33  ;;  %v9447_v24 = vld [vmem:[#allocation2 + $0xe0] sm:$0xff] }
0x116b   : > { %v5644_v15 = vadd.f32 %v5643_v8, %v12915_v33  ;;  %v8425_v36 = vpop.f32.mrb[138].mxu1  ;;  %v5720_v27 = vpop.xlane.xlu0 %5719 }
0x116c   : > { %5773 = vadd.xlane.f32.xlu0 %v5772_v47  ;;  %v5646_v17 = vpop.f32.mrb[139].mxu1  ;;  %v5655_v34 = vadd.f32 %v8425_v36, %v12915_v33  ;;  %v13065_v60 = vadd.f32 %v9444_v2, %v5652_v38  ;;  %v5723_v19 = vpop.xlane.xlu1 %5722 }
0x116d   : > { %v13059_v26 = vadd.f32 %v9443_v43, %v5644_v15  ;;  %v5647_v30 = vadd.f32 %v5646_v17, %v12915_v33  ;;  %v5804_v15 = vmul.f32 0.03125, %v5714_v12  ;;  %v13086_v17 = vsub.f32 %v12927_v39, %v5802_v53  ;;  %v9448_v43 = vld [vmem:[#allocation2 + $0xf0] sm:$0xff] }
0x116e   : > { %5776 = vadd.xlane.f32.xlu1 %v5775_v22  ;;  %14286 = vst [vmem:[#allocation57_spill] sm:$0xff] %v13065_v60  ;;  %v13071_v25 = vadd.f32 %v9446_v3, %v5655_v34  ;;  %v5784_v16 = vsel %vm670_vm1, %v13065_v60, 0.0 }
0x116f   : > { %14285 = vst [vmem:[#allocation50_spill] sm:$0xff] %v13059_v26  ;;  %v13067_v62 = vadd.f32 %v9445_v28, %v5647_v30  ;;  %v5778_v21 = vsel %vm670_vm1, %v13059_v26, 0.0  ;;  %v5726_v36 = vpop.xlane.xlu0 %5725  ;;  %v9449_v30 = vld [vmem:[#allocation2 + $0xe8] sm:$0xff]  ;;  %v13095_v28 = vsub.f32 %v12919_v23, %v5803_v58  ;;  %v5866_v41 = vmul.f32 %v13086_v17, %v13086_v17 }
0x1170   : > { %5779 = vadd.xlane.f32.xlu0 %v5778_v21  ;;  %14288 = vst [vmem:[#allocation20_spill] sm:$0xff] %v13071_v25  ;;  %v5787_v37 = vsel %vm670_vm1, %v13071_v25, 0.0  ;;  %v5729_v47 = vpop.xlane.xlu1 %5728  ;;  %v9450_v21 = vld [vmem:[#allocation2 + $0xf8] sm:$0xff] }
0x1171   : > { %14287 = vst [vmem:[#allocation51_spill] sm:$0xff] %v13067_v62  ;;  %v5781_v35 = vsel %vm670_vm1, %v13067_v62, 0.0 }
0x1172   : > { %5782 = vadd.xlane.f32.xlu1 %v5781_v35 }
0x1173   : > { %v5732_v12 = vpop.xlane.xlu0 %5731 }
0x1174   : > { %5785 = vadd.xlane.f32.xlu0 %v5784_v16  ;;  %v13102_v16 = vsub.f32 %v12922_v46, %v5804_v15 }
0x1176   : > { %5788 = vadd.xlane.f32.xlu1 %v5787_v37  ;;  %v5806_v37 = vmul.f32 0.03125, %v5720_v27 }
0x1178   : > { %v13116_v27 = vsub.f32 %v12931_v54, %v5806_v37 }
0x118f   : > { %v8428_v42 = vpop.f32.mrb[140].mxu1 }
0x1190   : > { %v5659_v18 = vpop.f32.mrb[141].mxu1  ;;  %v5668_v29 = vadd.f32 %v8428_v42, %v12915_v33  ;;  %v5735_v42 = vpop.xlane.xlu1 %5734 }
0x1191   : > { %v5660_v0 = vadd.f32 %v5659_v18, %v12915_v33  ;;  %v8429_v32 = vpop.f32.mrb[142].mxu1  ;;  %v5807_v18 = vmul.f32 0.03125, %v5723_v19  ;;  %v5809_v19 = vmul.f32 0.03125, %v5729_v47 }
0x1192   : > { %v5662_v55 = vpop.f32.mrb[143].mxu1  ;;  %v5671_v8 = vadd.f32 %v8429_v32, %v12915_v33  ;;  %v13088_v34 = vadd.f32 %v9448_v43, %v5668_v29  ;;  %v5867_v29 = vmul.f32 %v13095_v28, %v13095_v28  ;;  %v5898_v32 = vsel %vm670_vm1, %v5866_v41, 0.0 }
0x1193   : > { %v13081_v7 = vadd.f32 %v9447_v24, %v5660_v0  ;;  %v5663_v38 = vadd.f32 %v5662_v55, %v12915_v33  ;;  %v5805_v33 = vmul.f32 0.03125, %v5717_v57  ;;  %v5808_v0 = vmul.f32 0.03125, %v5726_v36 }
0x1194   : > { %14290 = vst [vmem:[#allocation59_spill] sm:$0xff] %v13088_v34  ;;  %v13097_v3 = vadd.f32 %v9450_v21, %v5671_v8  ;;  %v5796_v5 = vsel %vm670_vm1, %v13088_v34, 0.0  ;;  %v5868_v55 = vmul.f32 %v13102_v16, %v13102_v16  ;;  %v13122_v58 = vsub.f32 %v12946_v9, %v5807_v18  ;;  %v5741_v15 = vpop.xlane.xlu1 %5740 }
0x1195   : > { %14289 = vst [vmem:[#allocation18_spill] sm:$0xff] %v13081_v7  ;;  %v13090_v22 = vadd.f32 %v9449_v30, %v5663_v38  ;;  %v5790_v2 = vsel %vm670_vm1, %v13081_v7, 0.0  ;;  %v13109_v57 = vsub.f32 %v12935_v13, %v5805_v33  ;;  %v5901_v24 = vsel %vm670_vm1, %v5867_v29, 0.0  ;;  %v5738_v38 = vpop.xlane.xlu0 %5737 }
0x1196   : > { %5791 = vadd.xlane.f32.xlu0 %v5790_v2  ;;  %14292 = vst [vmem:[#allocation54_spill] sm:$0xff] %v13097_v3  ;;  %v5799_v53 = vsel %vm670_vm1, %v13097_v3, 0.0  ;;  %v13128_v36 = vsub.f32 %v12940_v48, %v5808_v0  ;;  %v5810_v43 = vmul.f32 0.03125, %v5732_v12  ;;  %v5904_v30 = vsel %vm670_vm1, %v5868_v55, 0.0 }
0x1197   : > { %14291 = vst [vmem:[#allocation16_spill] sm:$0xff] %v13090_v22  ;;  %v5793_v35 = vsel %vm670_vm1, %v13090_v22, 0.0  ;;  %v5869_v8 = vmul.f32 %v13109_v57, %v13109_v57  ;;  %v5870_v2 = vmul.f32 %v13116_v27, %v13116_v27  ;;  %v13134_v47 = vsub.f32 %v12955_v6, %v5809_v19 }
0x1198   : > { %5794 = vadd.xlane.f32.xlu1 %v5793_v35  ;;  %v5811_v33 = vmul.f32 0.03125, %v5735_v42  ;;  %v5871_v35 = vmul.f32 %v13122_v58, %v13122_v58  ;;  %v5812_v41 = vmul.f32 0.03125, %v5738_v38  ;;  %v5872_v18 = vmul.f32 %v13128_v36, %v13128_v36 }
0x1199   : > { %v5907_v21 = vsel %vm670_vm1, %v5869_v8, 0.0  ;;  %v5744_v37 = vpop.xlane.xlu0 %5743  ;;  %v5910_v12 = vsel %vm670_vm1, %v5870_v2, 0.0  ;;  %v5813_v29 = vmul.f32 0.03125, %v5741_v15 }
0x119a   : > { %5797 = vadd.xlane.f32.xlu0 %v5796_v5  ;;  %v13140_v5 = vsub.f32 %v12951_v4, %v5810_v43  ;;  %v13146_v42 = vsub.f32 %v12965_v56, %v5811_v33  ;;  %v5913_v0 = vsel %vm670_vm1, %v5871_v35, 0.0  ;;  %v13152_v55 = vsub.f32 %v12960_v11, %v5812_v41 }
0x119b   : > { %v5814_v19 = vmul.f32 0.03125, %v5744_v37  ;;  %v13158_v43 = vsub.f32 %v12971_v61, %v5813_v29 }
0x119c   : > { %5800 = vadd.xlane.f32.xlu1 %v5799_v53  ;;  %v5747_v53 = vpop.xlane.xlu1 %5746  ;;  %v5874_v8 = vmul.f32 %v13140_v5, %v13140_v5  ;;  %v5875_v2 = vmul.f32 %v13146_v42, %v13146_v42  ;;  %v5876_v41 = vmul.f32 %v13152_v55, %v13152_v55 }
0x119d   : > { %v5750_v38 = vpop.xlane.xlu0 %5749  ;;  %v5815_v15 = vmul.f32 0.03125, %v5747_v53  ;;  %v5877_v29 = vmul.f32 %v13158_v43, %v13158_v43 }
0x119e   : > { %5899 = vadd.xlane.f32.xlu0 %v5898_v32  ;;  %v5873_v32 = vmul.f32 %v13134_v47, %v13134_v47  ;;  %v5816_v35 = vmul.f32 0.03125, %v5750_v38  ;;  %v5922_v37 = vsel %vm670_vm1, %v5874_v8, 0.0  ;;  %v5925_v53 = vsel %vm670_vm1, %v5875_v2, 0.0 }
0x119f   : > { %v5931_v8 = vsel %vm670_vm1, %v5877_v29, 0.0 }
0x11a0   : > { %5902 = vadd.xlane.f32.xlu1 %v5901_v24  ;;  %v5916_v24 = vsel %vm670_vm1, %v5872_v18, 0.0  ;;  %v5753_v33 = vpop.xlane.xlu1 %5752 }
0x11a1   : > { %v5817_v18 = vmul.f32 0.03125, %v5753_v33 }
0x11a2   : > { %5905 = vadd.xlane.f32.xlu0 %v5904_v30  ;;  %v5919_v30 = vsel %vm670_vm1, %v5873_v32, 0.0  ;;  %v5928_v32 = vsel %vm670_vm1, %v5876_v41, 0.0  ;;  %v8640_v41 = vld [vmem:[%s9644_s29] sm:$0xff]  }
0x11a3   : > { %8430 = vmatprep.subr.bf16.mxu0 %v8640_v41 }
0x11a4   : > { %5908 = vadd.xlane.f32.xlu1 %v5907_v21  ;;  %v13164_v21 = vsub.f32 %v12977_v40, %v5814_v19  ;;  %8431 = vmatpush3.bf16.msra.mxu0 %v8640_v41 }
0x11a6   : > { %5911 = vadd.xlane.f32.xlu0 %v5910_v12  ;;  %v13170_v12 = vsub.f32 %v12985_v63, %v5815_v15  ;;  %v5878_v19 = vmul.f32 %v13164_v21, %v13164_v21 }
0x11a8   : > { %5914 = vadd.xlane.f32.xlu1 %v5913_v0  ;;  %v13176_v0 = vsub.f32 %v12983_v45, %v5816_v35  ;;  %v5879_v38 = vmul.f32 %v13170_v12, %v13170_v12  ;;  %v5934_v15 = vsel %vm670_vm1, %v5878_v19, 0.0 }
0x11aa   : > { %5917 = vadd.xlane.f32.xlu0 %v5916_v24  ;;  %v13182_v24 = vsub.f32 %v12989_v14, %v5817_v18  ;;  %v5937_v2 = vsel %vm670_vm1, %v5879_v38, 0.0  ;;  %v8641_v18 = vld [vmem:[%s9644_s29 + $0x8] sm:$0xff]  }
0x11ab   : > { %8432 = vmatprep.subr.bf16.mxu0 %v8641_v18 }
0x11ac   : > { %5920 = vadd.xlane.f32.xlu1 %v5919_v30  ;;  %v5880_v30 = vmul.f32 %v13176_v0, %v13176_v0  ;;  %v5881_v33 = vmul.f32 %v13182_v24, %v13182_v24  ;;  %8433 = vmatpush3.bf16.msra.mxu0 %v8641_v18 }
0x11ae   : > { %5923 = vadd.xlane.f32.xlu0 %v5922_v37  ;;  %v5940_v35 = vsel %vm670_vm1, %v5880_v30, 0.0  ;;  %v5943_v37 = vsel %vm670_vm1, %v5881_v33, 0.0 }
0x11b0   : > { %5926 = vadd.xlane.f32.xlu1 %v5925_v53 }
0x11b2   : > { %5929 = vadd.xlane.f32.xlu0 %v5928_v32 }
0x11b4   : > { %5932 = vadd.xlane.f32.xlu1 %v5931_v8 }
0x11b6   : > { %5935 = vadd.xlane.f32.xlu0 %v5934_v15 }
0x11b8   : > { %5938 = vadd.xlane.f32.xlu1 %v5937_v2 }
0x11ba   : > { %5941 = vadd.xlane.f32.xlu0 %v5940_v35 }
0x11bc   : > { %5944 = vadd.xlane.f32.xlu1 %v5943_v37 }
0x11ed   : > { %v5756_v53 = vpop.xlane.xlu0 %5755 }
0x11ee   : > { %v5818_v29 = vmul.f32 0.03125, %v5756_v53 }
0x11ef   : > { %v5759_v32 = vpop.xlane.xlu1 %5758 }
0x11f0   : > { %v13198_v19 = vsub.f32 %v13021_v49, %v5818_v29  ;;  %v5819_v8 = vmul.f32 0.03125, %v5759_v32 }
0x11f1   : > { %v5762_v38 = vpop.xlane.xlu0 %5761 }
0x11f2   : > { %v13201_v15 = vsub.f32 %v13027_v31, %v5819_v8  ;;  %v5820_v30 = vmul.f32 0.03125, %v5762_v38  ;;  %v5882_v2 = vmul.f32 %v13198_v19, %v13198_v19 }
0x11f3   : > { %v5765_v33 = vpop.xlane.xlu1 %5764 }
0x11f4   : > { %v13206_v35 = vsub.f32 %v13025_v52, %v5820_v30  ;;  %v5821_v37 = vmul.f32 0.03125, %v5765_v33  ;;  %v5946_v41 = vsel %vm670_vm1, %v5882_v2, 0.0  ;;  %v5883_v18 = vmul.f32 %v13201_v15, %v13201_v15 }
0x11f5   : > { %5947 = vadd.xlane.f32.xlu0 %v5946_v41  ;;  %v5768_v53 = vpop.xlane.xlu0 %5767 }
0x11f6   : > { %v13212_v29 = vsub.f32 %v13031_v50, %v5821_v37  ;;  %v5822_v32 = vmul.f32 0.03125, %v5768_v53  ;;  %v5949_v8 = vsel %vm670_vm1, %v5883_v18, 0.0  ;;  %v5884_v38 = vmul.f32 %v13206_v35, %v13206_v35 }
0x11f7   : > { %v5771_v31 = vpop.xlane.xlu1 %5770  ;;  %5950 = vadd.xlane.f32.xlu1 %v5949_v8 }
0x11f8   : > { %v13218_v30 = vsub.f32 %v13039_v59, %v5822_v32  ;;  %v5823_v2 = vmul.f32 0.03125, %v5771_v31  ;;  %v5952_v33 = vsel %vm670_vm1, %v5884_v38, 0.0  ;;  %v5885_v41 = vmul.f32 %v13212_v29, %v13212_v29 }
0x11f9   : > { %5953 = vadd.xlane.f32.xlu0 %v5952_v33  ;;  %v5774_v37 = vpop.xlane.xlu0 %5773 }
0x11fa   : > { %v13224_v53 = vsub.f32 %v13047_v51, %v5823_v2  ;;  %v5824_v18 = vmul.f32 0.03125, %v5774_v37  ;;  %v5955_v50 = vsel %vm670_vm1, %v5885_v41, 0.0  ;;  %v5886_v8 = vmul.f32 %v13218_v30, %v13218_v30 }
0x11fb   : > { %v5777_v49 = vpop.xlane.xlu1 %5776  ;;  %5956 = vadd.xlane.f32.xlu1 %v5955_v50 }
0x11fc   : > { %v13230_v31 = vsub.f32 %v13045_v44, %v5824_v18  ;;  %v5825_v32 = vmul.f32 0.03125, %v5777_v49  ;;  %v5958_v38 = vsel %vm670_vm1, %v5886_v8, 0.0  ;;  %v5887_v33 = vmul.f32 %v13224_v53, %v13224_v53 }
0x11fd   : > { %5959 = vadd.xlane.f32.xlu0 %v5958_v38  ;;  %v5780_v2 = vpop.xlane.xlu0 %5779 }
0x11fe   : > { %v13236_v37 = vsub.f32 %v13051_v10, %v5825_v32  ;;  %v5826_v41 = vmul.f32 0.03125, %v5780_v2  ;;  %v5961_v51 = vsel %vm670_vm1, %v5887_v33, 0.0  ;;  %v5888_v50 = vmul.f32 %v13230_v31, %v13230_v31 }
0x11ff   : > { %v5783_v59 = vpop.xlane.xlu1 %5782  ;;  %5962 = vadd.xlane.f32.xlu1 %v5961_v51 }
0x1200   : > { %v13242_v49 = vsub.f32 %v13059_v26, %v5826_v41  ;;  %v5827_v18 = vmul.f32 0.03125, %v5783_v59  ;;  %v5964_v8 = vsel %vm670_vm1, %v5888_v50, 0.0  ;;  %v5889_v38 = vmul.f32 %v13236_v37, %v13236_v37 }
0x1201   : > { %5965 = vadd.xlane.f32.xlu0 %v5964_v8  ;;  %v5786_v32 = vpop.xlane.xlu0 %5785 }
0x1202   : > { %v13248_v2 = vsub.f32 %v13067_v62, %v5827_v18  ;;  %v5828_v33 = vmul.f32 0.03125, %v5786_v32  ;;  %v5967_v10 = vsel %vm670_vm1, %v5889_v38, 0.0  ;;  %v5890_v51 = vmul.f32 %v13242_v49, %v13242_v49 }
0x1203   : > { %v5789_v44 = vpop.xlane.xlu1 %5788  ;;  %5968 = vadd.xlane.f32.xlu1 %v5967_v10 }
0x1204   : > { %v13254_v59 = vsub.f32 %v13065_v60, %v5828_v33  ;;  %v5829_v41 = vmul.f32 0.03125, %v5789_v44  ;;  %v5970_v50 = vsel %vm670_vm1, %v5890_v51, 0.0  ;;  %v5891_v8 = vmul.f32 %v13248_v2, %v13248_v2 }
0x1205   : > { %5971 = vadd.xlane.f32.xlu0 %v5970_v50 }
0x1206   : > { %v13260_v18 = vsub.f32 %v13071_v25, %v5829_v41  ;;  %v5973_v38 = vsel %vm670_vm1, %v5891_v8, 0.0  ;;  %v5892_v32 = vmul.f32 %v13254_v59, %v13254_v59 }
0x1207   : > { %5974 = vadd.xlane.f32.xlu1 %v5973_v38 }
0x1208   : > { %v5976_v10 = vsel %vm670_vm1, %v5892_v32, 0.0  ;;  %v5893_v44 = vmul.f32 %v13260_v18, %v13260_v18 }
0x1209   : > { %5977 = vadd.xlane.f32.xlu0 %v5976_v10 }
0x120a   : > { %v5979_v33 = vsel %vm670_vm1, %v5893_v44, 0.0 }
0x120b   : > { %5980 = vadd.xlane.f32.xlu1 %v5979_v33 }
0x1223   : > { %v5792_v51 = vpop.xlane.xlu0 %5791 }
0x1224   : > { %v5830_v50 = vmul.f32 0.03125, %v5792_v51 }
0x1225   : > { %v5795_v62 = vpop.xlane.xlu1 %5794 }
0x1226   : > { %v13270_v41 = vsub.f32 %v13081_v7, %v5830_v50  ;;  %v5831_v8 = vmul.f32 0.03125, %v5795_v62 }
0x1227   : > { %v5798_v25 = vpop.xlane.xlu0 %5797 }
0x1228   : > { %v13273_v26 = vsub.f32 %v13090_v22, %v5831_v8  ;;  %v5832_v38 = vmul.f32 0.03125, %v5798_v25  ;;  %v5894_v32 = vmul.f32 %v13270_v41, %v13270_v41 }
0x1229   : > { %v5801_v60 = vpop.xlane.xlu1 %5800 }
0x122a   : > { %v13278_v10 = vsub.f32 %v13088_v34, %v5832_v38  ;;  %v5833_v44 = vmul.f32 0.03125, %v5801_v60  ;;  %v5982_v33 = vsel %vm670_vm1, %v5894_v32, 0.0  ;;  %v5895_v51 = vmul.f32 %v13273_v26, %v13273_v26 }
0x122b   : > { %5983 = vadd.xlane.f32.xlu0 %v5982_v33  ;;  %v5900_v62 = vpop.xlane.xlu0 %5899 }
0x122c   : > { %v13284_v50 = vsub.f32 %v13097_v3, %v5833_v44  ;;  %v5994_v8 = vmul.f32 0.03125, %v5900_v62  ;;  %v5985_v25 = vsel %vm670_vm1, %v5895_v51, 0.0  ;;  %v5896_v22 = vmul.f32 %v13278_v10, %v13278_v10 }
0x122d   : > { %5986 = vadd.xlane.f32.xlu1 %v5985_v25  ;;  %v5903_v38 = vpop.xlane.xlu1 %5902 }
0x122e   : > { %v6026_v7 = vadd.f32 1e-05, %v5994_v8  ;;  %v5995_v60 = vmul.f32 0.03125, %v5903_v38  ;;  %v5988_v32 = vsel %vm670_vm1, %v5896_v22, 0.0  ;;  %v5897_v34 = vmul.f32 %v13284_v50, %v13284_v50 }
0x122f   : > { %5989 = vadd.xlane.f32.xlu0 %v5988_v32  ;;  %v5906_v33 = vpop.xlane.xlu0 %5905  ;;  %v6124_v22 = vsub.s32 2, %v14272_v20 }
0x1230   : > { %9226 = vrsqrt.f32 %v6026_v7  ;;  %v6027_v44 = vadd.f32 1e-05, %v5995_v60  ;;  %v5996_v3 = vmul.f32 0.03125, %v5906_v33  ;;  %v5991_v62 = vsel %vm670_vm1, %v5897_v34, 0.0 }
0x1231   : > { %5992 = vadd.xlane.f32.xlu1 %v5991_v62  ;;  %v5909_v51 = vpop.xlane.xlu1 %5908  ;;  %v13295_v34 = vrot.slane %v12912_v1, %v6124_v22 }
0x1232   : > { %9228 = vrsqrt.f32 %v6027_v44  ;;  %v6028_v52 = vadd.f32 1e-05, %v5996_v3  ;;  %v5997_v25 = vmul.f32 0.03125, %v5909_v51  ;;  %v6160_v3 = vsub.s32 3, %v14272_v20 }
0x1233   : > { %v5912_v63 = vpop.xlane.xlu0 %5911 }
0x1234   : > { %9230 = vrsqrt.f32 %v6028_v52  ;;  %v6029_v8 = vadd.f32 1e-05, %v5997_v25  ;;  %v5998_v38 = vmul.f32 0.03125, %v5912_v63 }
0x1235   : > { %v5915_v14 = vpop.xlane.xlu1 %5914 }
0x1236   : > { %9232 = vrsqrt.f32 %v6029_v8  ;;  %v6030_v32 = vadd.f32 1e-05, %v5998_v38  ;;  %v5999_v40 = vmul.f32 0.03125, %v5915_v14 }
0x1237   : > { %v5918_v7 = vpop.xlane.xlu0 %5917 }
0x1238   : > { %9234 = vrsqrt.f32 %v6030_v32  ;;  %v6031_v60 = vadd.f32 1e-05, %v5999_v40  ;;  %v6000_v33 = vmul.f32 0.03125, %v5918_v7  ;;  %v13301_v32 = vrot.slane %v12912_v1, %v6160_v3 }
0x1239   : > { %v5921_v44 = vpop.xlane.xlu1 %5920 }
0x123a   : > { %v9227_v62 = vpop.eup %9226  ;;  %9236 = vrsqrt.f32 %v6031_v60  ;;  %v6032_v52 = vadd.f32 1e-05, %v6000_v33  ;;  %v6001_v63 = vmul.f32 0.03125, %v5921_v44 }
0x123b   : > { %v6090_v51 = vmul.f32 %v9227_v62, %v13086_v17  ;;  %v5924_v25 = vpop.xlane.xlu0 %5923 }
0x123c   : > { %v9229_v8 = vpop.eup %9228  ;;  %9238 = vrsqrt.f32 %v6032_v52  ;;  %v6033_v14 = vadd.f32 1e-05, %v6001_v63  ;;  %v6002_v38 = vmul.f32 0.03125, %v5924_v25 }
0x123d   : > { %v6091_v40 = vmul.f32 %v9229_v8, %v13095_v28  ;;  %v5927_v22 = vpop.xlane.xlu1 %5926  ;;  %v6126_v7 = vmul.f32 %v13295_v34, %v6090_v51 }
0x123e   : > { %v9231_v45 = vpop.eup %9230  ;;  %9240 = vrsqrt.f32 %v6033_v14  ;;  %v6034_v60 = vadd.f32 1e-05, %v6002_v38  ;;  %v6003_v33 = vmul.f32 0.03125, %v5927_v22 }
0x123f   : > { %v6092_v44 = vmul.f32 %v9231_v45, %v13102_v16  ;;  %v5930_v17 = vpop.xlane.xlu0 %5929  ;;  %v6127_v62 = vmul.f32 %v13295_v34, %v6091_v40  ;;  %v6162_v51 = vadd.f32 %v13301_v32, %v6126_v7 }
0x1240   : > { %v9233_v52 = vpop.eup %9232  ;;  %9242 = vrsqrt.f32 %v6034_v60  ;;  %v6035_v63 = vadd.f32 1e-05, %v6003_v33  ;;  %v6004_v25 = vmul.f32 0.03125, %v5930_v17 }
0x1241   : > { %v6128_v28 = vmul.f32 %v13295_v34, %v6092_v44  ;;  %v6093_v1 = vmul.f32 %v9233_v52, %v13109_v57  ;;  %v5933_v3 = vpop.xlane.xlu1 %5932  ;;  %v6163_v8 = vadd.f32 %v13301_v32, %v6127_v62 }
0x1242   : > { %v9235_v14 = vpop.eup %9234  ;;  %9244 = vrsqrt.f32 %v6035_v63  ;;  %v6036_v38 = vadd.f32 1e-05, %v6004_v25  ;;  %v6005_v45 = vmul.f32 0.03125, %v5933_v3 }
0x1243   : > { %v6129_v16 = vmul.f32 %v13295_v34, %v6093_v1  ;;  %v6094_v40 = vmul.f32 %v9235_v14, %v13116_v27  ;;  %v5936_v22 = vpop.xlane.xlu0 %5935  ;;  %v6194_v60 = vpack.c.bf16 %v6163_v8, %v6162_v51  ;;  %v6164_v57 = vadd.f32 %v13301_v32, %v6128_v28 }
0x1244   : > { %v9237_v33 = vpop.eup %9236  ;;  %9246 = vrsqrt.f32 %v6036_v38  ;;  %v6037_v44 = vadd.f32 1e-05, %v6005_v45  ;;  %v6006_v17 = vmul.f32 0.03125, %v5936_v22 }
0x1245   : > { %v6165_v7 = vadd.f32 %v13301_v32, %v6129_v16  ;;  %v6095_v62 = vmul.f32 %v9237_v33, %v13122_v58  ;;  %v5939_v52 = vpop.xlane.xlu1 %5938  ;;  %8434 = vmatprep.mubr.msk.bf16.mxu0 %vm670_vm1, %v6194_v60  ;;  %v6130_v63 = vmul.f32 %v13295_v34, %v6094_v40 }
0x1246   : > { %v9239_v25 = vpop.eup %9238  ;;  %9248 = vrsqrt.f32 %v6037_v44  ;;  %v6038_v27 = vadd.f32 1e-05, %v6006_v17  ;;  %v6007_v1 = vmul.f32 0.03125, %v5939_v52 }
0x1247   : > { %v6096_v3 = vmul.f32 %v9239_v25, %v13128_v36  ;;  %v5942_v51 = vpop.xlane.xlu0 %5941  ;;  %v6195_v8 = vpack.c.bf16 %v6165_v7, %v6164_v57  ;;  %v6131_v14 = vmul.f32 %v13295_v34, %v6095_v62  ;;  %v6166_v40 = vadd.f32 %v13301_v32, %v6130_v63 }
0x1248   : > { %v9241_v28 = vpop.eup %9240  ;;  %9250 = vrsqrt.f32 %v6038_v27  ;;  %v6039_v38 = vadd.f32 1e-05, %v6007_v1  ;;  %v6008_v45 = vmul.f32 0.03125, %v5942_v51 }
0x1249   : > { %v6097_v58 = vmul.f32 %v9241_v28, %v13134_v47  ;;  %v5945_v16 = vpop.xlane.xlu1 %5944  ;;  %8435 = vmatmul.mubr.msk.bf16.vlgmr.msra.gmra.mrb[176].mxu0 %vm670_vm1, %v6195_v8  ;;  %v6167_v22 = vadd.f32 %v13301_v32, %v6131_v14  ;;  %v6132_v60 = vmul.f32 %v13295_v34, %v6096_v3 }
0x124a   : > { %v9243_v36 = vpop.eup %9242  ;;  %9252 = vrsqrt.f32 %v6039_v38  ;;  %v6040_v33 = vadd.f32 1e-05, %v6008_v45  ;;  %v6009_v44 = vmul.f32 0.03125, %v5945_v16 }
0x124b   : > { %v6098_v17 = vmul.f32 %v9243_v36, %v13140_v5  ;;  %v6196_v57 = vpack.c.bf16 %v6167_v22, %v6166_v40  ;;  %v6133_v7 = vmul.f32 %v13295_v34, %v6097_v58  ;;  %v6168_v63 = vadd.f32 %v13301_v32, %v6132_v60 }
0x124c   : > { %v9245_v62 = vpop.eup %9244  ;;  %9254 = vrsqrt.f32 %v6040_v33  ;;  %v6041_v47 = vadd.f32 1e-05, %v6009_v44 }
0x124d   : > { %v6099_v52 = vmul.f32 %v9245_v62, %v13146_v42  ;;  %8438 = vmatprep.mubr.msk.bf16.mxu0 %vm670_vm1, %v6196_v57  ;;  %v6169_v25 = vadd.f32 %v13301_v32, %v6133_v7  ;;  %v6134_v27 = vmul.f32 %v13295_v34, %v6098_v17 }
0x124e   : > { %v9247_v1 = vpop.eup %9246  ;;  %9256 = vrsqrt.f32 %v6041_v47 }
0x124f   : > { %v6100_v5 = vmul.f32 %v9247_v1, %v13152_v55  ;;  %v6197_v3 = vpack.c.bf16 %v6169_v25, %v6168_v63  ;;  %v6135_v51 = vmul.f32 %v13295_v34, %v6099_v52  ;;  %v6170_v42 = vadd.f32 %v13301_v32, %v6134_v27 }
0x1250   : > { %v9249_v8 = vpop.eup %9248 }
0x1251   : > { %v6101_v14 = vmul.f32 %v9249_v8, %v13158_v43  ;;  %8439 = vmatmul.mubr.msk.bf16.gmra.mrb[180].mxu0 %vm670_vm1, %v6197_v3  ;;  %v6171_v28 = vadd.f32 %v13301_v32, %v6135_v51  ;;  %v6136_v38 = vmul.f32 %v13295_v34, %v6100_v5 }
0x1252   : > { %v9251_v45 = vpop.eup %9250 }
0x1253   : > { %v6102_v58 = vmul.f32 %v9251_v45, %v13164_v21  ;;  %v6198_v16 = vpack.c.bf16 %v6171_v28, %v6170_v42  ;;  %v6137_v55 = vmul.f32 %v13295_v34, %v6101_v14  ;;  %v6172_v43 = vadd.f32 %v13301_v32, %v6136_v38 }
0x1254   : > { %v9253_v40 = vpop.eup %9252 }
0x1255   : > { %v6103_v22 = vmul.f32 %v9253_v40, %v13170_v12  ;;  %8442 = vmatprep.mubr.msk.bf16.mxu0 %vm670_vm1, %v6198_v16  ;;  %v6173_v60 = vadd.f32 %v13301_v32, %v6137_v55  ;;  %v6138_v36 = vmul.f32 %v13295_v34, %v6102_v58 }
0x1256   : > { %v9255_v33 = vpop.eup %9254 }
0x1257   : > { %v6104_v44 = vmul.f32 %v9255_v33, %v13176_v0  ;;  %v6199_v17 = vpack.c.bf16 %v6173_v60, %v6172_v43  ;;  %v6139_v21 = vmul.f32 %v13295_v34, %v6103_v22  ;;  %v6174_v12 = vadd.f32 %v13301_v32, %v6138_v36 }
0x1258   : > { %v9257_v57 = vpop.eup %9256 }
0x1259   : > { %v6105_v7 = vmul.f32 %v9257_v57, %v13182_v24  ;;  %8443 = vmatmul.mubr.msk.bf16.gmra.mrb[184].mxu0 %vm670_vm1, %v6199_v17  ;;  %v6175_v62 = vadd.f32 %v13301_v32, %v6139_v21  ;;  %v6140_v47 = vmul.f32 %v13295_v34, %v6104_v44 }
0x125b   : > { %v6200_v52 = vpack.c.bf16 %v6175_v62, %v6174_v12  ;;  %v6141_v63 = vmul.f32 %v13295_v34, %v6105_v7  ;;  %v6176_v0 = vadd.f32 %v13301_v32, %v6140_v47 }
0x125d   : > { %8446 = vmatprep.mubr.msk.bf16.mxu0 %vm670_vm1, %v6200_v52  ;;  %v6177_v25 = vadd.f32 %v13301_v32, %v6141_v63 }
0x125f   : > { %v6201_v27 = vpack.c.bf16 %v6177_v25, %v6176_v0 }
0x1261   : > { %8447 = vmatmul.mubr.msk.bf16.gmra.mrb[188].mxu0 %vm670_vm1, %v6201_v27 }
0x1282   : > { %v5948_v24 = vpop.xlane.xlu0 %5947 }
0x1283   : > { %v6010_v1 = vmul.f32 0.03125, %v5948_v24 }
0x1284   : > { %v5951_v5 = vpop.xlane.xlu1 %5950 }
0x1285   : > { %v6042_v3 = vadd.f32 1e-05, %v6010_v1  ;;  %v6011_v51 = vmul.f32 0.03125, %v5951_v5 }
0x1286   : > { %v5954_v8 = vpop.xlane.xlu0 %5953 }
0x1287   : > { %9258 = vrsqrt.f32 %v6042_v3  ;;  %v6043_v14 = vadd.f32 1e-05, %v6011_v51  ;;  %v6012_v42 = vmul.f32 0.03125, %v5954_v8 }
0x1288   : > { %v5957_v28 = vpop.xlane.xlu1 %5956 }
0x1289   : > { %9260 = vrsqrt.f32 %v6043_v14  ;;  %v6044_v38 = vadd.f32 1e-05, %v6012_v42  ;;  %v6013_v45 = vmul.f32 0.03125, %v5957_v28 }
0x128a   : > { %v5960_v58 = vpop.xlane.xlu0 %5959 }
0x128b   : > { %9262 = vrsqrt.f32 %v6044_v38  ;;  %v6045_v16 = vadd.f32 1e-05, %v6013_v45  ;;  %v6014_v55 = vmul.f32 0.03125, %v5960_v58 }
0x128c   : > { %v5963_v40 = vpop.xlane.xlu1 %5962 }
0x128d   : > { %9264 = vrsqrt.f32 %v6045_v16  ;;  %v6046_v22 = vadd.f32 1e-05, %v6014_v55  ;;  %v6015_v43 = vmul.f32 0.03125, %v5963_v40 }
0x128e   : > { %v5966_v60 = vpop.xlane.xlu0 %5965 }
0x128f   : > { %9266 = vrsqrt.f32 %v6046_v22  ;;  %v6047_v36 = vadd.f32 1e-05, %v6015_v43  ;;  %v6016_v33 = vmul.f32 0.03125, %v5966_v60 }
0x1290   : > { %v5969_v44 = vpop.xlane.xlu1 %5968 }
0x1291   : > { %v9259_v17 = vpop.eup %9258  ;;  %9268 = vrsqrt.f32 %v6047_v36  ;;  %v6048_v21 = vadd.f32 1e-05, %v6016_v33  ;;  %v6017_v57 = vmul.f32 0.03125, %v5969_v44 }
0x1292   : > { %v6106_v7 = vmul.f32 %v9259_v17, %v13198_v19  ;;  %v5972_v12 = vpop.xlane.xlu0 %5971 }
0x1293   : > { %v9261_v62 = vpop.eup %9260  ;;  %9270 = vrsqrt.f32 %v6048_v21  ;;  %v6049_v47 = vadd.f32 1e-05, %v6017_v57  ;;  %v6018_v52 = vmul.f32 0.03125, %v5972_v12 }
0x1294   : > { %v6107_v63 = vmul.f32 %v9261_v62, %v13201_v15  ;;  %v5975_v0 = vpop.xlane.xlu1 %5974  ;;  %v6142_v25 = vmul.f32 %v13295_v34, %v6106_v7 }
0x1295   : > { %v9263_v27 = vpop.eup %9262  ;;  %9272 = vrsqrt.f32 %v6049_v47  ;;  %v6050_v24 = vadd.f32 1e-05, %v6018_v52  ;;  %v6019_v1 = vmul.f32 0.03125, %v5975_v0 }
0x1296   : > { %v6108_v5 = vmul.f32 %v9263_v27, %v13206_v35  ;;  %v5978_v3 = vpop.xlane.xlu0 %5977  ;;  %v6143_v51 = vmul.f32 %v13295_v34, %v6107_v63  ;;  %v6178_v15 = vadd.f32 %v13301_v32, %v6142_v25 }
0x1297   : > { %v9265_v19 = vpop.eup %9264  ;;  %9274 = vrsqrt.f32 %v6050_v24  ;;  %v6051_v8 = vadd.f32 1e-05, %v6019_v1  ;;  %v6020_v14 = vmul.f32 0.03125, %v5978_v3 }
0x1298   : > { %v6109_v42 = vmul.f32 %v9265_v19, %v13212_v29  ;;  %v5981_v28 = vpop.xlane.xlu1 %5980  ;;  %v6179_v38 = vadd.f32 %v13301_v32, %v6143_v51  ;;  %v6144_v45 = vmul.f32 %v13295_v34, %v6108_v5  ;;  %v8642_v5 = vld [vmem:[%s9654_s17] sm:$0xff]  }
0x1299   : > { %v9267_v58 = vpop.eup %9266  ;;  %9276 = vrsqrt.f32 %v6051_v8  ;;  %v6052_v16 = vadd.f32 1e-05, %v6020_v14  ;;  %v6021_v35 = vmul.f32 0.03125, %v5981_v28  ;;  %8466 = vmatprep.subr.bf16.mxu1 %v8642_v5 }
0x129a   : > { %v6110_v55 = vmul.f32 %v9267_v58, %v13218_v30  ;;  %v6202_v40 = vpack.c.bf16 %v6179_v38, %v6178_v15  ;;  %v6145_v22 = vmul.f32 %v13295_v34, %v6109_v42  ;;  %v6180_v36 = vadd.f32 %v13301_v32, %v6144_v45  ;;  %8467 = vmatpush3.bf16.msra.mxu1 %v8642_v5  ;;  %v8643_v15 = vld [vmem:[%s9654_s17 + $0x8] sm:$0xff]   ;;  %v8644_v58 = vld [vmem:[%s9654_s17 + $0x10] sm:$0xff]  }
0x129b   : > { %v9269_v43 = vpop.eup %9268  ;;  %9278 = vrsqrt.f32 %v6052_v16  ;;  %v6053_v60 = vadd.f32 1e-05, %v6021_v35  ;;  %8468 = vmatprep.subr.bf16.mxu1 %v8643_v15  ;;  %v8645_v35 = vld [vmem:[%s9654_s17 + $0x18] sm:$0xff]  }
0x129c   : > { %v6111_v29 = vmul.f32 %v9269_v43, %v13224_v53  ;;  %8450 = vmatprep.mubr.msk.bf16.mxu0 %vm670_vm1, %v6202_v40  ;;  %v6181_v33 = vadd.f32 %v13301_v32, %v6145_v22  ;;  %v6146_v44 = vmul.f32 %v13295_v34, %v6110_v55  ;;  %v8646_v55 = vld [vmem:[%s9654_s17 + $0x20] sm:$0xff]   ;;  %v8647_v22 = vld [vmem:[%s9654_s17 + $0x28] sm:$0xff]  }
0x129d   : > { %v9271_v17 = vpop.eup %9270  ;;  %9280 = vrsqrt.f32 %v6053_v60 }
0x129e   : > { %v6112_v30 = vmul.f32 %v9271_v17, %v13230_v31  ;;  %v6203_v21 = vpack.c.bf16 %v6181_v33, %v6180_v36  ;;  %v6147_v57 = vmul.f32 %v13295_v34, %v6111_v29  ;;  %v6182_v53 = vadd.f32 %v13301_v32, %v6146_v44  ;;  %8469 = vmatpush3.bf16.msra.mxu1 %v8643_v15  ;;  %v8648_v44 = vld [vmem:[%s9654_s17 + $0x30] sm:$0xff]  }
0x129f   : > { %v9273_v7 = vpop.eup %9272  ;;  %8470 = vmatprep.subr.bf16.mxu1 %v8644_v58 }
0x12a0   : > { %v6113_v12 = vmul.f32 %v9273_v7, %v13236_v37  ;;  %8451 = vmatmul.mubr.msk.bf16.gmra.mrb[192].mxu0 %vm670_vm1, %v6203_v21  ;;  %v6183_v62 = vadd.f32 %v13301_v32, %v6147_v57  ;;  %v6148_v47 = vmul.f32 %v13295_v34, %v6112_v30 }
0x12a1   : > { %v9275_v52 = vpop.eup %9274 }
0x12a2   : > { %v6114_v63 = vmul.f32 %v9275_v52, %v13242_v49  ;;  %v6204_v0 = vpack.c.bf16 %v6183_v62, %v6182_v53  ;;  %v6149_v31 = vmul.f32 %v13295_v34, %v6113_v12  ;;  %v6184_v37 = vadd.f32 %v13301_v32, %v6148_v47  ;;  %8471 = vmatpush3.bf16.msra.mxu1 %v8644_v58  ;;  %v8649_v12 = vld [vmem:[%s9654_s17 + $0x38] sm:$0xff]  }
0x12a3   : > { %v9277_v25 = vpop.eup %9276  ;;  %8472 = vmatprep.subr.bf16.mxu1 %v8645_v35 }
0x12a4   : > { %v6115_v27 = vmul.f32 %v9277_v25, %v13248_v2  ;;  %8454 = vmatprep.mubr.msk.bf16.mxu0 %vm670_vm1, %v6204_v0  ;;  %v6185_v24 = vadd.f32 %v13301_v32, %v6149_v31  ;;  %v6150_v1 = vmul.f32 %v13295_v34, %v6114_v63 }
0x12a5   : > { %v9279_v3 = vpop.eup %9278 }
0x12a6   : > { %v6116_v51 = vmul.f32 %v9279_v3, %v13254_v59  ;;  %v6205_v49 = vpack.c.bf16 %v6185_v24, %v6184_v37  ;;  %v6151_v19 = vmul.f32 %v13295_v34, %v6115_v27  ;;  %v6186_v14 = vadd.f32 %v13301_v32, %v6150_v1  ;;  %8473 = vmatpush3.bf16.msra.mxu1 %v8645_v35 }
0x12a7   : > { %v9281_v8 = vpop.eup %9280  ;;  %8474 = vmatprep.subr.bf16.mxu1 %v8646_v55 }
0x12a8   : > { %v6117_v2 = vmul.f32 %v9281_v8, %v13260_v18  ;;  %8455 = vmatmul.mubr.msk.bf16.gmra.mrb[196].mxu0 %vm670_vm1, %v6205_v49  ;;  %v6187_v42 = vadd.f32 %v13301_v32, %v6151_v19  ;;  %v6152_v28 = vmul.f32 %v13295_v34, %v6116_v51 }
0x12aa   : > { %v6206_v59 = vpack.c.bf16 %v6187_v42, %v6186_v14  ;;  %v6153_v38 = vmul.f32 %v13295_v34, %v6117_v2  ;;  %v6188_v18 = vadd.f32 %v13301_v32, %v6152_v28  ;;  %8475 = vmatpush3.bf16.msra.mxu1 %v8646_v55 }
0x12ab   : > { %8476 = vmatprep.subr.bf16.mxu1 %v8647_v22 }
0x12ac   : > { %8458 = vmatprep.mubr.msk.bf16.mxu0 %vm670_vm1, %v6206_v59  ;;  %v6189_v45 = vadd.f32 %v13301_v32, %v6153_v38 }
0x12ae   : > { %v6207_v16 = vpack.c.bf16 %v6189_v45, %v6188_v18  ;;  %8477 = vmatpush3.bf16.msra.mxu1 %v8647_v22 }
0x12af   : > { %8478 = vmatprep.subr.bf16.mxu1 %v8648_v44 }
0x12b0   : > { %8459 = vmatmul.mubr.msk.bf16.gmra.mrb[200].mxu0 %vm670_vm1, %v6207_v16 }
0x12b2   : > { %8479 = vmatpush3.bf16.msra.mxu1 %v8648_v44 }
0x12b3   : > { %8480 = vmatprep.subr.bf16.mxu1 %v8649_v12 }
0x12b6   : > { %8481 = vmatpush3.bf16.msra.mxu1 %v8649_v12 }
0x12b8   : > { %v5984_v40 = vpop.xlane.xlu0 %5983 }
0x12b9   : > { %v6022_v43 = vmul.f32 0.03125, %v5984_v40 }
0x12ba   : > { %v5987_v60 = vpop.xlane.xlu1 %5986 }
0x12bb   : > { %v6054_v29 = vadd.f32 1e-05, %v6022_v43  ;;  %v6023_v36 = vmul.f32 0.03125, %v5987_v60 }
0x12bc   : > { %v5990_v33 = vpop.xlane.xlu0 %5989 }
0x12bd   : > { %9282 = vrsqrt.f32 %v6054_v29  ;;  %v6055_v17 = vadd.f32 1e-05, %v6023_v36  ;;  %v6024_v30 = vmul.f32 0.03125, %v5990_v33 }
0x12be   : > { %v5993_v21 = vpop.xlane.xlu1 %5992 }
0x12bf   : > { %9284 = vrsqrt.f32 %v6055_v17  ;;  %v6056_v57 = vadd.f32 1e-05, %v6024_v30  ;;  %v6025_v7 = vmul.f32 0.03125, %v5993_v21 }
0x12c1   : > { %9286 = vrsqrt.f32 %v6056_v57  ;;  %v6057_v53 = vadd.f32 1e-05, %v6025_v7 }
0x12c3   : > { %9288 = vrsqrt.f32 %v6057_v53 }
0x12c7   : > { %v9283_v62 = vpop.eup %9282 }
0x12c8   : > { %v6118_v47 = vmul.f32 %v9283_v62, %v13270_v41 }
0x12c9   : > { %v9285_v52 = vpop.eup %9284 }
0x12ca   : > { %v6119_v63 = vmul.f32 %v9285_v52, %v13273_v26  ;;  %v6154_v0 = vmul.f32 %v13295_v34, %v6118_v47 }
0x12cb   : > { %v9287_v31 = vpop.eup %9286 }
0x12cc   : > { %v6120_v25 = vmul.f32 %v9287_v31, %v13278_v10  ;;  %v6155_v27 = vmul.f32 %v13295_v34, %v6119_v63  ;;  %v6190_v1 = vadd.f32 %v13301_v32, %v6154_v0 }
0x12cd   : > { %v9289_v37 = vpop.eup %9288 }
0x12ce   : > { %v6121_v24 = vmul.f32 %v9289_v37, %v13284_v50  ;;  %v6191_v5 = vadd.f32 %v13301_v32, %v6155_v27  ;;  %v6156_v41 = vmul.f32 %v13295_v34, %v6120_v25  ;;  %v13426_v50 = vld [vmem:[%s560_s14] ss:$0 sm:$0xff] }
0x12d0   : > { %v6208_v3 = vpack.c.bf16 %v6191_v5, %v6190_v1  ;;  %v6157_v26 = vmul.f32 %v13295_v34, %v6121_v24  ;;  %v6192_v51 = vadd.f32 %v13301_v32, %v6156_v41 }
0x12d2   : > { %8462 = vmatprep.mubr.msk.bf16.mxu0 %vm670_vm1, %v6208_v3  ;;  %v6193_v10 = vadd.f32 %v13301_v32, %v6157_v26 }
0x12d4   : > { %v6209_v49 = vpack.c.bf16 %v6193_v10, %v6192_v51 }
0x12d6   : > { %8463 = vmatmul.mubr.msk.bf16.gmra.mrb[204].mxu0 %vm670_vm1, %v6209_v49 }
0x131c   : > { %v8436_v19 = vpop.f32.mrb[176].mxu0 }
0x131d   : > { %v13429_v8 = vadd.f32 %v8436_v19, %v13426_v50  ;;  %v6315_v34 = vpop.f32.mrb[177].mxu0 }
0x131e   : > { %v13432_v2 = vadd.f32 %v13426_v50, %v6315_v34  ;;  %v8437_v14 = vpop.f32.mrb[178].mxu0 }
0x131f   : > { %v7458_v32 = vmul.f32 -1.702, %v13429_v8  ;;  %v13436_v42 = vadd.f32 %v8437_v14, %v13426_v50  ;;  %v6318_v28 = vpop.f32.mrb[179].mxu0 }
0x1320   : > { %v7456_v15 = vmul.f32 -1.702, %v13432_v2  ;;  %v13440_v59 = vadd.f32 %v13426_v50, %v6318_v28 }
0x1321   : > { %v6510_v38 = vmul.f32 1.442695, %v7458_v32  ;;  %v7459_v18 = vmul.f32 -1.702, %v13436_v42 }
0x1322   : > { %v6506_v45 = vmul.f32 1.442695, %v7456_v15  ;;  %v7457_v58 = vmul.f32 -1.702, %v13440_v59 }
0x1323   : > { %9290 = vpow2.f32 %v6510_v38  ;;  %v6512_v16 = vmul.f32 1.442695, %v7459_v18 }
0x1324   : > { %9292 = vpow2.f32 %v6506_v45  ;;  %v6508_v35 = vmul.f32 1.442695, %v7457_v58  ;;  %v8440_v55 = vpop.f32.mrb[180].mxu0 }
0x1325   : > { %9294 = vpow2.f32 %v6512_v16  ;;  %v13445_v40 = vadd.f32 %v8440_v55, %v13426_v50  ;;  %v6331_v22 = vpop.f32.mrb[181].mxu0 }
0x1326   : > { %9296 = vpow2.f32 %v6508_v35  ;;  %v13448_v43 = vadd.f32 %v13426_v50, %v6331_v22  ;;  %v8441_v60 = vpop.f32.mrb[182].mxu0 }
0x1327   : > { %v7462_v29 = vmul.f32 -1.702, %v13445_v40  ;;  %v13452_v36 = vadd.f32 %v8441_v60, %v13426_v50  ;;  %v6334_v33 = vpop.f32.mrb[183].mxu0 }
0x1328   : > { %v7460_v44 = vmul.f32 -1.702, %v13448_v43  ;;  %v13456_v17 = vadd.f32 %v13426_v50, %v6334_v33 }
0x1329   : > { %v6518_v30 = vmul.f32 1.442695, %v7462_v29  ;;  %v7463_v21 = vmul.f32 -1.702, %v13452_v36 }
0x132a   : > { %v6514_v57 = vmul.f32 1.442695, %v7460_v44  ;;  %v7461_v7 = vmul.f32 -1.702, %v13456_v17 }
0x132b   : > { %9298 = vpow2.f32 %v6518_v30  ;;  %v6520_v12 = vmul.f32 1.442695, %v7463_v21 }
0x132c   : > { %9300 = vpow2.f32 %v6514_v57  ;;  %v6516_v53 = vmul.f32 1.442695, %v7461_v7  ;;  %v8444_v62 = vpop.f32.mrb[184].mxu0 }
0x132d   : > { %v9291_v47 = vpop.eup %9290  ;;  %9302 = vpow2.f32 %v6520_v12  ;;  %v13461_v52 = vadd.f32 %v8444_v62, %v13426_v50  ;;  %v6347_v63 = vpop.f32.mrb[185].mxu0 }
0x132e   : > { %v9293_v0 = vpop.eup %9292  ;;  %v6572_v31 = vadd.f32 1.0, %v9291_v47  ;;  %9304 = vpow2.f32 %v6516_v53  ;;  %v13464_v25 = vadd.f32 %v13426_v50, %v6347_v63  ;;  %v8445_v27 = vpop.f32.mrb[186].mxu0 }
0x132f   : > { %v9295_v37 = vpop.eup %9294  ;;  %v6570_v24 = vadd.f32 1.0, %v9293_v0  ;;  %v7466_v1 = vmul.f32 -1.702, %v13461_v52  ;;  %v13468_v5 = vadd.f32 %v8445_v27, %v13426_v50  ;;  %v6350_v41 = vpop.f32.mrb[187].mxu0 }
0x1330   : > { %v9297_v3 = vpop.eup %9296  ;;  %9306 = vrcp.f32 %v6572_v31  ;;  %v6573_v26 = vadd.f32 1.0, %v9295_v37  ;;  %v7464_v51 = vmul.f32 -1.702, %v13464_v25  ;;  %v13472_v10 = vadd.f32 %v13426_v50, %v6350_v41 }
0x1331   : > { %9308 = vrcp.f32 %v6570_v24  ;;  %v6571_v49 = vadd.f32 1.0, %v9297_v3  ;;  %v6526_v19 = vmul.f32 1.442695, %v7466_v1  ;;  %v7467_v34 = vmul.f32 -1.702, %v13468_v5 }
0x1332   : > { %9310 = vrcp.f32 %v6573_v26  ;;  %v6522_v14 = vmul.f32 1.442695, %v7464_v51  ;;  %v7465_v32 = vmul.f32 -1.702, %v13472_v10 }
0x1333   : > { %9312 = vrcp.f32 %v6571_v49  ;;  %v6528_v28 = vmul.f32 1.442695, %v7467_v34 }
0x1334   : > { %9314 = vpow2.f32 %v6526_v19  ;;  %v6524_v15 = vmul.f32 1.442695, %v7465_v32  ;;  %v8448_v38 = vpop.f32.mrb[188].mxu0 }
0x1335   : > { %v9299_v18 = vpop.eup %9298  ;;  %9316 = vpow2.f32 %v6522_v14  ;;  %v13477_v45 = vadd.f32 %v8448_v38, %v13426_v50  ;;  %v6363_v58 = vpop.f32.mrb[189].mxu0 }
0x1336   : > { %v9301_v16 = vpop.eup %9300  ;;  %v6576_v35 = vadd.f32 1.0, %v9299_v18  ;;  %9318 = vpow2.f32 %v6528_v28  ;;  %v13480_v55 = vadd.f32 %v13426_v50, %v6363_v58  ;;  %v8449_v22 = vpop.f32.mrb[190].mxu0 }
0x1337   : > { %v9303_v60 = vpop.eup %9302  ;;  %v6574_v29 = vadd.f32 1.0, %v9301_v16  ;;  %9320 = vpow2.f32 %v6524_v15  ;;  %v7470_v33 = vmul.f32 -1.702, %v13477_v45  ;;  %v13484_v44 = vadd.f32 %v8449_v22, %v13426_v50  ;;  %v6366_v30 = vpop.f32.mrb[191].mxu0 }
0x1338   : > { %v9305_v21 = vpop.eup %9304  ;;  %9322 = vrcp.f32 %v6576_v35  ;;  %v6577_v57 = vadd.f32 1.0, %v9303_v60  ;;  %v7468_v7 = vmul.f32 -1.702, %v13480_v55  ;;  %v13488_v12 = vadd.f32 %v13426_v50, %v6366_v30 }
0x1339   : > { %9324 = vrcp.f32 %v6574_v29  ;;  %v6575_v53 = vadd.f32 1.0, %v9305_v21  ;;  %v6534_v62 = vmul.f32 1.442695, %v7470_v33  ;;  %v7471_v47 = vmul.f32 -1.702, %v13484_v44 }
0x133a   : > { %v9307_v63 = vpop.eup %9306  ;;  %9326 = vrcp.f32 %v6577_v57  ;;  %v6530_v0 = vmul.f32 1.442695, %v7468_v7  ;;  %v7469_v31 = vmul.f32 -1.702, %v13488_v12 }
0x133b   : > { %v9309_v27 = vpop.eup %9308  ;;  %9328 = vrcp.f32 %v6575_v53  ;;  %v6536_v37 = vmul.f32 1.442695, %v7471_v47  ;;  %v6668_v3 = vmul.f32 %v9307_v63, %v13429_v8 }
0x133c   : > { %v9311_v24 = vpop.eup %9310  ;;  %9330 = vpow2.f32 %v6534_v62  ;;  %v6532_v1 = vmul.f32 1.442695, %v7469_v31  ;;  %v6666_v49 = vmul.f32 %v9309_v27, %v13432_v2 }
0x133d   : > { %v9313_v41 = vpop.eup %9312  ;;  %v6669_v26 = vmul.f32 %v9311_v24, %v13436_v42  ;;  %9332 = vpow2.f32 %v6530_v0 }
0x133e   : > { %v9315_v51 = vpop.eup %9314  ;;  %v6667_v19 = vmul.f32 %v9313_v41, %v13440_v59  ;;  %9334 = vpow2.f32 %v6536_v37 }
0x133f   : > { %v9317_v34 = vpop.eup %9316  ;;  %v6699_v14 = vpack.c.bf16 %v6669_v26, %v6668_v3  ;;  %v6580_v32 = vadd.f32 1.0, %v9315_v51  ;;  %9336 = vpow2.f32 %v6532_v1 }
0x1340   : > { %v9319_v28 = vpop.eup %9318  ;;  %v6578_v15 = vadd.f32 1.0, %v9317_v34  ;;  %v6698_v38 = vpack.c.bf16 %v6667_v19, %v6666_v49 }
0x1341   : > { %v9321_v18 = vpop.eup %9320  ;;  %9338 = vrcp.f32 %v6580_v32  ;;  %v6581_v58 = vadd.f32 1.0, %v9319_v28 }
0x1342   : > { %v9323_v8 = vpop.eup %9322  ;;  %9340 = vrcp.f32 %v6578_v15  ;;  %v6579_v42 = vadd.f32 1.0, %v9321_v18  ;;  %8482 = vmatprep.mubr.bf16.mxu1 %v6698_v38 }
0x1343   : > { %v9325_v16 = vpop.eup %9324  ;;  %9342 = vrcp.f32 %v6581_v58  ;;  %8483 = vmatmul.mubr.bf16.vlgmr.msra.gmra.mrb[144].mxu1 %v6699_v14  ;;  %v6672_v35 = vmul.f32 %v9323_v8, %v13445_v40 }
0x1344   : > { %v9327_v2 = vpop.eup %9326  ;;  %9344 = vrcp.f32 %v6579_v42  ;;  %v6670_v29 = vmul.f32 %v9325_v16, %v13448_v43 }
0x1345   : > { %v9329_v59 = vpop.eup %9328  ;;  %v6673_v22 = vmul.f32 %v9327_v2, %v13452_v36 }
0x1346   : > { %v9331_v60 = vpop.eup %9330  ;;  %v6671_v33 = vmul.f32 %v9329_v59, %v13456_v17 }
0x1347   : > { %v9333_v30 = vpop.eup %9332  ;;  %v6584_v21 = vadd.f32 1.0, %v9331_v60  ;;  %v6701_v57 = vpack.c.bf16 %v6673_v22, %v6672_v35 }
0x1348   : > { %v9335_v7 = vpop.eup %9334  ;;  %v6582_v53 = vadd.f32 1.0, %v9333_v30  ;;  %v6700_v62 = vpack.c.bf16 %v6671_v33, %v6670_v29 }
0x1349   : > { %v9337_v47 = vpop.eup %9336  ;;  %9346 = vrcp.f32 %v6584_v21  ;;  %v6585_v63 = vadd.f32 1.0, %v9335_v7 }
0x134a   : > { %9348 = vrcp.f32 %v6582_v53  ;;  %v6583_v0 = vadd.f32 1.0, %v9337_v47  ;;  %8486 = vmatprep.mubr.bf16.mxu1 %v6700_v62 }
0x134b   : > { %v9339_v40 = vpop.eup %9338  ;;  %9350 = vrcp.f32 %v6585_v63  ;;  %8487 = vmatmul.mubr.bf16.gmra.mrb[148].mxu1 %v6701_v57 }
0x134c   : > { %v9341_v36 = vpop.eup %9340  ;;  %9352 = vrcp.f32 %v6583_v0  ;;  %v6676_v17 = vmul.f32 %v9339_v40, %v13461_v52 }
0x134d   : > { %v9343_v43 = vpop.eup %9342  ;;  %v6674_v37 = vmul.f32 %v9341_v36, %v13464_v25 }
0x134e   : > { %v9345_v31 = vpop.eup %9344  ;;  %v6677_v27 = vmul.f32 %v9343_v43, %v13468_v5 }
0x134f   : > { %v6675_v24 = vmul.f32 %v9345_v31, %v13472_v10 }
0x1350   : > { %v6703_v1 = vpack.c.bf16 %v6677_v27, %v6676_v17 }
0x1351   : > { %v6702_v41 = vpack.c.bf16 %v6675_v24, %v6674_v37 }
0x1353   : > { %v9347_v3 = vpop.eup %9346  ;;  %8490 = vmatprep.mubr.bf16.mxu1 %v6702_v41 }
0x1354   : > { %v9349_v26 = vpop.eup %9348  ;;  %8491 = vmatmul.mubr.bf16.gmra.mrb[152].mxu1 %v6703_v1  ;;  %v6680_v19 = vmul.f32 %v9347_v3, %v13477_v45 }
0x1355   : > { %v9351_v51 = vpop.eup %9350  ;;  %v6678_v52 = vmul.f32 %v9349_v26, %v13480_v55 }
0x1356   : > { %v9353_v49 = vpop.eup %9352  ;;  %v6681_v34 = vmul.f32 %v9351_v51, %v13484_v44 }
0x1357   : > { %v6679_v5 = vmul.f32 %v9353_v49, %v13488_v12 }
0x1358   : > { %v6705_v14 = vpack.c.bf16 %v6681_v34, %v6680_v19 }
0x1359   : > { %v6704_v25 = vpack.c.bf16 %v6679_v5, %v6678_v52 }
0x135b   : > { %8494 = vmatprep.mubr.bf16.mxu1 %v6704_v25 }
0x135c   : > { %8495 = vmatmul.mubr.bf16.gmra.mrb[156].mxu1 %v6705_v14 }
0x1373   : > { %v8452_v10 = vpop.f32.mrb[192].mxu0 }
0x1374   : > { %v13509_v32 = vadd.f32 %v8452_v10, %v13426_v50  ;;  %v6379_v28 = vpop.f32.mrb[193].mxu0 }
0x1375   : > { %v13512_v15 = vadd.f32 %v13426_v50, %v6379_v28  ;;  %v8453_v38 = vpop.f32.mrb[194].mxu0 }
0x1376   : > { %v7474_v45 = vmul.f32 -1.702, %v13509_v32  ;;  %v13516_v44 = vadd.f32 %v8453_v38, %v13426_v50  ;;  %v6382_v55 = vpop.f32.mrb[195].mxu0 }
0x1377   : > { %v7472_v12 = vmul.f32 -1.702, %v13512_v15  ;;  %v13520_v18 = vadd.f32 %v13426_v50, %v6382_v55 }
0x1378   : > { %v6542_v58 = vmul.f32 1.442695, %v7474_v45  ;;  %v7475_v8 = vmul.f32 -1.702, %v13516_v44 }
0x1379   : > { %v6538_v42 = vmul.f32 1.442695, %v7472_v12  ;;  %v7473_v16 = vmul.f32 -1.702, %v13520_v18 }
0x137a   : > { %9354 = vpow2.f32 %v6542_v58  ;;  %v6544_v2 = vmul.f32 1.442695, %v7475_v8 }
0x137b   : > { %9356 = vpow2.f32 %v6538_v42  ;;  %v6540_v59 = vmul.f32 1.442695, %v7473_v16  ;;  %v8456_v35 = vpop.f32.mrb[196].mxu0 }
0x137c   : > { %9358 = vpow2.f32 %v6544_v2  ;;  %v13525_v22 = vadd.f32 %v8456_v35, %v13426_v50  ;;  %v6395_v60 = vpop.f32.mrb[197].mxu0 }
0x137d   : > { %9360 = vpow2.f32 %v6540_v59  ;;  %v13528_v29 = vadd.f32 %v13426_v50, %v6395_v60  ;;  %v8457_v33 = vpop.f32.mrb[198].mxu0 }
0x137e   : > { %v7478_v30 = vmul.f32 -1.702, %v13525_v22  ;;  %v13532_v21 = vadd.f32 %v8457_v33, %v13426_v50  ;;  %v6398_v57 = vpop.f32.mrb[199].mxu0 }
0x137f   : > { %v7476_v7 = vmul.f32 -1.702, %v13528_v29  ;;  %v13536_v53 = vadd.f32 %v13426_v50, %v6398_v57 }
0x1380   : > { %v6550_v62 = vmul.f32 1.442695, %v7478_v30  ;;  %v7479_v47 = vmul.f32 -1.702, %v13532_v21 }
0x1381   : > { %v6546_v63 = vmul.f32 1.442695, %v7476_v7  ;;  %v7477_v0 = vmul.f32 -1.702, %v13536_v53 }
0x1382   : > { %9362 = vpow2.f32 %v6550_v62  ;;  %v6552_v40 = vmul.f32 1.442695, %v7479_v47 }
0x1383   : > { %9364 = vpow2.f32 %v6546_v63  ;;  %v6548_v36 = vmul.f32 1.442695, %v7477_v0  ;;  %v8460_v43 = vpop.f32.mrb[200].mxu0 }
0x1384   : > { %v9355_v31 = vpop.eup %9354  ;;  %9366 = vpow2.f32 %v6552_v40  ;;  %v13541_v17 = vadd.f32 %v8460_v43, %v13426_v50  ;;  %v6411_v27 = vpop.f32.mrb[201].mxu0 }
0x1385   : > { %v9357_v37 = vpop.eup %9356  ;;  %v6588_v24 = vadd.f32 1.0, %v9355_v31  ;;  %9368 = vpow2.f32 %v6548_v36  ;;  %v13544_v1 = vadd.f32 %v13426_v50, %v6411_v27  ;;  %v8461_v41 = vpop.f32.mrb[202].mxu0 }
0x1386   : > { %v9359_v3 = vpop.eup %9358  ;;  %v6586_v26 = vadd.f32 1.0, %v9357_v37  ;;  %v7482_v51 = vmul.f32 -1.702, %v13541_v17  ;;  %v13548_v49 = vadd.f32 %v8461_v41, %v13426_v50  ;;  %v6414_v19 = vpop.f32.mrb[203].mxu0 }
0x1387   : > { %v9361_v34 = vpop.eup %9360  ;;  %9370 = vrcp.f32 %v6588_v24  ;;  %v6589_v52 = vadd.f32 1.0, %v9359_v3  ;;  %v7480_v5 = vmul.f32 -1.702, %v13544_v1  ;;  %v13552_v14 = vadd.f32 %v13426_v50, %v6414_v19 }
0x1388   : > { %9372 = vrcp.f32 %v6586_v26  ;;  %v6587_v25 = vadd.f32 1.0, %v9361_v34  ;;  %v6558_v10 = vmul.f32 1.442695, %v7482_v51  ;;  %v7483_v28 = vmul.f32 -1.702, %v13548_v49 }
0x1389   : > { %9374 = vrcp.f32 %v6589_v52  ;;  %v6554_v38 = vmul.f32 1.442695, %v7480_v5  ;;  %v7481_v45 = vmul.f32 -1.702, %v13552_v14 }
0x138a   : > { %9376 = vrcp.f32 %v6587_v25  ;;  %v6560_v55 = vmul.f32 1.442695, %v7483_v28 }
0x138b   : > { %9378 = vpow2.f32 %v6558_v10  ;;  %v6556_v12 = vmul.f32 1.442695, %v7481_v45 }
0x138c   : > { %v9363_v58 = vpop.eup %9362  ;;  %9380 = vpow2.f32 %v6554_v38 }
0x138d   : > { %v9365_v8 = vpop.eup %9364  ;;  %v6592_v42 = vadd.f32 1.0, %v9363_v58  ;;  %9382 = vpow2.f32 %v6560_v55 }
0x138e   : > { %v9367_v16 = vpop.eup %9366  ;;  %v6590_v2 = vadd.f32 1.0, %v9365_v8  ;;  %9384 = vpow2.f32 %v6556_v12 }
0x138f   : > { %v9369_v59 = vpop.eup %9368  ;;  %9386 = vrcp.f32 %v6592_v42  ;;  %v6593_v35 = vadd.f32 1.0, %v9367_v16 }
0x1390   : > { %9388 = vrcp.f32 %v6590_v2  ;;  %v6591_v60 = vadd.f32 1.0, %v9369_v59 }
0x1391   : > { %v9371_v33 = vpop.eup %9370  ;;  %9390 = vrcp.f32 %v6593_v35 }
0x1392   : > { %v9373_v30 = vpop.eup %9372  ;;  %9392 = vrcp.f32 %v6591_v60  ;;  %v6684_v62 = vmul.f32 %v9371_v33, %v13509_v32 }
0x1393   : > { %v9375_v57 = vpop.eup %9374  ;;  %v6682_v0 = vmul.f32 %v9373_v30, %v13512_v15 }
0x1394   : > { %v9377_v7 = vpop.eup %9376  ;;  %v6685_v47 = vmul.f32 %v9375_v57, %v13516_v44 }
0x1395   : > { %v9379_v63 = vpop.eup %9378  ;;  %v6683_v40 = vmul.f32 %v9377_v7, %v13520_v18 }
0x1396   : > { %v9381_v36 = vpop.eup %9380  ;;  %v6596_v43 = vadd.f32 1.0, %v9379_v63  ;;  %v6707_v31 = vpack.c.bf16 %v6685_v47, %v6684_v62 }
0x1397   : > { %v9383_v27 = vpop.eup %9382  ;;  %v6594_v37 = vadd.f32 1.0, %v9381_v36  ;;  %v6706_v24 = vpack.c.bf16 %v6683_v40, %v6682_v0 }
0x1398   : > { %v9385_v41 = vpop.eup %9384  ;;  %9394 = vrcp.f32 %v6596_v43  ;;  %v6597_v3 = vadd.f32 1.0, %v9383_v27 }
0x1399   : > { %v9387_v26 = vpop.eup %9386  ;;  %9396 = vrcp.f32 %v6594_v37  ;;  %v6595_v51 = vadd.f32 1.0, %v9385_v41  ;;  %8498 = vmatprep.mubr.bf16.mxu1 %v6706_v24 }
0x139a   : > { %v9389_v32 = vpop.eup %9388  ;;  %9398 = vrcp.f32 %v6597_v3  ;;  %8499 = vmatmul.mubr.bf16.gmra.mrb[160].mxu1 %v6707_v31  ;;  %v6688_v18 = vmul.f32 %v9387_v26, %v13525_v22 }
0x139b   : > { %v9391_v44 = vpop.eup %9390  ;;  %9400 = vrcp.f32 %v6595_v51  ;;  %v6686_v34 = vmul.f32 %v9389_v32, %v13528_v29 }
0x139c   : > { %v9393_v15 = vpop.eup %9392  ;;  %v6689_v19 = vmul.f32 %v9391_v44, %v13532_v21 }
0x139d   : > { %v6687_v52 = vmul.f32 %v9393_v15, %v13536_v53  ;;  %v6732_v15 = vsub.s32 5, %v14272_v20 }
0x139e   : > { %v6709_v5 = vpack.c.bf16 %v6689_v19, %v6688_v18  ;;  %v9451_v18 = vld [vmem:[%s9625_s13] sm:$0x3f] }
0x139f   : > { %v6708_v25 = vpack.c.bf16 %v6687_v52, %v6686_v34  ;;  %v13574_v19 = vrot.slane %v9451_v18, %v6732_v15  ;;  %v14298_v15 = vld [vmem:[#allocation12_spill] sm:$0xff] }
0x13a1   : > { %8502 = vmatprep.mubr.bf16.mxu1 %v6708_v25 }
0x13a2   : > { %v9395_v10 = vpop.eup %9394  ;;  %8503 = vmatmul.mubr.bf16.gmra.mrb[164].mxu1 %v6709_v5 }
0x13a3   : > { %v9397_v28 = vpop.eup %9396  ;;  %v6692_v55 = vmul.f32 %v9395_v10, %v13541_v17 }
0x13a4   : > { %v9399_v38 = vpop.eup %9398  ;;  %v6690_v22 = vmul.f32 %v9397_v28, %v13544_v1 }
0x13a5   : > { %v9401_v45 = vpop.eup %9400  ;;  %v6693_v12 = vmul.f32 %v9399_v38, %v13548_v49 }
0x13a6   : > { %v6691_v21 = vmul.f32 %v9401_v45, %v13552_v14 }
0x13a7   : > { %v6711_v58 = vpack.c.bf16 %v6693_v12, %v6692_v55 }
0x13a8   : > { %v6710_v29 = vpack.c.bf16 %v6691_v21, %v6690_v22 }
0x13a9   : > { %v8464_v8 = vpop.f32.mrb[204].mxu0 }
0x13aa   : > { %v6436_v53 = vadd.f32 %v8464_v8, %v13426_v50  ;;  %8506 = vmatprep.mubr.bf16.mxu1 %v6710_v29  ;;  %v6427_v42 = vpop.f32.mrb[205].mxu0 }
0x13ab   : > { %v6428_v16 = vadd.f32 %v13426_v50, %v6427_v42  ;;  %8507 = vmatmul.mubr.bf16.gmra.mrb[168].mxu1 %v6711_v58  ;;  %v8465_v2 = vpop.f32.mrb[206].mxu0 }
0x13ac   : > { %v7486_v59 = vmul.f32 -1.702, %v6436_v53  ;;  %v6439_v17 = vadd.f32 %v8465_v2, %v13426_v50  ;;  %v6430_v35 = vpop.f32.mrb[207].mxu0 }
0x13ad   : > { %v7484_v49 = vmul.f32 -1.702, %v6428_v16  ;;  %v6431_v1 = vadd.f32 %v13426_v50, %v6430_v35 }
0x13ae   : > { %v6566_v60 = vmul.f32 1.442695, %v7486_v59  ;;  %v7487_v14 = vmul.f32 -1.702, %v6439_v17 }
0x13af   : > { %v6562_v33 = vmul.f32 1.442695, %v7484_v49  ;;  %v7485_v30 = vmul.f32 -1.702, %v6431_v1 }
0x13b0   : > { %9402 = vpow2.f32 %v6566_v60  ;;  %v6568_v57 = vmul.f32 1.442695, %v7487_v14 }
0x13b1   : > { %9404 = vpow2.f32 %v6562_v33  ;;  %v6564_v7 = vmul.f32 1.442695, %v7485_v30 }
0x13b2   : > { %9406 = vpow2.f32 %v6568_v57 }
0x13b3   : > { %9408 = vpow2.f32 %v6564_v7 }
0x13ba   : > { %v9403_v62 = vpop.eup %9402 }
0x13bb   : > { %v9405_v47 = vpop.eup %9404  ;;  %v6600_v63 = vadd.f32 1.0, %v9403_v62  ;;  %v14293_v62 = vld [vmem:[#allocation37_spill] sm:$0xff] }
0x13bc   : > { %v9407_v0 = vpop.eup %9406  ;;  %v6598_v40 = vadd.f32 1.0, %v9405_v47 }
0x13bd   : > { %v9409_v36 = vpop.eup %9408  ;;  %9410 = vrcp.f32 %v6600_v63  ;;  %v6601_v43 = vadd.f32 1.0, %v9407_v0  ;;  %v14294_v0 = vld [vmem:[#allocation38_spill] sm:$0xff] }
0x13be   : > { %9412 = vrcp.f32 %v6598_v40  ;;  %v6599_v50 = vadd.f32 1.0, %v9409_v36  ;;  %v14295_v36 = vld [vmem:[#allocation13_spill] sm:$0xff] }
0x13bf   : > { %9414 = vrcp.f32 %v6601_v43 }
0x13c0   : > { %9416 = vrcp.f32 %v6599_v50  ;;  %v14296_v50 = vld [vmem:[#allocation36_spill] sm:$0xff] }
0x13c7   : > { %v9411_v31 = vpop.eup %9410 }
0x13c8   : > { %v9413_v27 = vpop.eup %9412  ;;  %v6696_v41 = vmul.f32 %v9411_v31, %v6436_v53 }
0x13c9   : > { %v9415_v37 = vpop.eup %9414  ;;  %v6694_v26 = vmul.f32 %v9413_v27, %v6428_v16 }
0x13ca   : > { %v9417_v24 = vpop.eup %9416  ;;  %v6697_v3 = vmul.f32 %v9415_v37, %v6439_v17 }
0x13cb   : > { %v6695_v51 = vmul.f32 %v9417_v24, %v6431_v1 }
0x13cc   : > { %v6713_v32 = vpack.c.bf16 %v6697_v3, %v6696_v41 }
0x13cd   : > { %v6712_v44 = vpack.c.bf16 %v6695_v51, %v6694_v26  ;;  %v14297_v26 = vld [vmem:[#allocation41_spill] sm:$0xff] }
0x13cf   : > { %8510 = vmatprep.mubr.bf16.mxu1 %v6712_v44 }
0x13d0   : > { %8511 = vmatmul.mubr.bf16.gmra.mrb[172].mxu1 %v6713_v32 }
0x1416   : > { %v8484_v34 = vpop.f32.mrb[144].mxu1 }
0x1417   : > { %v6825_v52 = vadd.f32 %v8484_v34, %v13574_v19  ;;  %v6816_v5 = vpop.f32.mrb[145].mxu1 }
0x1418   : > { %v6817_v25 = vadd.f32 %v6816_v5, %v13574_v19  ;;  %v8485_v10 = vpop.f32.mrb[146].mxu1 }
0x1419   : > { %v6945_v28 = vadd.f32 %v6825_v52, %v12922_v46  ;;  %v6828_v38 = vadd.f32 %v8485_v10, %v13574_v19  ;;  %v6819_v45 = vpop.f32.mrb[147].mxu1  ;;  %v14299_v52 = vld [vmem:[#allocation43_spill] sm:$0xff] }
0x141a   : > { %v13581_v55 = vadd.f32 %v6817_v25, %v12927_v39  ;;  %v6820_v20 = vadd.f32 %v6819_v45, %v13574_v19  ;;  %v14300_v25 = vld [vmem:[#allocation40_spill] sm:$0xff] }
0x141b   : > { %6977 = vst.msk [vmem:[#allocation2 + $0x10] sm:$0xff] %vm670_vm1, %v6945_v28  ;;  %v6946_v12 = vadd.f32 %v6828_v38, %v12935_v13 }
0x141c   : > { %6975 = vst.msk [vmem:[#allocation2] sm:$0xff] %vm670_vm1, %v13581_v55  ;;  %v6944_v22 = vadd.f32 %v6820_v20, %v12919_v23 }
0x141d   : > { %6978 = vst.msk [vmem:[#allocation2 + $0x18] sm:$0xff] %vm670_vm1, %v6946_v12 }
0x141e   : > { %6976 = vst.msk [vmem:[#allocation2 + $0x8] sm:$0xff] %vm670_vm1, %v6944_v22  ;;  %v8488_v46 = vpop.f32.mrb[148].mxu1  ;;  %v14301_v22 = vld [vmem:[#allocation44_spill] sm:$0xff] }
0x141f   : > { %v6841_v21 = vadd.f32 %v8488_v46, %v13574_v19  ;;  %v6832_v39 = vpop.f32.mrb[149].mxu1 }
0x1420   : > { %v6833_v58 = vadd.f32 %v6832_v39, %v13574_v19  ;;  %v8489_v29 = vpop.f32.mrb[150].mxu1 }
0x1421   : > { %v6949_v8 = vadd.f32 %v6841_v21, %v12940_v48  ;;  %v6844_v13 = vadd.f32 %v8489_v29, %v13574_v19  ;;  %v6835_v53 = vpop.f32.mrb[151].mxu1 }
0x1422   : > { %v6947_v42 = vadd.f32 %v6833_v58, %v12931_v54  ;;  %v6836_v23 = vadd.f32 %v6835_v53, %v13574_v19  ;;  %v14302_v58 = vld [vmem:[#allocation42_spill] sm:$0xff] }
0x1423   : > { %6981 = vst.msk [vmem:[#allocation2 + $0x30] sm:$0xff] %vm670_vm1, %v6949_v8  ;;  %v6950_v16 = vadd.f32 %v6844_v13, %v12955_v6  ;;  %v14303_v13 = vld [vmem:[#allocation56_spill] sm:$0xff] }
0x1424   : > { %6979 = vst.msk [vmem:[#allocation2 + $0x20] sm:$0xff] %vm670_vm1, %v6947_v42  ;;  %v6948_v2 = vadd.f32 %v6836_v23, %v12946_v9  ;;  %v14304_v42 = vld [vmem:[#allocation55_spill] sm:$0xff] }
0x1425   : > { %6982 = vst.msk [vmem:[#allocation2 + $0x38] sm:$0xff] %vm670_vm1, %v6950_v16 }
0x1426   : > { %6980 = vst.msk [vmem:[#allocation2 + $0x28] sm:$0xff] %vm670_vm1, %v6948_v2 }
0x1427   : > { %v8492_v48 = vpop.f32.mrb[152].mxu1 }
0x1428   : > { %v6857_v59 = vadd.f32 %v8492_v48, %v13574_v19  ;;  %v6848_v17 = vpop.f32.mrb[153].mxu1 }
0x1429   : > { %v6849_v54 = vadd.f32 %v6848_v17, %v13574_v19  ;;  %v8493_v35 = vpop.f32.mrb[154].mxu1 }
0x142a   : > { %v6953_v49 = vadd.f32 %v6857_v59, %v12960_v11  ;;  %v6860_v1 = vadd.f32 %v8493_v35, %v13574_v19  ;;  %v6851_v6 = vpop.f32.mrb[155].mxu1 }
0x142b   : > { %v6951_v60 = vadd.f32 %v6849_v54, %v12951_v4  ;;  %v6852_v9 = vadd.f32 %v6851_v6, %v13574_v19  ;;  %v14305_v54 = vld [vmem:[#allocation57_spill] sm:$0xff]  ;;  %v14306_v6 = vld [vmem:[#allocation50_spill] sm:$0xff] }
0x142c   : > { %6985 = vst.msk [vmem:[#allocation2 + $0x50] sm:$0xff] %vm670_vm1, %v6953_v49  ;;  %v6954_v14 = vadd.f32 %v6860_v1, %v12971_v61 }
0x142d   : > { %6983 = vst.msk [vmem:[#allocation2 + $0x40] sm:$0xff] %vm670_vm1, %v6951_v60  ;;  %v6952_v33 = vadd.f32 %v6852_v9, %v12965_v56 }
0x142e   : > { %6986 = vst.msk [vmem:[#allocation2 + $0x58] sm:$0xff] %vm670_vm1, %v6954_v14  ;;  %v14307_v14 = vld [vmem:[#allocation20_spill] sm:$0xff] }
0x142f   : > { %6984 = vst.msk [vmem:[#allocation2 + $0x48] sm:$0xff] %vm670_vm1, %v6952_v33  ;;  %v8496_v11 = vpop.f32.mrb[156].mxu1 }
0x1430   : > { %v6873_v30 = vadd.f32 %v8496_v11, %v13574_v19  ;;  %v6864_v57 = vpop.f32.mrb[157].mxu1  ;;  %v14308_v11 = vld [vmem:[#allocation51_spill] sm:$0xff] }
0x1431   : > { %v6865_v4 = vadd.f32 %v6864_v57, %v13574_v19  ;;  %v8497_v7 = vpop.f32.mrb[158].mxu1 }
0x1432   : > { %v6957_v47 = vadd.f32 %v6873_v30, %v14293_v62  ;;  %v6876_v63 = vadd.f32 %v8497_v7, %v13574_v19  ;;  %v6867_v61 = vpop.f32.mrb[159].mxu1 }
0x1433   : > { %v6955_v40 = vadd.f32 %v6865_v4, %v14294_v0  ;;  %v6868_v56 = vadd.f32 %v6867_v61, %v13574_v19 }
0x1434   : > { %6989 = vst.msk [vmem:[#allocation2 + $0x70] sm:$0xff] %vm670_vm1, %v6957_v47  ;;  %v6958_v43 = vadd.f32 %v6876_v63, %v14295_v36  ;;  %v14309_v63 = vld [vmem:[#allocation59_spill] sm:$0xff] }
0x1435   : > { %6987 = vst.msk [vmem:[#allocation2 + $0x60] sm:$0xff] %vm670_vm1, %v6955_v40  ;;  %v6956_v31 = vadd.f32 %v6868_v56, %v14296_v50  ;;  %v14310_v56 = vld [vmem:[#allocation18_spill] sm:$0xff] }
0x1436   : > { %6990 = vst.msk [vmem:[#allocation2 + $0x78] sm:$0xff] %vm670_vm1, %v6958_v43  ;;  %v14311_v50 = vld [vmem:[#allocation54_spill] sm:$0xff] }
0x1437   : > { %6988 = vst.msk [vmem:[#allocation2 + $0x68] sm:$0xff] %vm670_vm1, %v6956_v31 }
0x146d   : > { %v8500_v27 = vpop.f32.mrb[160].mxu1 }
0x146e   : > { %v6889_v37 = vadd.f32 %v8500_v27, %v13574_v19  ;;  %v6880_v24 = vpop.f32.mrb[161].mxu1  ;;  %v14312_v27 = vld [vmem:[#allocation16_spill] sm:$0xff] }
0x146f   : > { %v6881_v41 = vadd.f32 %v6880_v24, %v13574_v19  ;;  %v8501_v3 = vpop.f32.mrb[162].mxu1 }
0x1470   : > { %v6961_v51 = vadd.f32 %v6889_v37, %v14297_v26  ;;  %v6892_v32 = vadd.f32 %v8501_v3, %v13574_v19  ;;  %v6883_v44 = vpop.f32.mrb[163].mxu1 }
0x1471   : > { %v13632_v18 = vadd.f32 %v6881_v41, %v14298_v15  ;;  %v6884_v34 = vadd.f32 %v6883_v44, %v13574_v19 }
0x1472   : > { %6993 = vst.msk [vmem:[#allocation2 + $0x90] sm:$0xff] %vm670_vm1, %v6961_v51  ;;  %v6962_v5 = vadd.f32 %v6892_v32, %v14299_v52 }
0x1473   : > { %6991 = vst.msk [vmem:[#allocation2 + $0x80] sm:$0xff] %vm670_vm1, %v13632_v18  ;;  %v6960_v10 = vadd.f32 %v6884_v34, %v14300_v25  ;;  %v7014_v24 = vrot.slane (!%p7496_p6), %v13632_v18, 7 }
0x1474   : > { %6994 = vst.msk [vmem:[#allocation2 + $0x98] sm:$0xff] %vm670_vm1, %v6962_v5 }
0x1475   : > { %6992 = vst.msk [vmem:[#allocation2 + $0x88] sm:$0xff] %vm670_vm1, %v6960_v10  ;;  %v8504_v28 = vpop.f32.mrb[164].mxu1  ;;  %v9452_v10 = vld [vmem:[%s13753_s10] sm:$0xff] (!%p7496_p6)  }
0x1476   : > { %v6905_v38 = vadd.f32 %v8504_v28, %v13574_v19  ;;  %v6896_v45 = vpop.f32.mrb[165].mxu1  ;;  %v9525_v28 = vmov (!%p7496_p6), 0.0  }
0x1477   : > { %v6897_v20 = vadd.f32 %v6896_v45, %v13574_v19  ;;  %v8505_v12 = vpop.f32.mrb[166].mxu1  ;;  %8514 = vmatprep.subr.bf16.mxu0 (!%p7496_p6), %v9525_v28  ;;  %8518 = vmatprep.mubr.msk.bf16.mxu0 (!%p7496_p6), %vm9526_vm9, %v9525_v28 }
0x1478   : > { %v6965_v46 = vadd.f32 %v6905_v38, %v14301_v22  ;;  %v6908_v21 = vadd.f32 %v8505_v12, %v13574_v19  ;;  %v6899_v39 = vpop.f32.mrb[167].mxu1  ;;  %8515 = vmatpush3.bf16.msra.mxu0 (!%p7496_p6), %v9452_v10  ;;  %v14313_v12 = vld [vmem:[#allocation9_spill] sm:$0xff] (!%p7496_p6) }
0x1479   : > { %v6963_v29 = vadd.f32 %v6897_v20, %v14302_v58  ;;  %v6900_v8 = vadd.f32 %v6899_v39, %v13574_v19  ;;  %8516 = vmatprep.subr.bf16.mxu0 (!%p7496_p6), %v9525_v28  ;;  %v7011_v20 = vld [vmem:[%s13752_s9] sm:$0x3] (!%p7496_p6)  ;;  %v14314_v22 = vsub.s32 (!%p7496_p6), 0, %v14313_v12 }
0x147a   : > { %6997 = vst.msk [vmem:[#allocation2 + $0xb0] sm:$0xff] %vm670_vm1, %v6965_v46  ;;  %v6966_v53 = vadd.f32 %v6908_v21, %v14303_v13 }
0x147b   : > { %6995 = vst.msk [vmem:[#allocation2 + $0xa0] sm:$0xff] %vm670_vm1, %v6963_v29  ;;  %v6964_v23 = vadd.f32 %v6900_v8, %v14304_v42  ;;  %v7051_v46 = vrot.slane (!%p7496_p6), %v7011_v20, %v14314_v22  ;;  %v14315_v29 = vsub.s32 (!%p7496_p6), 1, %v14313_v12 }
0x147c   : > { %6998 = vst.msk [vmem:[#allocation2 + $0xb8] sm:$0xff] %vm670_vm1, %v6966_v53 }
0x147d   : > { %6996 = vst.msk [vmem:[#allocation2 + $0xa8] sm:$0xff] %vm670_vm1, %v6964_v23  ;;  %v7057_v8 = vrot.slane (!%p7496_p6), %v7011_v20, %v14315_v29 }
0x147e   : > { %v8508_v16 = vpop.f32.mrb[168].mxu1 }
0x147f   : > { %v6921_v2 = vadd.f32 %v8508_v16, %v13574_v19  ;;  %v6912_v48 = vpop.f32.mrb[169].mxu1 }
0x1480   : > { %v6913_v59 = vadd.f32 %v6912_v48, %v13574_v19  ;;  %v8509_v17 = vpop.f32.mrb[170].mxu1 }
0x1481   : > { %v6969_v35 = vadd.f32 %v6921_v2, %v14305_v54  ;;  %v6924_v49 = vadd.f32 %v8509_v17, %v13574_v19  ;;  %v6915_v1 = vpop.f32.mrb[171].mxu1 }
0x1482   : > { %v6967_v60 = vadd.f32 %v6913_v59, %v14306_v6  ;;  %v6916_v9 = vadd.f32 %v6915_v1, %v13574_v19  ;;  %v9527_v1 = vmov (!%p7496_p6), 1966171168  }
0x1483   : > { %7001 = vst.msk [vmem:[#allocation2 + $0xd0] sm:$0xff] %vm670_vm1, %v6969_v35  ;;  %v6970_v33 = vadd.f32 %v6924_v49, %v14307_v14  ;;  %v7137_v6 = vunpack.c.l.s4 (!%p7496_p6), %v9527_v1 }
0x1484   : > { %6999 = vst.msk [vmem:[#allocation2 + $0xc0] sm:$0xff] %vm670_vm1, %v6967_v60  ;;  %v6968_v30 = vadd.f32 %v6916_v9, %v14308_v11  ;;  %v7497_v9 = vld [vmem:[%s13754_s11] ss:$0 sm:$0xff] (!%p7496_p6) }
0x1485   : > { %7002 = vst.msk [vmem:[#allocation2 + $0xd8] sm:$0xff] %vm670_vm1, %v6970_v33  ;;  %v7138_v60 = vunpack.c.0.s8 (!%p7496_p6), %v7137_v6 }
0x1486   : > { %7000 = vst.msk [vmem:[#allocation2 + $0xc8] sm:$0xff] %vm670_vm1, %v6968_v30 }
0x1487   : > { %v7141_v14 = vsub.s32 (!%p7496_p6), %v7138_v60, %v14313_v12 }
0x14a3   : > { %v8512_v57 = vpop.f32.mrb[172].mxu1 }
0x14a4   : > { %v6937_v4 = vadd.f32 %v8512_v57, %v13574_v19  ;;  %v6928_v7 = vpop.f32.mrb[173].mxu1 }
0x14a5   : > { %v6929_v62 = vadd.f32 %v6928_v7, %v13574_v19  ;;  %v8513_v47 = vpop.f32.mrb[174].mxu1  ;;  %7010 = sbr.rel (%p7496_p6) target bundleno = 5838 (0x16ce), region = 76 }
0x14a6   : > { %v6973_v61 = vadd.f32 %v6937_v4, %v14309_v63  ;;  %v6940_v0 = vadd.f32 %v8513_v47, %v13574_v19  ;;  %v6931_v40 = vpop.f32.mrb[175].mxu1 }
0x14a7   : > { %v6971_v36 = vadd.f32 %v6929_v62, %v14310_v56  ;;  %v6932_v43 = vadd.f32 %v6931_v40, %v13574_v19  ;;  %v7016_v19 = vsel (!%p7496_p6), %vm7015_vm7, %v7014_v24, %v13581_v55 }
0x14a8   : > { %7005 = vst.msk [vmem:[#allocation2 + $0xf0] sm:$0xff] %vm670_vm1, %v6973_v61  ;;  %v6974_v31 = vadd.f32 %v6940_v0, %v14311_v50  ;;  %v7019_v41 = vsel (!%p7496_p6), %vm7018_vm8, %v7016_v19, 0.0 }
0x14a9   : > { %7003 = vst.msk [vmem:[#allocation2 + $0xe0] sm:$0xff] %vm670_vm1, %v6971_v36  ;;  %v6972_v37 = vadd.f32 %v6932_v43, %v14312_v27  ;;  %7020 = vadd.xlane.f32.xlu0 (!%p7496_p6), %v7019_v41 }
0x14aa   : > { %7006 = vst.msk [vmem:[#allocation2 + $0xf8] sm:$0xff] %vm670_vm1, %v6974_v31 }
0x14ab   : > { %7004 = vst.msk [vmem:[#allocation2 + $0xe8] sm:$0xff] %vm670_vm1, %v6972_v37 }
0x1536   : > { %v7021_v3 = vpop.xlane.xlu0 %7020 }
0x1537   : > { %v7022_v26 = vmul.f32 0.03125, %v7021_v3 }
0x1539   : > { %v7024_v51 = vrot.slane %v7022_v26, 1  ;;  %v7027_v32 = vsub.f32 %v13581_v55, %v7022_v26  ;;  %v9453_v55 = vld [vmem:[%s13753_s10 + $0x8] sm:$0xff]  }
0x153a   : > { %8517 = vmatpush3.bf16.msra.mxu0 %v9453_v55 }
0x153b   : > { %v7028_v44 = vsub.f32 %v13632_v18, %v7024_v51  ;;  %v7029_v34 = vmul.f32 %v7027_v32, %v7027_v32 }
0x153d   : > { %v7030_v15 = vmul.f32 %v7028_v44, %v7028_v44 }
0x153f   : > { %v7033_v52 = vrot.slane %v7030_v15, 7 }
0x1541   : > { %v7034_v5 = vsel %vm7015_vm7, %v7033_v52, %v7029_v34 }
0x1542   : > { %v7036_v25 = vsel %vm7018_vm8, %v7034_v5, 0.0 }
0x1543   : > { %7037 = vadd.xlane.f32.xlu0 %v7036_v25 }
0x15d0   : > { %v7038_v18 = vpop.xlane.xlu0 %7037 }
0x15d1   : > { %v7039_v38 = vmul.f32 0.03125, %v7038_v18 }
0x15d3   : > { %v7040_v45 = vadd.f32 1e-05, %v7039_v38 }
0x15d5   : > { %9454 = vrsqrt.f32 %v7040_v45 }
0x15df   : > { %v9455_v21 = vpop.eup %9454 }
0x15e0   : > { %v7043_v39 = vrot.slane %v9455_v21, 1  ;;  %v7046_v58 = vmul.f32 %v9455_v21, %v7027_v32 }
0x15e2   : > { %v7047_v13 = vmul.f32 %v7043_v39, %v7028_v44  ;;  %v7052_v53 = vmul.f32 %v7051_v46, %v7046_v58 }
0x15e4   : > { %v7053_v42 = vmul.f32 %v7051_v46, %v7047_v13  ;;  %v7058_v23 = vadd.f32 %v7057_v8, %v7052_v53 }
0x15e6   : > { %v7059_v16 = vadd.f32 %v7057_v8, %v7053_v42  ;;  %v7060_v2 = vpack.c.bf16 %v7058_v23, %v7058_v23 }
0x15e8   : > { %v7061_v48 = vpack.c.bf16 %v7059_v16, %v7059_v16  ;;  %v7075_v17 = vunpack.c.l.b16 %v7060_v2 }
0x15ea   : > { %v7076_v59 = vunpack.c.l.b16 %v7061_v48 }
0x15ec   : > { %v7077_v54 = vrot.slane %v7076_v59, 7 }
0x15ee   : > { %v7078_v35 = vsel %vm7015_vm7, %v7077_v54, %v7075_v17 }
0x15ef   : > { %v7079_v49 = vpack.c.b16 %v7078_v35, %v7078_v35 }
0x15f1   : > { %8519 = vmatmul.mubr.msk.bf16.vlgmr.msra.gmra.mrb[0].mxu0 %vm670_vm1, %v7079_v49 }
0x16c4   : > { %v7129_v33 = vpop.f32.mrb[0].mxu0 }
0x16c5   : > { %v7130_v11 = vadd.f32 %v7497_v9, %v7129_v33  ;;  %v8520_v30 = vpop.f32.mrb[1].mxu0 }
0x16c6   : > { %v7132_v57 = vpop.f32.mrb[2].mxu0 }
0x16c7   : > { %v7142_v4 = vrot.slane %v7130_v11, %v7141_v14  ;;  %v8521_v7 = vpop.f32.mrb[3].mxu0 }
0x16c9   : > { %v7143_v62 = vcombine.high %v7142_v4, %v7142_v4  ;;  %v7150_v47 = vrot.slane %v7142_v4, %v7141_v14 }
0x16cb   : > { %v7157_v63 = vrot.slane %v7143_v62, %v7141_v14  ;;  %7161 = vst.msk [vmem:[#allocation4] sm:$0x1] %vm7160_vm10, %v7150_v47 }
0x16cd   : > { %7162 = vst.msk [vmem:[#allocation4 + $0x1] sm:$0x1] %vm7160_vm10, %v7157_v63 }
0x16ce PF: > { %s14316_s2 = sadd.s32 4294967295, %s9508_s23   ;;  %s9528_s27 = smov [#allocation4]  }
0x16cf   : > { %p13706_p7 = scmp.eq.s32.totalorder %s14316_s2, 1  ;;  %s7172_s16 = sshll.u32 %s9528_s27, 4  ;;  %s7173_s16 = int_to_ptr.vmem [resolvable:$true] %s7172_s16 }
0x16d0   : > { %s9456_s30 = scalar_lea.vmem %s7173_s16, 32  ;;  %p9463_p11 = scmp.lt.s32.totalorder %s7173_s16, %s7173_s16 }
0x16d1   : > { %p9457_p8 = scmp.ne.s32.totalorder %s7173_s16, %s9456_s30  ;;  %p9464_p12 = scmp.lt.s32.totalorder %s9456_s30, %s9456_s30 }
0x16d3   : > { %p9458_p9 = pnand %p9457_p8, %p13706_p7  ;;  %p9465_p13 = por %p9464_p12, %p9463_p11 }
0x16d5   : > { %p9459_p10 = pneg %p9458_p9 }
0x16d7   : > { %p9466_p0 = pnand %p9465_p13, %p9459_p10 }
0x16d9   : > { %9469 = shalt.err (!%p9466_p0)
}
0x16da   : > { %s14318_s24 = sld [smem:[#allocation86_spill]] }
0x16e0   : > { %s9470_s12 = scalar_lea.hbm %s14318_s24, 32 }
0x16e1   : > { %p9471_p1 = scmp.ne.s32.totalorder %s14318_s24, %s9470_s12  ;;  %p9476_p4 = scmp.lt.u32.totalorder %s9470_s12, %s14318_s24 }
0x16e3   : > { %p9472_p2 = pnand %p9471_p1, %p13706_p7 }
0x16e5   : > { %p9473_p3 = pneg %p9472_p2 }
0x16e7   : > { %p9478_p5 = pnand %p9476_p4, %p9473_p3 }
0x16e9   : > { %9481 = shalt.err (!%p9478_p5)
}
0x16ea   : > { %s9529_s13 = smov 1  }
0x16eb   : > { %8587 = dma.vmem_to_hbm [thread:$0]  (%p13706_p7), %s7173_s16, 32, %s14318_s24, [#allocation5], %s9523_s18, %s9523_s18, %s9529_s13  }
0x16ec   : > { %9495 = dma.done.wait (%p13706_p7), [#allocation5], 32  }
0x16ed   : > { %9497 = vsyncadd (%p13706_p7), [#allocation5], 4294967264 }
0x16ee PF: > { %s23_s23 = sadd.s32 1, %s9508_s23   ;;  %s14319_s21 = sld [smem:[#allocation7_spill]] }
0x16ef   : > { %p20_p6 = scmp.ge.s32.totalorder %s23_s23, 4   ;;  %s14320_s22 = sld [smem:[#allocation8_spill]] }
0x16f1   :  { %22 = sbr.rel (!%p20_p6) target bundleno = 6 (0x6), region = 128 }
0x16f8   :  { %7188 = vsyncpa [#allocation5], 1 }
0x16f9   :  { %7190 = vsyncpa [#allocation5 + $0x1], 1 }

</bundles_post_ra>
